<compile_context>
chip_gen: v6e
topology: v6e:2x2x1
jax: 0.10.0
libtpu: 0.0.40
codegen_flags: <defaults>
</compile_context>

<pallas_src>
import functools

import numpy as np
import jax
import jax.numpy as jnp
from jax.experimental import pallas as pl
from jax.experimental.pallas import tpu as pltpu


MATMUL_PRECISION = jax.lax.Precision.HIGHEST  # see header note (review item)


# ----------------------------- Pallas kernel ------------------------------- #

def _embedding_kernel(x_ref, w1_ref, b1_ref, w2_ref, b2_ref, p_ref, o_ref,
                      act_ref, patches_ref, *, H, W, B, Cin, C1, C2, MARGIN):
    """Fused conv-relu-conv-relu-adaptivepool for one tile of B images.

    Activations are lane-packed: (C, B*H*W), image b in lanes
    [b*H*W, (b+1)*H*W).  Each 3x3 SAME conv = one im2col matmul over the whole
    tile; out-of-image taps are removed with boundary masks (no halo zeroing).
    """
    HW = H * W
    BN = B * HW
    cmax = max(Cin, C1)

    # ---- boundary masks: built ONCE per grid step, shared by both convs ----
    lane = jax.lax.broadcasted_iota(jnp.int32, (cmax, BN), 1)
    colx = lane % W                    # x coordinate inside the image
    pix = lane % HW                    # flat pixel index inside the image
    not_l = colx != 0
    not_r = colx != (W - 1)
    not_t = pix >= W
    not_b = pix < (HW - W)

    def tap_mask(dy, dx):
        m = None
        if dy == 0:
            m = not_t
        elif dy == 2:
            m = not_b
        if dx == 0:
            m = not_l if m is None else (m & not_l)
        elif dx == 2:
            m = not_r if m is None else (m & not_r)
        return m

    def conv3x3(src, w_mat, b_col, cin):
        # Stage the activation once so the 9 taps are static lane-shifted
        # slices; any lane outside the current image (margins / neighbouring
        # images) is select-masked to zero, reproducing SAME padding.
        act_ref[0:cin, MARGIN:MARGIN + BN] = src
        for dy in range(3):
            for dx in range(3):
                s = MARGIN + (dy - 1) * W + (dx - 1)     # static slice start
                tap = act_ref[0:cin, s:s + BN]
                m = tap_mask(dy, dx)
                if m is not None:
                    tap = jnp.where(m[0:cin, :], tap, 0.0)
                t = dy * 3 + dx
                patches_ref[t * cin:(t + 1) * cin, :] = tap
        acc = jnp.dot(w_mat, patches_ref[0:9 * cin, :],
                      preferred_element_type=jnp.float32,
                      precision=MATMUL_PRECISION)        # (cout, BN)
        return jnp.maximum(acc + b_col, 0.0)

    h1 = conv3x3(x_ref[...], w1_ref[...], b1_ref[...], Cin)   # (C1, BN)
    h2 = conv3x3(h1, w2_ref[...], b2_ref[...], C1)            # (C2, BN)

    # Spatial mean over H*W (1/(H*W) folded into the pool matrix) + adaptive
    # channel pool as broadcast-multiply + sublane reduce; output (B, E) is
    # lane-dense (E = 1024 lanes).
    pool = p_ref[...]                                          # (C2, E)
    for b in range(B):
        msum = jnp.sum(h2[:, b * HW:(b + 1) * HW], axis=1, keepdims=True)
        emb = jnp.sum(msum * pool, axis=0, keepdims=True)      # (1, E)
        o_ref[:, b:b + 1, :] = emb[None].astype(o_ref.dtype)


# ------------------------------ wrappers ----------------------------------- #

def _pick_batch_tile(total, target=8):
    """Images per grid step: amortize per-step overhead over ~`target` images
    while keeping the grid length even (>=2 steps) for v7x megacore."""
    if total <= 1:
        return 1, 1
    steps = 2 * max(1, -(-total // (2 * target)))
    tile = -(-total // steps)
    return tile, steps


def embedding_forward(x_nchw, kparams, *, batch_tile=8):
    """(N, Cin, H, W) -> (N, E) embeddings via one fused, batch-tiled kernel."""
    N0, Cin, H, W = x_nchw.shape
    HW = H * W
    w1m, b1c = kparams["w1m"], kparams["b1c"]
    w2m, b2c = kparams["w2m"], kparams["b2c"]
    pool = kparams["pool_scaled"]
    C1, C2, E = w1m.shape[0], w2m.shape[0], pool.shape[1]

    B, steps = _pick_batch_tile(N0, batch_tile)
    T = B * steps
    BN = B * HW
    margin = ((W + 1 + 127) // 128) * 128
    cmax = max(Cin, C1)

    x = x_nchw.reshape(N0, Cin, HW).astype(jnp.float32)
    if T != N0:
        x = jnp.pad(x, ((0, T - N0), (0, 0), (0, 0)))
    # Lane-pack the batch: (T, Cin, HW) -> (Cin, T*HW); image n occupies lanes
    # [n*HW, (n+1)*HW).  Pure layout plumbing, done once in XLA.
    x2d = jnp.transpose(x, (1, 0, 2)).reshape(Cin, T * HW)

    kern = functools.partial(_embedding_kernel, H=H, W=W, B=B,
                             Cin=Cin, C1=C1, C2=C2, MARGIN=margin)
    out = pl.pallas_call(
        kern,
        out_shape=jax.ShapeDtypeStruct((steps, B, E), jnp.float32),
        grid=(steps,),
        in_specs=[
            pl.BlockSpec((Cin, BN), lambda i: (0, i)),       # batched activation
            pl.BlockSpec((C1, 9 * Cin), lambda i: (0, 0)),   # conv1 im2col weights
            pl.BlockSpec((C1, 1), lambda i: (0, 0)),         # conv1 bias
            pl.BlockSpec((C2, 9 * C1), lambda i: (0, 0)),    # conv2 im2col weights
            pl.BlockSpec((C2, 1), lambda i: (0, 0)),         # conv2 bias
            pl.BlockSpec((C2, E), lambda i: (0, 0)),         # scaled pool matrix
        ],
        out_specs=pl.BlockSpec((1, B, E), lambda i: (i, 0, 0)),
        scratch_shapes=[
            pltpu.VMEM((cmax, BN + 2 * margin), jnp.float32),  # staged activation
            pltpu.VMEM((9 * cmax, BN), jnp.float32),           # im2col patches
        ],
        compiler_params=pltpu.CompilerParams(
            dimension_semantics=("parallel",)),
    )(x2d, w1m, b1c, w2m, b2c, pool)
    return out.reshape(T, E)[:N0]


def triplet_net_forward(x1, x2, x3, kparams):
    """TripletNet.forward: one kernel launch over the stacked triplet batch."""
    n = x1.shape[0]
    xs = jnp.concatenate([x1, x2, x3], axis=0)
    emb = embedding_forward(xs, kparams)
    return emb[:n], emb[n:2 * n], emb[2 * n:]


# TripletNet.get_embedding(x) == embedding_forward(x, kparams)


# ------------------------------ params / glue ------------------------------ #

def adaptive_pool_matrix(c_in, c_out):
    """P[c, i] = 1/len_i for c in PyTorch's adaptive range of output index i."""
    P = np.zeros((c_in, c_out), dtype=np.float32)
    for i in range(c_out):
        start = (i * c_in) // c_out
        end = -(-((i + 1) * c_in) // c_out)   # ceil
        P[start:end, i] = 1.0 / (end - start)
    return jnp.asarray(P)


def make_kernel_params(w1_hwio, b1, w2_hwio, b2, pool_mat, H, W):
    """Precompute im2col weights, column biases and mean-folded pool matrix.

    Expects HWIO conv weights.  For PyTorch OIHW weights use
    w.transpose(0, 2, 3, 1).reshape(Cout, 9*Cin) instead (same (dy,dx,ci)
    tap ordering as the kernel).
    """
    C1 = w1_hwio.shape[-1]
    C2 = w2_hwio.shape[-1]
    return {
        "w1m": jnp.transpose(w1_hwio, (3, 0, 1, 2)).reshape(C1, -1),
        "b1c": b1.reshape(C1, 1),
        "w2m": jnp.transpose(w2_hwio, (3, 0, 1, 2)).reshape(C2, -1),
        "b2c": b2.reshape(C2, 1),
        "pool_scaled": pool_mat * (1.0 / float(H * W)),
    }


def reference_embedding(x_nchw, w1, b1, w2, b2, pool_mat):
    x = jnp.transpose(x_nchw, (0, 2, 3, 1))          # NCHW -> NHWC

    def conv(h, w, b):
        y = jax.lax.conv_general_dilated(
            h, w, window_strides=(1, 1), padding="SAME",
            dimension_numbers=("NHWC", "HWIO", "NHWC"),
            precision=jax.lax.Precision.HIGHEST)
        return jax.nn.relu(y + b)

    h = conv(x, w1, b1)
    h = conv(h, w2, b2)
    m = jnp.mean(h, axis=(1, 2))
    return jnp.dot(m, pool_mat, precision=jax.lax.Precision.HIGHEST)


if __name__ == "__main__":
    N, Cin, H, W = 2, 4, 16, 16
    C1, C2, E = 16, 32, 1024

    key = jax.random.PRNGKey(0)
    k1, k2, k3, k4, kx1, kx2, kx3 = jax.random.split(key, 7)
    w1 = jax.random.normal(k1, (3, 3, Cin, C1), jnp.float32) * 0.1
    b1 = jax.random.normal(k2, (C1,), jnp.float32) * 0.01
    w2 = jax.random.normal(k3, (3, 3, C1, C2), jnp.float32) * 0.1
    b2 = jax.random.normal(k4, (C2,), jnp.float32) * 0.01
    pool = adaptive_pool_matrix(C2, E)
    kparams = make_kernel_params(w1, b1, w2, b2, pool, H, W)

    x1 = jax.random.normal(kx1, (N, Cin, H, W), jnp.float32)
    x2 = jax.random.normal(kx2, (N, Cin, H, W), jnp.float32)
    x3 = jax.random.normal(kx3, (N, Cin, H, W), jnp.float32)

    fwd = jax.jit(triplet_net_forward)
    o1, o2, o3 = jax.block_until_ready(fwd(x1, x2, x3, kparams))
    assert o1.shape == (N, E) and o2.shape == (N, E) and o3.shape == (N, E)

    for out, xin in ((o1, x1), (o2, x2), (o3, x3)):
        ref = jax.block_until_ready(
            reference_embedding(xin, w1, b1, w2, b2, pool))
        np.testing.assert_allclose(np.asarray(out), np.asarray(ref),
                                   rtol=1e-4, atol=1e-4)

    # get_embedding path with a batch size that requires tile padding (N=5 ->
    # tile B=3, 2 grid steps, 1 padded image).
    x5 = jax.random.normal(jax.random.PRNGKey(1), (5, Cin, H, W), jnp.float32)
    e5 = jax.block_until_ready(jax.jit(embedding_forward)(x5, kparams))
    ref5 = jax.block_until_ready(
        reference_embedding(x5, w1, b1, w2, b2, pool))
    np.testing.assert_allclose(np.asarray(e5), np.asarray(ref5),
                               rtol=1e-4, atol=1e-4)

    print("KERNEL_OK")
</pallas_src>

<mosaic_0001>
module attributes {stable_mosaic.version = 11 : i64} {
  func.func @_embedding_kernel(%arg0: i32, %arg1: memref<4x768xf32, #tpu.memory_space<vmem>>, %arg2: memref<16x36xf32, #tpu.memory_space<vmem>>, %arg3: memref<16x1xf32, #tpu.memory_space<vmem>>, %arg4: memref<32x144xf32, #tpu.memory_space<vmem>>, %arg5: memref<32x1xf32, #tpu.memory_space<vmem>>, %arg6: memref<32x1024xf32, #tpu.memory_space<vmem>>, %arg7: memref<1x3x1024xf32, #tpu.memory_space<vmem>>, %arg8: memref<16x1024xf32, #tpu.memory_space<vmem>>, %arg9: memref<144x768xf32, #tpu.memory_space<vmem>>) attributes {dimension_semantics = [#tpu.dimension_semantics<parallel>], iteration_bounds = array<i64: 2>, scalar_prefetch = 0 : i64, scratch_operands = 2 : i64, tpu.core_type = #tpu.core_type<tc>, window_params = [{transform_indices = @transform_0, window_bounds = array<i64: 4, 768>}, {pipeline_mode = #tpu.pipeline_mode<synchronous>, transform_indices = @transform_1, window_bounds = array<i64: 16, 36>}, {pipeline_mode = #tpu.pipeline_mode<synchronous>, transform_indices = @transform_2, window_bounds = array<i64: 16, 1>}, {pipeline_mode = #tpu.pipeline_mode<synchronous>, transform_indices = @transform_3, window_bounds = array<i64: 32, 144>}, {pipeline_mode = #tpu.pipeline_mode<synchronous>, transform_indices = @transform_4, window_bounds = array<i64: 32, 1>}, {pipeline_mode = #tpu.pipeline_mode<synchronous>, transform_indices = @transform_5, window_bounds = array<i64: 32, 1024>}, {transform_indices = @transform_6, window_bounds = array<i64: 1, 3, 1024>}]} {
    %0 = tpu.iota {dimensions = array<i32: 1>} : vector<16x768xi32>
    %c16_i32 = arith.constant 16 : i32
    %c0_i32 = arith.constant 0 : i32
    %1 = arith.cmpi eq, %c16_i32, %c0_i32 : i32
    %c1_i32 = arith.constant 1 : i32
    %2 = arith.select %1, %c1_i32, %c16_i32 : i32
    %3 = vector.broadcast %2 : i32 to vector<16x768xi32>
    %4 = arith.remsi %0, %3 : vector<16x768xi32>
    %c0_i32_0 = arith.constant 0 : i32
    %5 = vector.broadcast %c0_i32_0 : i32 to vector<16x768xi32>
    %6 = arith.cmpi ne, %4, %5 : vector<16x768xi32>
    %c0_i32_1 = arith.constant 0 : i32
    %7 = vector.broadcast %c0_i32_1 : i32 to vector<16x768xi32>
    %8 = arith.cmpi slt, %4, %7 : vector<16x768xi32>
    %c0_i32_2 = arith.constant 0 : i32
    %9 = arith.cmpi slt, %2, %c0_i32_2 : i32
    %10 = vector.broadcast %9 : i1 to vector<16x768xi1>
    %11 = vector.broadcast %10 : vector<16x768xi1> to vector<16x768xi1>
    %12 = arith.xori %8, %11 : vector<16x768xi1>
    %13 = arith.andi %12, %6 : vector<16x768xi1>
    %14 = vector.broadcast %2 : i32 to vector<16x768xi32>
    %15 = arith.addi %4, %14 : vector<16x768xi32>
    %16 = arith.select %13, %15, %4 : vector<16x768xi1>, vector<16x768xi32>
    %c256_i32 = arith.constant 256 : i32
    %c0_i32_3 = arith.constant 0 : i32
    %17 = arith.cmpi eq, %c256_i32, %c0_i32_3 : i32
    %c1_i32_4 = arith.constant 1 : i32
    %18 = arith.select %17, %c1_i32_4, %c256_i32 : i32
    %19 = vector.broadcast %18 : i32 to vector<16x768xi32>
    %20 = arith.remsi %0, %19 : vector<16x768xi32>
    %c0_i32_5 = arith.constant 0 : i32
    %21 = vector.broadcast %c0_i32_5 : i32 to vector<16x768xi32>
    %22 = arith.cmpi ne, %20, %21 : vector<16x768xi32>
    %c0_i32_6 = arith.constant 0 : i32
    %23 = vector.broadcast %c0_i32_6 : i32 to vector<16x768xi32>
    %24 = arith.cmpi slt, %20, %23 : vector<16x768xi32>
    %c0_i32_7 = arith.constant 0 : i32
    %25 = arith.cmpi slt, %18, %c0_i32_7 : i32
    %26 = vector.broadcast %25 : i1 to vector<16x768xi1>
    %27 = vector.broadcast %26 : vector<16x768xi1> to vector<16x768xi1>
    %28 = arith.xori %24, %27 : vector<16x768xi1>
    %29 = arith.andi %28, %22 : vector<16x768xi1>
    %30 = vector.broadcast %18 : i32 to vector<16x768xi32>
    %31 = arith.addi %20, %30 : vector<16x768xi32>
    %32 = arith.select %29, %31, %20 : vector<16x768xi1>, vector<16x768xi32>
    %c0_i32_8 = arith.constant 0 : i32
    %33 = vector.broadcast %c0_i32_8 : i32 to vector<16x768xi32>
    %34 = arith.cmpi ne, %16, %33 : vector<16x768xi32>
    %c15_i32 = arith.constant 15 : i32
    %35 = vector.broadcast %c15_i32 : i32 to vector<16x768xi32>
    %36 = arith.cmpi ne, %16, %35 : vector<16x768xi32>
    %c16_i32_9 = arith.constant 16 : i32
    %37 = vector.broadcast %c16_i32_9 : i32 to vector<16x768xi32>
    %38 = arith.cmpi sge, %32, %37 : vector<16x768xi32>
    %c240_i32 = arith.constant 240 : i32
    %39 = vector.broadcast %c240_i32 : i32 to vector<16x768xi32>
    %40 = arith.cmpi slt, %32, %39 : vector<16x768xi32>
    %c0 = arith.constant 0 : index
    %c0_10 = arith.constant 0 : index
    %41 = vector.load %arg1[%c0, %c0_10] : memref<4x768xf32, #tpu.memory_space<vmem>>, vector<4x768xf32>
    %c0_11 = arith.constant 0 : index
    %c0_12 = arith.constant 0 : index
    %42 = vector.load %arg2[%c0_11, %c0_12] : memref<16x36xf32, #tpu.memory_space<vmem>>, vector<16x36xf32>
    %c0_13 = arith.constant 0 : index
    %c0_14 = arith.constant 0 : index
    %43 = vector.load %arg3[%c0_13, %c0_14] : memref<16x1xf32, #tpu.memory_space<vmem>>, vector<16x1xf32>
    %c0_15 = arith.constant 0 : index
    %c128 = arith.constant 128 : index
    %44 = vector.load %arg8[%c0_15, %c128] : memref<16x1024xf32, #tpu.memory_space<vmem>>, vector<4x768xf32>
    tpu.vector_store %arg8[%c0_15, %c128], %41 {strides = array<i32>} : memref<16x1024xf32, #tpu.memory_space<vmem>>, vector<4x768xf32>,
    %c0_16 = arith.constant 0 : index
    %c111 = arith.constant 111 : index
    %45 = vector.load %arg8[%c0_16, %c111] : memref<16x1024xf32, #tpu.memory_space<vmem>>, vector<4x768xf32>
    %46 = arith.andi %38, %34 : vector<16x768xi1>
    %47 = vector.extract_strided_slice %46 {offsets = [0, 0], sizes = [4, 768], strides = [1, 1]} : vector<16x768xi1> to vector<4x768xi1>
    %cst = arith.constant 0.000000e+00 : f32
    %48 = vector.broadcast %cst : f32 to vector<4x768xf32>
    %49 = arith.select %47, %45, %48 : vector<4x768xi1>, vector<4x768xf32>
    %c0_17 = arith.constant 0 : index
    %c0_18 = arith.constant 0 : index
    %50 = vector.load %arg9[%c0_17, %c0_18] : memref<144x768xf32, #tpu.memory_space<vmem>>, vector<4x768xf32>
    tpu.vector_store %arg9[%c0_17, %c0_18], %49 {strides = array<i32>} : memref<144x768xf32, #tpu.memory_space<vmem>>, vector<4x768xf32>,
    %c0_19 = arith.constant 0 : index
    %c112 = arith.constant 112 : index
    %51 = vector.load %arg8[%c0_19, %c112] : memref<16x1024xf32, #tpu.memory_space<vmem>>, vector<4x768xf32>
    %52 = vector.extract_strided_slice %38 {offsets = [0, 0], sizes = [4, 768], strides = [1, 1]} : vector<16x768xi1> to vector<4x768xi1>
    %cst_20 = arith.constant 0.000000e+00 : f32
    %53 = vector.broadcast %cst_20 : f32 to vector<4x768xf32>
    %54 = arith.select %52, %51, %53 : vector<4x768xi1>, vector<4x768xf32>
    %c4 = arith.constant 4 : index
    %c0_21 = arith.constant 0 : index
    %55 = vector.load %arg9[%c4, %c0_21] : memref<144x768xf32, #tpu.memory_space<vmem>>, vector<4x768xf32>
    tpu.vector_store %arg9[%c4, %c0_21], %54 {strides = array<i32>} : memref<144x768xf32, #tpu.memory_space<vmem>>, vector<4x768xf32>,
    %c0_22 = arith.constant 0 : index
    %c113 = arith.constant 113 : index
    %56 = vector.load %arg8[%c0_22, %c113] : memref<16x1024xf32, #tpu.memory_space<vmem>>, vector<4x768xf32>
    %57 = arith.andi %38, %36 : vector<16x768xi1>
    %58 = vector.extract_strided_slice %57 {offsets = [0, 0], sizes = [4, 768], strides = [1, 1]} : vector<16x768xi1> to vector<4x768xi1>
    %cst_23 = arith.constant 0.000000e+00 : f32
    %59 = vector.broadcast %cst_23 : f32 to vector<4x768xf32>
    %60 = arith.select %58, %56, %59 : vector<4x768xi1>, vector<4x768xf32>
    %c8 = arith.constant 8 : index
    %c0_24 = arith.constant 0 : index
    %61 = vector.load %arg9[%c8, %c0_24] : memref<144x768xf32, #tpu.memory_space<vmem>>, vector<4x768xf32>
    tpu.vector_store %arg9[%c8, %c0_24], %60 {strides = array<i32>} : memref<144x768xf32, #tpu.memory_space<vmem>>, vector<4x768xf32>,
    %c0_25 = arith.constant 0 : index
    %c127 = arith.constant 127 : index
    %62 = vector.load %arg8[%c0_25, %c127] : memref<16x1024xf32, #tpu.memory_space<vmem>>, vector<4x768xf32>
    %63 = vector.extract_strided_slice %34 {offsets = [0, 0], sizes = [4, 768], strides = [1, 1]} : vector<16x768xi1> to vector<4x768xi1>
    %cst_26 = arith.constant 0.000000e+00 : f32
    %64 = vector.broadcast %cst_26 : f32 to vector<4x768xf32>
    %65 = arith.select %63, %62, %64 : vector<4x768xi1>, vector<4x768xf32>
    %c12 = arith.constant 12 : index
    %c0_27 = arith.constant 0 : index
    %66 = vector.load %arg9[%c12, %c0_27] : memref<144x768xf32, #tpu.memory_space<vmem>>, vector<4x768xf32>
    tpu.vector_store %arg9[%c12, %c0_27], %65 {strides = array<i32>} : memref<144x768xf32, #tpu.memory_space<vmem>>, vector<4x768xf32>,
    %c0_28 = arith.constant 0 : index
    %c128_29 = arith.constant 128 : index
    %67 = vector.load %arg8[%c0_28, %c128_29] : memref<16x1024xf32, #tpu.memory_space<vmem>>, vector<4x768xf32>
    %c16 = arith.constant 16 : index
    %c0_30 = arith.constant 0 : index
    %68 = vector.load %arg9[%c16, %c0_30] : memref<144x768xf32, #tpu.memory_space<vmem>>, vector<4x768xf32>
    tpu.vector_store %arg9[%c16, %c0_30], %67 {strides = array<i32>} : memref<144x768xf32, #tpu.memory_space<vmem>>, vector<4x768xf32>,
    %c0_31 = arith.constant 0 : index
    %c129 = arith.constant 129 : index
    %69 = vector.load %arg8[%c0_31, %c129] : memref<16x1024xf32, #tpu.memory_space<vmem>>, vector<4x768xf32>
    %70 = vector.extract_strided_slice %36 {offsets = [0, 0], sizes = [4, 768], strides = [1, 1]} : vector<16x768xi1> to vector<4x768xi1>
    %cst_32 = arith.constant 0.000000e+00 : f32
    %71 = vector.broadcast %cst_32 : f32 to vector<4x768xf32>
    %72 = arith.select %70, %69, %71 : vector<4x768xi1>, vector<4x768xf32>
    %c20 = arith.constant 20 : index
    %c0_33 = arith.constant 0 : index
    %73 = vector.load %arg9[%c20, %c0_33] : memref<144x768xf32, #tpu.memory_space<vmem>>, vector<4x768xf32>
    tpu.vector_store %arg9[%c20, %c0_33], %72 {strides = array<i32>} : memref<144x768xf32, #tpu.memory_space<vmem>>, vector<4x768xf32>,
    %c0_34 = arith.constant 0 : index
    %c143 = arith.constant 143 : index
    %74 = vector.load %arg8[%c0_34, %c143] : memref<16x1024xf32, #tpu.memory_space<vmem>>, vector<4x768xf32>
    %75 = arith.andi %40, %34 : vector<16x768xi1>
    %76 = vector.extract_strided_slice %75 {offsets = [0, 0], sizes = [4, 768], strides = [1, 1]} : vector<16x768xi1> to vector<4x768xi1>
    %cst_35 = arith.constant 0.000000e+00 : f32
    %77 = vector.broadcast %cst_35 : f32 to vector<4x768xf32>
    %78 = arith.select %76, %74, %77 : vector<4x768xi1>, vector<4x768xf32>
    %c24 = arith.constant 24 : index
    %c0_36 = arith.constant 0 : index
    %79 = vector.load %arg9[%c24, %c0_36] : memref<144x768xf32, #tpu.memory_space<vmem>>, vector<4x768xf32>
    tpu.vector_store %arg9[%c24, %c0_36], %78 {strides = array<i32>} : memref<144x768xf32, #tpu.memory_space<vmem>>, vector<4x768xf32>,
    %c0_37 = arith.constant 0 : index
    %c144 = arith.constant 144 : index
    %80 = vector.load %arg8[%c0_37, %c144] : memref<16x1024xf32, #tpu.memory_space<vmem>>, vector<4x768xf32>
    %81 = vector.extract_strided_slice %40 {offsets = [0, 0], sizes = [4, 768], strides = [1, 1]} : vector<16x768xi1> to vector<4x768xi1>
    %cst_38 = arith.constant 0.000000e+00 : f32
    %82 = vector.broadcast %cst_38 : f32 to vector<4x768xf32>
    %83 = arith.select %81, %80, %82 : vector<4x768xi1>, vector<4x768xf32>
    %c28 = arith.constant 28 : index
    %c0_39 = arith.constant 0 : index
    %84 = vector.load %arg9[%c28, %c0_39] : memref<144x768xf32, #tpu.memory_space<vmem>>, vector<4x768xf32>
    tpu.vector_store %arg9[%c28, %c0_39], %83 {strides = array<i32>} : memref<144x768xf32, #tpu.memory_space<vmem>>, vector<4x768xf32>,
    %c0_40 = arith.constant 0 : index
    %c145 = arith.constant 145 : index
    %85 = vector.load %arg8[%c0_40, %c145] : memref<16x1024xf32, #tpu.memory_space<vmem>>, vector<4x768xf32>
    %86 = arith.andi %40, %36 : vector<16x768xi1>
    %87 = vector.extract_strided_slice %86 {offsets = [0, 0], sizes = [4, 768], strides = [1, 1]} : vector<16x768xi1> to vector<4x768xi1>
    %cst_41 = arith.constant 0.000000e+00 : f32
    %88 = vector.broadcast %cst_41 : f32 to vector<4x768xf32>
    %89 = arith.select %87, %85, %88 : vector<4x768xi1>, vector<4x768xf32>
    %c32 = arith.constant 32 : index
    %c0_42 = arith.constant 0 : index
    %90 = vector.load %arg9[%c32, %c0_42] : memref<144x768xf32, #tpu.memory_space<vmem>>, vector<4x768xf32>
    tpu.vector_store %arg9[%c32, %c0_42], %89 {strides = array<i32>} : memref<144x768xf32, #tpu.memory_space<vmem>>, vector<4x768xf32>,
    %c0_43 = arith.constant 0 : index
    %c0_44 = arith.constant 0 : index
    %91 = vector.load %arg9[%c0_43, %c0_44] : memref<144x768xf32, #tpu.memory_space<vmem>>, vector<36x768xf32>
    %cst_45 = arith.constant dense<0.000000e+00> : vector<16x768xf32>
    %92 = tpu.matmul %42, %91, %cst_45 {dimension_numbers = #tpu.dot_dimension_numbers<[1], [0], [0], [1], [0, 0, 1, 1], [], []>, precision = #tpu.contract_precision<fp32>} : vector<16x36xf32>, vector<36x768xf32>, vector<16x768xf32> -> vector<16x768xf32>
    %93 = vector.broadcast %43 : vector<16x1xf32> to vector<16x768xf32>
    %94 = arith.addf %92, %93 : vector<16x768xf32>
    %cst_46 = arith.constant 0.000000e+00 : f32
    %95 = vector.broadcast %cst_46 : f32 to vector<16x768xf32>
    %96 = arith.maximumf %94, %95 : vector<16x768xf32>
    %c0_47 = arith.constant 0 : index
    %c0_48 = arith.constant 0 : index
    %97 = vector.load %arg4[%c0_47, %c0_48] : memref<32x144xf32, #tpu.memory_space<vmem>>, vector<32x144xf32>
    %c0_49 = arith.constant 0 : index
    %c0_50 = arith.constant 0 : index
    %98 = vector.load %arg5[%c0_49, %c0_50] : memref<32x1xf32, #tpu.memory_space<vmem>>, vector<32x1xf32>
    %c0_51 = arith.constant 0 : index
    %c128_52 = arith.constant 128 : index
    %99 = vector.load %arg8[%c0_51, %c128_52] : memref<16x1024xf32, #tpu.memory_space<vmem>>, vector<16x768xf32>
    tpu.vector_store %arg8[%c0_51, %c128_52], %96 {strides = array<i32>} : memref<16x1024xf32, #tpu.memory_space<vmem>>, vector<16x768xf32>,
    %c0_53 = arith.constant 0 : index
    %c111_54 = arith.constant 111 : index
    %100 = vector.load %arg8[%c0_53, %c111_54] : memref<16x1024xf32, #tpu.memory_space<vmem>>, vector<16x768xf32>
    %101 = arith.andi %38, %34 : vector<16x768xi1>
    %cst_55 = arith.constant 0.000000e+00 : f32
    %102 = vector.broadcast %cst_55 : f32 to vector<16x768xf32>
    %103 = arith.select %101, %100, %102 : vector<16x768xi1>, vector<16x768xf32>
    %c0_56 = arith.constant 0 : index
    %c0_57 = arith.constant 0 : index
    %104 = vector.load %arg9[%c0_56, %c0_57] : memref<144x768xf32, #tpu.memory_space<vmem>>, vector<16x768xf32>
    tpu.vector_store %arg9[%c0_56, %c0_57], %103 {strides = array<i32>} : memref<144x768xf32, #tpu.memory_space<vmem>>, vector<16x768xf32>,
    %c0_58 = arith.constant 0 : index
    %c112_59 = arith.constant 112 : index
    %105 = vector.load %arg8[%c0_58, %c112_59] : memref<16x1024xf32, #tpu.memory_space<vmem>>, vector<16x768xf32>
    %cst_60 = arith.constant 0.000000e+00 : f32
    %106 = vector.broadcast %cst_60 : f32 to vector<16x768xf32>
    %107 = arith.select %38, %105, %106 : vector<16x768xi1>, vector<16x768xf32>
    %c16_61 = arith.constant 16 : index
    %c0_62 = arith.constant 0 : index
    %108 = vector.load %arg9[%c16_61, %c0_62] : memref<144x768xf32, #tpu.memory_space<vmem>>, vector<16x768xf32>
    tpu.vector_store %arg9[%c16_61, %c0_62], %107 {strides = array<i32>} : memref<144x768xf32, #tpu.memory_space<vmem>>, vector<16x768xf32>,
    %c0_63 = arith.constant 0 : index
    %c113_64 = arith.constant 113 : index
    %109 = vector.load %arg8[%c0_63, %c113_64] : memref<16x1024xf32, #tpu.memory_space<vmem>>, vector<16x768xf32>
    %110 = arith.andi %38, %36 : vector<16x768xi1>
    %cst_65 = arith.constant 0.000000e+00 : f32
    %111 = vector.broadcast %cst_65 : f32 to vector<16x768xf32>
    %112 = arith.select %110, %109, %111 : vector<16x768xi1>, vector<16x768xf32>
    %c32_66 = arith.constant 32 : index
    %c0_67 = arith.constant 0 : index
    %113 = vector.load %arg9[%c32_66, %c0_67] : memref<144x768xf32, #tpu.memory_space<vmem>>, vector<16x768xf32>
    tpu.vector_store %arg9[%c32_66, %c0_67], %112 {strides = array<i32>} : memref<144x768xf32, #tpu.memory_space<vmem>>, vector<16x768xf32>,
    %c0_68 = arith.constant 0 : index
    %c127_69 = arith.constant 127 : index
    %114 = vector.load %arg8[%c0_68, %c127_69] : memref<16x1024xf32, #tpu.memory_space<vmem>>, vector<16x768xf32>
    %cst_70 = arith.constant 0.000000e+00 : f32
    %115 = vector.broadcast %cst_70 : f32 to vector<16x768xf32>
    %116 = arith.select %34, %114, %115 : vector<16x768xi1>, vector<16x768xf32>
    %c48 = arith.constant 48 : index
    %c0_71 = arith.constant 0 : index
    %117 = vector.load %arg9[%c48, %c0_71] : memref<144x768xf32, #tpu.memory_space<vmem>>, vector<16x768xf32>
    tpu.vector_store %arg9[%c48, %c0_71], %116 {strides = array<i32>} : memref<144x768xf32, #tpu.memory_space<vmem>>, vector<16x768xf32>,
    %c0_72 = arith.constant 0 : index
    %c128_73 = arith.constant 128 : index
    %118 = vector.load %arg8[%c0_72, %c128_73] : memref<16x1024xf32, #tpu.memory_space<vmem>>, vector<16x768xf32>
    %c64 = arith.constant 64 : index
    %c0_74 = arith.constant 0 : index
    %119 = vector.load %arg9[%c64, %c0_74] : memref<144x768xf32, #tpu.memory_space<vmem>>, vector<16x768xf32>
    tpu.vector_store %arg9[%c64, %c0_74], %118 {strides = array<i32>} : memref<144x768xf32, #tpu.memory_space<vmem>>, vector<16x768xf32>,
    %c0_75 = arith.constant 0 : index
    %c129_76 = arith.constant 129 : index
    %120 = vector.load %arg8[%c0_75, %c129_76] : memref<16x1024xf32, #tpu.memory_space<vmem>>, vector<16x768xf32>
    %cst_77 = arith.constant 0.000000e+00 : f32
    %121 = vector.broadcast %cst_77 : f32 to vector<16x768xf32>
    %122 = arith.select %36, %120, %121 : vector<16x768xi1>, vector<16x768xf32>
    %c80 = arith.constant 80 : index
    %c0_78 = arith.constant 0 : index
    %123 = vector.load %arg9[%c80, %c0_78] : memref<144x768xf32, #tpu.memory_space<vmem>>, vector<16x768xf32>
    tpu.vector_store %arg9[%c80, %c0_78], %122 {strides = array<i32>} : memref<144x768xf32, #tpu.memory_space<vmem>>, vector<16x768xf32>,
    %c0_79 = arith.constant 0 : index
    %c143_80 = arith.constant 143 : index
    %124 = vector.load %arg8[%c0_79, %c143_80] : memref<16x1024xf32, #tpu.memory_space<vmem>>, vector<16x768xf32>
    %125 = arith.andi %40, %34 : vector<16x768xi1>
    %cst_81 = arith.constant 0.000000e+00 : f32
    %126 = vector.broadcast %cst_81 : f32 to vector<16x768xf32>
    %127 = arith.select %125, %124, %126 : vector<16x768xi1>, vector<16x768xf32>
    %c96 = arith.constant 96 : index
    %c0_82 = arith.constant 0 : index
    %128 = vector.load %arg9[%c96, %c0_82] : memref<144x768xf32, #tpu.memory_space<vmem>>, vector<16x768xf32>
    tpu.vector_store %arg9[%c96, %c0_82], %127 {strides = array<i32>} : memref<144x768xf32, #tpu.memory_space<vmem>>, vector<16x768xf32>,
    %c0_83 = arith.constant 0 : index
    %c144_84 = arith.constant 144 : index
    %129 = vector.load %arg8[%c0_83, %c144_84] : memref<16x1024xf32, #tpu.memory_space<vmem>>, vector<16x768xf32>
    %cst_85 = arith.constant 0.000000e+00 : f32
    %130 = vector.broadcast %cst_85 : f32 to vector<16x768xf32>
    %131 = arith.select %40, %129, %130 : vector<16x768xi1>, vector<16x768xf32>
    %c112_86 = arith.constant 112 : index
    %c0_87 = arith.constant 0 : index
    %132 = vector.load %arg9[%c112_86, %c0_87] : memref<144x768xf32, #tpu.memory_space<vmem>>, vector<16x768xf32>
    tpu.vector_store %arg9[%c112_86, %c0_87], %131 {strides = array<i32>} : memref<144x768xf32, #tpu.memory_space<vmem>>, vector<16x768xf32>,
    %c0_88 = arith.constant 0 : index
    %c145_89 = arith.constant 145 : index
    %133 = vector.load %arg8[%c0_88, %c145_89] : memref<16x1024xf32, #tpu.memory_space<vmem>>, vector<16x768xf32>
    %134 = arith.andi %40, %36 : vector<16x768xi1>
    %cst_90 = arith.constant 0.000000e+00 : f32
    %135 = vector.broadcast %cst_90 : f32 to vector<16x768xf32>
    %136 = arith.select %134, %133, %135 : vector<16x768xi1>, vector<16x768xf32>
    %c128_91 = arith.constant 128 : index
    %c0_92 = arith.constant 0 : index
    %137 = vector.load %arg9[%c128_91, %c0_92] : memref<144x768xf32, #tpu.memory_space<vmem>>, vector<16x768xf32>
    tpu.vector_store %arg9[%c128_91, %c0_92], %136 {strides = array<i32>} : memref<144x768xf32, #tpu.memory_space<vmem>>, vector<16x768xf32>,
    %c0_93 = arith.constant 0 : index
    %c0_94 = arith.constant 0 : index
    %138 = vector.load %arg9[%c0_93, %c0_94] : memref<144x768xf32, #tpu.memory_space<vmem>>, vector<144x768xf32>
    %cst_95 = arith.constant dense<0.000000e+00> : vector<32x768xf32>
    %139 = tpu.matmul %97, %138, %cst_95 {dimension_numbers = #tpu.dot_dimension_numbers<[1], [0], [0], [1], [0, 0, 1, 1], [], []>, precision = #tpu.contract_precision<fp32>} : vector<32x144xf32>, vector<144x768xf32>, vector<32x768xf32> -> vector<32x768xf32>
    %140 = vector.broadcast %98 : vector<32x1xf32> to vector<32x768xf32>
    %141 = arith.addf %139, %140 : vector<32x768xf32>
    %cst_96 = arith.constant 0.000000e+00 : f32
    %142 = vector.broadcast %cst_96 : f32 to vector<32x768xf32>
    %143 = arith.maximumf %141, %142 : vector<32x768xf32>
    %c0_97 = arith.constant 0 : index
    %c0_98 = arith.constant 0 : index
    %144 = vector.load %arg6[%c0_97, %c0_98] : memref<32x1024xf32, #tpu.memory_space<vmem>>, vector<32x1024xf32>
    %145 = vector.extract_strided_slice %143 {offsets = [0, 0], sizes = [32, 256], strides = [1, 1]} : vector<32x768xf32> to vector<32x256xf32>
    %cst_99 = arith.constant dense<0.000000e+00> : vector<32xf32>
    %146 = vector.multi_reduction <add>, %145, %cst_99 [1] : vector<32x256xf32> to vector<32xf32>
    %147 = vector.shape_cast %146 : vector<32xf32> to vector<32x1xf32>
    %148 = vector.broadcast %147 : vector<32x1xf32> to vector<32x1024xf32>
    %149 = arith.mulf %148, %144 : vector<32x1024xf32>
    %cst_100 = arith.constant dense<0.000000e+00> : vector<1024xf32>
    %150 = vector.multi_reduction <add>, %149, %cst_100 [0] : vector<32x1024xf32> to vector<1024xf32>
    %151 = vector.shape_cast %150 : vector<1024xf32> to vector<1x1024xf32>
    %152 = vector.shape_cast %151 : vector<1x1024xf32> to vector<1x1x1024xf32>
    %c0_101 = arith.constant 0 : index
    %c0_102 = arith.constant 0 : index
    %c0_103 = arith.constant 0 : index
    %153 = vector.load %arg7[%c0_101, %c0_102, %c0_103] : memref<1x3x1024xf32, #tpu.memory_space<vmem>>, vector<1x1x1024xf32>
    tpu.vector_store %arg7[%c0_101, %c0_102, %c0_103], %152 {strides = array<i32>} : memref<1x3x1024xf32, #tpu.memory_space<vmem>>, vector<1x1x1024xf32>,
    %154 = vector.extract_strided_slice %143 {offsets = [0, 256], sizes = [32, 256], strides = [1, 1]} : vector<32x768xf32> to vector<32x256xf32>
    %cst_104 = arith.constant dense<0.000000e+00> : vector<32xf32>
    %155 = vector.multi_reduction <add>, %154, %cst_104 [1] : vector<32x256xf32> to vector<32xf32>
    %156 = vector.shape_cast %155 : vector<32xf32> to vector<32x1xf32>
    %157 = vector.broadcast %156 : vector<32x1xf32> to vector<32x1024xf32>
    %158 = arith.mulf %157, %144 : vector<32x1024xf32>
    %cst_105 = arith.constant dense<0.000000e+00> : vector<1024xf32>
    %159 = vector.multi_reduction <add>, %158, %cst_105 [0] : vector<32x1024xf32> to vector<1024xf32>
    %160 = vector.shape_cast %159 : vector<1024xf32> to vector<1x1024xf32>
    %161 = vector.shape_cast %160 : vector<1x1024xf32> to vector<1x1x1024xf32>
    %c0_106 = arith.constant 0 : index
    %c1 = arith.constant 1 : index
    %c0_107 = arith.constant 0 : index
    %162 = vector.load %arg7[%c0_106, %c1, %c0_107] : memref<1x3x1024xf32, #tpu.memory_space<vmem>>, vector<1x1x1024xf32>
    tpu.vector_store %arg7[%c0_106, %c1, %c0_107], %161 {strides = array<i32>} : memref<1x3x1024xf32, #tpu.memory_space<vmem>>, vector<1x1x1024xf32>,
    %163 = vector.extract_strided_slice %143 {offsets = [0, 512], sizes = [32, 256], strides = [1, 1]} : vector<32x768xf32> to vector<32x256xf32>
    %cst_108 = arith.constant dense<0.000000e+00> : vector<32xf32>
    %164 = vector.multi_reduction <add>, %163, %cst_108 [1] : vector<32x256xf32> to vector<32xf32>
    %165 = vector.shape_cast %164 : vector<32xf32> to vector<32x1xf32>
    %166 = vector.broadcast %165 : vector<32x1xf32> to vector<32x1024xf32>
    %167 = arith.mulf %166, %144 : vector<32x1024xf32>
    %cst_109 = arith.constant dense<0.000000e+00> : vector<1024xf32>
    %168 = vector.multi_reduction <add>, %167, %cst_109 [0] : vector<32x1024xf32> to vector<1024xf32>
    %169 = vector.shape_cast %168 : vector<1024xf32> to vector<1x1024xf32>
    %170 = vector.shape_cast %169 : vector<1x1024xf32> to vector<1x1x1024xf32>
    %c0_110 = arith.constant 0 : index
    %c2 = arith.constant 2 : index
    %c0_111 = arith.constant 0 : index
    %171 = vector.load %arg7[%c0_110, %c2, %c0_111] : memref<1x3x1024xf32, #tpu.memory_space<vmem>>, vector<1x1x1024xf32>
    tpu.vector_store %arg7[%c0_110, %c2, %c0_111], %170 {strides = array<i32>} : memref<1x3x1024xf32, #tpu.memory_space<vmem>>, vector<1x1x1024xf32>,
    return
  }
  func.func @transform_0(%arg0: i32) -> (i32, i32) {
    %c0_i32 = arith.constant 0 : i32
    %c0_i32_0 = arith.constant 0 : i32
    return %c0_i32, %arg0 : i32, i32
  }
  func.func @transform_1(%arg0: i32) -> (i32, i32) {
    %c0_i32 = arith.constant 0 : i32
    %c0_i32_0 = arith.constant 0 : i32
    %c0_i32_1 = arith.constant 0 : i32
    return %c0_i32, %c0_i32_0 : i32, i32
  }
  func.func @transform_2(%arg0: i32) -> (i32, i32) {
    %c0_i32 = arith.constant 0 : i32
    %c0_i32_0 = arith.constant 0 : i32
    %c0_i32_1 = arith.constant 0 : i32
    return %c0_i32, %c0_i32_0 : i32, i32
  }
  func.func @transform_3(%arg0: i32) -> (i32, i32) {
    %c0_i32 = arith.constant 0 : i32
    %c0_i32_0 = arith.constant 0 : i32
    %c0_i32_1 = arith.constant 0 : i32
    return %c0_i32, %c0_i32_0 : i32, i32
  }
  func.func @transform_4(%arg0: i32) -> (i32, i32) {
    %c0_i32 = arith.constant 0 : i32
    %c0_i32_0 = arith.constant 0 : i32
    %c0_i32_1 = arith.constant 0 : i32
    return %c0_i32, %c0_i32_0 : i32, i32
  }
  func.func @transform_5(%arg0: i32) -> (i32, i32) {
    %c0_i32 = arith.constant 0 : i32
    %c0_i32_0 = arith.constant 0 : i32
    %c0_i32_1 = arith.constant 0 : i32
    return %c0_i32, %c0_i32_0 : i32, i32
  }
  func.func @transform_6(%arg0: i32) -> (i32, i32, i32) {
    %c0_i32 = arith.constant 0 : i32
    %c0_i32_0 = arith.constant 0 : i32
    %c0_i32_1 = arith.constant 0 : i32
    return %arg0, %c0_i32, %c0_i32_0 : i32, i32, i32
  }
}

</mosaic_0001>

<bundles_post_ra>
// kernel: triplet_net_forward.1
= control target key start
LH: loop header
LB: loop body
LE: loop exit
PB: predicated region body
PF: predicated region fallthrough
CT: control target
= control target key end

     0   :  { %s7994_s21 = smov 0   ;;  %s12614_s0 = inlined_call_operand.vmem [shape: f32[4,1536], index: 0, kind: input, shape index: {}]   ;;  %s12615_s1 = inlined_call_operand.vmem [shape: f32[16,36], index: 1, kind: input, shape index: {}]   ;;  %s12616_s2 = inlined_call_operand.vmem [shape: f32[16,1], index: 2, kind: input, shape index: {}]   ;;  %s12617_s3 = inlined_call_operand.vmem [shape: f32[32,144], index: 3, kind: input, shape index: {}]   ;;  %s12618_s4 = inlined_call_operand.vmem [shape: f32[32,1], index: 4, kind: input, shape index: {}]   ;;  %s12619_s5 = inlined_call_operand.vmem [shape: f32[32,1024], index: 5, kind: input, shape index: {}]   ;;  %s12620_s6 = inlined_call_operand.vmem [shape: f32[2,3,1024], index: 6, kind: output, shape index: {}]  }
   0x1 LB: > { %s8000_s22 = sadd.s32 4294967295, %s7946_s21   ;;  %p7895_p0 = scmp.ge.s32.totalorder %s7946_s21, 1  ;;  %s7946_s21 = sphi %s7994_s21, %s16_s21  }
   0x2   : > { %p213_p1 = scmp.lt.s32.totalorder %s7946_s21, 3 }
   0x4   : > { %p214_p2 = pnand %p7895_p0, %p213_p1 }
   0x6   : > { %217 = sbr.rel (%p214_p2) target bundleno = 1423 (0x58f), region = 44 }
   0xb   : > { %s243_s23 = smul.u32 6, %s8000_s22  ;;  %s7948_s28 = smov 111   ;;  %v640_v22 = vld [vmem:[#allocation2 + $0x10] sm:$0xf]  ;;  %v12636_v34 = vmov 0.0   ;;  %vm12638_vm0 = vcmask 916480  }
   0xc   : > { %s7949_s29 = smov 112   ;;  %s7950_s30 = smov 127   ;;  %v510_v24 = vld [vmem:[#allocation2 + $0x10] sm:$0xf]  ;;  %1123 = vmatprep.mubr.f32.mxu0 %v12636_v34  ;;  %1260 = vmatprep.mubr.f32.mxu1 %v12636_v34  ;;  %vm12627_vm2 = vcmask 1039360   ;;  %vm12639_vm5 = vcmask 908288  }
   0xd   : > { %p244_p3 = scmp.lt.s32.totalorder %s243_s23, 11  ;;  %s7951_s7 = smov 113   ;;  %v581_v28 = vld [vmem:[#allocation2 + $0x10] sm:$0xf]  ;;  %vm12625_vm7 = vcmask 924672   ;;  %vm12624_vm11 = vcmask 7168  }
   0xe   : > { %s7952_s8 = smov 1   ;;  %s7953_s9 = smov 15   ;;  %v451_v30 = vld [vmem:[#allocation2 + $0x10] sm:$0xf]  ;;  %vm12621_vm12 = vcmask 1043456   ;;  %vm12623_vm13 = vcmask 121856  }
   0xf   : > { %s14283_s23 = smov (!%p244_p3, %s243_s23), 11  ;;  %s7954_s10 = smov 16   ;;  %v930_v51 = vld [vmem:[#allocation2 + $0x50] sm:$0xf]  ;;  %vm12622_vm14 = vcmask 130048   ;;  %vm1023_vm15 = vcmask 293888  }
  0x10   : > { %s7896_s24 = sshll.u32 %s14283_s23, 2  ;;  %s7955_s11 = smov 17   ;;  %v859_v53 = vld [vmem:[#allocation2 + $0x50] sm:$0xf] }
  0x11   : > { %s247_s27 = scalar_lea.vmem %s12614_s0, %s7896_s24  ;;  %v729_v55 = vld [vmem:[#allocation2 + $0x50] sm:$0xf]  ;;  %p249_p4 = scmp.lt.s32.totalorder %s8000_s22, 1 }
  0x12   : > { %v430_v0 = vld [vmem:[%s247_s27 + $0x8] sm:$0xff]  ;;  %v429_v1 = vld [vmem:[%s247_s27] sm:$0xff]  ;;  %v431_v2 = vld [vmem:[%s247_s27 + $0x10] sm:$0xff] }
  0x13   : > { %447 = vst [vmem:[#allocation2 + $0x60] sm:$0xf] %v430_v0  ;;  %445 = vst [vmem:[#allocation2] sm:$0xf] %v429_v1  ;;  %v439_v3 = vcombine.high %v429_v1, %v429_v1  ;;  %v440_v4 = vcombine.high %v430_v0, %v430_v0  ;;  %v441_v5 = vcombine.high %v431_v2, %v431_v2  ;;  %v800_v57 = vld [vmem:[#allocation2 + $0x50] sm:$0xf] }
  0x14   : > { %449 = vst [vmem:[#allocation2 + $0x58] sm:$0xf] %v431_v2  ;;  %s14285_s22 = smov (!%p249_p4, %s8000_s22), 1 }
  0x15   : > { %446 = vst [vmem:[#allocation2 + $0x8] sm:$0xf] %v439_v3  ;;  %448 = vst [vmem:[#allocation2 + $0x20] sm:$0xf] %v440_v4  ;;  %v12628_v4 = vlaneseq  ;;  %s7903_s20 = sshll.u32 %s14285_s22, 5 }
  0x16   : > { %450 = vst [vmem:[#allocation2 + $0x70] sm:$0xf] %v441_v5  ;;  %s12481_s25 = scalar_lea.vmem %s12620_s6, %s7903_s20 }
  0x1a   : > { %v926_v6 = vld [vmem:[#allocation2 + $0x60] sm:$0xf] }
  0x1b   : > { %v855_v7 = vld [vmem:[#allocation2 + $0x60] sm:$0xf]  ;;  %948 = vrot.lane.b32.xlu0 %v926_v6, %s7948_s28  ;;  %v928_v32 = vld [vmem:[#allocation2 + $0x58] sm:$0xf]  ;;  %v8067_v6 = vand.u32 127, %v12628_v4 }
  0x1c   : > { %871 = vrot.lane.b32.xlu1 %v855_v7, %s7949_s29  ;;  %v924_v8 = vld [vmem:[#allocation2] sm:$0xf]  ;;  %v854_v11 = vld [vmem:[#allocation2 + $0x8] sm:$0xf]  ;;  %v857_v35 = vld [vmem:[#allocation2 + $0x58] sm:$0xf] }
  0x1d   : > { %v853_v9 = vld [vmem:[#allocation2] sm:$0xf]  ;;  %v724_v13 = vld [vmem:[#allocation2 + $0x8] sm:$0xf]  ;;  %v727_v37 = vld [vmem:[#allocation2 + $0x58] sm:$0xf] }
  0x1e   : > { %v725_v10 = vld [vmem:[#allocation2 + $0x60] sm:$0xf]  ;;  %v925_v14 = vld [vmem:[#allocation2 + $0x8] sm:$0xf]  ;;  %v798_v40 = vld [vmem:[#allocation2 + $0x58] sm:$0xf] }
  0x1f   : > { %944 = vrot.lane.b32.xlu0 %v924_v8, %s7948_s28  ;;  %v796_v12 = vld [vmem:[#allocation2 + $0x60] sm:$0xf]  ;;  %v795_v15 = vld [vmem:[#allocation2 + $0x8] sm:$0xf]  ;;  %v929_v52 = vld [vmem:[#allocation2 + $0x70] sm:$0xf] }
  0x20   : > { %867 = vrot.lane.b32.xlu1 %v853_v9, %s7949_s29  ;;  %v712_v16 = vld [vmem:[#allocation2 + $0x8] sm:$0xf]  ;;  %v711_v17 = vld [vmem:[#allocation2] sm:$0xf]  ;;  %v858_v54 = vld [vmem:[#allocation2 + $0x70] sm:$0xf] }
  0x21   : > { %718 = vst [vmem:[#allocation3 + $0x138] sm:$0xf] %v712_v16  ;;  %v723_v18 = vld [vmem:[#allocation2] sm:$0xf]  ;;  %717 = vst [vmem:[#allocation3 + $0xb8] sm:$0xf] %v711_v17 }
  0x22   : > { %v794_v19 = vld [vmem:[#allocation2] sm:$0xf]  ;;  %v642_v21 = vld [vmem:[#allocation2 + $0x8] sm:$0xf]  ;;  %v728_v56 = vld [vmem:[#allocation2 + $0x70] sm:$0xf] }
  0x23   : > { %741 = vrot.lane.b32.xlu0 %v725_v10, %s7950_s30  ;;  %v641_v20 = vld [vmem:[#allocation2] sm:$0xf]  ;;  %v583_v25 = vld [vmem:[#allocation2 + $0x8] sm:$0xf]  ;;  %v799_v58 = vld [vmem:[#allocation2 + $0x70] sm:$0xf] }
  0x24   : > { %869 = vrot.lane.b32.xlu1 %v854_v11, %s7949_s29  ;;  %v582_v23 = vld [vmem:[#allocation2] sm:$0xf]  ;;  %v512_v27 = vld [vmem:[#allocation2 + $0x8] sm:$0xf]  ;;  %v646_v59 = vld [vmem:[#allocation2 + $0x70] sm:$0xf] }
  0x25   : > { %v511_v26 = vld [vmem:[#allocation2] sm:$0xf]  ;;  %v453_v31 = vld [vmem:[#allocation2 + $0x8] sm:$0xf]  ;;  %v645_v60 = vld [vmem:[#allocation2 + $0x58] sm:$0xf] }
  0x26   : > { %v452_v29 = vld [vmem:[#allocation2] sm:$0xf]  ;;  %v715_v61 = vld [vmem:[#allocation2 + $0x58] sm:$0xf]  ;;  %v587_v62 = vld [vmem:[#allocation2 + $0x70] sm:$0xf] }
  0x27   : > { %818 = vrot.lane.b32.xlu0 %v796_v12, %s7951_s7  ;;  %v927_v33 = vld [vmem:[#allocation2 + $0x20] sm:$0xf]  ;;  %721 = vst [vmem:[#allocation3 + $0x338] sm:$0xf] %v715_v61  ;;  %v586_v63 = vld [vmem:[#allocation2 + $0x58] sm:$0xf] }
  0x28   : > { %739 = vrot.lane.b32.xlu1 %v724_v13, %s7950_s30  ;;  %v856_v36 = vld [vmem:[#allocation2 + $0x20] sm:$0xf]  ;;  %v516_v0 = vld [vmem:[#allocation2 + $0x70] sm:$0xf]  ;;  %v515_v1 = vld [vmem:[#allocation2 + $0x58] sm:$0xf] }
  0x29   : > { %v726_v38 = vld [vmem:[#allocation2 + $0x20] sm:$0xf]  ;;  %v457_v2 = vld [vmem:[#allocation2 + $0x70] sm:$0xf]  ;;  %v456_v3 = vld [vmem:[#allocation2 + $0x58] sm:$0xf] }
  0x2a   : > { %v713_v39 = vld [vmem:[#allocation2 + $0x60] sm:$0xf]  ;;  %v716_v5 = vld [vmem:[#allocation2 + $0x70] sm:$0xf]  ;;  %v256_v7 = vadd.s32 128, %v8067_v6 }
  0x2b   : > { %946 = vrot.lane.b32.xlu0 %v925_v14, %s7948_s28  ;;  %719 = vst [vmem:[#allocation3 + $0x1f8] sm:$0xf] %v713_v39  ;;  %v797_v41 = vld [vmem:[#allocation2 + $0x20] sm:$0xf]  ;;  %722 = vst [vmem:[#allocation3 + $0xd0] sm:$0xf] %v716_v5 }
  0x2c   : > { %816 = vrot.lane.b32.xlu1 %v795_v15, %s7951_s7  ;;  %v714_v42 = vld [vmem:[#allocation2 + $0x20] sm:$0xf]  ;;  %v344_v10 = vand.u32 255, %v256_v7  ;;  %v272_v13 = vand.u32 15, %v256_v7 }
  0x2d   : > { %v644_v43 = vld [vmem:[#allocation2 + $0x20] sm:$0xf]  ;;  %720 = vst [vmem:[#allocation3 + $0x78] sm:$0xf] %v714_v42 }
  0x2e   : > { %v643_v44 = vld [vmem:[#allocation2 + $0x60] sm:$0xf]  ;;  %vm8074_vm1 = vcmp.lt.s32.totalorder %v344_v10, 240  ;;  %vm8085_vm3 = vcmp.ne.s32.totalorder %v272_v13, 0  ;;  %vm8089_vm4 = vcmp.ne.s32.totalorder %v272_v13, 15  ;;  %v337_v10 = vand.u32 255, %v8067_v6 }
  0x2f   : > { %737 = vrot.lane.b32.xlu0 %v723_v18, %s7950_s30  ;;  %v585_v45 = vld [vmem:[#allocation2 + $0x20] sm:$0xf]  ;;  %vm8104_vm6 = vmand %vm8074_vm1, %vm8085_vm3 }
  0x30   : > { %814 = vrot.lane.b32.xlu1 %v794_v19, %s7951_s7  ;;  %v584_v46 = vld [vmem:[#allocation2 + $0x60] sm:$0xf]  ;;  %vm8116_vm9 = vmand %vm8074_vm1, %vm8089_vm4 }
  0x31   : > { %v514_v47 = vld [vmem:[#allocation2 + $0x20] sm:$0xf] }
  0x32   : > { %v513_v48 = vld [vmem:[#allocation2 + $0x60] sm:$0xf] }
  0x33   : > { %656 = vrot.lane.b32.xlu0 %v641_v20, %s7952_s8  ;;  %v455_v49 = vld [vmem:[#allocation2 + $0x20] sm:$0xf] }
  0x34   : > { %658 = vrot.lane.b32.xlu1 %v642_v21, %s7952_s8  ;;  %v454_v50 = vld [vmem:[#allocation2 + $0x60] sm:$0xf] }
  0x35   : > { %v434_v5 = vld [vmem:[%s12616_s2] sm:$0xff] }
  0x36   : > { %v9812_v21 = vld [vmem:[%s12617_s3 + $0x20] sm:$0xff] }
  0x37   : > { %654 = vrot.lane.b32.xlu0 %v640_v22, %s7952_s8 }
  0x38   : > { %603 = vrot.lane.b32.xlu1 %v582_v23, %s7953_s9 }
  0x3b   : > { %605 = vrot.lane.b32.xlu0 %v583_v25, %s7953_s9 }
  0x3c   : > { %524 = vrot.lane.b32.xlu1 %v510_v24, %s7954_s10  ;;  %v265_v24 = vand.u32 15, %v8067_v6 }
  0x3e   : > { %vm8108_vm8 = vcmp.ne.s32.totalorder %v265_v24, 15  ;;  %vm8131_vm10 = vcmp.ne.s32.totalorder %v265_v24, 0 }
  0x3f   : > { %526 = vrot.lane.b32.xlu0 %v511_v26, %s7954_s10 }
  0x40   : > { %528 = vrot.lane.b32.xlu1 %v512_v27, %s7954_s10 }
  0x43   : > { %601 = vrot.lane.b32.xlu0 %v581_v28, %s7953_s9 }
  0x44   : > { %473 = vrot.lane.b32.xlu1 %v452_v29, %s7955_s11 }
  0x47   : > { %475 = vrot.lane.b32.xlu0 %v453_v31, %s7955_s11 }
  0x48   : > { %471 = vrot.lane.b32.xlu1 %v451_v30, %s7955_s11 }
  0x4b   : > { %950 = vrot.lane.b32.xlu0 %v927_v33, %s7948_s28 }
  0x4c   : > { %952 = vrot.lane.b32.xlu1 %v928_v32, %s7948_s28  ;;  %v13168_v32 = vmov 0 }
  0x4d   : > { %v13169_v32 = vsel %vm8116_vm9, 4294967295, %v13168_v32 }
  0x4e   : > { %13170 = vst [vmem:[#allocation4_spill] sm:$0xff] %v13169_v32 }
  0x4f   : > { %873 = vrot.lane.b32.xlu0 %v856_v36, %s7949_s29 }
  0x50   : > { %875 = vrot.lane.b32.xlu1 %v857_v35, %s7949_s29 }
  0x53   : > { %743 = vrot.lane.b32.xlu0 %v726_v38, %s7950_s30 }
  0x54   : > { %745 = vrot.lane.b32.xlu1 %v727_v37, %s7950_s30 }
  0x57   : > { %820 = vrot.lane.b32.xlu0 %v797_v41, %s7951_s7 }
  0x58   : > { %822 = vrot.lane.b32.xlu1 %v798_v40, %s7951_s7 }
  0x5b   : > { %660 = vrot.lane.b32.xlu0 %v643_v44, %s7952_s8 }
  0x5c   : > { %662 = vrot.lane.b32.xlu1 %v644_v43, %s7952_s8 }
  0x5f   : > { %607 = vrot.lane.b32.xlu0 %v584_v46, %s7953_s9 }
  0x60   : > { %609 = vrot.lane.b32.xlu1 %v585_v45, %s7953_s9 }
  0x63   : > { %530 = vrot.lane.b32.xlu0 %v513_v48, %s7954_s10 }
  0x64   : > { %532 = vrot.lane.b32.xlu1 %v514_v47, %s7954_s10 }
  0x67   : > { %477 = vrot.lane.b32.xlu0 %v454_v50, %s7955_s11 }
  0x68   : > { %479 = vrot.lane.b32.xlu1 %v455_v49, %s7955_s11 }
  0x6b   : > { %954 = vrot.lane.b32.xlu0 %v929_v52, %s7948_s28 }
  0x6c   : > { %956 = vrot.lane.b32.xlu1 %v930_v51, %s7948_s28 }
  0x6f   : > { %877 = vrot.lane.b32.xlu0 %v858_v54, %s7949_s29 }
  0x70   : > { %879 = vrot.lane.b32.xlu1 %v859_v53, %s7949_s29 }
  0x73   : > { %747 = vrot.lane.b32.xlu0 %v728_v56, %s7950_s30 }
  0x74   : > { %749 = vrot.lane.b32.xlu1 %v729_v55, %s7950_s30 }
  0x77   : > { %824 = vrot.lane.b32.xlu0 %v799_v58, %s7951_s7 }
  0x78   : > { %826 = vrot.lane.b32.xlu1 %v800_v57, %s7951_s7 }
  0x7b   : > { %664 = vrot.lane.b32.xlu0 %v645_v60, %s7952_s8 }
  0x7c   : > { %666 = vrot.lane.b32.xlu1 %v646_v59, %s7952_s8 }
  0x7f   : > { %611 = vrot.lane.b32.xlu0 %v586_v63, %s7953_s9 }
  0x80   : > { %613 = vrot.lane.b32.xlu1 %v587_v62, %s7953_s9 }
  0x83   : > { %534 = vrot.lane.b32.xlu0 %v515_v1, %s7954_s10 }
  0x84   : > { %536 = vrot.lane.b32.xlu1 %v516_v0, %s7954_s10 }
  0x87   : > { %481 = vrot.lane.b32.xlu0 %v456_v3, %s7955_s11 }
  0x88   : > { %483 = vrot.lane.b32.xlu1 %v457_v2, %s7955_s11 }
  0x8d   : > { %v8070_v8 = vpop.permute.xlu0 %948 }
  0x8e   : > { %v8072_v9 = vpop.permute.xlu1 %871 }
  0x91   : > { %v945_v11 = vpop.permute.xlu0 %944 }
  0x92   : > { %v868_v12 = vpop.permute.xlu1 %867 }
  0x95   : > { %v8078_v15 = vpop.permute.xlu0 %741 }
  0x96   : > { %v870_v16 = vpop.permute.xlu1 %869 }
  0x97   : > { %v882_v17 = vsel %vm12638_vm0, %v868_v12, %v870_v16  ;;  %v883_v18 = vsel %vm12638_vm0, %v870_v16, %v8072_v9  ;;  %v7957_v12 = vmov 0  }
  0x98   : > { %v895_v19 = vsel %vm8074_vm1, %v883_v18, 0.0  ;;  %v906_v20 = vrot.slane %v882_v17, 4  ;;  %7924 = vset.pattern.permute.xlu1 %v7957_v12  ;;  %7923 = vset.pattern.permute.xlu0 %v7957_v12 }
  0x99   : > { %v907_v22 = vrot.slane %v895_v19, 4  ;;  %v8094_v25 = vpop.permute.xlu0 %818  ;;  %1015 = vperm.xlu1 %7924, %v434_v5  }
  0x9a   : > { %918 = vst [vmem:[#allocation3 + $0x358] sm:$0xf0] %v906_v20  ;;  %v740_v26 = vpop.permute.xlu1 %739 }
  0x9b   : > { %919 = vst [vmem:[#allocation3 + $0x190] sm:$0xf0] %v907_v22  ;;  %v753_v27 = vsel %vm12627_vm2, %v740_v26, %v8078_v15 }
  0x9c   : > { %v765_v28 = vsel %vm8089_vm4, %v753_v27, 0.0 }
  0x9d   : > { %v777_v30 = vrot.slane %v765_v28, 4  ;;  %v947_v33 = vpop.permute.xlu0 %946 }
  0x9e   : > { %v817_v35 = vpop.permute.xlu1 %816  ;;  %v959_v36 = vsel %vm12639_vm5, %v945_v11, %v947_v33  ;;  %v960_v37 = vsel %vm12639_vm5, %v947_v33, %v8070_v8 }
  0x9f   : > { %789 = vst [vmem:[#allocation3 + $0x138] sm:$0xf0] %v777_v30  ;;  %v830_v38 = vsel %vm12625_vm7, %v817_v35, %v8094_v25  ;;  %v971_v39 = vsel %vm8108_vm8, %v959_v36, 0.0  ;;  %v972_v40 = vsel %vm8116_vm9, %v960_v37, 0.0 }
  0xa0   : > { %v842_v41 = vsel %vm8104_vm6, %v830_v38, 0.0  ;;  %977 = vst [vmem:[#allocation3 + $0x228] sm:$0xf] %v971_v39  ;;  %978 = vst [vmem:[#allocation3 + $0x120] sm:$0xf] %v972_v40 }
  0xa1   : > { %848 = vst [vmem:[#allocation3 + $0x190] sm:$0xf] %v842_v41  ;;  %v738_v43 = vpop.permute.xlu0 %737 }
  0xa2   : > { %v815_v44 = vpop.permute.xlu1 %814  ;;  %v752_v45 = vsel %vm12627_vm2, %v738_v43, %v740_v26 }
  0xa3   : > { %v829_v46 = vsel %vm12625_vm7, %v815_v44, %v817_v35  ;;  %v764_v47 = vsel %vm8108_vm8, %v752_v45, 0.0  ;;  %v432_v35 = vld [vmem:[%s12615_s1] sm:$0xff] }
  0xa4   : > { %v841_v48 = vsel %vm8131_vm10, %v829_v46, 0.0  ;;  %v776_v49 = vrot.slane %v764_v47, 4  ;;  %v8223_v47 = vadd.s32 256, %v8067_v6 }
  0xa5   : > { %847 = vst [vmem:[#allocation3 + $0x358] sm:$0xf] %v841_v48  ;;  %v657_v50 = vpop.permute.xlu0 %656  ;;  %v1025_v48 = vsel %vm1023_vm15, %v432_v35, 0 }
  0xa6   : > { %v8141_v51 = vpop.permute.xlu1 %658  ;;  %v996_v52 = vld [vmem:[#allocation3 + $0x138] sm:$0xff]  ;;  %788 = vst [vmem:[#allocation3 + $0xb8] sm:$0xf0] %v776_v49  ;;  %v8249_v12 = vand.u32 4294901760, %v1025_v48 }
  0xa7   : > { %v670_v53 = vsel %vm12624_vm11, %v657_v50, %v8141_v51  ;;  %v8145_v54 = vand.u32 4294901760, %v996_v52  ;;  %v1008_v56 = vld [vmem:[#allocation3 + $0x120] sm:$0xf]  ;;  %v1007_v57 = vld [vmem:[#allocation3 + $0x228] sm:$0xf] }
  0xa8   : > { %v682_v55 = vsel %vm8085_vm3, %v670_v53, 0.0  ;;  %v1002_v58 = vld [vmem:[#allocation3 + $0x190] sm:$0xff]  ;;  %v1035_v60 = vsel %vm12621_vm12, %v1008_v56, 0  ;;  %v1032_v61 = vsel %vm12621_vm12, %v1007_v57, 0  ;;  %vm8198_vm12 = vcmp.ge.s32.totalorder %v337_v10, 16  ;;  %v433_v57 = vld [vmem:[%s12615_s1 + $0x8] sm:$0xff] }
  0xa9   : > { %v694_v59 = vrot.slane %v682_v55, 4  ;;  %v8151_v62 = vand.u32 4294901760, %v1002_v58  ;;  %v655_v63 = vpop.permute.xlu0 %654  ;;  %v8155_v1 = vand.u32 4294901760, %v1035_v60  ;;  %v8157_v2 = vand.u32 4294901760, %v1032_v61 }
  0xaa   : > { %v8153_v0 = vpop.permute.xlu1 %603  ;;  %v8160_v3 = vsub.f32 %v996_v52, %v8145_v54  ;;  %v669_v7 = vsel %vm12624_vm11, %v655_v63, %v657_v50  ;;  %v8232_v56 = vadd.s32 384, %v8067_v6 }
  0xab   : > { %706 = vst [vmem:[#allocation3 + $0x140] sm:$0xf0] %v694_v59  ;;  %v8168_v11 = vsub.f32 %v1002_v58, %v8151_v62  ;;  %v681_v13 = vsel %vm8131_vm10, %v669_v7, 0.0  ;;  %1072 = vmatprep.subr.mxu0 %v8155_v1  ;;  %v8174_v17 = vsub.f32 %v1035_v60, %v8155_v1  ;;  %v8177_v18 = vsub.f32 %v1032_v61, %v8157_v2  ;;  %v435_v58 = vld [vmem:[%s12616_s2 + $0x8] sm:$0xff] }
  0xac   : > { %v1001_v16 = vld [vmem:[#allocation3 + $0x358] sm:$0xff]  ;;  %v693_v19 = vrot.slane %v681_v13, 4  ;;  %1074 = vmatpush1.msra.mxu0 %v8157_v2  ;;  %v12631_v33 = vand.u32 4294901760, %v8160_v3  ;;  %1020 = vperm.xlu0 %7923, %v435_v58  }
  0xad   : > { %v8180_v20 = vand.u32 4294901760, %v1001_v16  ;;  %v12633_v22 = vand.u32 4294901760, %v8168_v11  ;;  %1076 = vmatprep.subr.mxu0 %v8151_v62  ;;  %v8184_v26 = vpop.permute.xlu0 %605  ;;  %v995_v27 = vld [vmem:[#allocation3 + $0xb8] sm:$0xff]  ;;  %v12635_v28 = vand.u32 4294901760, %v8174_v17  ;;  %v12634_v30 = vand.u32 4294901760, %v8177_v18 }
  0xae   : > { %v525_v24 = vpop.permute.xlu1 %524  ;;  %705 = vst [vmem:[#allocation3 + $0x130] sm:$0xf0] %v693_v19  ;;  %v617_v36 = vsel %vm12623_vm13, %v8153_v0, %v8184_v26  ;;  %v8196_v37 = vand.u32 4294901760, %v995_v27  ;;  %v1195_v55 = vsub.f32 %v8160_v3, %v12631_v33 }
  0xaf   : > { %1078 = vmatpush1.msra.mxu0 %v8180_v20  ;;  %v8203_v39 = vsub.f32 %v1001_v16, %v8180_v20  ;;  %v629_v40 = vsel %vm8089_vm4, %v617_v36, 0.0  ;;  %v1171_v41 = vsub.f32 %v8174_v17, %v12635_v28  ;;  %v1177_v43 = vsub.f32 %v8177_v18, %v12634_v30 }
  0xb0   : > { %1080 = vmatprep.subr.mxu0 %v8145_v54  ;;  %v1183_v44 = vsub.f32 %v8168_v11, %v12633_v22  ;;  %635 = vst [vmem:[#allocation3 + $0x140] sm:$0xf] %v629_v40  ;;  %v8220_v46 = vsub.f32 %v995_v27, %v8196_v37  ;;  %v1028_v27 = vsel %vm1023_vm15, %v433_v57, 0  ;;  %v1196_v40 = vand.u32 4294901760, %v1195_v55 }
  0xb1   : > { %1082 = vmatpush1.msra.mxu0 %v8196_v37  ;;  %v12632_v45 = vand.u32 4294901760, %v8203_v39  ;;  %v527_v49 = vpop.permute.xlu0 %526  ;;  %v1172_v52 = vand.u32 4294901760, %v1171_v41  ;;  %v1178_v53 = vand.u32 4294901760, %v1177_v43  ;;  %v286_v41 = vand.u32 15, %v8232_v56 }
  0xb2   : > { %v8226_v50 = vpop.permute.xlu1 %528  ;;  %v539_v59 = vsel %vm12622_vm14, %v525_v24, %v527_v49  ;;  %v12629_v63 = vand.u32 4294901760, %v8220_v46  ;;  %v1184_v10 = vand.u32 4294901760, %v1183_v44  ;;  %v358_v43 = vand.u32 255, %v8232_v56 }
  0xb3   : > { %v540_v60 = vsel %vm12622_vm14, %v527_v49, %v8226_v50  ;;  %v1189_v61 = vsub.f32 %v8203_v39, %v12632_v45  ;;  %v551_v5 = vsel %vm8198_vm12, %v539_v59, 0.0  ;;  %1173 = vmatprep.subr.mxu1 %v1172_v52  ;;  %vm8255_vm14 = vmand %vm8198_vm12, %vm8108_vm8  ;;  %vm12626_vm15 = vcmask 138240  }
  0xb4   : > { %v564_v7 = vrot.slane %v540_v60, 4  ;;  %v563_v13 = vrot.slane %v551_v5, 4  ;;  %1179 = vmatpush1.msra.mxu1 %v1178_v53  ;;  %v1201_v24 = vsub.f32 %v8220_v46, %v12629_v63  ;;  %v8270_v57 = vsub.f32 %v1025_v48, %v8249_v12 }
  0xb5   : > { %v1190_v19 = vand.u32 4294901760, %v1189_v61  ;;  %1185 = vmatprep.subr.mxu1 %v1184_v10  ;;  %v602_v35 = vpop.permute.xlu0 %601  ;;  %v8272_v55 = vand.u32 4294901760, %v1028_v27  ;;  %v279_v59 = vand.u32 15, %v8223_v47  ;;  %vm8289_vm11 = vcmp.ne.s32.totalorder %v286_v41, 15 }
  0xb6   : > { %576 = vst [vmem:[#allocation3 + $0x268] sm:$0xf0] %v564_v7  ;;  %v474_v36 = vpop.permute.xlu1 %473  ;;  %575 = vst [vmem:[#allocation3 + $0x2a8] sm:$0xf0] %v563_v13  ;;  %v616_v44 = vsel %vm12623_vm13, %v602_v35, %v8153_v0  ;;  %v1202_v49 = vand.u32 4294901760, %v1201_v24  ;;  %v13177_v0 = vmov 0 }
  0xb7   : > { %1191 = vmatpush1.msra.mxu1 %v1190_v19  ;;  %v628_v52 = vsel %vm8255_vm14, %v616_v44, 0.0  ;;  %v990_v53 = vld [vmem:[#allocation3 + $0x140] sm:$0xff]  ;;  %vm8278_vm13 = vmand %vm8198_vm12, %vm8131_vm10  ;;  %v13180_v48 = vmov 0  ;;  %vm8293_vm7 = vcmp.lt.s32.totalorder %v358_v43, 240  ;;  %v13183_v5 = vmov 0 }
  0xb8   : > { %1197 = vmatprep.subr.mxu1 %v1196_v40  ;;  %634 = vst [vmem:[#allocation3 + $0x130] sm:$0xf] %v628_v52  ;;  %v13178_v0 = vsel %vm8278_vm13, 4294967295, %v13177_v0  ;;  %v8282_v58 = vand.u32 4294901760, %v990_v53  ;;  %v13181_v48 = vsel %vm8289_vm11, 4294967295, %v13180_v48  ;;  %v13184_v5 = vsel %vm8293_vm7, 4294967295, %v13183_v5  ;;  %vm8322_vm2 = vmand %vm8293_vm7, %vm8289_vm11 }
  0xb9   : > { %1203 = vmatpush1.msra.mxu1 %v1202_v49  ;;  %13179 = vst [vmem:[#allocation5_spill] sm:$0xff] %v13178_v0  ;;  %v8285_v61 = vpop.permute.xlu0 %475  ;;  %13182 = vst [vmem:[#allocation6_spill] sm:$0xff] %v13181_v48  ;;  %v8309_v35 = vand.u32 4294901760, %v8270_v57  ;;  %v8312_v40 = vsub.f32 %v1028_v27, %v8272_v55  ;;  %v13189_v43 = vmov 0 }
  0xba   : > { %v472_v60 = vpop.permute.xlu1 %471  ;;  %13185 = vst [vmem:[#allocation7_spill] sm:$0xff] %v13184_v5  ;;  %v487_v10 = vsel %vm12626_vm15, %v474_v36, %v8285_v61  ;;  %1084 = vmatprep.subr.mxu0 %v8282_v58  ;;  %v8302_v13 = vsub.f32 %v990_v53, %v8282_v58  ;;  %v13190_v43 = vsel %vm8322_vm2, 4294967295, %v13189_v43 }
  0xbb   : > { %v486_v7 = vsel %vm12626_vm15, %v472_v60, %v474_v36  ;;  %v499_v24 = vsel %vm8085_vm3, %v487_v10, 0.0  ;;  %vm8314_vm15 = vcmp.ne.s32.totalorder %v279_v59, 15  ;;  %v13186_v36 = vmov 0  ;;  %13191 = vst [vmem:[#allocation9_spill] sm:$0xff] %v13190_v43 }
  0xbc   : > { %v498_v19 = vsel %vm8278_vm13, %v486_v7, 0.0  ;;  %505 = vst [vmem:[#allocation3 + $0x268] sm:$0xf] %v499_v24  ;;  %v13187_v36 = vsel %vm8314_vm15, 4294967295, %v13186_v36  ;;  %v12630_v44 = vand.u32 4294901760, %v8302_v13  ;;  %v1127_v24 = vsub.f32 %v8270_v57, %v8309_v35 }
  0xbd   : > { %504 = vst [vmem:[#allocation3 + $0x2a8] sm:$0xf] %v498_v19  ;;  %13188 = vst [vmem:[#allocation8_spill] sm:$0xff] %v13187_v36  ;;  %v951_v27 = vpop.permute.xlu0 %950  ;;  %v8343_v4 = vand.u32 4294901760, %v8312_v40 }
  0xbe   : > { %v8327_v49 = vpop.permute.xlu1 %952  ;;  %v961_v52 = vsel %vm12639_vm5, %v8070_v8, %v951_v27  ;;  %v1207_v60 = vsub.f32 %v8302_v13, %v12630_v44  ;;  %v8359_v22 = vand.u32 4294901760, %v1127_v24  ;;  %v13195_v24 = vmov 0 }
  0xbf   : > { %v962_v53 = vsel %vm12639_vm5, %v951_v27, %v8327_v49  ;;  %v973_v7 = vsel %vm8314_vm15, %v961_v52, 0.0  ;;  %v989_v19 = vld [vmem:[#allocation3 + $0x130] sm:$0xff]  ;;  %vm8376_vm5 = vcmp.ne.s32.totalorder %v286_v41, 0 }
  0xc0   : > { %v974_v10 = vsel %vm8322_vm2, %v962_v53, 0.0  ;;  %979 = vst [vmem:[#allocation3 + $0x148] sm:$0xf] %v973_v7  ;;  %v8345_v8 = vand.u32 4294901760, %v989_v19  ;;  %v1208_v27 = vand.u32 4294901760, %v1207_v60  ;;  %v13196_v24 = vsel %vm8376_vm5, 4294967295, %v13195_v24 }
  0xc1   : > { %980 = vst [vmem:[#allocation3 + $0x158] sm:$0xf] %v974_v10  ;;  %v874_v44 = vpop.permute.xlu0 %873  ;;  %13197 = vst [vmem:[#allocation11_spill] sm:$0xff] %v13196_v24  ;;  %vm13198_vm2 = vcmask 1039360  }
  0xc2   : > { %v8347_v63 = vpop.permute.xlu1 %875  ;;  %v884_v52 = vsel %vm12638_vm0, %v8072_v9, %v874_v44  ;;  %1086 = vmatpush1.msra.mxu0 %v8345_v8  ;;  %1209 = vmatprep.subr.mxu1 %v1208_v27  ;;  %v8355_v33 = vsub.f32 %v989_v19, %v8345_v8  ;;  %v1138_v9 = vsub.f32 %v8312_v40, %v8343_v4  ;;  %vm13199_vm9 = vmmov %vm13198_vm2 }
  0xc3   : > { %v885_v53 = vsel %vm12638_vm0, %v874_v44, %v8347_v63  ;;  %v908_v10 = vrot.slane %v884_v52, 4  ;;  %v984_v60 = vld [vmem:[#allocation3 + $0x268] sm:$0xff]  ;;  %vm8370_vm0 = vcmp.ne.s32.totalorder %v279_v59, 0  ;;  %v13192_v52 = vmov 0 }
  0xc4   : > { %v897_v7 = vsel %vm8293_vm7, %v885_v53, 0.0  ;;  %v983_v45 = vld [vmem:[#allocation3 + $0x2a8] sm:$0xff]  ;;  %v8363_v28 = vand.u32 4294901760, %v984_v60  ;;  %v12646_v27 = vand.u32 4294901760, %v8355_v33  ;;  %v13193_v52 = vsel %vm8370_vm0, 4294967295, %v13192_v52 }
  0xc5   : > { %v909_v30 = vrot.slane %v897_v7, 4  ;;  %v8365_v44 = vand.u32 4294901760, %v983_v45  ;;  %920 = vst [vmem:[#allocation3 + $0x320] sm:$0xf0] %v908_v10  ;;  %v744_v34 = vpop.permute.xlu0 %743  ;;  %13194 = vst [vmem:[#allocation10_spill] sm:$0xff] %v13193_v52 }
  0xc6   : > { %v8368_v19 = vpop.permute.xlu1 %745  ;;  %v754_v53 = vsel %vm13198_vm2, %v8078_v15, %v744_v34  ;;  %1088 = vmatprep.subr.mxu0 %v8363_v28  ;;  %v1213_v59 = vsub.f32 %v8355_v33, %v12646_v27  ;;  %v8389_v10 = vsub.f32 %v984_v60, %v8363_v28  ;;  %v8396_v15 = vand.u32 4294901760, %v1138_v9  ;;  %vm8407_vm2 = vmand %vm8293_vm7, %vm8376_vm5 }
  0xc7   : > { %921 = vst [vmem:[#allocation3 + $0x208] sm:$0xf0] %v909_v30  ;;  %v755_v7 = vsel %vm13199_vm9, %v744_v34, %v8368_v19  ;;  %v766_v56 = vsel %vm8314_vm15, %v754_v53, 0.0  ;;  %1090 = vmatpush1.msra.mxu0 %v8365_v44  ;;  %v8399_v34 = vsub.f32 %v983_v45, %v8365_v44  ;;  %v13200_v60 = vmov 0 }
  0xc8   : > { %v767_v30 = vsel %vm8289_vm11, %v755_v7, 0.0  ;;  %v778_v41 = vrot.slane %v766_v56, 4  ;;  %1299 = vmatprep.subr.mxu0 %v8174_v17  ;;  %1129 = vmatmul.mubr.f32.vlgmr.msra.gmra.mxu0 %v8359_v22  ;;  %v13201_v60 = vsel %vm8407_vm2, 4294967295, %v13200_v60  ;;  %v1214_v53 = vand.u32 4294901760, %v1213_v59 }
  0xc9   : > { %v779_v43 = vrot.slane %v767_v30, 4  ;;  %13202 = vst [vmem:[#allocation12_spill] sm:$0xff] %v13201_v60  ;;  %v12657_v9 = vand.u32 4294901760, %v8389_v10  ;;  %1302 = vmatpush1.msra.mxu0 %v8177_v18  ;;  %v821_v45 = vpop.permute.xlu0 %820  ;;  %v13203_v56 = vmov 0.0   ;;  %v351_v27 = vand.u32 255, %v8223_v47 }
  0xca   : > { %v8412_v7 = vpop.permute.xlu1 %822  ;;  %1134 = vmatprep.mubr.f32.mxu0 %v13203_v56  ;;  %790 = vst [vmem:[#allocation3 + $0x1f8] sm:$0xf0] %v778_v41  ;;  %vm13204_vm9 = vcmask 924672   ;;  %1215 = vmatpush1.msra.mxu1 %v1214_v53  ;;  %v13247_v52 = vand.u32 4294901760, %v8389_v10  ;;  %v13250_v0 = vand.u32 4294901760, %v8399_v34 }
  0xcb   : > { %791 = vst [vmem:[#allocation3 + $0x78] sm:$0xf0] %v779_v43  ;;  %v831_v5 = vsel %vm13204_vm9, %v8094_v25, %v821_v45  ;;  %vm13205_vm7 = vmmov %vm13204_vm9  ;;  %1305 = vmatprep.subr.mxu0 %v8168_v11  ;;  %v1219_v32 = vsub.f32 %v8389_v10, %v12657_v9  ;;  %v13206_v25 = vand.u32 4294901760, %v8399_v34  ;;  %vm13210_vm9 = vcmask 7168   ;;  %v1009_v9 = vld [vmem:[#allocation3 + $0x148] sm:$0xf] }
  0xcc   : > { %v832_v59 = vsel %vm13205_vm7, %v821_v45, %v8412_v7  ;;  %v843_v30 = vsel %vm8370_vm0, %v831_v5, 0.0  ;;  %1308 = vmatpush1.msra.mxu0 %v8203_v39  ;;  %vm8440_vm7 = vcmp.ge.s32.totalorder %v351_v27, 16 }
  0xcd   : > { %v844_v47 = vsel %vm8407_vm2, %v832_v59, 0.0  ;;  %v1225_v43 = vsub.f32 %v8399_v34, %v13206_v25  ;;  %849 = vst [vmem:[#allocation3 + $0x320] sm:$0xf] %v843_v30  ;;  %1311 = vmatprep.subr.mxu0 %v8160_v3  ;;  %1140 = vmatmul.mubr.f32.gmra.mxu0 %v8396_v15  ;;  %v1220_v41 = vand.u32 4294901760, %v1219_v32  ;;  %v661_v5 = vpop.permute.xlu0 %660  ;;  %v13207_v59 = vmov 0  ;;  %vm13211_vm2 = vmmov %vm13210_vm9 }
  0xce   : > { %850 = vst [vmem:[#allocation3 + $0x208] sm:$0xf] %v844_v47  ;;  %v8436_v53 = vpop.permute.xlu1 %662  ;;  %1314 = vmatpush1.msra.mxu0 %v8220_v46  ;;  %1359 = vmatprep.mubr.f32.mxu0 %v13203_v56  ;;  %v13208_v59 = vsel %vm8440_vm7, 4294967295, %v13207_v59  ;;  %v671_v30 = vsel %vm13210_vm9, %v8141_v51, %v661_v5  ;;  %v13212_v51 = vmov 0  ;;  %vm13215_vm9 = vcmask 121856  }
  0xcf   : > { %v1226_v45 = vand.u32 4294901760, %v1225_v43  ;;  %13209 = vst [vmem:[#allocation13_spill] sm:$0xff] %v13208_v59  ;;  %v672_v47 = vsel %vm13211_vm2, %v661_v5, %v8436_v53  ;;  %1221 = vmatprep.subr.mxu1 %v1220_v41  ;;  %1317 = vmatprep.subr.mxu0 %v8302_v13  ;;  %v683_v32 = vsel %vm8370_vm0, %v671_v30, 0.0  ;;  %vm8460_vm2 = vmand %vm8440_vm7, %vm8314_vm15 }
  0xd0   : > { %v684_v25 = vsel %vm8376_vm5, %v672_v47, 0.0  ;;  %1320 = vmatpush1.msra.mxu0 %v8355_v33  ;;  %v695_v27 = vrot.slane %v683_v32, 4  ;;  %v13213_v51 = vsel %vm8460_vm2, 4294967295, %v13212_v51  ;;  %vm13216_vm15 = vmmov %vm13215_vm9 }
  0xd1   : > { %1227 = vmatpush1.msra.mxu1 %v1226_v45  ;;  %v696_v43 = vrot.slane %v684_v25, 4  ;;  %1323 = vmatprep.subr.mxu0 %v8389_v10  ;;  %13214 = vst [vmem:[#allocation14_spill] sm:$0xff] %v13213_v51  ;;  %v608_v5 = vpop.permute.xlu0 %607  ;;  %v8469_v45 = vadd.s32 640, %v8067_v6 }
  0xd2   : > { %1262 = vmatmul.mubr.f32.vlgmr.msra.gmra.mxu1 %v8249_v12  ;;  %1399 = vmatprep.subr.mxu1 %v8155_v1  ;;  %v8465_v41 = vpop.permute.xlu1 %609  ;;  %707 = vst [vmem:[#allocation3 + $0xf0] sm:$0xf0] %v695_v27  ;;  %v618_v30 = vsel %vm13215_vm9, %v8184_v26, %v608_v5  ;;  %v13217_v27 = vand.u32 4294901760, %v8174_v17  ;;  %v13218_v26 = vand.u32 4294901760, %v8177_v18  ;;  %v998_v60 = vld [vmem:[#allocation3 + $0x78] sm:$0xff] }
  0xd3   : > { %1326 = vmatpush1.msra.mxu0 %v8399_v34  ;;  %708 = vst [vmem:[#allocation3 + $0x278] sm:$0xf0] %v696_v43  ;;  %1401 = vmatpush1.msra.mxu1 %v8157_v2  ;;  %v619_v47 = vsel %vm13216_vm15, %v608_v5, %v8465_v41  ;;  %v630_v32 = vsel %vm8460_vm2, %v618_v30, 0.0  ;;  %v1010_v43 = vld [vmem:[#allocation3 + $0x158] sm:$0xf]  ;;  %v8488_v5 = vadd.s32 512, %v8067_v6 }
  0xd4   : > { %1362 = vmatmul.mubr.f32.vlgmr.msra.gmra.mxu0 %v8270_v57  ;;  %v631_v25 = vsel %vm8289_vm11, %v619_v47, 0.0  ;;  %1403 = vmatprep.subr.mxu1 %v8151_v62  ;;  %636 = vst [vmem:[#allocation3 + $0xf0] sm:$0xf] %v630_v32  ;;  %v372_v32 = vand.u32 255, %v8469_v45  ;;  %vm13220_vm15 = vcmask 130048   ;;  %vm13222_vm11 = vcmask 1043456  }
  0xd5   : > { %1494 = vmatprep.subr.mxu0 %v13217_v27  ;;  %637 = vst [vmem:[#allocation3 + $0x278] sm:$0xf] %v631_v25  ;;  %1405 = vmatpush1.msra.mxu1 %v8180_v20  ;;  %v531_v17 = vpop.permute.xlu0 %530  ;;  %v13219_v25 = vand.u32 4294901760, %v8168_v11  ;;  %vm13221_vm9 = vmmov %vm13220_vm15  ;;  %v1041_v27 = vsel %vm13222_vm11, %v1010_v43, 0  ;;  %v13224_v47 = vand.u32 4294901760, %v8203_v39  ;;  %v293_v39 = vand.u32 15, %v8488_v5 }
  0xd6   : > { %1498 = vmatpush1.msra.mxu0 %v13218_v26  ;;  %1267 = vmatprep.mubr.f32.mxu1 %v13203_v56  ;;  %v8492_v30 = vpop.permute.xlu1 %532  ;;  %v541_v6 = vsel %vm13220_vm15, %v8226_v50, %v531_v17  ;;  %vm13223_vm2 = vmmov %vm13222_vm11  ;;  %v13225_v50 = vmov 0  ;;  %vm8536_vm15 = vcmp.lt.s32.totalorder %v372_v32, 240  ;;  %v1003_v51 = vld [vmem:[#allocation3 + $0x320] sm:$0xff]  ;;  %v13239_v32 = vand.u32 4294901760, %v8302_v13 }
  0xd7   : > { %1407 = vmatprep.subr.mxu1 %v8145_v54  ;;  %1502 = vmatprep.subr.mxu0 %v13219_v25  ;;  %v542_v18 = vsel %vm13221_vm9, %v531_v17, %v8492_v30  ;;  %v1038_v26 = vsel %vm13223_vm2, %v1009_v9, 0  ;;  %v553_v11 = vsel %vm8440_vm7, %v541_v6, 0.0  ;;  %vm8516_vm11 = vmand %vm8440_vm7, %vm8370_vm0  ;;  %v13228_v9 = vand.u32 4294901760, %v8160_v3  ;;  %v1004_v3 = vld [vmem:[#allocation3 + $0x208] sm:$0xff] }
  0xd8   : > { %1269 = vmatmul.mubr.f32.gmra.mxu1 %v8272_v55  ;;  %1506 = vmatpush1.msra.mxu0 %v13224_v47  ;;  %v566_v25 = vrot.slane %v542_v18, 4  ;;  %v565_v48 = vrot.slane %v553_v11, 4  ;;  %v13226_v50 = vsel %vm8516_vm11, 4294967295, %v13225_v50  ;;  %v8526_v47 = vand.u32 4294901760, %v1041_v27 }
  0xd9   : > { %1409 = vmatpush1.msra.mxu1 %v8196_v37  ;;  %1367 = vmatprep.mubr.f32.mxu0 %v13203_v56  ;;  %13227 = vst [vmem:[#allocation15_spill] sm:$0xff] %v13226_v50  ;;  %v478_v17 = vpop.permute.xlu0 %477  ;;  %v8528_v6 = vand.u32 4294901760, %v1038_v26  ;;  %v13229_v18 = vand.u32 15, %v8469_v45  ;;  %v13230_v11 = vmov 0  ;;  %vm13237_vm9 = vcmask 138240  }
  0xda   : > { %1411 = vmatprep.subr.mxu1 %v8282_v58  ;;  %578 = vst [vmem:[#allocation3 + $0x2c0] sm:$0xf0] %v566_v25  ;;  %1510 = vmatprep.subr.mxu0 %v13228_v9  ;;  %v8524_v43 = vpop.permute.xlu1 %479  ;;  %v13233_v25 = vmov 0  ;;  %577 = vst [vmem:[#allocation3 + $0x310] sm:$0xf0] %v565_v48  ;;  %v13236_v9 = vand.u32 4294901760, %v8220_v46  ;;  %v488_v59 = vsel %vm13237_vm9, %v8285_v61, %v478_v17  ;;  %v8581_v36 = vsub.f32 %v1041_v27, %v8526_v47 }
  0xdb   : > { %1370 = vmatmul.mubr.f32.gmra.mxu0 %v8312_v40  ;;  %vm8532_vm2 = vcmp.ne.s32.totalorder %v13229_v18, 15  ;;  %v13234_v25 = vsel %vm8536_vm15, 4294967295, %v13233_v25  ;;  %1413 = vmatpush1.msra.mxu1 %v8345_v8  ;;  %vm13238_vm7 = vmmov %vm13237_vm9  ;;  %v500_v48 = vsel %vm8516_vm11, %v488_v59, 0.0  ;;  %v13240_v61 = vmov 0 }
  0xdc   : > { %v13231_v11 = vsel %vm8532_vm2, 4294967295, %v13230_v11  ;;  %13235 = vst [vmem:[#allocation17_spill] sm:$0xff] %v13234_v25  ;;  %1514 = vmatpush1.msra.mxu0 %v13236_v9  ;;  %v489_v18 = vsel %vm13238_vm7, %v478_v17, %v8524_v43  ;;  %1415 = vmatprep.subr.mxu1 %v8363_v28  ;;  %v992_v9 = vld [vmem:[#allocation3 + $0x278] sm:$0xff]  ;;  %506 = vst [vmem:[#allocation3 + $0x310] sm:$0xf] %v500_v48  ;;  %vm8556_vm7 = vcmp.ne.s32.totalorder %v293_v39, 15 }
  0xdd   : > { %13232 = vst [vmem:[#allocation16_spill] sm:$0xff] %v13231_v11  ;;  %1518 = vmatprep.subr.mxu0 %v13239_v32  ;;  %v501_v46 = vsel %vm8376_vm5, %v489_v18, 0.0  ;;  %1417 = vmatpush1.msra.mxu1 %v8365_v44  ;;  %v13241_v61 = vsel %vm8556_vm7, 4294967295, %v13240_v61  ;;  %vm8564_vm9 = vmand %vm8536_vm15, %vm8532_vm2  ;;  %v13243_v13 = vmov 0  ;;  %v8568_v59 = vand.u32 4294901760, %v1004_v3  ;;  %v997_v17 = vld [vmem:[#allocation3 + $0x1f8] sm:$0xff] }
  0xde   : > { %1450 = vmatprep.mubr.f32.mxu1 %v13203_v56  ;;  %507 = vst [vmem:[#allocation3 + $0x2c0] sm:$0xf] %v501_v46  ;;  %13242 = vst [vmem:[#allocation18_spill] sm:$0xff] %v13241_v61  ;;  %v13244_v13 = vsel %vm8564_vm9, 4294967295, %v13243_v13  ;;  %v13246_v18 = vand.u32 4294901760, %v8355_v33  ;;  %v957_v32 = vpop.permute.xlu1 %956  ;;  %v8574_v48 = vsub.f32 %v1038_v26, %v8528_v6  ;;  %v955_v46 = vpop.permute.xlu0 %954  ;;  %v8576_v50 = vand.u32 4294901760, %v1003_v51  ;;  %1601 = vmatprep.subr.mxu1 %v8155_v1 }
  0xdf   : > { %13245 = vst [vmem:[#allocation19_spill] sm:$0xff] %v13244_v13  ;;  %1454 = vmatmul.mubr.f32.vlgmr.msra.gmra.mxu1 %v8309_v35  ;;  %v8578_v24 = vand.u32 4294901760, %v998_v60  ;;  %vm13248_vm11 = vcmask 908288   ;;  %v8589_v26 = vand.u32 4294901760, %v992_v9  ;;  %1563 = vmatprep.mubr.f32.mxu0 %v13203_v56  ;;  %v8598_v10 = vand.u32 4294901760, %v997_v17  ;;  %v991_v1 = vld [vmem:[#allocation3 + $0xf0] sm:$0xff] }
  0xe0   : > { %1522 = vmatpush1.msra.mxu0 %v13246_v18  ;;  %v963_v33 = vsel %vm13248_vm11, %v8327_v49, %v955_v46  ;;  %vm13249_vm5 = vmmov %vm13248_vm11  ;;  %1603 = vmatpush1.msra.mxu1 %v8157_v2  ;;  %v8603_v49 = vsub.f32 %v1004_v3, %v8568_v59  ;;  %v13254_v34 = vand.u32 15, %v8469_v45  ;;  %v8618_v2 = vsub.f32 %v1003_v51, %v8576_v50 }
  0xe1   : > { %1526 = vmatprep.subr.mxu0 %v13247_v52  ;;  %v964_v18 = vsel %vm13249_vm5, %v955_v46, %v957_v32  ;;  %v975_v27 = vsel %vm8556_vm7, %v963_v33, 0.0  ;;  %vm8605_vm5 = vcmp.ne.s32.totalorder %v293_v39, 0  ;;  %v13255_v32 = vmov 0  ;;  %1605 = vmatprep.subr.mxu1 %v8151_v62 }
  0xe2   : > { %1530 = vmatpush1.msra.mxu0 %v13250_v0  ;;  %v976_v52 = vsel %vm8564_vm9, %v964_v18, 0.0  ;;  %981 = vst [vmem:[#allocation3 + $0x2d0] sm:$0xf] %v975_v27  ;;  %v13251_v0 = vmov 0  ;;  %vm8611_vm11 = vcmp.ne.s32.totalorder %v13254_v34, 0  ;;  %v880_v46 = vpop.permute.xlu1 %879  ;;  %v878_v3 = vpop.permute.xlu0 %877  ;;  %v8623_v18 = vsub.f32 %v998_v60, %v8578_v24  ;;  %1459 = vmatprep.mubr.f32.mxu1 %v13203_v56 }
  0xe3   : > { %1565 = vmatmul.mubr.f32.vlgmr.msra.gmra.mxu0 %v8249_v12  ;;  %982 = vst [vmem:[#allocation3 + $0x198] sm:$0xf] %v976_v52  ;;  %v13252_v0 = vsel %vm8605_vm5, 4294967295, %v13251_v0  ;;  %v13256_v32 = vsel %vm8611_vm11, 4294967295, %v13255_v32  ;;  %1690 = vmatprep.subr.mxu0 %v8526_v47  ;;  %vm13258_vm9 = vcmask 916480   ;;  %v8630_v51 = vand.u32 4294901760, %v991_v1 }
  0xe4   : > { %13253 = vst [vmem:[#allocation20_spill] sm:$0xff] %v13252_v0  ;;  %13257 = vst [vmem:[#allocation21_spill] sm:$0xff] %v13256_v32  ;;  %1607 = vmatpush1.msra.mxu1 %v8180_v20  ;;  %v886_v62 = vsel %vm13258_vm9, %v8347_v63, %v878_v3  ;;  %v8633_v27 = vsub.f32 %v992_v9, %v8589_v26  ;;  %1692 = vmatpush1.msra.mxu0 %v8528_v6  ;;  %v985_v63 = vld [vmem:[#allocation3 + $0x310] sm:$0xff]  ;;  %v12694_v13 = vand.u32 4294901760, %v8618_v2 }
  0xe5   : > { %vm13259_vm0 = vmmov %vm13258_vm9  ;;  %1463 = vmatmul.mubr.f32.gmra.mxu1 %v8343_v4  ;;  %v8638_v60 = vsub.f32 %v997_v17, %v8598_v10  ;;  %v910_v52 = vrot.slane %v886_v62, 4  ;;  %v986_v34 = vld [vmem:[#allocation3 + $0x2c0] sm:$0xff]  ;;  %1609 = vmatprep.subr.mxu1 %v8145_v54  ;;  %v8648_v39 = vand.u32 4294901760, %v985_v63  ;;  %v13260_v17 = vand.u32 4294901760, %v8581_v36 }
  0xe6   : > { %v887_v45 = vsel %vm13259_vm0, %v878_v3, %v880_v46  ;;  %1694 = vmatprep.subr.mxu0 %v8568_v59  ;;  %v8645_v3 = vand.u32 4294901760, %v986_v34  ;;  %1570 = vmatprep.mubr.f32.mxu0 %v13203_v56  ;;  %v13261_v54 = vand.u32 4294901760, %v8574_v48  ;;  %v748_v46 = vpop.permute.xlu0 %747  ;;  %vm13262_vm0 = vcmask 1039360  }
  0xe7   : > { %v899_v20 = vsel %vm8536_vm15, %v887_v45, 0.0  ;;  %1611 = vmatpush1.msra.mxu1 %v8196_v37  ;;  %922 = vst [vmem:[#allocation3 + $0x90] sm:$0xf0] %v910_v52  ;;  %v1789_v62 = vsub.f32 %v8581_v36, %v13260_v17  ;;  %v750_v45 = vpop.permute.xlu1 %749  ;;  %1696 = vmatpush1.msra.mxu0 %v8576_v50  ;;  %v8663_v37 = vsub.f32 %v991_v1, %v8630_v51  ;;  %vm13263_vm9 = vmmov %vm13262_vm0 }
  0xe8   : > { %v911_v9 = vrot.slane %v899_v20, 4  ;;  %v1795_v20 = vsub.f32 %v8574_v48, %v13261_v54  ;;  %1613 = vmatprep.subr.mxu1 %v8282_v58  ;;  %v756_v52 = vsel %vm13262_vm0, %v8368_v19, %v748_v46  ;;  %v757_v17 = vsel %vm13263_vm9, %v748_v46, %v750_v45  ;;  %1572 = vmatmul.mubr.f32.gmra.mxu0 %v8272_v55  ;;  %vm8691_vm0 = vmand %vm8536_vm15, %vm8611_vm11 }
  0xe9   : > { %1698 = vmatprep.subr.mxu0 %v8578_v24  ;;  %v768_v33 = vsel %vm8556_vm7, %v756_v52, 0.0  ;;  %v769_v58 = vsel %vm8532_vm2, %v757_v17, 0.0  ;;  %v8676_v1 = vsub.f32 %v985_v63, %v8648_v39  ;;  %1615 = vmatpush1.msra.mxu1 %v8345_v8  ;;  %v13264_v45 = vand.u32 4294901760, %v8603_v49 }
  0xea   : > { %923 = vst [vmem:[#allocation3 + $0x248] sm:$0xf0] %v911_v9  ;;  %v8679_v9 = vsub.f32 %v986_v34, %v8645_v3  ;;  %1700 = vmatpush1.msra.mxu0 %v8598_v10  ;;  %v780_v19 = vrot.slane %v768_v33, 4  ;;  %v781_v46 = vrot.slane %v769_v58, 4  ;;  %v13265_v63 = vmov 0  ;;  %1617 = vmatprep.subr.mxu1 %v8363_v28  ;;  %v825_v58 = vpop.permute.xlu0 %824 }
  0xeb   : > { %v1801_v54 = vsub.f32 %v8603_v49, %v13264_v45  ;;  %v13266_v63 = vsel %vm8691_vm0, 4294967295, %v13265_v63  ;;  %1702 = vmatprep.subr.mxu0 %v8589_v26  ;;  %v1790_v8 = vand.u32 4294901760, %v1789_v62  ;;  %v1796_v33 = vand.u32 4294901760, %v1795_v20  ;;  %v827_v17 = vpop.permute.xlu1 %826  ;;  %1619 = vmatpush1.msra.mxu1 %v8365_v44 }
  0xec   : > { %13267 = vst [vmem:[#allocation22_spill] sm:$0xff] %v13266_v63  ;;  %v1807_v34 = vsub.f32 %v8618_v2, %v12694_v13  ;;  %1652 = vmatprep.mubr.f32.mxu1 %v13203_v56  ;;  %792 = vst [vmem:[#allocation3 + $0x338] sm:$0xf0] %v780_v19  ;;  %v13268_v28 = vand.u32 4294901760, %v8623_v18  ;;  %vm13269_vm9 = vcmask 924672   ;;  %1704 = vmatpush1.msra.mxu0 %v8630_v51 }
  0xed   : > { %793 = vst [vmem:[#allocation3 + $0xd0] sm:$0xf0] %v781_v46  ;;  %v833_v62 = vsel %vm13269_vm9, %v8412_v7, %v825_v58  ;;  %vm13270_vm15 = vmmov %vm13269_vm9  ;;  %1654 = vmatmul.mubr.f32.vlgmr.msra.gmra.mxu1 %v8249_v12  ;;  %v13271_v46 = vand.u32 4294901760, %v8633_v27  ;;  %1791 = vmatprep.subr.mxu1 %v1790_v8  ;;  %v13274_v8 = vand.u32 255, %v8488_v5  ;;  %vm13279_vm9 = vcmask 7168  }
  0xee   : > { %v1813_v52 = vsub.f32 %v8623_v18, %v13268_v28  ;;  %v834_v20 = vsel %vm13270_vm15, %v825_v58, %v827_v17  ;;  %v845_v44 = vsel %vm8605_vm5, %v833_v62, 0.0  ;;  %1706 = vmatprep.subr.mxu0 %v8645_v3  ;;  %v1802_v17 = vand.u32 4294901760, %v1801_v54  ;;  %1797 = vmatpush1.msra.mxu1 %v1796_v33  ;;  %v665_v45 = vpop.permute.xlu0 %664 }
  0xef   : > { %v846_v19 = vsel %vm8691_vm0, %v834_v20, 0.0  ;;  %v1825_v28 = vsub.f32 %v8633_v27, %v13271_v46  ;;  %v13272_v58 = vand.u32 4294901760, %v8638_v60  ;;  %851 = vst [vmem:[#allocation3 + $0x90] sm:$0xf] %v845_v44  ;;  %1659 = vmatprep.mubr.f32.mxu1 %v13203_v56  ;;  %v1808_v62 = vand.u32 4294901760, %v1807_v34  ;;  %v667_v20 = vpop.permute.xlu1 %666  ;;  %1708 = vmatpush1.msra.mxu0 %v8648_v39  ;;  %vm13280_vm0 = vmmov %vm13279_vm9 }
  0xf0   : > { %852 = vst [vmem:[#allocation3 + $0x248] sm:$0xf] %v846_v19  ;;  %v13273_v46 = vand.u32 4294901760, %v8679_v9  ;;  %vm8730_vm15 = vcmp.ge.s32.totalorder %v13274_v8, 16  ;;  %v13275_v54 = vmov 0  ;;  %1803 = vmatprep.subr.mxu1 %v1802_v17  ;;  %v1814_v44 = vand.u32 4294901760, %v1813_v52  ;;  %1741 = vmatprep.mubr.f32.mxu0 %v13203_v56 }
  0xf1   : > { %v1819_v13 = vsub.f32 %v8638_v60, %v13272_v58  ;;  %v13276_v54 = vsel %vm8730_vm15, 4294967295, %v13275_v54  ;;  %v13278_v33 = vand.u32 4294901760, %v8663_v37  ;;  %v673_v19 = vsel %vm13279_vm9, %v8436_v53, %v665_v45  ;;  %1809 = vmatpush1.msra.mxu1 %v1808_v62  ;;  %1747 = vmatmul.mubr.f32.vlgmr.msra.gmra.mxu0 %v8359_v22 }
  0xf2   : > { %v1837_v7 = vsub.f32 %v8679_v9, %v13273_v46  ;;  %13277 = vst [vmem:[#allocation23_spill] sm:$0xff] %v13276_v54  ;;  %v674_v58 = vsel %vm13280_vm0, %v665_v45, %v667_v20  ;;  %v1826_v5 = vand.u32 4294901760, %v1825_v28  ;;  %v685_v46 = vsel %vm8605_vm5, %v673_v19, 0.0  ;;  %1661 = vmatmul.mubr.f32.gmra.mxu1 %v8272_v55  ;;  %vm8755_vm0 = vmand %vm8730_vm15, %vm8556_vm7  ;;  %1815 = vmatprep.subr.mxu1 %v1814_v44  ;;  %v612_v19 = vpop.permute.xlu0 %611 }
  0xf3   : > { %v1831_v34 = vsub.f32 %v8663_v37, %v13278_v33  ;;  %v686_v17 = vsel %vm8611_vm11, %v674_v58, 0.0  ;;  %v13281_v52 = vand.u32 4294901760, %v8676_v1  ;;  %v1820_v53 = vand.u32 4294901760, %v1819_v13  ;;  %1917 = vmatprep.subr.mxu0 %v8581_v36  ;;  %v614_v33 = vpop.permute.xlu1 %613  ;;  %1752 = vmatprep.mubr.f32.mxu0 %v13203_v56 }
  0xf4   : > { %v697_v45 = vrot.slane %v685_v46, 4  ;;  %v698_v20 = vrot.slane %v686_v17, 4  ;;  %v13282_v28 = vmov 0  ;;  %v1838_v62 = vand.u32 4294901760, %v1837_v7  ;;  %1920 = vmatpush1.msra.mxu0 %v8574_v48  ;;  %1878 = vmatprep.mubr.f32.mxu1 %v13203_v56 }
  0xf5   : > { %v1843_v8 = vsub.f32 %v8676_v1, %v13281_v52  ;;  %v13283_v28 = vsel %vm8755_vm0, 4294967295, %v13282_v28  ;;  %1821 = vmatpush1.msra.mxu1 %v1820_v53  ;;  %v1832_v13 = vand.u32 4294901760, %v1831_v34  ;;  %vm13285_vm9 = vcmask 121856   ;;  %1923 = vmatprep.subr.mxu0 %v8603_v49 }
  0xf6   : > { %13284 = vst [vmem:[#allocation24_spill] sm:$0xff] %v13283_v28  ;;  %709 = vst [vmem:[#allocation3 + $0x210] sm:$0xf0] %v697_v45  ;;  %v620_v58 = vsel %vm13285_vm9, %v8465_v41, %v612_v19  ;;  %1827 = vmatprep.subr.mxu1 %v1826_v5  ;;  %1926 = vmatpush1.msra.mxu0 %v8618_v2  ;;  %v535_v34 = vpop.permute.xlu0 %534 }
  0xf7   : > { %710 = vst [vmem:[#allocation3 + $0x2e8] sm:$0xf0] %v698_v20  ;;  %vm13286_vm13 = vmmov %vm13285_vm9  ;;  %v1844_v44 = vand.u32 4294901760, %v1843_v8  ;;  %v632_v7 = vsel %vm8755_vm0, %v620_v58, 0.0  ;;  %1833 = vmatpush1.msra.mxu1 %v1832_v13  ;;  %v537_v41 = vpop.permute.xlu1 %536  ;;  %1758 = vmatmul.mubr.f32.gmra.mxu0 %v8396_v15 }
  0xf8   : > { %v621_v46 = vsel %vm13286_vm13, %v612_v19, %v614_v33  ;;  %638 = vst [vmem:[#allocation3 + $0x210] sm:$0xf] %v632_v7  ;;  %1839 = vmatprep.subr.mxu1 %v1838_v62  ;;  %1929 = vmatprep.subr.mxu0 %v8623_v18  ;;  %vm13287_vm13 = vcmask 130048  }
  0xf9   : > { %v633_v17 = vsel %vm8532_vm2, %v621_v46, 0.0  ;;  %v543_v5 = vsel %vm13287_vm13, %v8492_v30, %v535_v34  ;;  %vm13288_vm9 = vmmov %vm13287_vm13  ;;  %1932 = vmatpush1.msra.mxu0 %v8638_v60  ;;  %1845 = vmatpush1.msra.mxu1 %v1844_v44  ;;  %v13289_v30 = vmov 0  ;;  %vm13292_vm13 = vcmask 138240   ;;  %v1012_v46 = vld [vmem:[#allocation3 + $0x198] sm:$0xf] }
  0xfa   : > { %639 = vst [vmem:[#allocation3 + $0x2e8] sm:$0xf] %v633_v17  ;;  %v544_v52 = vsel %vm13288_vm9, %v535_v34, %v537_v41  ;;  %v555_v8 = vsel %vm8730_vm15, %v543_v5, 0.0  ;;  %1935 = vmatprep.subr.mxu0 %v8633_v27  ;;  %vm8785_vm2 = vmand %vm8730_vm15, %vm8605_vm5  ;;  %1880 = vmatmul.mubr.f32.vlgmr.msra.gmra.mxu1 %v8249_v12  ;;  %v482_v62 = vpop.permute.xlu0 %481  ;;  %v13295_v44 = vand.u32 4294901760, %v8574_v48  ;;  %v1011_v17 = vld [vmem:[#allocation3 + $0x2d0] sm:$0xf] }
  0xfb   : > { %v568_v53 = vrot.slane %v544_v52, 4  ;;  %v567_v45 = vrot.slane %v555_v8, 4  ;;  %v13290_v30 = vsel %vm8785_vm2, 4294967295, %v13289_v30  ;;  %1938 = vmatpush1.msra.mxu0 %v8663_v37  ;;  %v484_v20 = vpop.permute.xlu1 %483  ;;  %2017 = vmatprep.subr.mxu1 %v8526_v47  ;;  %v490_v33 = vsel %vm13292_vm13, %v8524_v43, %v482_v62  ;;  %vm13293_vm9 = vmmov %vm13292_vm13 }
  0xfc   : > { %13291 = vst [vmem:[#allocation25_spill] sm:$0xff] %v13290_v30  ;;  %1941 = vmatprep.subr.mxu0 %v8679_v9  ;;  %v491_v19 = vsel %vm13293_vm9, %v482_v62, %v484_v20  ;;  %1977 = vmatprep.mubr.f32.mxu0 %v13203_v56  ;;  %v502_v13 = vsel %vm8785_vm2, %v490_v33, 0.0  ;;  %v13294_v43 = vand.u32 4294901760, %v8581_v36  ;;  %vm13296_vm13 = vcmask 1043456   ;;  %v1006_v36 = vld [vmem:[#allocation3 + $0x248] sm:$0xff] }
  0xfd   : > { %580 = vst [vmem:[#allocation3 + $0x8] sm:$0xf0] %v568_v53  ;;  %579 = vst [vmem:[#allocation3 + $0x2c8] sm:$0xf0] %v567_v45  ;;  %1944 = vmatpush1.msra.mxu0 %v8676_v1  ;;  %v503_v58 = vsel %vm8611_vm11, %v491_v19, 0.0  ;;  %2019 = vmatpush1.msra.mxu1 %v8528_v6  ;;  %v1047_v7 = vsel %vm13296_vm13, %v1012_v46, 0 }
  0xfe   : > { %1980 = vmatmul.mubr.f32.vlgmr.msra.gmra.mxu0 %v8270_v57  ;;  %508 = vst [vmem:[#allocation3 + $0x2c8] sm:$0xf] %v502_v13  ;;  %509 = vst [vmem:[#allocation3 + $0x8] sm:$0xf] %v503_v58  ;;  %2021 = vmatprep.subr.mxu1 %v8568_v59  ;;  %v13297_v41 = vand.u32 4294901760, %v8603_v49  ;;  %v13298_v34 = vand.u32 4294901760, %v8618_v2 }
  0xff   : > { %2112 = vmatprep.subr.mxu0 %v13294_v43  ;;  %1885 = vmatprep.mubr.f32.mxu1 %v13203_v56  ;;  %v8821_v48 = vand.u32 4294901760, %v1047_v7  ;;  %vm13299_vm9 = vmmov %vm13296_vm13  ;;  %v13300_v52 = vand.u32 4294901760, %v8623_v18  ;;  %v13301_v49 = vand.u32 4294901760, %v8638_v60  ;;  %v8830_v8 = vand.u32 4294901760, %v1006_v36  ;;  %v1005_v2 = vld [vmem:[#allocation3 + $0x90] sm:$0xff] }
 0x100   : > { %2023 = vmatpush1.msra.mxu1 %v8576_v50  ;;  %2116 = vmatpush1.msra.mxu0 %v13295_v44  ;;  %v1044_v5 = vsel %vm13299_vm9, %v1011_v17, 0  ;;  %v1000_v53 = vld [vmem:[#allocation3 + $0xd0] sm:$0xff]  ;;  %v13302_v45 = vand.u32 4294901760, %v8633_v27  ;;  %v13303_v60 = vand.u32 4294901760, %v8663_v37  ;;  %v8845_v33 = vand.u32 4294901760, %v1005_v2  ;;  %v999_v27 = vld [vmem:[#allocation3 + $0x338] sm:$0xff] }
 0x101   : > { %1887 = vmatmul.mubr.f32.gmra.mxu1 %v8272_v55  ;;  %2025 = vmatprep.subr.mxu1 %v8578_v24  ;;  %v8835_v20 = vand.u32 4294901760, %v1044_v5  ;;  %v994_v18 = vld [vmem:[#allocation3 + $0x2e8] sm:$0xff]  ;;  %v8840_v62 = vsub.f32 %v1047_v7, %v8821_v48  ;;  %v8847_v19 = vand.u32 4294901760, %v1000_v53  ;;  %v13304_v13 = vand.u32 4294901760, %v8679_v9  ;;  %v993_v7 = vld [vmem:[#allocation3 + $0x210] sm:$0xff] }
 0x102   : > { %2120 = vmatprep.subr.mxu0 %v13297_v41  ;;  %1985 = vmatprep.mubr.f32.mxu0 %v13203_v56  ;;  %v8853_v46 = vsub.f32 %v1006_v36, %v8830_v8  ;;  %v13305_v43 = vand.u32 4294901760, %v8676_v1  ;;  %v8861_v44 = vand.u32 4294901760, %v994_v18  ;;  %v8871_v1 = vsub.f32 %v1005_v2, %v8845_v33 }
 0x103   : > { %2027 = vmatpush1.msra.mxu1 %v8598_v10  ;;  %2124 = vmatpush1.msra.mxu0 %v13298_v34  ;;  %v8859_v37 = vsub.f32 %v1044_v5, %v8835_v20  ;;  %v2406_v9 = vand.u32 4294901760, %v8840_v62  ;;  %v8876_v36 = vsub.f32 %v1000_v53, %v8847_v19  ;;  %vm13309_vm13 = vcmask 130048  }
 0x104   : > { %2029 = vmatprep.subr.mxu1 %v8589_v26  ;;  %1988 = vmatmul.mubr.f32.gmra.mxu0 %v8312_v40  ;;  %v2418_v34 = vand.u32 4294901760, %v8853_v46  ;;  %v12702_v2 = vand.u32 4294901760, %v8871_v1  ;;  %vm13314_vm9 = vcmask 916480  }
 0x105   : > { %2128 = vmatprep.subr.mxu0 %v13300_v52  ;;  %2031 = vmatpush1.msra.mxu1 %v8630_v51  ;;  %v988_v58 = vld [vmem:[#allocation3 + $0x8] sm:$0xff]  ;;  %v8889_v52 = vsub.f32 %v994_v18, %v8861_v44  ;;  %v12701_v53 = vand.u32 4294901760, %v8876_v36 }
 0x106   : > { %2132 = vmatpush1.msra.mxu0 %v13301_v49  ;;  %2033 = vmatprep.subr.mxu1 %v8645_v3  ;;  %v987_v17 = vld [vmem:[#allocation3 + $0x2c8] sm:$0xff]  ;;  %v8873_v41 = vand.u32 4294901760, %v988_v58  ;;  %v2407_v49 = vsub.f32 %v8840_v62, %v2406_v9  ;;  %v2419_v18 = vsub.f32 %v8853_v46, %v2418_v34 }
 0x107   : > { %2136 = vmatprep.subr.mxu0 %v13302_v45  ;;  %2035 = vmatpush1.msra.mxu1 %v8648_v39  ;;  %v8886_v5 = vand.u32 4294901760, %v987_v17 }
 0x108   : > { %2068 = vmatprep.mubr.f32.mxu1 %v13203_v56  ;;  %2140 = vmatpush1.msra.mxu0 %v13303_v60  ;;  %v8904_v45 = vsub.f32 %v988_v58, %v8873_v41  ;;  %v2425_v58 = vsub.f32 %v8871_v1, %v12702_v2 }
 0x109   : > { %2072 = vmatmul.mubr.f32.vlgmr.msra.gmra.mxu1 %v8309_v35  ;;  %2144 = vmatprep.subr.mxu0 %v13304_v13  ;;  %v8920_v60 = vsub.f32 %v987_v17, %v8886_v5 }
 0x10a   : > { %2219 = vmatprep.subr.mxu1 %v8526_v47  ;;  %2148 = vmatpush1.msra.mxu0 %v13305_v43  ;;  %v8865_v47 = vand.u32 4294901760, %v999_v27  ;;  %v2431_v43 = vsub.f32 %v8876_v36, %v12701_v53 }
 0x10b   : > { %2181 = vmatprep.mubr.f32.mxu0 %v13203_v56  ;;  %2221 = vmatpush1.msra.mxu1 %v8528_v6  ;;  %v8880_v6 = vand.u32 4294901760, %v993_v7  ;;  %v2460_v53 = vand.u32 4294901760, %v8920_v60 }
 0x10c   : > { %2183 = vmatmul.mubr.f32.vlgmr.msra.gmra.mxu0 %v8249_v12  ;;  %2223 = vmatprep.subr.mxu1 %v8568_v59  ;;  %v2412_v59 = vand.u32 4294901760, %v8859_v37  ;;  %v2432_v2 = vand.u32 4294901760, %v2431_v43 }
 0x10d   : > { %2308 = vmatprep.subr.mxu0 %v8821_v48  ;;  %2077 = vmatprep.mubr.f32.mxu1 %v13203_v56 }
 0x10e   : > { %2225 = vmatpush1.msra.mxu1 %v8576_v50  ;;  %2310 = vmatpush1.msra.mxu0 %v8835_v20  ;;  %v8894_v50 = vsub.f32 %v999_v27, %v8865_v47  ;;  %v2408_v27 = vand.u32 4294901760, %v2407_v49 }
 0x10f   : > { %2081 = vmatmul.mubr.f32.gmra.mxu1 %v8343_v4  ;;  %2227 = vmatprep.subr.mxu1 %v8578_v24  ;;  %v8909_v24 = vsub.f32 %v993_v7, %v8880_v6  ;;  %v2454_v7 = vand.u32 4294901760, %v8904_v45 }
 0x110   : > { %2312 = vmatprep.subr.mxu0 %v8830_v8  ;;  %2188 = vmatprep.mubr.f32.mxu0 %v13203_v56  ;;  %v2436_v13 = vand.u32 4294901760, %v8894_v50 }
 0x111   : > { %2229 = vmatpush1.msra.mxu1 %v8598_v10  ;;  %2314 = vmatpush1.msra.mxu0 %v8845_v33  ;;  %v2413_v10 = vsub.f32 %v8859_v37, %v2412_v59  ;;  %v2448_v17 = vand.u32 4294901760, %v8909_v24 }
 0x112   : > { %2231 = vmatprep.subr.mxu1 %v8589_v26  ;;  %2190 = vmatmul.mubr.f32.gmra.mxu0 %v8272_v55  ;;  %v12703_v26 = vand.u32 4294901760, %v8889_v52 }
 0x113   : > { %2316 = vmatprep.subr.mxu0 %v8847_v19  ;;  %2233 = vmatpush1.msra.mxu1 %v8630_v51  ;;  %v2420_v51 = vand.u32 4294901760, %v2419_v18  ;;  %v2426_v18 = vand.u32 4294901760, %v2425_v58  ;;  %v2461_v58 = vsub.f32 %v8920_v60, %v2460_v53 }
 0x114   : > { %2318 = vmatpush1.msra.mxu0 %v8865_v47  ;;  %2235 = vmatprep.subr.mxu1 %v8645_v3  ;;  %v2414_v3 = vand.u32 4294901760, %v2413_v10  ;;  %v2443_v49 = vsub.f32 %v8889_v52, %v12703_v26  ;;  %v2455_v10 = vsub.f32 %v8904_v45, %v2454_v7 }
 0x115   : > { %2320 = vmatprep.subr.mxu0 %v8861_v44  ;;  %2237 = vmatpush1.msra.mxu1 %v8648_v39  ;;  %v2437_v39 = vsub.f32 %v8894_v50, %v2436_v13 }
 0x116   : > { %2270 = vmatprep.mubr.f32.mxu1 %v13203_v56  ;;  %2322 = vmatpush1.msra.mxu0 %v8880_v6  ;;  %v2444_v26 = vand.u32 4294901760, %v2443_v49  ;;  %v2462_v49 = vand.u32 4294901760, %v2461_v58 }
 0x117   : > { %2272 = vmatmul.mubr.f32.vlgmr.msra.gmra.mxu1 %v8249_v12  ;;  %2409 = vmatprep.subr.mxu1 %v2408_v27  ;;  %v2449_v27 = vsub.f32 %v8909_v24, %v2448_v17  ;;  %v2438_v43 = vand.u32 4294901760, %v2437_v39 }
 0x118   : > { %2324 = vmatprep.subr.mxu0 %v8873_v41  ;;  %2415 = vmatpush1.msra.mxu1 %v2414_v3 }
 0x119   : > { %2277 = vmatprep.mubr.f32.mxu1 %v13203_v56  ;;  %2421 = vmatprep.subr.mxu1 %v2420_v51  ;;  %v2456_v51 = vand.u32 4294901760, %v2455_v10  ;;  %v2450_v3 = vand.u32 4294901760, %v2449_v27 }
 0x11a   : > { %2326 = vmatpush1.msra.mxu0 %v8886_v5  ;;  %2359 = vmatprep.mubr.f32.mxu0 %v13203_v56 }
 0x11b   : > { %2427 = vmatpush1.msra.mxu1 %v2426_v18  ;;  %2365 = vmatmul.mubr.f32.vlgmr.msra.gmra.mxu0 %v8359_v22  ;;  %v13306_v22 = vand.u32 4294901760, %v8871_v1 }
 0x11c   : > { %2279 = vmatmul.mubr.f32.gmra.mxu1 %v8272_v55  ;;  %2433 = vmatprep.subr.mxu1 %v2432_v2 }
 0x11d   : > { %2535 = vmatprep.subr.mxu0 %v8840_v62  ;;  %2439 = vmatpush1.msra.mxu1 %v2438_v43 }
 0x11e   : > { %2538 = vmatpush1.msra.mxu0 %v8859_v37  ;;  %2445 = vmatprep.subr.mxu1 %v2444_v26 }
 0x11f   : > { %2541 = vmatprep.subr.mxu0 %v8853_v46  ;;  %2370 = vmatprep.mubr.f32.mxu0 %v13203_v56  ;;  %v9048_v46 = vpop.permute.xlu1 %1015 }
 0x120   : > { %2451 = vmatpush1.msra.mxu1 %v2450_v3  ;;  %2544 = vmatpush1.msra.mxu0 %v8871_v1 }
 0x121   : > { %2457 = vmatprep.subr.mxu1 %v2456_v51  ;;  %2376 = vmatmul.mubr.f32.gmra.mxu0 %v8396_v15  ;;  %v13308_v15 = vand.u32 4294901760, %v8889_v52 }
 0x122   : > { %2547 = vmatprep.subr.mxu0 %v8876_v36  ;;  %2463 = vmatpush1.msra.mxu1 %v2462_v49 }
 0x123   : > { %2550 = vmatpush1.msra.mxu0 %v8894_v50  ;;  %2496 = vmatprep.mubr.f32.mxu1 %v13203_v56 }
 0x124   : > { %2553 = vmatprep.subr.mxu0 %v8889_v52  ;;  %2498 = vmatmul.mubr.f32.vlgmr.msra.gmra.mxu1 %v8249_v12 }
 0x125   : > { %2556 = vmatpush1.msra.mxu0 %v8909_v24  ;;  %2635 = vmatprep.subr.mxu1 %v8821_v48 }
 0x126   : > { %2559 = vmatprep.subr.mxu0 %v8904_v45  ;;  %2595 = vmatprep.mubr.f32.mxu0 %v13203_v56 }
 0x127   : > { %2562 = vmatpush1.msra.mxu0 %v8920_v60  ;;  %2637 = vmatpush1.msra.mxu1 %v8835_v20  ;;  %v9052_v1 = vpop.permute.xlu0 %1020 }
 0x128   : > { %2598 = vmatmul.mubr.f32.vlgmr.msra.gmra.mxu0 %v8270_v57  ;;  %2639 = vmatprep.subr.mxu1 %v8830_v8  ;;  %v13307_v57 = vand.u32 4294901760, %v8876_v36 }
 0x129   : > { %2730 = vmatprep.subr.mxu0 %v2406_v9  ;;  %2503 = vmatprep.mubr.f32.mxu1 %v13203_v56 }
 0x12a   : > { %2641 = vmatpush1.msra.mxu1 %v8845_v33  ;;  %2734 = vmatpush1.msra.mxu0 %v2412_v59 }
 0x12b   : > { %2505 = vmatmul.mubr.f32.gmra.mxu1 %v8272_v55  ;;  %2643 = vmatprep.subr.mxu1 %v8847_v19 }
 0x12c   : > { %2738 = vmatprep.subr.mxu0 %v2418_v34  ;;  %2603 = vmatprep.mubr.f32.mxu0 %v13203_v56 }
 0x12d   : > { %2645 = vmatpush1.msra.mxu1 %v8865_v47  ;;  %2742 = vmatpush1.msra.mxu0 %v13306_v22 }
 0x12e   : > { %2647 = vmatprep.subr.mxu1 %v8861_v44  ;;  %2606 = vmatmul.mubr.f32.gmra.mxu0 %v8312_v40  ;;  %v9028_v40 = vld [vmem:[#allocation2 + $0x10] sm:$0xff] }
 0x12f   : > { %2746 = vmatprep.subr.mxu0 %v13307_v57  ;;  %2649 = vmatpush1.msra.mxu1 %v8880_v6 }
 0x130   : > { %2750 = vmatpush1.msra.mxu0 %v2436_v13  ;;  %2651 = vmatprep.subr.mxu1 %v8873_v41 }
 0x131   : > { %2754 = vmatprep.subr.mxu0 %v13308_v15  ;;  %2653 = vmatpush1.msra.mxu1 %v8886_v5 }
 0x132   : > { %2686 = vmatprep.mubr.f32.mxu1 %v13203_v56  ;;  %2758 = vmatpush1.msra.mxu0 %v2448_v17 }
 0x133   : > { %2690 = vmatmul.mubr.f32.vlgmr.msra.gmra.mxu1 %v8309_v35  ;;  %2762 = vmatprep.subr.mxu0 %v2454_v7  ;;  %v9024_v35 = vld [vmem:[#allocation2 + $0x78] sm:$0xff] }
 0x134   : > { %2837 = vmatprep.subr.mxu1 %v8821_v48  ;;  %2766 = vmatpush1.msra.mxu0 %v2460_v53 }
 0x135   : > { %2799 = vmatprep.mubr.f32.mxu0 %v13203_v56  ;;  %2839 = vmatpush1.msra.mxu1 %v8835_v20 }
 0x136   : > { %2801 = vmatmul.mubr.f32.vlgmr.msra.gmra.mxu0 %v8249_v12  ;;  %2841 = vmatprep.subr.mxu1 %v8830_v8 }
 0x137   : > { %2695 = vmatprep.mubr.f32.mxu1 %v13203_v56  ;;  %2843 = vmatpush1.msra.mxu1 %v8845_v33 }
 0x138   : > { %2806 = vmatprep.mubr.f32.mxu0 %v13203_v56  ;;  %2699 = vmatmul.mubr.f32.gmra.mxu1 %v8343_v4 }
 0x139   : > { %2845 = vmatprep.subr.mxu1 %v8847_v19  ;;  %2888 = vmatprep.mubr.f32.mxu1 %v13203_v56 }
 0x13a   : > { %2847 = vmatpush1.msra.mxu1 %v8865_v47  ;;  %2808 = vmatmul.mubr.f32.gmra.mxu0 %v8272_v55 }
 0x13b   : > { %2849 = vmatprep.subr.mxu1 %v8861_v44  ;;  %3293 = vrot.lane.b32.xlu1 %v9024_v35, %s7952_s8 }
 0x13c   : > { %2851 = vmatpush1.msra.mxu1 %v8880_v6  ;;  %3279 = vrot.lane.b32.xlu0 %v9028_v40, %s7952_s8 }
 0x13d   : > { %2853 = vmatprep.subr.mxu1 %v8873_v41 }
 0x13e   : > { %2855 = vmatpush1.msra.mxu1 %v8886_v5 }
 0x13f   : > { %2890 = vmatmul.mubr.f32.vlgmr.msra.gmra.mxu1 %v8249_v12  ;;  %3189 = vrot.lane.b32.xlu1 %v9024_v35, %s7953_s9 }
 0x140   : > { %2895 = vmatprep.mubr.f32.mxu1 %v13203_v56  ;;  %3175 = vrot.lane.b32.xlu0 %v9028_v40, %s7953_s9 }
 0x143   : > { %2897 = vmatmul.mubr.f32.gmra.mxu1 %v8272_v55  ;;  %3085 = vrot.lane.b32.xlu1 %v9024_v35, %s7954_s10 }
 0x188   : > { %v1130_v4 = vpop.f32.mrf.mxu0 }
 0x189   : > { %v1131_v47 = vadd.f32 %v1130_v4, %v9048_v46 }
 0x18a   : > { %v1132_v48 = vpop.f32.mrf.mxu0 }
 0x18b   : > { %v1133_v55 = vadd.f32 %v1132_v48, %v9048_v46 }
 0x18d   : > { %v1141_v8 = vpop.f32.mrf.mxu0 }
 0x18e   : > { %v1142_v6 = vadd.f32 %v1141_v8, %v9052_v1 }
 0x18f   : > { %v1143_v20 = vpop.f32.mrf.mxu0 }
 0x190   : > { %v1144_v52 = vadd.f32 %v1143_v20, %v9052_v1 }
 0x192   : > { %v1263_v62 = vpop.f32.mrf.mxu1 }
 0x193   : > { %v1264_v36 = vadd.f32 %v1263_v62, %v1131_v47 }
 0x194   : > { %v1265_v33 = vpop.f32.mrf.mxu1  ;;  %v1363_v12 = vpop.f32.mrf.mxu0 }
 0x195   : > { %v1266_v59 = vadd.f32 %v1265_v33, %v1133_v55  ;;  %v1364_v50 = vadd.f32 %v1363_v12, %v1264_v36 }
 0x196   : > { %v1365_v19 = vpop.f32.mrf.mxu0 }
 0x197   : > { %v1366_v45 = vadd.f32 %v1365_v19, %v1266_v59 }
 0x198   : > { %v1270_v56 = vpop.f32.mrf.mxu1 }
 0x199   : > { %v1271_v2 = vadd.f32 %v1270_v56, %v1142_v6 }
 0x19a   : > { %v1272_v37 = vpop.f32.mrf.mxu1 }
 0x19b   : > { %v1371_v44 = vpop.f32.mrf.mxu0  ;;  %v1273_v26 = vadd.f32 %v1272_v37, %v1144_v52 }
 0x19c   : > { %v1372_v7 = vadd.f32 %v1371_v44, %v1271_v2 }
 0x19d   : > { %v1373_v41 = vpop.f32.mrf.mxu0 }
 0x19e   : > { %v1374_v10 = vadd.f32 %v1373_v41, %v1273_v26 }
 0x19f   : > { %v1455_v9 = vpop.f32.mrf.mxu1 }
 0x1a0   : > { %v1456_v24 = vadd.f32 %v1455_v9, %v1364_v50 }
 0x1a1   : > { %v1457_v34 = vpop.f32.mrf.mxu1 }
 0x1a2   : > { %v1458_v13 = vadd.f32 %v1457_v34, %v1366_v45 }
 0x1a3   : > { %v1566_v5 = vpop.f32.mrf.mxu0 }
 0x1a4   : > { %v1567_v39 = vadd.f32 %v1566_v5, %v1456_v24 }
 0x1a5   : > { %v1464_v53 = vpop.f32.mrf.mxu1  ;;  %v1568_v60 = vpop.f32.mrf.mxu0 }
 0x1a6   : > { %v1465_v27 = vadd.f32 %v1464_v53, %v1372_v7  ;;  %v1569_v43 = vadd.f32 %v1568_v60, %v1458_v13 }
 0x1a7   : > { %v1466_v17 = vpop.f32.mrf.mxu1 }
 0x1a8   : > { %v1573_v18 = vpop.f32.mrf.mxu0  ;;  %v1467_v3 = vadd.f32 %v1466_v17, %v1374_v10 }
 0x1a9   : > { %v1574_v4 = vadd.f32 %v1573_v18, %v1465_v27 }
 0x1aa   : > { %v1575_v22 = vpop.f32.mrf.mxu0 }
 0x1ab   : > { %v1576_v62 = vadd.f32 %v1575_v22, %v1467_v3 }
 0x1ad   : > { %v1655_v58 = vpop.f32.mrf.mxu1 }
 0x1ae   : > { %v1656_v51 = vadd.f32 %v1655_v58, %v1567_v39 }
 0x1af   : > { %v1657_v49 = vpop.f32.mrf.mxu1 }
 0x1b0   : > { %v9056_v57 = vmax.f32 %v1656_v51, 0.0  ;;  %v1658_v15 = vadd.f32 %v1657_v49, %v1569_v43 }
 0x1b1   : > { %v1748_v20 = vpop.f32.mrf.mxu0 }
 0x1b2   : > { %2927 = vst [vmem:[#allocation2] sm:$0xff] %v9056_v57  ;;  %v9059_v48 = vmax.f32 %v1658_v15, 0.0  ;;  %v1662_v8 = vpop.f32.mrf.mxu1  ;;  %3615 = vrot.lane.b32.xlu0 %v9056_v57, %s7949_s29  ;;  %v1749_v53 = vadd.f32 %v1748_v20, %v9048_v46 }
 0x1b3   : > { %v1663_v33 = vadd.f32 %v1662_v8, %v1574_v4  ;;  %v1750_v37 = vpop.f32.mrf.mxu0 }
 0x1b4   : > { %2928 = vst [vmem:[#allocation2 + $0x8] sm:$0xff] %v9059_v48  ;;  %v1664_v12 = vpop.f32.mrf.mxu1  ;;  %3617 = vrot.lane.b32.xlu1 %v9059_v48, %s7949_s29  ;;  %v1751_v45 = vadd.f32 %v1750_v37, %v9048_v46 }
 0x1b5   : > { %v9066_v19 = vmax.f32 %v1663_v33, 0.0  ;;  %v1665_v56 = vadd.f32 %v1664_v12, %v1576_v62 }
 0x1b6   : > { %3511 = vrot.lane.b32.xlu0 %v9056_v57, %s7951_s7 }
 0x1b7   : > { %3373 = vst [vmem:[#allocation3 + $0x108] sm:$0xff] %v9066_v19  ;;  %v9071_v44 = vmax.f32 %v1665_v56, 0.0  ;;  %v1759_v9 = vpop.f32.mrf.mxu0 }
 0x1b8   : > { %3283 = vrot.lane.b32.xlu1 %v9059_v48, %s7952_s8  ;;  %v1760_v17 = vadd.f32 %v1759_v9, %v9052_v1 }
 0x1b9   : > { %v9075_v47 = vld [vmem:[#allocation2] sm:$0xff]  ;;  %v1761_v36 = vpop.f32.mrf.mxu0 }
 0x1ba   : > { %3407 = vrot.lane.b32.xlu0 %v9056_v57, %s7950_s30  ;;  %v1881_v55 = vpop.f32.mrf.mxu1  ;;  %v1762_v18 = vadd.f32 %v1761_v36, %v9052_v1 }
 0x1bb   : > { %v9079_v41 = vld [vmem:[#allocation2 + $0x8] sm:$0xff]  ;;  %v1882_v24 = vadd.f32 %v1881_v55, %v1749_v53 }
 0x1bc   : > { %3179 = vrot.lane.b32.xlu1 %v9059_v48, %s7953_s9  ;;  %v1883_v6 = vpop.f32.mrf.mxu1 }
 0x1bd   : > { %v1884_v13 = vadd.f32 %v1883_v6, %v1751_v45 }
 0x1be   : > { %3281 = vrot.lane.b32.xlu0 %v9056_v57, %s7952_s8  ;;  %v1981_v34 = vpop.f32.mrf.mxu0 }
 0x1bf   : > { %v1982_v39 = vadd.f32 %v1981_v34, %v1882_v24 }
 0x1c0   : > { %3629 = vrot.lane.b32.xlu1 %v9066_v19, %s7949_s29  ;;  %v1983_v5 = vpop.f32.mrf.mxu0 }
 0x1c1   : > { %v1888_v59 = vpop.f32.mrf.mxu1  ;;  %v1984_v58 = vadd.f32 %v1983_v5, %v1884_v13 }
 0x1c2   : > { %3177 = vrot.lane.b32.xlu0 %v9056_v57, %s7953_s9  ;;  %v1889_v10 = vadd.f32 %v1888_v59, %v1760_v17 }
 0x1c3   : > { %v1890_v52 = vpop.f32.mrf.mxu1 }
 0x1c4   : > { %3525 = vrot.lane.b32.xlu1 %v9066_v19, %s7951_s7  ;;  %v1989_v50 = vpop.f32.mrf.mxu0  ;;  %v1891_v3 = vadd.f32 %v1890_v52, %v1762_v18 }
 0x1c5   : > { %v1990_v22 = vadd.f32 %v1989_v50, %v1889_v10 }
 0x1c6   : > { %3513 = vrot.lane.b32.xlu0 %v9059_v48, %s7951_s7  ;;  %v1991_v60 = vpop.f32.mrf.mxu0 }
 0x1c7   : > { %v1992_v20 = vadd.f32 %v1991_v60, %v1891_v3 }
 0x1c8   : > { %3421 = vrot.lane.b32.xlu1 %v9066_v19, %s7950_s30 }
 0x1c9   : > { %v2073_v2 = vpop.f32.mrf.mxu1 }
 0x1ca   : > { %3409 = vrot.lane.b32.xlu0 %v9059_v48, %s7950_s30  ;;  %v2074_v43 = vadd.f32 %v2073_v2, %v1982_v39 }
 0x1cb   : > { %v2075_v26 = vpop.f32.mrf.mxu1 }
 0x1cc   : > { %3295 = vrot.lane.b32.xlu1 %v9066_v19, %s7952_s8  ;;  %v2184_v7 = vpop.f32.mrf.mxu0  ;;  %v2076_v49 = vadd.f32 %v2075_v26, %v1984_v58 }
 0x1cd   : > { %v2185_v4 = vadd.f32 %v2184_v7, %v2074_v43 }
 0x1ce   : > { %3087 = vrot.lane.b32.xlu0 %v9066_v19, %s7954_s10  ;;  %v2186_v51 = vpop.f32.mrf.mxu0 }
 0x1cf   : > { %v2082_v27 = vpop.f32.mrf.mxu1  ;;  %v2187_v12 = vadd.f32 %v2186_v51, %v2076_v49 }
 0x1d0   : > { %3191 = vrot.lane.b32.xlu1 %v9066_v19, %s7953_s9  ;;  %v2083_v62 = vadd.f32 %v2082_v27, %v1990_v22 }
 0x1d1   : > { %v2084_v15 = vpop.f32.mrf.mxu1 }
 0x1d2   : > { %3527 = vrot.lane.b32.xlu0 %v9071_v44, %s7951_s7  ;;  %v2191_v8 = vpop.f32.mrf.mxu0  ;;  %v2085_v37 = vadd.f32 %v2084_v15, %v1992_v20 }
 0x1d3   : > { %v2192_v34 = vadd.f32 %v2191_v8, %v2083_v62 }
 0x1d4   : > { %3631 = vrot.lane.b32.xlu1 %v9071_v44, %s7949_s29  ;;  %v2193_v55 = vpop.f32.mrf.mxu0 }
 0x1d5   : > { %v2194_v50 = vadd.f32 %v2193_v55, %v2085_v37 }
 0x1d6   : > { %3297 = vrot.lane.b32.xlu0 %v9071_v44, %s7952_s8 }
 0x1d7   : > { %v2273_v33 = vpop.f32.mrf.mxu1 }
 0x1d8   : > { %v2274_v56 = vadd.f32 %v2273_v33, %v2185_v4  ;;  %3423 = vrot.lane.b32.xlu1 %v9071_v44, %s7950_s30 }
 0x1d9   : > { %v2275_v9 = vpop.f32.mrf.mxu1 }
 0x1da   : > { %v9115_v36 = vmax.f32 %v2274_v56, 0.0  ;;  %v2276_v6 = vadd.f32 %v2275_v9, %v2187_v12  ;;  %3193 = vrot.lane.b32.xlu0 %v9071_v44, %s7953_s9 }
 0x1db   : > { %v2366_v52 = vpop.f32.mrf.mxu0 }
 0x1dc   : > { %2929 = vst [vmem:[#allocation2 + $0x60] sm:$0xff] %v9115_v36  ;;  %v9120_v59 = vmax.f32 %v2276_v6, 0.0  ;;  %v2280_v5 = vpop.f32.mrf.mxu1  ;;  %3515 = vrot.lane.b32.xlu1 %v9115_v36, %s7951_s7  ;;  %v2367_v49 = vadd.f32 %v2366_v52, %v9048_v46 }
 0x1dd   : > { %v2281_v2 = vadd.f32 %v2280_v5, %v2192_v34  ;;  %v2368_v45 = vpop.f32.mrf.mxu0 }
 0x1de   : > { %2930 = vst [vmem:[#allocation2 + $0x20] sm:$0xff] %v9120_v59  ;;  %v2282_v53 = vpop.f32.mrf.mxu1  ;;  %3619 = vrot.lane.b32.xlu0 %v9115_v36, %s7949_s29  ;;  %v2369_v15 = vadd.f32 %v2368_v45, %v9048_v46 }
 0x1df   : > { %v9127_v24 = vmax.f32 %v2281_v2, 0.0  ;;  %v2283_v60 = vadd.f32 %v2282_v53, %v2194_v50 }
 0x1e0   : > { %3411 = vrot.lane.b32.xlu1 %v9115_v36, %s7950_s30 }
 0x1e1   : > { %3375 = vst [vmem:[#allocation3 + $0x88] sm:$0xff] %v9127_v24  ;;  %v9132_v26 = vmax.f32 %v2283_v60, 0.0  ;;  %v2377_v13 = vpop.f32.mrf.mxu0 }
 0x1e2   : > { %3633 = vrot.lane.b32.xlu0 %v9127_v24, %s7949_s29  ;;  %v2378_v62 = vadd.f32 %v2377_v13, %v9052_v1 }
 0x1e3   : > { %3376 = vst [vmem:[#allocation3 + $0x2e0] sm:$0xff] %v9132_v26  ;;  %v3357_v7 = vld [vmem:[#allocation2 + $0x60] sm:$0xff]  ;;  %v2379_v18 = vpop.f32.mrf.mxu0 }
 0x1e4   : > { %3529 = vrot.lane.b32.xlu1 %v9127_v24, %s7951_s7  ;;  %3369 = vst [vmem:[#allocation3 + $0x28] sm:$0xff] %v3357_v7  ;;  %v2499_v17 = vpop.f32.mrf.mxu1  ;;  %v2380_v56 = vadd.f32 %v2379_v18, %v9052_v1 }
 0x1e5   : > { %v3358_v39 = vld [vmem:[#allocation2 + $0x20] sm:$0xff]  ;;  %v2500_v4 = vadd.f32 %v2499_v17, %v2367_v49 }
 0x1e6   : > { %3071 = vrot.lane.b32.xlu0 %v9028_v40, %s7954_s10  ;;  %3370 = vst [vmem:[#allocation3 + $0x20] sm:$0xff] %v3358_v39  ;;  %v2501_v27 = vpop.f32.mrf.mxu1 }
 0x1e7   : > { %v2502_v33 = vadd.f32 %v2501_v27, %v2369_v15 }
 0x1e8   : > { %v2599_v10 = vpop.f32.mrf.mxu0  ;;  %3089 = vrot.lane.b32.xlu1 %v9071_v44, %s7954_s10 }
 0x1e9   : > { %v2600_v37 = vadd.f32 %v2599_v10, %v2500_v4 }
 0x1ea   : > { %3425 = vrot.lane.b32.xlu0 %v9127_v24, %s7950_s30  ;;  %v2601_v58 = vpop.f32.mrf.mxu0 }
 0x1eb   : > { %v2506_v43 = vpop.f32.mrf.mxu1  ;;  %v2602_v6 = vadd.f32 %v2601_v58, %v2502_v33 }
 0x1ec   : > { %3073 = vrot.lane.b32.xlu1 %v9056_v57, %s7954_s10  ;;  %v2507_v9 = vadd.f32 %v2506_v43, %v2378_v62 }
 0x1ed   : > { %v2508_v3 = vpop.f32.mrf.mxu1 }
 0x1ee   : > { %3075 = vrot.lane.b32.xlu0 %v9059_v48, %s7954_s10  ;;  %v2607_v51 = vpop.f32.mrf.mxu0  ;;  %v2509_v34 = vadd.f32 %v2508_v3, %v2380_v56 }
 0x1ef   : > { %v2608_v5 = vadd.f32 %v2607_v51, %v2507_v9  ;;  %v3280_v9 = vpop.permute.xlu0 %3279 }
 0x1f0   : > { %2983 = vrot.lane.b32.xlu1 %v9066_v19, %s7955_s11  ;;  %v2609_v8 = vpop.f32.mrf.mxu0 }
 0x1f1   : > { %v2610_v2 = vadd.f32 %v2609_v8, %v2509_v34 }
 0x1f2   : > { %2985 = vrot.lane.b32.xlu0 %v9071_v44, %s7955_s11 }
 0x1f3   : > { %v2691_v22 = vpop.f32.mrf.mxu1 }
 0x1f4   : > { %2981 = vrot.lane.b32.xlu1 %v9024_v35, %s7955_s11  ;;  %v2692_v35 = vadd.f32 %v2691_v22, %v2600_v37  ;;  %v3294_v37 = vpop.permute.xlu1 %3293 }
 0x1f5   : > { %v2693_v20 = vpop.f32.mrf.mxu1 }
 0x1f6   : > { %v2802_v12 = vpop.f32.mrf.mxu0  ;;  %2969 = vrot.lane.b32.xlu0 %v9056_v57, %s7955_s11  ;;  %v2694_v52 = vadd.f32 %v2693_v20, %v2602_v6 }
 0x1f7   : > { %v2803_v53 = vadd.f32 %v2802_v12, %v2692_v35 }
 0x1f8   : > { %2971 = vrot.lane.b32.xlu1 %v9059_v48, %s7955_s11  ;;  %v2700_v46 = vpop.f32.mrf.mxu1  ;;  %v2804_v55 = vpop.f32.mrf.mxu0 }
 0x1f9   : > { %v2701_v45 = vadd.f32 %v2700_v46, %v2608_v5  ;;  %v2805_v13 = vadd.f32 %v2804_v55, %v2694_v52  ;;  %v3190_v46 = vpop.permute.xlu1 %3189  ;;  %v3176_v55 = vpop.permute.xlu0 %3175 }
 0x1fa   : > { %2967 = vrot.lane.b32.xlu0 %v9028_v40, %s7955_s11  ;;  %v2702_v50 = vpop.f32.mrf.mxu1  ;;  %v2809_v1 = vpop.f32.mrf.mxu0 }
 0x1fb   : > { %v2703_v7 = vadd.f32 %v2702_v50, %v2610_v2  ;;  %v2810_v18 = vadd.f32 %v2809_v1, %v2701_v45 }
 0x1fc   : > { %3735 = vrot.lane.b32.xlu1 %v9071_v44, %s7948_s28  ;;  %v2811_v40 = vpop.f32.mrf.mxu0 }
 0x1fd   : > { %v2812_v43 = vadd.f32 %v2811_v40, %v2703_v7  ;;  %v3086_v6 = vpop.permute.xlu1 %3085 }
 0x1fe   : > { %3721 = vrot.lane.b32.xlu0 %v9059_v48, %s7948_s28  ;;  %v2916_v48 = vld [vmem:[%s12617_s3 + $0x8] sm:$0xff] }
 0x1ff   : > { %v2891_v60 = vpop.f32.mrf.mxu1  ;;  %v3924_v3 = vsel %vm13309_vm13, %v2916_v48, 0  ;;  %vm13317_vm13 = vcmask 7168  }
 0x200   : > { %v2892_v17 = vadd.f32 %v2891_v60, %v2803_v53  ;;  %3733 = vrot.lane.b32.xlu1 %v9066_v19, %s7948_s28  ;;  %v9184_v22 = vand.u32 4294901760, %v3924_v3 }
 0x201   : > { %v2893_v39 = vpop.f32.mrf.mxu1 }
 0x202   : > { %v9171_v10 = vmax.f32 %v2892_v17, 0.0  ;;  %v2894_v27 = vadd.f32 %v2893_v39, %v2805_v13  ;;  %3737 = vrot.lane.b32.xlu0 %v9127_v24, %s7948_s28  ;;  %13310 = vst [vmem:[#allocation26_spill] sm:$0xff] %v9184_v22  ;;  %v9192_v8 = vsub.f32 %v3924_v3, %v9184_v22  ;;  %4345 = vmatprep.mubr.f32.mxu1 %v9184_v22 }
 0x203   : > { %v2898_v58 = vpop.f32.mrf.mxu1 }
 0x204   : > { %2931 = vst [vmem:[#allocation2 + $0x58] sm:$0xff] %v9171_v10  ;;  %v9179_v51 = vmax.f32 %v2894_v27, 0.0  ;;  %v2899_v19 = vadd.f32 %v2898_v58, %v2810_v18  ;;  %3723 = vrot.lane.b32.xlu1 %v9115_v36, %s7948_s28  ;;  %13311 = vst [vmem:[#allocation27_spill] sm:$0xff] %v9192_v8  ;;  %v9201_v62 = vand.u32 4294901760, %v9192_v8 }
 0x205   : > { %v2900_v49 = vpop.f32.mrf.mxu1 }
 0x206   : > { %2932 = vst [vmem:[#allocation2 + $0x70] sm:$0xff] %v9179_v51  ;;  %v9187_v15 = vmax.f32 %v2899_v19, 0.0  ;;  %v2901_v4 = vadd.f32 %v2900_v49, %v2812_v43  ;;  %3719 = vrot.lane.b32.xlu0 %v9056_v57, %s7948_s28  ;;  %13312 = vst [vmem:[#allocation28_spill] sm:$0xff] %v9201_v62  ;;  %v4038_v57 = vsub.f32 %v9192_v8, %v9201_v62 }
 0x208   : > { %3377 = vst [vmem:[#allocation3 + $0x340] sm:$0xff] %v9187_v15  ;;  %v9196_v20 = vmax.f32 %v2901_v4, 0.0  ;;  %3621 = vrot.lane.b32.xlu1 %v9120_v59, %s7949_s29  ;;  %v9211_v12 = vand.u32 4294901760, %v4038_v57 }
 0x20a   : > { %2938 = vst [vmem:[#allocation2 + $0x40] sm:$0xff] %v9196_v20  ;;  %3378 = vst [vmem:[#allocation3 + $0x348] sm:$0xff] %v9196_v20  ;;  %3287 = vrot.lane.b32.xlu0 %v9120_v59, %s7952_s8  ;;  %4040 = vmatprep.mubr.f32.mxu0 %v9211_v12 }
 0x20b   : > { %v3359_v33 = vld [vmem:[#allocation2 + $0x58] sm:$0xff]  ;;  %13313 = vst [vmem:[#allocation29_spill] sm:$0xff] %v9211_v12 }
 0x20c   : > { %3517 = vrot.lane.b32.xlu1 %v9120_v59, %s7951_s7  ;;  %3371 = vst [vmem:[#allocation3 + $0x288] sm:$0xff] %v3359_v33 }
 0x20d   : > { %v3360_v56 = vld [vmem:[#allocation2 + $0x70] sm:$0xff] }
 0x20e   : > { %3301 = vrot.lane.b32.xlu0 %v9132_v26, %s7952_s8  ;;  %3372 = vst [vmem:[#allocation3 + $0x1c0] sm:$0xff] %v3360_v56 }
 0x210   : > { %3413 = vrot.lane.b32.xlu1 %v9120_v59, %s7950_s30 }
 0x212   : > { %3197 = vrot.lane.b32.xlu0 %v9132_v26, %s7953_s9 }
 0x214   : > { %3285 = vrot.lane.b32.xlu1 %v9115_v36, %s7952_s8 }
 0x216   : > { %3623 = vrot.lane.b32.xlu0 %v9171_v10, %s7949_s29 }
 0x218   : > { %3299 = vrot.lane.b32.xlu1 %v9127_v24, %s7952_s8 }
 0x21a   : > { %3519 = vrot.lane.b32.xlu0 %v9171_v10, %s7951_s7 }
 0x21c   : > { %3195 = vrot.lane.b32.xlu1 %v9127_v24, %s7953_s9 }
 0x21e   : > { %3415 = vrot.lane.b32.xlu0 %v9171_v10, %s7950_s30 }
 0x220   : > { %3635 = vrot.lane.b32.xlu1 %v9132_v26, %s7949_s29 }
 0x222   : > { %3637 = vrot.lane.b32.xlu0 %v9187_v15, %s7949_s29 }
 0x224   : > { %3531 = vrot.lane.b32.xlu1 %v9132_v26, %s7951_s7  ;;  %v3616_v34 = vpop.permute.xlu0 %3615 }
 0x226   : > { %v9238_v35 = vpop.permute.xlu1 %3617  ;;  %3533 = vrot.lane.b32.xlu0 %v9187_v15, %s7951_s7 }
 0x227   : > { %v9244_v5 = vsel %vm13314_vm9, %v3616_v34, %v9238_v35  ;;  %vm13318_vm9 = vmmov %vm13317_vm13 }
 0x228   : > { %3427 = vrot.lane.b32.xlu1 %v9132_v26, %s7950_s30  ;;  %v3512_v52 = vpop.permute.xlu0 %3511 }
 0x22a   : > { %v9248_v50 = vpop.permute.xlu1 %3283  ;;  %3429 = vrot.lane.b32.xlu0 %v9187_v15, %s7950_s30 }
 0x22b   : > { %13315 = vst [vmem:[#allocation30_spill] sm:$0xff] %v9248_v50 }
 0x22c   : > { %3181 = vrot.lane.b32.xlu1 %v9115_v36, %s7953_s9  ;;  %v3408_v1 = vpop.permute.xlu0 %3407 }
 0x22e   : > { %v9254_v2 = vpop.permute.xlu1 %3179  ;;  %3183 = vrot.lane.b32.xlu0 %v9120_v59, %s7953_s9 }
 0x22f   : > { %13316 = vst [vmem:[#allocation31_spill] sm:$0xff] %v9254_v2 }
 0x230   : > { %3091 = vrot.lane.b32.xlu1 %v9127_v24, %s7954_s10  ;;  %v3282_v53 = vpop.permute.xlu0 %3281 }
 0x231   : > { %v3307_v45 = vsel %vm13317_vm13, %v3280_v9, %v3282_v53  ;;  %v3308_v60 = vsel %vm13318_vm9, %v3282_v53, %v9248_v50  ;;  %vm13319_vm13 = vcmask 121856  }
 0x232   : > { %v9265_v13 = vsel %vm8131_vm10, %v3307_v45, 0.0  ;;  %v9269_v7 = vsel %vm8085_vm3, %v3308_v60, 0.0  ;;  %v3630_v17 = vpop.permute.xlu1 %3629  ;;  %3093 = vrot.lane.b32.xlu0 %v9132_v26, %s7954_s10  ;;  %vm13320_vm9 = vmmov %vm13319_vm13  ;;  %v9345_v45 = vand.u32 4294901760, %v9079_v41  ;;  %v9348_v60 = vand.u32 4294901760, %v9075_v47 }
 0x234   : > { %3077 = vrot.lane.b32.xlu1 %v9115_v36, %s7954_s10  ;;  %v3178_v40 = vpop.permute.xlu0 %3177  ;;  %13327 = vst [vmem:[#allocation33_spill] sm:$0xff] %v9345_v45  ;;  %13328 = vst [vmem:[#allocation34_spill] sm:$0xff] %v9348_v60 }
 0x235   : > { %v3203_v39 = vsel %vm13319_vm13, %v3176_v55, %v3178_v40  ;;  %v3204_v18 = vsel %vm13320_vm9, %v3178_v40, %v9254_v2  ;;  %vm13321_vm13 = vcmask 924672   ;;  %vm13322_vm9 = vcmask 1039360  }
 0x236   : > { %v9280_v27 = vsel %vm8255_vm14, %v3203_v39, 0.0  ;;  %v9284_v58 = vsel %vm8089_vm4, %v3204_v18, 0.0  ;;  %v3526_v48 = vpop.permute.xlu1 %3525  ;;  %3079 = vrot.lane.b32.xlu0 %v9120_v59, %s7954_s10  ;;  %v9361_v18 = vld [vmem:[#allocation2 + $0x30] sm:$0xff] }
 0x237   : > { %3239 = vst [vmem:[#allocation3 + $0x228] sm:$0xff] %v9280_v27  ;;  %3240 = vst [vmem:[#allocation3 + $0x120] sm:$0xff] %v9284_v58 }
 0x238   : > { %2987 = vrot.lane.b32.xlu1 %v9127_v24, %s7955_s11  ;;  %v9292_v43 = vpop.permute.xlu0 %3513  ;;  %13332 = vst [vmem:[#allocation36_spill] sm:$0xff] %v9361_v18 }
 0x239   : > { %v3539_v19 = vsel %vm13321_vm13, %v3512_v52, %v9292_v43  ;;  %vm13323_vm13 = vcmask 7168  }
 0x23a   : > { %v9298_v3 = vsel %vm8131_vm10, %v3539_v19, 0.0  ;;  %v3422_v49 = vpop.permute.xlu1 %3421  ;;  %2989 = vrot.lane.b32.xlu0 %v9132_v26, %s7955_s11 }
 0x23c   : > { %2973 = vrot.lane.b32.xlu1 %v9115_v36, %s7955_s11  ;;  %v9304_v4 = vpop.permute.xlu0 %3409 }
 0x23d   : > { %v3435_v24 = vsel %vm13322_vm9, %v3408_v1, %v9304_v4  ;;  %vm13324_vm9 = vcmask 130048  }
 0x23e   : > { %v9310_v57 = vsel %vm8108_vm8, %v3435_v24, 0.0  ;;  %v3296_v33 = vpop.permute.xlu1 %3295  ;;  %2975 = vrot.lane.b32.xlu0 %v9120_v59, %s7955_s11  ;;  %v9376_v24 = vsub.f32 %v9075_v47, %v9348_v60 }
 0x23f   : > { %v3313_v56 = vsel %vm13323_vm13, %v3294_v37, %v3296_v33  ;;  %v3849_v37 = vld [vmem:[#allocation3 + $0x108] sm:$0xff]  ;;  %vm13325_vm13 = vcmask 121856  }
 0x240   : > { %v9317_v9 = vsel %vm8131_vm10, %v3313_v56, 0.0  ;;  %3739 = vrot.lane.b32.xlu1 %v9132_v26, %s7948_s28  ;;  %v9321_v36 = vpop.permute.xlu0 %3087  ;;  %v9334_v26 = vand.u32 4294901760, %v9071_v44  ;;  %v9352_v40 = vand.u32 4294901760, %v3849_v37  ;;  %13335 = vst [vmem:[#allocation39_spill] sm:$0xff] %v9376_v24  ;;  %v9385_v56 = vand.u32 4294901760, %v9244_v5 }
 0x241   : > { %v3105_v55 = vsel %vm13324_vm9, %v3086_v6, %v9321_v36  ;;  %vm13329_vm9 = vcmask 924672  }
 0x242   : > { %v9327_v34 = vsel %vm8198_vm12, %v3105_v55, 0.0  ;;  %v3192_v52 = vpop.permute.xlu1 %3191  ;;  %3741 = vrot.lane.b32.xlu0 %v9187_v15, %s7948_s28  ;;  %13326 = vst [vmem:[#allocation32_spill] sm:$0xff] %v9334_v26  ;;  %13330 = vst [vmem:[#allocation35_spill] sm:$0xff] %v9352_v40  ;;  %v9365_v19 = vsub.f32 %v9071_v44, %v9334_v26  ;;  %v9388_v55 = vsub.f32 %v3849_v37, %v9352_v40  ;;  %v9405_v37 = vld [vmem:[#allocation2 + $0x50] sm:$0xff] }
 0x243   : > { %3141 = vst [vmem:[#allocation3 + $0x358] sm:$0xff] %v9327_v34  ;;  %v3209_v1 = vsel %vm13325_vm13, %v3190_v46, %v3192_v52  ;;  %13338 = vst [vmem:[#allocation41_spill] sm:$0xff] %v9385_v56  ;;  %vm13341_vm13 = vcmask 1039360   ;;  %v9422_v32 = vsub.f32 %v9244_v5, %v9385_v56 }
 0x244   : > { %v9338_v53 = vsel %vm8255_vm14, %v3209_v1, 0.0  ;;  %3725 = vrot.lane.b32.xlu1 %v9120_v59, %s7948_s28  ;;  %v9342_v6 = vpop.permute.xlu0 %3527  ;;  %vm13331_vm14 = vcmask 916480   ;;  %13333 = vst [vmem:[#allocation37_spill] sm:$0xff] %v9365_v19  ;;  %13339 = vst [vmem:[#allocation42_spill] sm:$0xff] %v9388_v55  ;;  %v13355_v0 = vand.u32 4294901760, %v9388_v55 }
 0x245   : > { %v3545_v46 = vsel %vm13329_vm9, %v3526_v48, %v9342_v6  ;;  %v2915_v48 = vld [vmem:[%s12617_s3] sm:$0xff]  ;;  %vm13343_vm9 = vcmask 121856   ;;  %13344 = vst [vmem:[#allocation45_spill] sm:$0xff] %v9422_v32 }
 0x246   : > { %v9356_v16 = vsel %vm8131_vm10, %v3545_v46, 0.0  ;;  %v3632_v39 = vpop.permute.xlu1 %3631  ;;  %3727 = vrot.lane.b32.xlu0 %v9171_v10, %s7948_s28  ;;  %vm13337_vm10 = vcmask 7168   ;;  %v9398_v47 = vand.u32 4294901760, %v2915_v48  ;;  %v9475_v62 = vsub.f32 %v9388_v55, %v13355_v0 }
 0x247   : > { %v3649_v59 = vsel %vm13331_vm14, %v3630_v17, %v3632_v39  ;;  %v9380_v17 = vsub.f32 %v9079_v41, %v9345_v45  ;;  %v2918_v41 = vld [vmem:[%s12617_s3 + $0x18] sm:$0xff]  ;;  %vm13345_vm14 = vcmask 130048  }
 0x248   : > { %3625 = vrot.lane.b32.xlu1 %v9179_v51, %s7949_s29  ;;  %v9372_v42 = vpop.permute.xlu0 %3297  ;;  %13340 = vst [vmem:[#allocation43_spill] sm:$0xff] %v9398_v47  ;;  %v9435_v22 = vsub.f32 %v2915_v48, %v9398_v47  ;;  %v9469_v25 = vand.u32 4294901760, %v3649_v59 }
 0x249   : > { %13334 = vst [vmem:[#allocation38_spill] sm:$0xff] %v9372_v42  ;;  %13336 = vst [vmem:[#allocation40_spill] sm:$0xff] %v9380_v17  ;;  %v3314_v44 = vsel %vm13337_vm10, %v3296_v33, %v9372_v42  ;;  %v12724_v54 = vand.u32 4294901760, %v9380_v17  ;;  %vm13348_vm10 = vcmask 924672  }
 0x24a   : > { %v9392_v1 = vsel %vm8085_vm3, %v3314_v44, 0.0  ;;  %v9394_v46 = vpop.permute.xlu1 %3423  ;;  %3641 = vrot.lane.b32.xlu0 %v9361_v18, %s7949_s29  ;;  %13347 = vst [vmem:[#allocation47_spill] sm:$0xff] %v9435_v22  ;;  %13354 = vst [vmem:[#allocation50_spill] sm:$0xff] %v9469_v25  ;;  %v9484_v2 = vand.u32 4294901760, %v9435_v22  ;;  %v9510_v47 = vsub.f32 %v3649_v59, %v9469_v25 }
 0x24b   : > { %v3441_v33 = vsel %vm13341_vm13, %v3422_v49, %v9394_v46  ;;  %v9454_v48 = vsub.f32 %v9380_v17, %v12724_v54  ;;  %vm13353_vm13 = vcmask 916480  }
 0x24c   : > { %v9410_v44 = vsel %vm8108_vm8, %v3441_v33, 0.0  ;;  %3521 = vrot.lane.b32.xlu1 %v9179_v51, %s7951_s7  ;;  %v9414_v30 = vpop.permute.xlu0 %3193  ;;  %v3927_v33 = vsel %vm13345_vm14, %v2918_v41, 0  ;;  %13357 = vst [vmem:[#allocation52_spill] sm:$0xff] %v9484_v2  ;;  %vm13363_vm14 = vmmov %vm13353_vm13 }
 0x24d   : > { %13342 = vst [vmem:[#allocation44_spill] sm:$0xff] %v9414_v30  ;;  %v3210_v49 = vsel %vm13343_vm9, %v3192_v52, %v9414_v30  ;;  %v13349_v52 = vand.u32 4294901760, %v9365_v19  ;;  %vm13358_vm9 = vcmask 1039360   ;;  %v9576_v50 = vand.u32 4294901760, %v9410_v44 }
 0x24e   : > { %v9428_v11 = vsel %vm8089_vm4, %v3210_v49, 0.0  ;;  %v9430_v28 = vpop.permute.xlu1 %3515  ;;  %3627 = vrot.lane.b32.xlu0 %v9405_v37, %s7949_s29 }
 0x24f   : > { %13346 = vst [vmem:[#allocation46_spill] sm:$0xff] %v9430_v28  ;;  %v3540_v5 = vsel %vm13348_vm10, %v9292_v43, %v9430_v28  ;;  %v9443_v41 = vsub.f32 %v9365_v19, %v13349_v52  ;;  %v13351_v43 = vand.u32 4294901760, %v9376_v24  ;;  %v9461_v52 = vand.u32 4294901760, %v3927_v33  ;;  %v2920_v19 = vld [vmem:[%s12617_s3 + $0x28] sm:$0xff]  ;;  %13375 = vst [vmem:[#allocation66_spill] sm:$0xff] %v9576_v50 }
 0x250   : > { %v3564_v49 = vsel %vm8104_vm6, %v3540_v5, 0.0  ;;  %3417 = vrot.lane.b32.xlu1 %v9179_v51, %s7950_s30  ;;  %v9449_v12 = vpop.permute.xlu0 %3619  ;;  %v2917_v5 = vld [vmem:[%s12617_s3 + $0x10] sm:$0xff] }
 0x251   : > { %13350 = vst [vmem:[#allocation48_spill] sm:$0xff] %v9449_v12  ;;  %v9459_v63 = vsub.f32 %v9376_v24, %v13351_v43  ;;  %13352 = vst [vmem:[#allocation49_spill] sm:$0xff] %v9461_v52  ;;  %v3644_v61 = vsel %vm13353_vm13, %v9238_v35, %v9449_v12  ;;  %v9492_v24 = vand.u32 4294901760, %v2917_v5 }
 0x252   : > { %v3668_v43 = vsel %vm8074_vm1, %v3644_v61, 0.0  ;;  %v9479_v8 = vpop.permute.xlu1 %3411  ;;  %3537 = vrot.lane.b32.xlu0 %v9361_v18, %s7951_s7  ;;  %vm13383_vm13 = vmmov %vm13358_vm9 }
 0x253   : > { %13356 = vst [vmem:[#allocation51_spill] sm:$0xff] %v9479_v8  ;;  %v3436_v35 = vsel %vm13358_vm9, %v9304_v4, %v9479_v8  ;;  %v9489_v54 = vand.u32 4294901760, %v3668_v43  ;;  %13360 = vst [vmem:[#allocation54_spill] sm:$0xff] %v9492_v24  ;;  %v9505_v4 = vsub.f32 %v3927_v33, %v9461_v52  ;;  %v9543_v52 = vsub.f32 %v2917_v5, %v9492_v24 }
 0x254   : > { %v9496_v61 = vsel %vm8089_vm4, %v3436_v35, 0.0  ;;  %3289 = vrot.lane.b32.xlu1 %v9171_v10, %s7952_s8  ;;  %v9500_v17 = vpop.permute.xlu0 %3633  ;;  %v13364_v35 = vand.u32 4294901760, %v9422_v32 }
 0x255   : > { %13359 = vst [vmem:[#allocation53_spill] sm:$0xff] %v9489_v54  ;;  %13361 = vst [vmem:[#allocation55_spill] sm:$0xff] %v9500_v17  ;;  %v3650_v0 = vsel %vm13363_vm14, %v3632_v39, %v9500_v17  ;;  %v9528_v39 = vand.u32 4294901760, %v9356_v16  ;;  %v9531_v59 = vsub.f32 %v3668_v43, %v9489_v54 }
 0x256   : > { %13362 = vst [vmem:[#allocation56_spill] sm:$0xff] %v9505_v4  ;;  %v9515_v30 = vsub.f32 %v9422_v32, %v13364_v35  ;;  %v3674_v33 = vsel %vm8074_vm1, %v3650_v0, 0.0  ;;  %v9523_v55 = vpop.permute.xlu1 %3529  ;;  %3523 = vrot.lane.b32.xlu0 %v9405_v37, %s7951_s7  ;;  %v9540_v0 = vand.u32 4294901760, %v3564_v49  ;;  %13369 = vst [vmem:[#allocation61_spill] sm:$0xff] %v9543_v52  ;;  %v9550_v35 = vand.u32 4294901760, %v9298_v3 }
 0x257   : > { %13365 = vst [vmem:[#allocation57_spill] sm:$0xff] %v9523_v55  ;;  %13366 = vst [vmem:[#allocation58_spill] sm:$0xff] %v9528_v39  ;;  %v3546_v42 = vsel %vm13348_vm10, %v9342_v6, %v9523_v55  ;;  %v9538_v14 = vand.u32 4294901760, %v3674_v33  ;;  %v9553_v32 = vand.u32 4294901760, %v9505_v4  ;;  %vm13372_vm1 = vcmask 130048  }
 0x258   : > { %13368 = vst [vmem:[#allocation60_spill] sm:$0xff] %v9540_v0  ;;  %v3570_v17 = vsel %vm8104_vm6, %v3546_v42, 0.0  ;;  %3303 = vrot.lane.b32.xlu1 %v9187_v15, %s7952_s8  ;;  %v3072_v43 = vpop.permute.xlu0 %3071  ;;  %13370 = vst [vmem:[#allocation62_spill] sm:$0xff] %v9550_v35  ;;  %v9556_v6 = vsel %vm13372_vm1, %v2920_v19, 0  ;;  %v9573_v19 = vsub.f32 %v9356_v16, %v9528_v39  ;;  %v9580_v42 = vand.u32 4294901760, %v9269_v7 }
 0x259   : > { %13367 = vst [vmem:[#allocation59_spill] sm:$0xff] %v9538_v14  ;;  %13371 = vst [vmem:[#allocation63_spill] sm:$0xff] %v9553_v32  ;;  %3936 = vmatprep.subr.mxu0 %v9538_v14  ;;  %v9559_v5 = vand.u32 4294901760, %v3570_v17  ;;  %v9562_v29 = vsub.f32 %v3674_v33, %v9538_v14  ;;  %v9593_v14 = vsub.f32 %v3564_v49, %v9540_v0  ;;  %v9612_v49 = vand.u32 4294901760, %v9265_v13 }
 0x25a   : > { %v9566_v55 = vpop.permute.xlu1 %3089  ;;  %3433 = vrot.lane.b32.xlu0 %v9361_v18, %s7950_s30  ;;  %3938 = vmatpush1.msra.mxu0 %v9469_v25  ;;  %13376 = vst [vmem:[#allocation67_spill] sm:$0xff] %v9580_v42  ;;  %vm13377_vm6 = vmmov %vm13372_vm1  ;;  %v9606_v25 = vand.u32 4294901760, %v9496_v61 }
 0x25b   : > { %13373 = vst [vmem:[#allocation64_spill] sm:$0xff] %v9559_v5  ;;  %13374 = vst [vmem:[#allocation65_spill] sm:$0xff] %v9566_v55  ;;  %v9585_v24 = vsel %vm13377_vm6, %v9321_v36, %v9566_v55  ;;  %3940 = vmatprep.subr.mxu0 %v9489_v54  ;;  %v9590_v16 = vsub.f32 %v3570_v17, %v9559_v5  ;;  %v9603_v36 = vsub.f32 %v9298_v3, %v9550_v35  ;;  %vm13433_vm6 = vcmask 908288  }
 0x25c   : > { %3142 = vst [vmem:[#allocation3 + $0x190] sm:$0xff] %v9585_v24  ;;  %3199 = vrot.lane.b32.xlu1 %v9187_v15, %s7953_s9  ;;  %v9598_v33 = vpop.permute.xlu0 %3425  ;;  %3942 = vmatpush1.msra.mxu0 %v9385_v56  ;;  %13380 = vst [vmem:[#allocation70_spill] sm:$0xff] %v9606_v25  ;;  %v9609_v17 = vand.u32 4294901760, %v9310_v57  ;;  %v13384_v56 = vand.u32 4294901760, %v9562_v29  ;;  %v13385_v54 = vand.u32 4294901760, %v9510_v47 }
 0x25d   : > { %13378 = vst [vmem:[#allocation68_spill] sm:$0xff] %v9598_v33  ;;  %13379 = vst [vmem:[#allocation69_spill] sm:$0xff] %v9603_v36  ;;  %v3442_v55 = vsel %vm13383_vm13, %v9394_v46, %v9598_v33  ;;  %3944 = vmatprep.subr.mxu0 %v9559_v5  ;;  %v9632_v46 = vsub.f32 %v9410_v44, %v9576_v50 }
 0x25e   : > { %13381 = vst [vmem:[#allocation71_spill] sm:$0xff] %v9609_v17  ;;  %13382 = vst [vmem:[#allocation72_spill] sm:$0xff] %v9612_v49  ;;  %v4103_v3 = vsub.f32 %v9562_v29, %v13384_v56  ;;  %v4109_v8 = vsub.f32 %v9510_v47, %v13385_v54  ;;  %v3466_v28 = vsel %vm8089_vm4, %v3442_v55, 0.0  ;;  %v3074_v12 = vpop.permute.xlu1 %3073  ;;  %3419 = vrot.lane.b32.xlu0 %v9405_v37, %s7950_s30  ;;  %3946 = vmatpush1.msra.mxu0 %v9528_v39 }
 0x25f   : > { %v13386_v56 = vand.u32 4294901760, %v9531_v59  ;;  %v12774_v54 = vand.u32 4294901760, %v9573_v19  ;;  %vm13387_vm9 = vmmov %vm13372_vm1  ;;  %3948 = vmatprep.subr.mxu0 %v9540_v0  ;;  %v9640_v23 = vand.u32 4294901760, %v3466_v28 }
 0x260   : > { %v3099_v18 = vsel %vm13387_vm9, %v3072_v43, %v3074_v12  ;;  %v4104_v55 = vand.u32 4294901760, %v4103_v3  ;;  %3639 = vrot.lane.b32.xlu1 %v9196_v20, %s7949_s29  ;;  %v9649_v44 = vpop.permute.xlu0 %3075  ;;  %3950 = vmatpush1.msra.mxu0 %v9550_v35  ;;  %v9659_v3 = vsub.f32 %v9269_v7, %v9580_v42  ;;  %vm13391_vm4 = vmmov %vm13372_vm1  ;;  %v13392_v43 = vand.u32 4294901760, %v9590_v16 }
 0x261   : > { %v4115_v33 = vsub.f32 %v9531_v59, %v13386_v56  ;;  %13388 = vst [vmem:[#allocation73_spill] sm:$0xff] %v9640_v23  ;;  %v9645_v39 = vsel %vm8198_vm12, %v3099_v18, 0.0  ;;  %13389 = vst [vmem:[#allocation74_spill] sm:$0xff] %v9649_v44  ;;  %v9655_v56 = vsub.f32 %v9496_v61, %v9606_v25  ;;  %v9664_v38 = vsel %vm13391_vm4, %v3074_v12, %v9649_v44 }
 0x262   : > { %3135 = vst [vmem:[#allocation3 + $0xb8] sm:$0xff] %v9645_v39  ;;  %3952 = vmatprep.subr.mxu0 %v9640_v23  ;;  %4105 = vmatprep.subr.mxu1 %v4104_v55  ;;  %v4110_v18 = vand.u32 4294901760, %v4109_v8  ;;  %v4127_v5 = vsub.f32 %v9590_v16, %v13392_v43  ;;  %v9671_v61 = vsub.f32 %v3466_v28, %v9640_v23  ;;  %3136 = vst [vmem:[#allocation3 + $0x138] sm:$0xff] %v9664_v38  ;;  %v2984_v7 = vpop.permute.xlu1 %2983  ;;  %vm13399_vm12 = vcmask 138240  }
 0x263   : > { %13390 = vst [vmem:[#allocation75_spill] sm:$0xff] %v9655_v56  ;;  %3291 = vrot.lane.b32.xlu0 %v9179_v51, %s7952_s8  ;;  %3954 = vmatpush1.msra.mxu0 %v9576_v50  ;;  %v4116_v12 = vand.u32 4294901760, %v4115_v33  ;;  %v9679_v55 = vsub.f32 %v9310_v57, %v9609_v17  ;;  %v4133_v8 = vsub.f32 %v9573_v19, %v12774_v54  ;;  %v13393_v43 = vand.u32 4294901760, %v9593_v14  ;;  %vm13403_vm14 = vmmov %vm13399_vm12 }
 0x264   : > { %v9686_v28 = vsub.f32 %v9265_v13, %v9612_v49  ;;  %4111 = vmatpush1.msra.mxu1 %v4110_v18  ;;  %3956 = vmatprep.subr.mxu0 %v9606_v25  ;;  %v9695_v50 = vand.u32 4294901760, %v9284_v58  ;;  %v9699_v54 = vpop.permute.xlu0 %2985  ;;  %v13396_v13 = vand.u32 4294901760, %v9603_v36  ;;  %v9705_v25 = vand.u32 4294901760, %v9392_v1  ;;  %vm13415_vm1 = vmmov %vm13399_vm12 }
 0x265   : > { %v4139_v44 = vsub.f32 %v9593_v14, %v13393_v43  ;;  %3535 = vrot.lane.b32.xlu1 %v9196_v20, %s7951_s7  ;;  %13395 = vst [vmem:[#allocation77_spill] sm:$0xff] %v9699_v54  ;;  %4117 = vmatprep.subr.mxu1 %v4116_v12  ;;  %v9708_v43 = vand.u32 4294901760, %v9280_v27  ;;  %v3002_v33 = vsel %vm13399_vm12, %v2984_v7, %v9699_v54  ;;  %v13400_v23 = vand.u32 4294901760, %v9515_v30  ;;  %vm13442_vm13 = vmmov %vm13433_vm6 }
 0x266   : > { %13394 = vst [vmem:[#allocation76_spill] sm:$0xff] %v9695_v50  ;;  %v4145_v18 = vsub.f32 %v9603_v36, %v13396_v13  ;;  %13397 = vst [vmem:[#allocation78_spill] sm:$0xff] %v9705_v25  ;;  %3958 = vmatpush1.msra.mxu0 %v9609_v17  ;;  %v4128_v12 = vand.u32 4294901760, %v4127_v5  ;;  %v13401_v35 = vand.u32 4294901760, %v9671_v61  ;;  %v9722_v36 = vsel %vm8085_vm3, %v3002_v33, 0.0  ;;  %v2982_v57 = vpop.permute.xlu1 %2981 }
 0x267   : > { %13398 = vst [vmem:[#allocation79_spill] sm:$0xff] %v9708_v43  ;;  %4123 = vmatpush1.msra.mxu1 %v13400_v23  ;;  %3187 = vrot.lane.b32.xlu0 %v9179_v51, %s7953_s9  ;;  %v4134_v54 = vand.u32 4294901760, %v4133_v8  ;;  %v9728_v30 = vand.u32 4294901760, %v9317_v9  ;;  %3038 = vst [vmem:[#allocation3 + $0x140] sm:$0xff] %v9722_v36  ;;  %v4140_v23 = vand.u32 4294901760, %v4139_v44  ;;  %v13404_v33 = vand.u32 4294901760, %v9632_v46 }
 0x268   : > { %v4151_v13 = vsub.f32 %v9671_v61, %v13401_v35  ;;  %3960 = vmatprep.subr.mxu0 %v9334_v26  ;;  %v3001_v35 = vsel %vm13403_vm14, %v2982_v57, %v2984_v7  ;;  %4129 = vmatprep.subr.mxu1 %v4128_v12  ;;  %v13405_v8 = vld [vmem:[#allocation5_spill] sm:$0xff]  ;;  %v2970_v5 = vpop.permute.xlu0 %2969  ;;  %v9745_v57 = vand.u32 4294901760, %v9338_v53  ;;  %v9749_v44 = vsub.f32 %v9392_v1, %v9705_v25  ;;  %vm13451_vm4 = vmmov %vm13433_vm6 }
 0x269   : > { %13402 = vst [vmem:[#allocation80_spill] sm:$0xff] %v9728_v30  ;;  %3962 = vmatpush1.msra.mxu0 %v9352_v40  ;;  %v4157_v0 = vsub.f32 %v9632_v46, %v13404_v33  ;;  %vm13406_vm10 = vnez %v13405_v8  ;;  %3431 = vrot.lane.b32.xlu1 %v9196_v20, %s7950_s30  ;;  %v4146_v12 = vand.u32 4294901760, %v4145_v18  ;;  %v9769_v18 = vsub.f32 %v9317_v9, %v9728_v30  ;;  %vm13456_vm12 = vmmov %vm13451_vm4 }
 0x26a   : > { %v9740_v17 = vsel %vm13406_vm10, %v3001_v35, 0.0  ;;  %4135 = vmatpush1.msra.mxu1 %v4134_v54  ;;  %v4152_v7 = vand.u32 4294901760, %v4151_v13  ;;  %13407 = vst [vmem:[#allocation5_spill] sm:$0xff] %v9745_v57  ;;  %3964 = vmatprep.subr.mxu0 %v9345_v45  ;;  %v13408_v35 = vand.u32 4294901760, %v9655_v56  ;;  %v9757_v54 = vand.u32 4294901760, %v9428_v11  ;;  %v9764_v1 = vpop.permute.xlu1 %2971 }
 0x26b   : > { %3037 = vst [vmem:[#allocation3 + $0x130] sm:$0xff] %v9740_v17  ;;  %4141 = vmatprep.subr.mxu1 %v4140_v23  ;;  %v9760_v13 = vand.u32 4294901760, %v9556_v6  ;;  %3083 = vrot.lane.b32.xlu0 %v9179_v51, %s7954_s10  ;;  %13411 = vst [vmem:[#allocation83_spill] sm:$0xff] %v9764_v1  ;;  %v13412_v23 = vand.u32 4294901760, %v9679_v55  ;;  %v9776_v26 = vsub.f32 %v9280_v27, %v9708_v43  ;;  %v9779_v45 = vand.u32 4294901760, %v9543_v52 }
 0x26c   : > { %v4163_v33 = vsub.f32 %v9655_v56, %v13408_v35  ;;  %13409 = vst [vmem:[#allocation81_spill] sm:$0xff] %v9757_v54  ;;  %3966 = vmatpush1.msra.mxu0 %v9348_v60  ;;  %v2996_v40 = vsel %vm13415_vm1, %v2970_v5, %v9764_v1  ;;  %4147 = vmatpush1.msra.mxu1 %v4146_v12  ;;  %v4158_v60 = vand.u32 4294901760, %v4157_v0  ;;  %v13416_v9 = vand.u32 4294901760, %v9659_v3  ;;  %v2968_v12 = vpop.permute.xlu0 %2967 }
 0x26d   : > { %13410 = vst [vmem:[#allocation82_spill] sm:$0xff] %v9760_v13  ;;  %v4169_v35 = vsub.f32 %v9679_v55, %v13412_v23  ;;  %13413 = vst [vmem:[#allocation84_spill] sm:$0xff] %v9776_v26  ;;  %3968 = vmatprep.subr.mxu0 %v9705_v25  ;;  %v9791_v23 = vsub.f32 %v9284_v58, %v9695_v50  ;;  %v9795_v27 = vsel %vm8085_vm3, %v2996_v40, 0.0  ;;  %3185 = vrot.lane.b32.xlu1 %v9171_v10, %s7953_s9  ;;  %vm13462_vm14 = vcmask 916480  }
 0x26e   : > { %13414 = vst [vmem:[#allocation85_spill] sm:$0xff] %v9779_v45  ;;  %v9787_v56 = vsub.f32 %v9659_v3, %v13416_v9  ;;  %4153 = vmatprep.subr.mxu1 %v4152_v7  ;;  %v9801_v0 = vsub.f32 %v9338_v53, %v9745_v57  ;;  %v13419_v1 = vand.u32 4294901760, %v9686_v28  ;;  %3032 = vst [vmem:[#allocation3 + $0x268] sm:$0xff] %v9795_v27  ;;  %3970 = vmatpush1.msra.mxu0 %v9728_v30  ;;  %v3736_v25 = vpop.permute.xlu1 %3735 }
 0x26f   : > { %13417 = vst [vmem:[#allocation86_spill] sm:$0xff] %v9791_v23  ;;  %vm13420_vm3 = vmmov %vm13415_vm1  ;;  %4159 = vmatpush1.msra.mxu1 %v4158_v60  ;;  %v4164_v53 = vand.u32 4294901760, %v4163_v33  ;;  %v9818_v7 = vand.u32 4294901760, %v9585_v24  ;;  %2979 = vrot.lane.b32.xlu0 %v9179_v51, %s7955_s11  ;;  %v13424_v51 = vsub.f32 %v9435_v22, %v9484_v2  ;;  %v13429_v2 = vand.u32 4294901760, %v9443_v41 }
 0x270   : > { %13418 = vst [vmem:[#allocation87_spill] sm:$0xff] %v9801_v0  ;;  %v9807_v58 = vsub.f32 %v9686_v28, %v13419_v1  ;;  %v2995_v40 = vsel %vm13420_vm3, %v2968_v12, %v2970_v5  ;;  %v9822_v1 = vsub.f32 %v9428_v11, %v9757_v54  ;;  %3972 = vmatprep.subr.mxu0 %v9580_v42  ;;  %v4170_v5 = vand.u32 4294901760, %v4169_v35 }
 0x271   : > { %13421 = vst [vmem:[#allocation88_spill] sm:$0xff] %v9818_v7  ;;  %v9826_v9 = vsel %vm13406_vm10, %v2995_v40, 0.0  ;;  %4165 = vmatprep.subr.mxu1 %v4164_v53  ;;  %3974 = vmatpush1.msra.mxu0 %v9612_v49  ;;  %v9836_v11 = vand.u32 4294901760, %v9327_v34  ;;  %v9842_v12 = vand.u32 4294901760, %v13424_v51  ;;  %v9845_v35 = vand.u32 4294901760, %v9812_v21  ;;  %v3722_v40 = vpop.permute.xlu0 %3721 }
 0x272   : > { %13422 = vst [vmem:[#allocation89_spill] sm:$0xff] %v9822_v1  ;;  %3031 = vst [vmem:[#allocation3 + $0x2a8] sm:$0xff] %v9826_v9  ;;  %3095 = vrot.lane.b32.xlu1 %v9187_v15, %s7954_s10  ;;  %4171 = vmatpush1.msra.mxu1 %v4170_v5  ;;  %v13427_v53 = vand.u32 4294901760, %v9749_v44  ;;  %v9857_v51 = vsub.f32 %v9556_v6, %v9760_v13  ;;  %v4212_v5 = vand.u32 4294901760, %v9787_v56  ;;  %v3734_v60 = vpop.permute.xlu1 %3733  ;;  %v13430_v41 = vand.u32 4294901760, %v9769_v18 }
 0x273   : > { %13423 = vst [vmem:[#allocation90_spill] sm:$0xff] %v9836_v11  ;;  %13425 = vst [vmem:[#allocation91_spill] sm:$0xff] %v9842_v12  ;;  %3976 = vmatprep.subr.mxu0 %v9757_v54  ;;  %4177 = vmatprep.subr.mxu1 %v13429_v2  ;;  %v9877_v6 = vand.u32 4294901760, %v9664_v38  ;;  %v4218_v56 = vand.u32 4294901760, %v9807_v58  ;;  %v3753_v8 = vsel %vm13433_vm6, %v3734_v60, %v3736_v25  ;;  %v13434_v54 = vand.u32 4294901760, %v9475_v62 }
 0x274   : > { %13426 = vst [vmem:[#allocation92_spill] sm:$0xff] %v9845_v35  ;;  %v4199_v33 = vsub.f32 %v9749_v44, %v13427_v53  ;;  %13428 = vst [vmem:[#allocation93_spill] sm:$0xff] %v9857_v51  ;;  %v9866_v53 = vsub.f32 %v9585_v24, %v9818_v7  ;;  %3305 = vrot.lane.b32.xlu0 %v9196_v20, %s7952_s8  ;;  %3978 = vmatpush1.msra.mxu0 %v9745_v57  ;;  %v13432_v24 = vand.u32 4294901760, %v9776_v26  ;;  %vm13470_vm10 = vcmask 924672  }
 0x275   : > { %v4205_v2 = vsub.f32 %v9769_v18, %v13430_v41  ;;  %13431 = vst [vmem:[#allocation94_spill] sm:$0xff] %v9877_v6  ;;  %4183 = vmatpush1.msra.mxu1 %v13434_v54  ;;  %3980 = vmatprep.subr.mxu0 %v9695_v50  ;;  %v9891_v41 = vsub.f32 %v9327_v34, %v9836_v11  ;;  %v9894_v57 = vand.u32 4294901760, %v9645_v39  ;;  %v13437_v58 = vand.u32 4294901760, %v9791_v23  ;;  %v9907_v62 = vpop.permute.xlu0 %3737 }
 0x276   : > { %v9883_v22 = vsub.f32 %v9776_v26, %v13432_v24  ;;  %v9903_v60 = vsel %vm8108_vm8, %v3753_v8, 0.0  ;;  %3081 = vrot.lane.b32.xlu1 %v9171_v10, %s7954_s10  ;;  %13438 = vst [vmem:[#allocation97_spill] sm:$0xff] %v9907_v62  ;;  %v13439_v34 = vand.u32 4294901760, %v9454_v48  ;;  %v4200_v54 = vand.u32 4294901760, %v4199_v33  ;;  %3982 = vmatpush1.msra.mxu0 %v9708_v43  ;;  %v13446_v26 = vld [vmem:[#allocation4_spill] sm:$0xff] }
 0x277   : > { %13435 = vst [vmem:[#allocation95_spill] sm:$0xff] %v9891_v41  ;;  %13436 = vst [vmem:[#allocation96_spill] sm:$0xff] %v9894_v57  ;;  %v9899_v49 = vsub.f32 %v9791_v23, %v13437_v58  ;;  %v9912_v24 = vand.u32 4294901760, %v9722_v36  ;;  %v13441_v50 = vand.u32 4294901760, %v9801_v0  ;;  %v3754_v8 = vsel %vm13442_vm13, %v3736_v25, %v9907_v62  ;;  %v9931_v23 = vpop.permute.xlu1 %3723  ;;  %3984 = vmatprep.subr.mxu0 %v9818_v7  ;;  %v13487_v43 = vld [vmem:[#allocation8_spill] sm:$0xff] }
 0x278   : > { %4189 = vmatprep.subr.mxu1 %v13439_v34  ;;  %v13443_v42 = vand.u32 4294901760, %v9459_v63  ;;  %v13444_v30 = vand.u32 4294901760, %v9822_v1  ;;  %v9926_v33 = vand.u32 4294901760, %v9740_v17  ;;  %vm13447_vm9 = vnez %v13446_v26  ;;  %13448 = vst [vmem:[#allocation4_spill] sm:$0xff] %v9931_v23  ;;  %3201 = vrot.lane.b32.xlu0 %v9196_v20, %s7953_s9 }
 0x279   : > { %13440 = vst [vmem:[#allocation98_spill] sm:$0xff] %v9912_v24  ;;  %v4229_v58 = vsub.f32 %v9801_v0, %v13441_v50  ;;  %v3778_v50 = vsel %vm13447_vm9, %v3754_v8, 0.0  ;;  %v4206_v25 = vand.u32 4294901760, %v4205_v2  ;;  %v9937_v63 = vand.u32 4294901760, %v9795_v27  ;;  %3986 = vmatpush1.msra.mxu0 %v9836_v11 }
 0x27a   : > { %4195 = vmatpush1.msra.mxu1 %v13443_v42  ;;  %v4223_v48 = vsub.f32 %v9822_v1, %v13444_v30  ;;  %13445 = vst [vmem:[#allocation99_spill] sm:$0xff] %v9926_v33  ;;  %v9941_v42 = vsub.f32 %v9664_v38, %v9877_v6  ;;  %v3748_v30 = vsel %vm13451_vm4, %v3722_v40, %v9931_v23  ;;  %v9950_v34 = vand.u32 4294901760, %v3778_v50  ;;  %v3720_v38 = vpop.permute.xlu0 %3719 }
 0x27b   : > { %13449 = vst [vmem:[#allocation100_spill] sm:$0xff] %v9937_v63  ;;  %4201 = vmatprep.subr.mxu1 %v4200_v54  ;;  %v9948_v8 = vsub.f32 %v9645_v39, %v9894_v57  ;;  %v3772_v62 = vsel %vm13447_vm9, %v3748_v30, 0.0  ;;  %2991 = vrot.lane.b32.xlu1 %v9187_v15, %s7955_s11  ;;  %v4230_v23 = vand.u32 4294901760, %v4229_v58  ;;  %v9958_v54 = vand.u32 4294901760, %v9826_v9 }
 0x27c   : > { %13450 = vst [vmem:[#allocation101_spill] sm:$0xff] %v9941_v42  ;;  %13453 = vst [vmem:[#allocation103_spill] sm:$0xff] %v9950_v34  ;;  %4207 = vmatpush1.msra.mxu1 %v4206_v25  ;;  %v9962_v39 = vsub.f32 %v9722_v36, %v9912_v24  ;;  %v3747_v11 = vsel %vm13456_vm12, %v3720_v38, %v3722_v40  ;;  %3988 = vmatprep.subr.mxu0 %v9877_v6  ;;  %v4224_v26 = vand.u32 4294901760, %v4223_v48  ;;  %v2922_v25 = vld [vmem:[%s12617_s3 + $0x38] sm:$0xff]  ;;  %v9978_v40 = vpop.permute.xlu1 %3621  ;;  %v13461_v38 = vld [vmem:[#allocation48_spill] sm:$0xff]  ;;  %vm13485_vm3 = vcmask 1039360  }
 0x27d   : > { %13452 = vst [vmem:[#allocation102_spill] sm:$0xff] %v9948_v8  ;;  %13454 = vst [vmem:[#allocation104_spill] sm:$0xff] %v9958_v54  ;;  %4213 = vmatprep.subr.mxu1 %v4212_v5  ;;  %v9968_v30 = vsub.f32 %v9740_v17, %v9926_v33  ;;  %v13458_v15 = vand.u32 4294901760, %v9866_v53  ;;  %v3771_v36 = vsel %vm8108_vm8, %v3747_v11, 0.0  ;;  %3097 = vrot.lane.b32.xlu0 %v9196_v20, %s7954_s10  ;;  %v9983_v17 = vand.u32 4294901760, %v3772_v62  ;;  %v13469_v5 = vld [vmem:[#allocation46_spill] sm:$0xff] }
 0x27e   : > { %13455 = vst [vmem:[#allocation105_spill] sm:$0xff] %v9962_v39  ;;  %3990 = vmatpush1.msra.mxu0 %v9894_v57  ;;  %v9988_v48 = vsub.f32 %v9795_v27, %v9937_v63  ;;  %v3645_v31 = vsel %vm13462_vm14, %v13461_v38, %v9978_v40  ;;  %4219 = vmatpush1.msra.mxu1 %v4218_v56  ;;  %v9995_v11 = vand.u32 4294901760, %v9903_v60  ;;  %v10003_v27 = vpop.permute.xlu0 %3287  ;;  %v4242_v38 = vand.u32 4294901760, %v9883_v22  ;;  %vm13504_vm12 = vmmov %vm13462_vm14 }
 0x27f   : > { %13457 = vst [vmem:[#allocation106_spill] sm:$0xff] %v9968_v30  ;;  %v4247_v58 = vsub.f32 %v9866_v53, %v13458_v15  ;;  %13459 = vst [vmem:[#allocation107_spill] sm:$0xff] %v9983_v17  ;;  %3992 = vmatprep.subr.mxu0 %v9912_v24  ;;  %v9999_v2 = vsub.f32 %v3778_v50, %v9950_v34  ;;  %2977 = vrot.lane.b32.xlu1 %v9171_v10, %s7955_s11  ;;  %vm13464_vm8 = vcmask 130048   ;;  %v4236_v50 = vand.u32 4294901760, %v9899_v49 }
 0x280   : > { %13460 = vst [vmem:[#allocation108_spill] sm:$0xff] %v9988_v48  ;;  %13463 = vst [vmem:[#allocation48_spill] sm:$0xff] %v9995_v11  ;;  %4225 = vmatprep.subr.mxu1 %v4224_v26  ;;  %v10007_v56 = vsub.f32 %v9826_v9, %v9958_v54  ;;  %v10012_v15 = vsel %vm13464_vm8, %v2922_v25, 0  ;;  %3994 = vmatpush1.msra.mxu0 %v9926_v33  ;;  %v13465_v10 = vand.u32 4294901760, %v9891_v41  ;;  %v10022_v24 = vpop.permute.xlu1 %3517  ;;  %v3703_v33 = vld [vmem:[#allocation2 + $0x40] sm:$0xff]  ;;  %vm13488_vm6 = vnez %v13487_v43 }
 0x281   : > { %3681 = vst [vmem:[#allocation3 + $0x200] sm:$0xff] %v3645_v31  ;;  %4231 = vmatpush1.msra.mxu1 %v4230_v23  ;;  %v10019_v31 = vand.u32 4294901760, %v3771_v36  ;;  %2993 = vrot.lane.b32.xlu0 %v9196_v20, %s7955_s11  ;;  %v4248_v22 = vand.u32 4294901760, %v4247_v58  ;;  %v13467_v23 = vand.u32 4294901760, %v9941_v42  ;;  %v3541_v9 = vsel %vm13470_vm10, %v13469_v5, %v10022_v24 }
 0x282   : > { %v4253_v26 = vsub.f32 %v9891_v41, %v13465_v10  ;;  %3996 = vmatprep.subr.mxu0 %v9937_v63  ;;  %v10032_v10 = vsub.f32 %v3772_v62, %v9983_v17  ;;  %4237 = vmatprep.subr.mxu1 %v4236_v50  ;;  %v10040_v20 = vsub.f32 %v9903_v60, %v9995_v11  ;;  %v13472_v58 = vand.u32 4294901760, %v9948_v8  ;;  %v13473_v62 = vld [vmem:[#allocation10_spill] sm:$0xff]  ;;  %v10049_v5 = vpop.permute.xlu0 %3301 }
 0x283   : > { %13466 = vst [vmem:[#allocation109_spill] sm:$0xff] %v10019_v31  ;;  %v4259_v49 = vsub.f32 %v9941_v42, %v13467_v23  ;;  %3998 = vmatpush1.msra.mxu0 %v9958_v54  ;;  %vm13474_vm1 = vnez %v13473_v62  ;;  %3743 = vrot.lane.b32.xlu1 %v3703_v33, %s7948_s28  ;;  %13475 = vst [vmem:[#allocation10_spill] sm:$0xff] %v10049_v5  ;;  %v13476_v50 = vand.u32 4294901760, %v9962_v39  ;;  %v10082_v25 = vand.u32 4294901760, %v10012_v15 }
 0x284   : > { %13468 = vst [vmem:[#allocation110_spill] sm:$0xff] %v10032_v10  ;;  %13471 = vst [vmem:[#allocation46_spill] sm:$0xff] %v10040_v20  ;;  %v4265_v23 = vsub.f32 %v9948_v8, %v13472_v58  ;;  %v3565_v63 = vsel %vm13474_vm1, %v3541_v9, 0.0  ;;  %4243 = vmatpush1.msra.mxu1 %v4242_v38  ;;  %v10057_v57 = vsub.f32 %v9812_v21, %v9845_v35  ;;  %4028 = vmatprep.subr.mxu0 %v9950_v34  ;;  %v2921_v21 = vld [vmem:[%s12617_s3 + $0x30] sm:$0xff]  ;;  %v10072_v60 = vpop.permute.xlu1 %3413  ;;  %v13484_v34 = vld [vmem:[#allocation51_spill] sm:$0xff]  ;;  %vm13498_vm13 = vcmask 7168  }
 0x285   : > { %v4271_v54 = vsub.f32 %v9962_v39, %v13476_v50  ;;  %3577 = vst [vmem:[#allocation3 + $0x300] sm:$0xff] %v3565_v63  ;;  %4249 = vmatprep.subr.mxu1 %v4248_v22  ;;  %v4254_v9 = vand.u32 4294901760, %v4253_v26  ;;  %v10061_v33 = vsub.f32 %v3771_v36, %v10019_v31  ;;  %v13479_v38 = vand.u32 4294901760, %v9968_v30  ;;  %v13481_v63 = vld [vmem:[#allocation36_spill] sm:$0xff]  ;;  %4030 = vmatpush2.msra.mxu0 %v9995_v11  ;;  %vm13499_vm9 = vmmov %vm13498_vm13 }
 0x286   : > { %13477 = vst [vmem:[#allocation111_spill] sm:$0xff] %v10057_v57  ;;  %v10067_v50 = vand.u32 4294901760, %v9857_v51  ;;  %3745 = vrot.lane.b32.xlu0 %v13481_v63, %s7948_s28  ;;  %v4260_v36 = vand.u32 4294901760, %v4259_v49  ;;  %v13482_v26 = vand.u32 4294901760, %v9988_v48  ;;  %13483 = vst [vmem:[#allocation36_spill] sm:$0xff] %v10082_v25  ;;  %v3437_v6 = vsel %vm13485_vm3, %v13484_v34, %v10072_v60  ;;  %4032 = vmatprep.subr.mxu0 %v9983_v17  ;;  %v3696_v63 = vld [vmem:[#allocation2 + $0x70] sm:$0xff] }
 0x287   : > { %13478 = vst [vmem:[#allocation112_spill] sm:$0xff] %v10061_v33  ;;  %v4277_v58 = vsub.f32 %v9968_v30, %v13479_v38  ;;  %4255 = vmatpush1.msra.mxu1 %v4254_v9  ;;  %v4266_v7 = vand.u32 4294901760, %v4265_v23  ;;  %v13486_v49 = vand.u32 4294901760, %v9999_v2  ;;  %v3461_v38 = vsel %vm13488_vm6, %v3437_v6, 0.0  ;;  %3729 = vrot.lane.b32.xlu1 %v3696_v63, %s7948_s28  ;;  %vm13513_vm8 = vmmov %vm13499_vm9 }
 0x288   : > { %13480 = vst [vmem:[#allocation113_spill] sm:$0xff] %v10067_v50  ;;  %v4283_v22 = vsub.f32 %v9988_v48, %v13482_v26  ;;  %4261 = vmatprep.subr.mxu1 %v4260_v36  ;;  %v10095_v48 = vpop.permute.xlu0 %3197  ;;  %v4272_v34 = vand.u32 4294901760, %v4271_v54  ;;  %v13490_v9 = vand.u32 4294901760, %v10007_v56  ;;  %v10100_v23 = vand.u32 4294901760, %v2921_v21  ;;  %3473 = vst [vmem:[#allocation3 + $0x180] sm:$0xff] %v3461_v38  ;;  %4034 = vmatpush2.msra.mxu0 %v10019_v31  ;;  %v3286_v26 = vpop.permute.xlu1 %3285 }
 0x289   : > { %v4323_v11 = vsub.f32 %v9999_v2, %v13486_v49  ;;  %13489 = vst [vmem:[#allocation51_spill] sm:$0xff] %v10095_v48  ;;  %4267 = vmatpush1.msra.mxu1 %v4266_v7  ;;  %v4278_v49 = vand.u32 4294901760, %v4277_v58  ;;  %v13492_v6 = vsub.f32 %v9505_v4, %v9553_v32  ;;  %v10110_v54 = vand.u32 4294901760, %v10057_v57  ;;  %v2923_v7 = vld [vmem:[%s12618_s4] sm:$0xff]  ;;  %4046 = vmatmul.mubr.f32.vlgmr.msra.gmra.mxu0 %v9842_v12  ;;  %vm13514_vm10 = vmmov %vm13513_vm8 }
 0x28a   : > { %v4289_v17 = vsub.f32 %v10007_v56, %v13490_v9  ;;  %13491 = vst [vmem:[#allocation8_spill] sm:$0xff] %v10100_v23  ;;  %4273 = vmatprep.subr.mxu1 %v4272_v34  ;;  %3731 = vrot.lane.b32.xlu0 %v9405_v37, %s7948_s28  ;;  %v4284_v38 = vand.u32 4294901760, %v4283_v22  ;;  %v13495_v58 = vand.u32 4294901760, %v10032_v10  ;;  %v10124_v63 = vsub.f32 %v10012_v15, %v10082_v25  ;;  %v13497_v34 = vld [vmem:[#allocation30_spill] sm:$0xff] }
 0x28b   : > { %v10106_v36 = vand.u32 4294901760, %v13492_v6  ;;  %13494 = vst [vmem:[#allocation115_spill] sm:$0xff] %v10110_v54  ;;  %v4070_v6 = vsub.f32 %v9857_v51, %v10067_v50  ;;  %v3309_v32 = vsel %vm13498_vm13, %v13497_v34, %v3286_v26  ;;  %v3310_v37 = vsel %vm13499_vm9, %v3286_v26, %v10003_v27  ;;  %4279 = vmatpush1.msra.mxu1 %v4278_v49  ;;  %v13501_v51 = vld [vmem:[#allocation11_spill] sm:$0xff] }
 0x28c   : > { %v4335_v9 = vsub.f32 %v10032_v10, %v13495_v58  ;;  %13496 = vst [vmem:[#allocation116_spill] sm:$0xff] %v10124_v63  ;;  %v4324_v22 = vand.u32 4294901760, %v4323_v11  ;;  %v13500_v31 = vand.u32 4294901760, %v10040_v20  ;;  %v3333_v50 = vsel %vm13474_vm1, %v3309_v32, 0.0  ;;  %4379 = vmatprep.subr.mxu0 %v9562_v29  ;;  %4285 = vmatprep.subr.mxu1 %v4284_v38  ;;  %v10139_v4 = vpop.permute.xlu0 %3623  ;;  %v2924_v11 = vld [vmem:[%s12618_s4 + $0x8] sm:$0xff]  ;;  %v13508_v49 = vld [vmem:[#allocation7_spill] sm:$0xff] }
 0x28d   : > { %13493 = vst [vmem:[#allocation114_spill] sm:$0xff] %v10106_v36  ;;  %vm13502_vm4 = vnez %v13501_v51  ;;  %v4290_v34 = vand.u32 4294901760, %v4289_v17  ;;  %v10142_v26 = vsub.f32 %v2921_v21, %v10100_v23  ;;  %3345 = vst [vmem:[#allocation3 + $0x1d0] sm:$0xff] %v3333_v50  ;;  %4382 = vmatpush1.msra.mxu0 %v9510_v47  ;;  %3905 = vperm.xlu1 %7924, %v2923_v7   ;;  %v13507_v21 = vand.u32 4294901760, %v10061_v33 }
 0x28e   : > { %v4329_v58 = vsub.f32 %v10040_v20, %v13500_v31  ;;  %v3334_v15 = vsel %vm13502_vm4, %v3310_v37, 0.0  ;;  %v3646_v32 = vsel %vm13504_vm12, %v9978_v40, %v10139_v4  ;;  %v13505_v17 = vsub.f32 %v9543_v52, %v9779_v45  ;;  %4385 = vmatprep.subr.mxu0 %v9531_v59  ;;  %v3300_v40 = vpop.permute.xlu1 %3299  ;;  %4056 = vmatprep.mubr.f32.mxu0 %v10106_v36 }
 0x28f   : > { %13503 = vst [vmem:[#allocation30_spill] sm:$0xff] %v10142_v26  ;;  %3346 = vst [vmem:[#allocation3 + $0x2b8] sm:$0xff] %v3334_v15  ;;  %v4341_v50 = vsub.f32 %v10061_v33, %v13507_v21  ;;  %4291 = vmatpush1.msra.mxu1 %v4290_v34  ;;  %vm13509_vm14 = vnez %v13508_v49  ;;  %v4336_v7 = vand.u32 4294901760, %v4335_v9  ;;  %v4076_v37 = vsub.f32 %v10057_v57, %v10110_v54  ;;  %v13556_v49 = vld [vmem:[#allocation54_spill] sm:$0xff]  ;;  %v13566_v54 = vld [vmem:[#allocation60_spill] sm:$0xff] }
 0x290   : > { %v10154_v31 = vand.u32 4294901760, %v13505_v17  ;;  %v10162_v38 = vsel %vm13509_vm14, %v3646_v32, 0.0  ;;  %v10167_v15 = vand.u32 4294901760, %v10124_v63  ;;  %4325 = vmatprep.subr.mxu1 %v4324_v22  ;;  %v13512_v17 = vld [vmem:[#allocation38_spill] sm:$0xff]  ;;  %v3316_v21 = vsel %vm13514_vm10, %v3300_v40, %v10049_v5  ;;  %v13515_v32 = vld [vmem:[#allocation45_spill] sm:$0xff]  ;;  %3910 = vperm.xlu0 %7923, %v2924_v11   ;;  %v13521_v11 = vld [vmem:[#allocation12_spill] sm:$0xff] }
 0x291   : > { %13510 = vst [vmem:[#allocation7_spill] sm:$0xff] %v10162_v38  ;;  %v3315_v34 = vsel %vm13513_vm8, %v13512_v17, %v3300_v40  ;;  %v4330_v12 = vand.u32 4294901760, %v4329_v58  ;;  %4388 = vmatpush1.msra.mxu0 %v13515_v32  ;;  %v10181_v38 = vsel %vm13502_vm4, %v3316_v21, 0.0  ;;  %v2925_v22 = vld [vmem:[%s12618_s4 + $0x10] sm:$0xff]  ;;  %v10186_v17 = vpop.permute.xlu0 %3519  ;;  %v10188_v36 = vand.u32 4294901760, %v4070_v6  ;;  %v13553_v5 = vld [vmem:[#allocation41_spill] sm:$0xff] }
 0x292   : > { %13506 = vst [vmem:[#allocation11_spill] sm:$0xff] %v10154_v31  ;;  %13511 = vst [vmem:[#allocation117_spill] sm:$0xff] %v10167_v15  ;;  %v10177_v9 = vsel %vm13474_vm1, %v3315_v34, 0.0  ;;  %v10191_v58 = vand.u32 4294901760, %v10142_v26  ;;  %4062 = vmatmul.mubr.f32.gmra.mxu0 %v10154_v31  ;;  %vm13520_vm3 = vcmask 924672   ;;  %v4342_v34 = vand.u32 4294901760, %v4341_v50  ;;  %4391 = vmatprep.subr.mxu0 %v9590_v16  ;;  %v3196_v6 = vpop.permute.xlu1 %3195 }
 0x293   : > { %13516 = vst [vmem:[#allocation38_spill] sm:$0xff] %v10177_v9  ;;  %13517 = vst [vmem:[#allocation45_spill] sm:$0xff] %v10181_v38  ;;  %4331 = vmatpush2.msra.mxu1 %v4330_v12  ;;  %v3542_v40 = vsel %vm13520_vm3, %v10022_v24, %v10186_v17  ;;  %vm13522_vm13 = vnez %v13521_v11  ;;  %v10202_v9 = vand.u32 4294901760, %v4076_v37  ;;  %v4086_v38 = vsub.f32 %v10124_v63, %v10167_v15  ;;  %v13525_v12 = vld [vmem:[#allocation44_spill] sm:$0xff]  ;;  %v13528_v37 = vld [vmem:[#allocation14_spill] sm:$0xff] }
 0x294   : > { %13518 = vst [vmem:[#allocation118_spill] sm:$0xff] %v10188_v36  ;;  %13519 = vst [vmem:[#allocation119_spill] sm:$0xff] %v10191_v58  ;;  %4337 = vmatprep.subr.mxu1 %v4336_v7  ;;  %v10200_v21 = vsel %vm13522_vm13, %v3542_v40, 0.0  ;;  %4394 = vmatpush1.msra.mxu0 %v9573_v19  ;;  %vm13526_vm9 = vcmask 121856   ;;  %v2926_v7 = vld [vmem:[%s12618_s4 + $0x18] sm:$0xff]  ;;  %vm13529_vm8 = vnez %v13528_v37  ;;  %v13531_v31 = vld [vmem:[#allocation6_spill] sm:$0xff] }
 0x295   : > { %13523 = vst [vmem:[#allocation12_spill] sm:$0xff] %v10200_v21  ;;  %13524 = vst [vmem:[#allocation120_spill] sm:$0xff] %v10202_v9  ;;  %3915 = vperm.xlu1 %7924, %v2925_v22   ;;  %v3211_v24 = vsel %vm13526_vm9, %v13525_v12, %v3196_v6  ;;  %4397 = vmatprep.subr.mxu0 %v9593_v14  ;;  %vm13532_vm10 = vnez %v13531_v31  ;;  %v10224_v12 = vpop.permute.xlu0 %3415  ;;  %v13534_v21 = vld [vmem:[#allocation69_spill] sm:$0xff]  ;;  %vm13535_vm3 = vcmask 1039360   ;;  %v13569_v11 = vld [vmem:[#allocation39_spill] sm:$0xff] }
 0x296   : > { %vm13527_vm12 = vmmov %vm13526_vm9  ;;  %4072 = vmatprep.mubr.f32.mxu0 %v10188_v36  ;;  %v10218_v40 = vsel %vm13529_vm8, %v3211_v24, 0.0  ;;  %4343 = vmatpush2.msra.mxu1 %v4342_v34  ;;  %v3438_v36 = vsel %vm13535_vm3, %v10072_v60, %v10224_v12  ;;  %v13539_v34 = vld [vmem:[#allocation55_spill] sm:$0xff]  ;;  %vm13540_vm9 = vcmask 916480   ;;  %vm13552_vm3 = vcmask 924672  }
 0x297   : > { %v3212_v50 = vsel %vm13527_vm12, %v3196_v6, %v10095_v48  ;;  %13530 = vst [vmem:[#allocation44_spill] sm:$0xff] %v10218_v40  ;;  %v4092_v6 = vsub.f32 %v10142_v26, %v10191_v58  ;;  %4400 = vmatpush1.msra.mxu0 %v13534_v21  ;;  %3920 = vperm.xlu0 %7923, %v2926_v7   ;;  %v10235_v24 = vsel %vm13532_vm10, %v3438_v36, 0.0  ;;  %v13538_v40 = vld [vmem:[#allocation43_spill] sm:$0xff]  ;;  %v13545_v36 = vld [vmem:[#allocation50_spill] sm:$0xff]  ;;  %vm13547_vm12 = vmmov %vm13540_vm9 }
 0x298   : > { %v10222_v22 = vsel %vm13532_vm10, %v3212_v50, 0.0  ;;  %4078 = vmatmul.mubr.f32.gmra.mxu0 %v10202_v9  ;;  %13536 = vst [vmem:[#allocation6_spill] sm:$0xff] %v10235_v24  ;;  %v10237_v50 = vand.u32 4294901760, %v4086_v38  ;;  %4347 = vmatmul.mubr.f32.vlgmr.msra.gmra.mxu1 %v13538_v40  ;;  %v13542_v58 = vld [vmem:[#allocation59_spill] sm:$0xff]  ;;  %v13548_v24 = vld [vmem:[#allocation53_spill] sm:$0xff] }
 0x299   : > { %13533 = vst [vmem:[#allocation14_spill] sm:$0xff] %v10222_v22  ;;  %v3636_v22 = vpop.permute.xlu1 %3635  ;;  %4403 = vmatprep.subr.mxu0 %v9671_v61  ;;  %4555 = vmatprep.subr.mxu1 %v13542_v58  ;;  %v10247_v60 = vand.u32 4294901760, %v4092_v6  ;;  %v10249_v7 = vpop.permute.xlu0 %3637  ;;  %v13546_v38 = vld [vmem:[#allocation75_spill] sm:$0xff]  ;;  %v13550_v6 = vld [vmem:[#allocation49_spill] sm:$0xff] }
 0x29a   : > { %13537 = vst [vmem:[#allocation69_spill] sm:$0xff] %v10237_v50  ;;  %v10243_v48 = vsel %vm13540_vm9, %v13539_v34, %v3636_v22  ;;  %4406 = vmatpush1.msra.mxu0 %v9632_v46  ;;  %13544 = vst [vmem:[#allocation121_spill] sm:$0xff] %v10249_v7  ;;  %4557 = vmatpush1.msra.mxu1 %v13545_v36  ;;  %v3652_v9 = vsel %vm13547_vm12, %v3636_v22, %v10249_v7  ;;  %v13564_v7 = vld [vmem:[#allocation68_spill] sm:$0xff]  ;;  %vm13575_vm9 = vcmask 121856  }
 0x29b   : > { %13541 = vst [vmem:[#allocation55_spill] sm:$0xff] %v10243_v48  ;;  %13543 = vst [vmem:[#allocation59_spill] sm:$0xff] %v10247_v60  ;;  %4409 = vmatprep.subr.mxu0 %v13546_v38  ;;  %4559 = vmatprep.subr.mxu1 %v13548_v24  ;;  %v10259_v34 = vsel %vm13509_vm14, %v3652_v9, 0.0  ;;  %v13551_v48 = vld [vmem:[#allocation57_spill] sm:$0xff] }
 0x29c   : > { %4088 = vmatprep.mubr.f32.mxu0 %v10237_v50  ;;  %13549 = vst [vmem:[#allocation50_spill] sm:$0xff] %v10259_v34  ;;  %4353 = vmatprep.mubr.f32.mxu1 %v13550_v6  ;;  %v13557_v9 = vld [vmem:[#allocation37_spill] sm:$0xff]  ;;  %vm13558_vm14 = vmmov %vm13552_vm3  ;;  %v13559_v34 = vld [vmem:[#allocation64_spill] sm:$0xff] }
 0x29d   : > { %v3532_v40 = vpop.permute.xlu1 %3531  ;;  %4412 = vmatpush1.msra.mxu0 %v9679_v55  ;;  %4561 = vmatpush1.msra.mxu1 %v13553_v5  ;;  %v10271_v50 = vpop.permute.xlu0 %3533  ;;  %vm13580_vm12 = vmmov %vm13575_vm9 }
 0x29e   : > { %v3547_v15 = vsel %vm13552_vm3, %v13551_v48, %v3532_v40  ;;  %4094 = vmatmul.mubr.f32.gmra.mxu0 %v10247_v60  ;;  %13555 = vst [vmem:[#allocation53_spill] sm:$0xff] %v10271_v50  ;;  %4355 = vmatmul.mubr.f32.gmra.mxu1 %v13556_v49  ;;  %v3548_v6 = vsel %vm13558_vm14, %v3532_v40, %v10271_v50  ;;  %v13560_v48 = vld [vmem:[#allocation42_spill] sm:$0xff] }
 0x29f   : > { %v10269_v22 = vsel %vm13474_vm1, %v3547_v15, 0.0  ;;  %4415 = vmatprep.subr.mxu0 %v13557_v9  ;;  %4563 = vmatprep.subr.mxu1 %v13559_v34  ;;  %v10281_v60 = vsel %vm13522_vm13, %v3548_v6, 0.0  ;;  %v13562_v15 = vld [vmem:[#allocation58_spill] sm:$0xff]  ;;  %vm13565_vm1 = vcmask 1039360  }
 0x2a0   : > { %13554 = vst [vmem:[#allocation75_spill] sm:$0xff] %v10269_v22  ;;  %4418 = vmatpush1.msra.mxu0 %v13560_v48  ;;  %13561 = vst [vmem:[#allocation57_spill] sm:$0xff] %v10281_v60  ;;  %4565 = vmatpush1.msra.mxu1 %v13562_v15  ;;  %v13563_v22 = vld [vmem:[#allocation40_spill] sm:$0xff]  ;;  %v13570_v6 = vld [vmem:[#allocation62_spill] sm:$0xff] }
 0x2a1   : > { %v3428_v62 = vpop.permute.xlu1 %3427  ;;  %4421 = vmatprep.subr.mxu0 %v13563_v22  ;;  %4567 = vmatprep.subr.mxu1 %v13566_v54  ;;  %v10293_v50 = vpop.permute.xlu0 %3429  ;;  %vm13571_vm13 = vmmov %vm13565_vm1 }
 0x2a2   : > { %v3443_v49 = vsel %vm13565_vm1, %v13564_v7, %v3428_v62  ;;  %4361 = vmatprep.mubr.f32.mxu1 %v9760_v13  ;;  %13568 = vst [vmem:[#allocation37_spill] sm:$0xff] %v10293_v50  ;;  %4424 = vmatpush1.msra.mxu0 %v13569_v11  ;;  %v3444_v60 = vsel %vm13571_vm13, %v3428_v62, %v10293_v50  ;;  %v13585_v50 = vld [vmem:[#allocation32_spill] sm:$0xff]  ;;  %vm13608_vm13 = vcmask 138240  }
 0x2a3   : > { %v10291_v40 = vsel %vm13488_vm6, %v3443_v49, 0.0  ;;  %4569 = vmatpush1.msra.mxu1 %v13570_v6  ;;  %4427 = vmatprep.subr.mxu0 %v9749_v44  ;;  %v10303_v7 = vsel %vm13532_vm10, %v3444_v60, 0.0  ;;  %v13573_v49 = vld [vmem:[#allocation73_spill] sm:$0xff]  ;;  %v13576_v6 = vld [vmem:[#allocation66_spill] sm:$0xff] }
 0x2a4   : > { %13567 = vst [vmem:[#allocation41_spill] sm:$0xff] %v10291_v40  ;;  %4363 = vmatmul.mubr.f32.gmra.mxu1 %v9845_v35  ;;  %13572 = vst [vmem:[#allocation64_spill] sm:$0xff] %v10303_v7  ;;  %4571 = vmatprep.subr.mxu1 %v13573_v49  ;;  %v13574_v40 = vld [vmem:[#allocation31_spill] sm:$0xff]  ;;  %v13579_v60 = vld [vmem:[#allocation70_spill] sm:$0xff] }
 0x2a5   : > { %v3182_v13 = vpop.permute.xlu1 %3181  ;;  %4430 = vmatpush1.msra.mxu0 %v9769_v18  ;;  %4573 = vmatpush1.msra.mxu1 %v13576_v6  ;;  %v10315_v35 = vpop.permute.xlu0 %3183 }
 0x2a6   : > { %v3205_v11 = vsel %vm13575_vm9, %v13574_v40, %v3182_v13  ;;  %4433 = vmatprep.subr.mxu0 %v9659_v3  ;;  %13578 = vst [vmem:[#allocation58_spill] sm:$0xff] %v10315_v35  ;;  %4575 = vmatprep.subr.mxu1 %v13579_v60  ;;  %v3206_v7 = vsel %vm13580_vm12, %v3182_v13, %v10315_v35  ;;  %v13581_v40 = vld [vmem:[#allocation71_spill] sm:$0xff]  ;;  %v13586_v13 = vld [vmem:[#allocation13_spill] sm:$0xff]  ;;  %vm13616_vm12 = vmmov %vm13608_vm13 }
 0x2a7   : > { %v10313_v62 = vsel %vm13529_vm8, %v3205_v11, 0.0  ;;  %4369 = vmatprep.mubr.f32.mxu1 %v10082_v25  ;;  %4436 = vmatpush1.msra.mxu0 %v9686_v28  ;;  %v10326_v37 = vsel %vm13532_vm10, %v3206_v7, 0.0  ;;  %v13583_v25 = vld [vmem:[#allocation65_spill] sm:$0xff]  ;;  %vm13584_vm8 = vcmask 130048   ;;  %vm13587_vm3 = vnez %v13586_v13  ;;  %v13590_v7 = vld [vmem:[#allocation35_spill] sm:$0xff]  ;;  %v13606_v13 = vld [vmem:[#allocation72_spill] sm:$0xff] }
 0x2a8   : > { %13577 = vst [vmem:[#allocation42_spill] sm:$0xff] %v10313_v62  ;;  %3241 = vst [vmem:[#allocation3 + $0x148] sm:$0xff] %v10313_v62  ;;  %4577 = vmatpush1.msra.mxu1 %v13581_v40  ;;  %4439 = vmatprep.subr.mxu0 %v9822_v1  ;;  %v13599_v1 = vld [vmem:[#allocation78_spill] sm:$0xff] }
 0x2a9   : > { %13582 = vst [vmem:[#allocation40_spill] sm:$0xff] %v10326_v37  ;;  %v3092_v11 = vpop.permute.xlu1 %3091  ;;  %4371 = vmatmul.mubr.f32.gmra.mxu1 %v10100_v23  ;;  %3242 = vst [vmem:[#allocation3 + $0x158] sm:$0xff] %v10326_v37  ;;  %4579 = vmatprep.subr.mxu1 %v13585_v50  ;;  %v10339_v31 = vpop.permute.xlu0 %3093  ;;  %v13591_v23 = vld [vmem:[#allocation86_spill] sm:$0xff]  ;;  %v13595_v50 = vld [vmem:[#allocation84_spill] sm:$0xff] }
 0x2aa   : > { %v3107_v62 = vsel %vm13584_vm8, %v13583_v25, %v3092_v11  ;;  %4442 = vmatpush1.msra.mxu0 %v9801_v0  ;;  %13589 = vst [vmem:[#allocation60_spill] sm:$0xff] %v10339_v31  ;;  %4581 = vmatpush1.msra.mxu1 %v13590_v7  ;;  %vm13592_vm10 = vmmov %vm13584_vm8  ;;  %v13594_v25 = vld [vmem:[#allocation33_spill] sm:$0xff]  ;;  %v13596_v0 = vld [vmem:[#allocation34_spill] sm:$0xff] }
 0x2ab   : > { %v10337_v35 = vsel %vm13587_vm3, %v3107_v62, 0.0  ;;  %4445 = vmatprep.subr.mxu0 %v13591_v23  ;;  %v10346_v37 = vsel %vm13592_vm10, %v3092_v11, %v10339_v31  ;;  %4583 = vmatprep.subr.mxu1 %v13594_v25  ;;  %v13597_v7 = vld [vmem:[#allocation74_spill] sm:$0xff]  ;;  %vm13598_vm14 = vmmov %vm13584_vm8  ;;  %v13602_v31 = vld [vmem:[#allocation80_spill] sm:$0xff]  ;;  %vm13632_vm10 = vcmask 908288  }
 0x2ac   : > { %13588 = vst [vmem:[#allocation68_spill] sm:$0xff] %v10337_v35  ;;  %3143 = vst [vmem:[#allocation3 + $0x320] sm:$0xff] %v10337_v35  ;;  %4448 = vmatpush1.msra.mxu0 %v13595_v50  ;;  %4585 = vmatpush1.msra.mxu1 %v13596_v0 }
 0x2ad   : > { %13593 = vst [vmem:[#allocation73_spill] sm:$0xff] %v10346_v37  ;;  %3144 = vst [vmem:[#allocation3 + $0x208] sm:$0xff] %v10346_v37  ;;  %v3078_v62 = vpop.permute.xlu1 %3077  ;;  %4451 = vmatprep.subr.mxu0 %v9866_v53  ;;  %4587 = vmatprep.subr.mxu1 %v13599_v1  ;;  %v10361_v35 = vpop.permute.xlu0 %3079 }
 0x2ae   : > { %v3101_v23 = vsel %vm13598_vm14, %v13597_v7, %v3078_v62  ;;  %4454 = vmatpush1.msra.mxu0 %v9891_v41  ;;  %13601 = vst [vmem:[#allocation66_spill] sm:$0xff] %v10361_v35  ;;  %4589 = vmatpush1.msra.mxu1 %v13602_v31  ;;  %vm13603_vm1 = vmmov %vm13584_vm8  ;;  %v13605_v7 = vld [vmem:[#allocation67_spill] sm:$0xff]  ;;  %v13607_v31 = vld [vmem:[#allocation77_spill] sm:$0xff] }
 0x2af   : > { %v10359_v11 = vsel %vm13587_vm3, %v3101_v23, 0.0  ;;  %4457 = vmatprep.subr.mxu0 %v9941_v42  ;;  %v10368_v37 = vsel %vm13603_vm1, %v3078_v62, %v10361_v35  ;;  %4591 = vmatprep.subr.mxu1 %v13605_v7  ;;  %v13609_v41 = vld [vmem:[#allocation81_spill] sm:$0xff]  ;;  %v13610_v62 = vld [vmem:[#allocation15_spill] sm:$0xff]  ;;  %vm13621_vm8 = vmmov %vm13616_vm12 }
 0x2b0   : > { %13600 = vst [vmem:[#allocation31_spill] sm:$0xff] %v10359_v11  ;;  %3137 = vst [vmem:[#allocation3 + $0x1f8] sm:$0xff] %v10359_v11  ;;  %4460 = vmatpush1.msra.mxu0 %v9948_v8  ;;  %4593 = vmatpush1.msra.mxu1 %v13606_v13  ;;  %vm13611_vm9 = vnez %v13610_v62  ;;  %v13614_v8 = vld [vmem:[#allocation5_spill] sm:$0xff] }
 0x2b1   : > { %13604 = vst [vmem:[#allocation70_spill] sm:$0xff] %v10368_v37  ;;  %3138 = vst [vmem:[#allocation3 + $0x78] sm:$0xff] %v10368_v37  ;;  %v2988_v23 = vpop.permute.xlu1 %2987  ;;  %4463 = vmatprep.subr.mxu0 %v9962_v39  ;;  %4595 = vmatprep.subr.mxu1 %v13609_v41  ;;  %v10383_v35 = vpop.permute.xlu0 %2989  ;;  %v13615_v37 = vld [vmem:[#allocation108_spill] sm:$0xff]  ;;  %v13619_v41 = vld [vmem:[#allocation79_spill] sm:$0xff] }
 0x2b2   : > { %v3003_v42 = vsel %vm13608_vm13, %v13607_v31, %v2988_v23  ;;  %4466 = vmatpush1.msra.mxu0 %v9968_v30  ;;  %13613 = vst [vmem:[#allocation65_spill] sm:$0xff] %v10383_v35  ;;  %4597 = vmatpush1.msra.mxu1 %v13614_v8  ;;  %v3004_v39 = vsel %vm13616_vm12, %v2988_v23, %v10383_v35  ;;  %v13617_v31 = vld [vmem:[#allocation76_spill] sm:$0xff]  ;;  %v13625_v35 = vld [vmem:[#allocation90_spill] sm:$0xff]  ;;  %vm13626_vm3 = vmmov %vm13621_vm8 }
 0x2b3   : > { %v10381_v11 = vsel %vm13611_vm9, %v3003_v42, 0.0  ;;  %4469 = vmatprep.subr.mxu0 %v13615_v37  ;;  %4599 = vmatprep.subr.mxu1 %v13617_v31  ;;  %v10394_v30 = vsel %vm13502_vm4, %v3004_v39, 0.0  ;;  %v13620_v37 = vld [vmem:[#allocation83_spill] sm:$0xff]  ;;  %v13622_v8 = vld [vmem:[#allocation88_spill] sm:$0xff] }
 0x2b4   : > { %13612 = vst [vmem:[#allocation71_spill] sm:$0xff] %v10381_v11  ;;  %3039 = vst [vmem:[#allocation3 + $0xf0] sm:$0xff] %v10381_v11  ;;  %4472 = vmatpush1.msra.mxu0 %v10007_v56  ;;  %4601 = vmatpush1.msra.mxu1 %v13619_v41 }
 0x2b5   : > { %13618 = vst [vmem:[#allocation13_spill] sm:$0xff] %v10394_v30  ;;  %v2974_v42 = vpop.permute.xlu1 %2973  ;;  %4503 = vmatprep.subr.mxu0 %v9999_v2  ;;  %3040 = vst [vmem:[#allocation3 + $0x278] sm:$0xff] %v10394_v30  ;;  %4603 = vmatprep.subr.mxu1 %v13622_v8  ;;  %v10407_v39 = vpop.permute.xlu0 %2975  ;;  %v13630_v8 = vld [vmem:[#allocation96_spill] sm:$0xff] }
 0x2b6   : > { %v2997_v11 = vsel %vm13621_vm8, %v13620_v37, %v2974_v42  ;;  %4506 = vmatpush2.msra.mxu0 %v10040_v20  ;;  %13624 = vst [vmem:[#allocation84_spill] sm:$0xff] %v10407_v39  ;;  %4605 = vmatpush1.msra.mxu1 %v13625_v35  ;;  %v2998_v30 = vsel %vm13626_vm3, %v2974_v42, %v10407_v39  ;;  %v13627_v37 = vld [vmem:[#allocation94_spill] sm:$0xff]  ;;  %v13629_v20 = vld [vmem:[#allocation27_spill] sm:$0xff]  ;;  %vm13672_vm3 = vcmask 1039360  }
 0x2b7   : > { %v10405_v23 = vsel %vm13611_vm9, %v2997_v11, 0.0  ;;  %4509 = vmatprep.subr.mxu0 %v10032_v10  ;;  %4607 = vmatprep.subr.mxu1 %v13627_v37  ;;  %v10418_v62 = vsel %vm13502_vm4, %v2998_v30, 0.0  ;;  %v13631_v10 = vld [vmem:[#allocation97_spill] sm:$0xff]  ;;  %v13633_v35 = vld [vmem:[#allocation47_spill] sm:$0xff]  ;;  %v13634_v42 = vld [vmem:[#allocation98_spill] sm:$0xff]  ;;  %v13636_v30 = vand.u32 4294901760, %v9562_v29 }
 0x2b8   : > { %13623 = vst [vmem:[#allocation33_spill] sm:$0xff] %v10405_v23  ;;  %3033 = vst [vmem:[#allocation3 + $0x310] sm:$0xff] %v10405_v23  ;;  %4512 = vmatpush2.msra.mxu0 %v10061_v33  ;;  %4515 = vmatprep.mubr.f32.mxu0 %v13629_v20  ;;  %v13637_v20 = vld [vmem:[#allocation99_spill] sm:$0xff]  ;;  %v13644_v29 = vld [vmem:[#allocation56_spill] sm:$0xff]  ;;  %vm13663_vm9 = vcmask 924672  }
 0x2b9   : > { %13628 = vst [vmem:[#allocation34_spill] sm:$0xff] %v10418_v62  ;;  %v3740_v11 = vpop.permute.xlu1 %3739  ;;  %4609 = vmatpush1.msra.mxu1 %v13630_v8  ;;  %3034 = vst [vmem:[#allocation3 + $0x2c0] sm:$0xff] %v10418_v62  ;;  %4518 = vmatmul.mubr.f32.vlgmr.msra.gmra.mxu0 %v13633_v35  ;;  %v10431_v51 = vpop.permute.xlu0 %3741  ;;  %v13640_v35 = vld [vmem:[#allocation100_spill] sm:$0xff] }
 0x2ba   : > { %v3755_v23 = vsel %vm13632_vm10, %v13631_v10, %v3740_v11  ;;  %4611 = vmatprep.subr.mxu1 %v13634_v42  ;;  %4706 = vmatprep.subr.mxu0 %v13636_v30  ;;  %vm13638_vm4 = vmmov %vm13632_vm10  ;;  %v13639_v10 = vand.u32 4294901760, %v9510_v47  ;;  %v13641_v42 = vld [vmem:[#allocation9_spill] sm:$0xff]  ;;  %v13645_v30 = vld [vmem:[#allocation4_spill] sm:$0xff]  ;;  %v13648_v47 = vand.u32 4294901760, %v13515_v32  ;;  %vm13677_vm10 = vcmask 7168  }
 0x2bb   : > { %v10429_v39 = vsel %vm13488_vm6, %v3755_v23, 0.0  ;;  %4613 = vmatpush1.msra.mxu1 %v13637_v20  ;;  %v3756_v62 = vsel %vm13638_vm4, %v3740_v11, %v10431_v51  ;;  %vm13642_vm14 = vnez %v13641_v42  ;;  %4525 = vmatprep.mubr.f32.mxu0 %v13644_v29  ;;  %vm13646_vm1 = vmmov %vm13638_vm4  ;;  %v13647_v33 = vld [vmem:[#allocation104_spill] sm:$0xff]  ;;  %v13658_v42 = vld [vmem:[#allocation109_spill] sm:$0xff] }
 0x2bc   : > { %13635 = vst [vmem:[#allocation74_spill] sm:$0xff] %v10429_v39  ;;  %4710 = vmatpush1.msra.mxu0 %v13639_v10  ;;  %4615 = vmatprep.subr.mxu1 %v13640_v35  ;;  %v10443_v8 = vsel %vm13642_vm14, %v3756_v62, 0.0  ;;  %v13643_v39 = vand.u32 4294901760, %v9531_v59  ;;  %v13649_v59 = vld [vmem:[#allocation103_spill] sm:$0xff]  ;;  %vm13650_vm13 = vmmov %vm13646_vm1  ;;  %v13651_v10 = vand.u32 4294901760, %v9590_v16  ;;  %v13657_v16 = vld [vmem:[#allocation93_spill] sm:$0xff] }
 0x2bd   : > { %v3726_v23 = vpop.permute.xlu1 %3725  ;;  %4617 = vmatpush1.msra.mxu1 %v13647_v33  ;;  %v10457_v62 = vpop.permute.xlu0 %3727  ;;  %4528 = vmatmul.mubr.f32.gmra.mxu0 %v9543_v52  ;;  %vm13682_vm4 = vmmov %vm13663_vm9 }
 0x2be   : > { %4714 = vmatprep.subr.mxu0 %v13643_v39  ;;  %v3749_v20 = vsel %vm13646_vm1, %v13645_v30, %v3726_v23  ;;  %4647 = vmatprep.subr.mxu1 %v13649_v59  ;;  %v3750_v39 = vsel %vm13650_vm13, %v3726_v23, %v10457_v62  ;;  %v13652_v30 = vld [vmem:[#allocation48_spill] sm:$0xff]  ;;  %v13656_v23 = vand.u32 4294901760, %v9593_v14  ;;  %v13664_v14 = vand.u32 4294901760, %v9632_v46  ;;  %vm13689_vm1 = vmmov %vm13677_vm10 }
 0x2bf   : > { %4718 = vmatpush1.msra.mxu0 %v13648_v47  ;;  %v10455_v11 = vsel %vm13488_vm6, %v3749_v20, 0.0  ;;  %4649 = vmatpush2.msra.mxu1 %v13652_v30  ;;  %v10468_v32 = vsel %vm13642_vm14, %v3750_v39, 0.0  ;;  %v13653_v20 = vand.u32 4294901760, %v9573_v19  ;;  %v13654_v47 = vld [vmem:[#allocation107_spill] sm:$0xff]  ;;  %vm13655_vm6 = vcmask 916480   ;;  %v13659_v39 = vld [vmem:[#allocation28_spill] sm:$0xff] }
 0x2c0   : > { %4722 = vmatprep.subr.mxu0 %v13651_v10  ;;  %4651 = vmatprep.subr.mxu1 %v13654_v47  ;;  %v13660_v19 = vand.u32 4294901760, %v13534_v21  ;;  %vm13667_vm12 = vmmov %vm13655_vm6  ;;  %vm13698_vm13 = vcmask 121856  }
 0x2c1   : > { %v3626_v43 = vpop.permute.xlu1 %3625  ;;  %4726 = vmatpush1.msra.mxu0 %v13653_v20  ;;  %4535 = vmatprep.mubr.f32.mxu0 %v13657_v16  ;;  %v10478_v10 = vpop.permute.xlu0 %3641  ;;  %v13661_v20 = vld [vmem:[#allocation52_spill] sm:$0xff] }
 0x2c2   : > { %v3647_v52 = vsel %vm13655_vm6, %v10139_v4, %v3626_v43  ;;  %4730 = vmatprep.subr.mxu0 %v13656_v23  ;;  %4653 = vmatpush2.msra.mxu1 %v13658_v42  ;;  %v13662_v4 = vand.u32 4294901760, %v9671_v61  ;;  %vm13706_vm6 = vmmov %vm13672_vm3 }
 0x2c3   : > { %3683 = vst [vmem:[#allocation3 + $0x1b0] sm:$0xff] %v3647_v52  ;;  %4657 = vmatprep.mubr.f32.mxu1 %v13659_v39  ;;  %4734 = vmatpush1.msra.mxu0 %v13660_v19 }
 0x2c4   : > { %4661 = vmatmul.mubr.f32.vlgmr.msra.gmra.mxu1 %v13661_v20  ;;  %4538 = vmatmul.mubr.f32.gmra.mxu0 %v10057_v57  ;;  %v13666_v20 = vand.u32 4294901760, %v13546_v38 }
 0x2c5   : > { %v3522_v29 = vpop.permute.xlu1 %3521  ;;  %4738 = vmatprep.subr.mxu0 %v13662_v4  ;;  %4909 = vmatprep.subr.mxu1 %v13542_v58  ;;  %v3628_v19 = vpop.permute.xlu0 %3627  ;;  %v13670_v4 = vld [vmem:[#allocation63_spill] sm:$0xff] }
 0x2c6   : > { %v3543_v52 = vsel %vm13663_vm9, %v10186_v17, %v3522_v29  ;;  %4742 = vmatpush1.msra.mxu0 %v13664_v14  ;;  %4911 = vmatpush1.msra.mxu1 %v13545_v36  ;;  %v3648_v61 = vsel %vm13667_vm12, %v3626_v43, %v3628_v19  ;;  %v13668_v17 = vld [vmem:[#allocation17_spill] sm:$0xff] }
 0x2c7   : > { %v3567_v21 = vsel %vm8605_vm5, %v3543_v52, 0.0  ;;  %4746 = vmatprep.subr.mxu0 %v13666_v20  ;;  %4913 = vmatprep.subr.mxu1 %v13548_v24  ;;  %vm13669_vm8 = vnez %v13668_v17  ;;  %v13671_v52 = vand.u32 4294901760, %v9679_v55  ;;  %v13674_v20 = vand.u32 4294901760, %v13557_v9  ;;  %v13678_v9 = vld [vmem:[#allocation113_spill] sm:$0xff] }
 0x2c8   : > { %3579 = vst [vmem:[#allocation3 + $0xd8] sm:$0xff] %v3567_v21  ;;  %4545 = vmatprep.mubr.f32.mxu0 %v10124_v63  ;;  %v3672_v46 = vsel %vm13669_vm8, %v3648_v61, 0.0  ;;  %4669 = vmatprep.mubr.f32.mxu1 %v13670_v4  ;;  %v13675_v55 = vand.u32 4294901760, %v13560_v48  ;;  %v13679_v21 = vld [vmem:[#allocation39_spill] sm:$0xff]  ;;  %v13681_v61 = vld [vmem:[#allocation62_spill] sm:$0xff]  ;;  %v13781_v63 = vld [vmem:[#allocation60_spill] sm:$0xff] }
 0x2c9   : > { %v3418_v58 = vpop.permute.xlu1 %3417  ;;  %4750 = vmatpush1.msra.mxu0 %v13671_v52  ;;  %3684 = vst [vmem:[#allocation3 + $0x2d8] sm:$0xff] %v3672_v46  ;;  %4915 = vmatpush1.msra.mxu1 %v13553_v5  ;;  %v10512_v43 = vpop.permute.xlu0 %3537  ;;  %v13676_v5 = vand.u32 4294901760, %v13563_v22  ;;  %v13680_v19 = vand.u32 4294901760, %v13679_v21  ;;  %v13844_v24 = vld [vmem:[#allocation13_spill] sm:$0xff] }
 0x2ca   : > { %v3439_v36 = vsel %vm13672_vm3, %v10224_v12, %v3418_v58  ;;  %4548 = vmatmul.mubr.f32.gmra.mxu0 %v10142_v26  ;;  %4673 = vmatmul.mubr.f32.gmra.mxu1 %v9779_v45  ;;  %vm13715_vm3 = vmmov %vm13667_vm12 }
 0x2cb   : > { %v3463_v38 = vsel %vm8556_vm7, %v3439_v36, 0.0  ;;  %4754 = vmatprep.subr.mxu0 %v13674_v20  ;;  %4917 = vmatprep.subr.mxu1 %v13559_v34  ;;  %v13687_v36 = vand.u32 4294901760, %v9769_v18  ;;  %v7928_v18 = vld [vmem:[#allocation3 + $0x28] sm:$0xff] }
 0x2cc   : > { %3475 = vst [vmem:[#allocation3 + $0xc0] sm:$0xff] %v3463_v38  ;;  %4758 = vmatpush1.msra.mxu0 %v13675_v55  ;;  %4919 = vmatpush1.msra.mxu1 %v13562_v15  ;;  %v13683_v15 = vld [vmem:[#allocation115_spill] sm:$0xff]  ;;  %v13688_v38 = vld [vmem:[#allocation10_spill] sm:$0xff] }
 0x2cd   : > { %v10520_v12 = vpop.permute.xlu1 %3289  ;;  %4762 = vmatprep.subr.mxu0 %v13676_v5  ;;  %4921 = vmatprep.subr.mxu1 %v13566_v54  ;;  %v3524_v48 = vpop.permute.xlu0 %3523  ;;  %v13685_v54 = vld [vmem:[#allocation22_spill] sm:$0xff]  ;;  %v10558_v5 = vand.u32 4294901760, %v7928_v18 }
 0x2ce   : > { %v3311_v14 = vsel %vm13677_vm10, %v10003_v27, %v10520_v12  ;;  %4681 = vmatprep.mubr.f32.mxu1 %v13678_v9  ;;  %4766 = vmatpush1.msra.mxu0 %v13680_v19  ;;  %v3544_v22 = vsel %vm13682_vm4, %v3522_v29, %v3524_v48  ;;  %v13684_v27 = vand.u32 4294901760, %v9749_v44  ;;  %vm13686_vm14 = vnez %v13685_v54  ;;  %v13695_v48 = vld [vmem:[#allocation89_spill] sm:$0xff]  ;;  %vm13721_vm10 = vmmov %vm13689_vm1 }
 0x2cf   : > { %v3335_v34 = vsel %vm8605_vm5, %v3311_v14, 0.0  ;;  %4923 = vmatpush1.msra.mxu1 %v13681_v61  ;;  %v3568_v46 = vsel %vm13686_vm14, %v3544_v22, 0.0  ;;  %v13690_v44 = vand.u32 4294901760, %v9659_v3  ;;  %13692 = vst [vmem:[#allocation78_spill] sm:$0xff] %v10558_v5  ;;  %v13693_v14 = vand.u32 4294901760, %v9686_v28  ;;  %v3881_v61 = vld [vmem:[#allocation3 + $0x200] sm:$0xff] }
 0x2d0   : > { %3347 = vst [vmem:[#allocation3 + $0x40] sm:$0xff] %v3335_v34  ;;  %4685 = vmatmul.mubr.f32.gmra.mxu1 %v13683_v15  ;;  %4770 = vmatprep.subr.mxu0 %v13684_v27  ;;  %3580 = vst [vmem:[#allocation3 + $0xe8] sm:$0xff] %v3568_v46  ;;  %v13694_v34 = vld [vmem:[#allocation119_spill] sm:$0xff]  ;;  %v13696_v21 = vand.u32 4294901760, %v13695_v48  ;;  %v3852_v22 = vld [vmem:[#allocation3 + $0x2e0] sm:$0xff]  ;;  %v13741_v54 = vand.u32 4294901760, %v10007_v56 }
 0x2d1   : > { %v10541_v52 = vpop.permute.xlu1 %3303  ;;  %4925 = vmatprep.subr.mxu1 %v13573_v49  ;;  %4774 = vmatpush1.msra.mxu0 %v13687_v36  ;;  %v10554_v55 = vpop.permute.xlu0 %3433  ;;  %v13691_v49 = vld [vmem:[#allocation117_spill] sm:$0xff]  ;;  %v13699_v27 = vld [vmem:[#allocation32_spill] sm:$0xff]  ;;  %v13700_v28 = vld [vmem:[#allocation87_spill] sm:$0xff] }
 0x2d2   : > { %v3317_v29 = vsel %vm13689_vm1, %v13688_v38, %v10541_v52  ;;  %4927 = vmatpush1.msra.mxu1 %v13576_v6  ;;  %4778 = vmatprep.subr.mxu0 %v13690_v44  ;;  %v3851_v6 = vld [vmem:[#allocation3 + $0x88] sm:$0xff]  ;;  %v13701_v46 = vand.u32 4294901760, %v13700_v28  ;;  %v13704_v44 = vld [vmem:[#allocation86_spill] sm:$0xff]  ;;  %v13710_v28 = vld [vmem:[#allocation16_spill] sm:$0xff] }
 0x2d3   : > { %v3341_v20 = vsel %vm8605_vm5, %v3317_v29, 0.0  ;;  %4929 = vmatprep.subr.mxu1 %v13579_v60  ;;  %4693 = vmatprep.mubr.f32.mxu1 %v13691_v49  ;;  %v13697_v60 = vld [vmem:[#allocation51_spill] sm:$0xff]  ;;  %v10580_v48 = vand.u32 4294901760, %v3851_v6  ;;  %vm13711_vm9 = vnez %v13710_v28  ;;  %v3857_v56 = vld [vmem:[#allocation3 + $0x180] sm:$0xff]  ;;  %vm13764_vm1 = vmmov %vm13698_vm13 }
 0x2d4   : > { %3353 = vst [vmem:[#allocation3 + $0x168] sm:$0xff] %v3341_v20  ;;  %4782 = vmatpush1.msra.mxu0 %v13693_v14  ;;  %4931 = vmatpush1.msra.mxu1 %v13581_v40  ;;  %v13703_v29 = vld [vmem:[#allocation35_spill] sm:$0xff]  ;;  %v13705_v20 = vand.u32 4294901760, %v13704_v44  ;;  %v13767_v49 = vld [vmem:[#allocation98_spill] sm:$0xff] }
 0x2d5   : > { %v10563_v3 = vpop.permute.xlu1 %3199  ;;  %4697 = vmatmul.mubr.f32.gmra.mxu1 %v13694_v34  ;;  %4786 = vmatprep.subr.mxu0 %v13696_v21  ;;  %v3420_v38 = vpop.permute.xlu0 %3419  ;;  %v7929_v21 = vld [vmem:[#allocation3 + $0x20] sm:$0xff]  ;;  %v13716_v44 = vld [vmem:[#allocation95_spill] sm:$0xff] }
 0x2d6   : > { %v3213_v19 = vsel %vm13698_vm13, %v13697_v60, %v10563_v3  ;;  %4933 = vmatprep.subr.mxu1 %v13699_v27  ;;  %4790 = vmatpush1.msra.mxu0 %v13701_v46  ;;  %v3440_v14 = vsel %vm13706_vm6, %v3418_v58, %v3420_v38  ;;  %v10582_v60 = vand.u32 4294901760, %v7929_v21  ;;  %v10585_v27 = vsub.f32 %v7928_v18, %v10558_v5  ;;  %v13714_v18 = vld [vmem:[#allocation121_spill] sm:$0xff]  ;;  %vm13765_vm13 = vmmov %vm13764_vm1  ;;  %v13766_v34 = vld [vmem:[#allocation43_spill] sm:$0xff] }
 0x2d7   : > { %v3237_v36 = vsel %vm8755_vm0, %v3213_v19, 0.0  ;;  %4935 = vmatpush1.msra.mxu1 %v13703_v29  ;;  %4794 = vmatprep.subr.mxu0 %v13705_v20  ;;  %v13709_v19 = vand.u32 4294901760, %v13595_v50  ;;  %v3464_v46 = vsel %vm13711_vm9, %v3440_v14, 0.0  ;;  %v10592_v29 = vand.u32 4294901760, %v3881_v61 }
 0x2d8   : > { %3249 = vst [vmem:[#allocation3 + $0x70] sm:$0xff] %v3237_v36  ;;  %13707 = vst [vmem:[#allocation67_spill] sm:$0xff] %v10582_v60  ;;  %4937 = vmatprep.subr.mxu1 %v13594_v25  ;;  %v10594_v58 = vand.u32 4294901760, %v3852_v22  ;;  %v13713_v38 = vand.u32 4294901760, %v9866_v53  ;;  %v13717_v20 = vand.u32 4294901760, %v13716_v44  ;;  %v13718_v53 = vld [vmem:[#allocation80_spill] sm:$0xff] }
 0x2d9   : > { %13708 = vst [vmem:[#allocation72_spill] sm:$0xff] %v10585_v27  ;;  %4798 = vmatpush1.msra.mxu0 %v13709_v19  ;;  %13712 = vst [vmem:[#allocation77_spill] sm:$0xff] %v10592_v29  ;;  %v3640_v36 = vpop.permute.xlu1 %3639  ;;  %4939 = vmatpush1.msra.mxu1 %v13596_v0  ;;  %v3292_v0 = vpop.permute.xlu0 %3291  ;;  %v3869_v19 = vld [vmem:[#allocation3 + $0x300] sm:$0xff]  ;;  %v12943_v17 = vand.u32 4294901760, %v10585_v27 }
 0x2da   : > { %4802 = vmatprep.subr.mxu0 %v13713_v38  ;;  %3476 = vst [vmem:[#allocation3 + $0x48] sm:$0xff] %v3464_v46  ;;  %v3653_v25 = vsel %vm13667_vm12, %v13714_v18, %v3640_v36  ;;  %v3654_v50 = vsel %vm13715_vm3, %v3640_v36, %v10478_v10  ;;  %4941 = vmatprep.subr.mxu1 %v13599_v1  ;;  %v13719_v46 = vld [vmem:[#allocation101_spill] sm:$0xff]  ;;  %v13724_v18 = vld [vmem:[#allocation102_spill] sm:$0xff] }
 0x2db   : > { %4806 = vmatpush1.msra.mxu0 %v13717_v20  ;;  %v3678_v14 = vsel %vm13669_vm8, %v3654_v50, 0.0  ;;  %3689 = vst [vmem:[#allocation3 + $0xe0] sm:$0xff] %v3653_v25  ;;  %4943 = vmatpush1.msra.mxu1 %v13718_v53  ;;  %v13720_v38 = vand.u32 4294901760, %v13719_v46  ;;  %v3312_v10 = vsel %vm13721_vm10, %v10520_v12, %v3292_v0  ;;  %v10614_v1 = vsub.f32 %v3851_v6, %v10580_v48  ;;  %v13731_v0 = vld [vmem:[#allocation53_spill] sm:$0xff]  ;;  %vm13732_vm8 = vmmov %vm13682_vm4 }
 0x2dc   : > { %3690 = vst [vmem:[#allocation3 + $0xc8] sm:$0xff] %v3678_v14  ;;  %v10617_v36 = vsub.f32 %v7929_v21, %v10582_v60  ;;  %4945 = vmatprep.subr.mxu1 %v13605_v7  ;;  %v13725_v25 = vand.u32 4294901760, %v13724_v18  ;;  %v10624_v50 = vsub.f32 %v3881_v61, %v10592_v29  ;;  %v3336_v20 = vsel %vm8611_vm11, %v3312_v10, 0.0  ;;  %v13728_v21 = vld [vmem:[#allocation105_spill] sm:$0xff] }
 0x2dd   : > { %4810 = vmatprep.subr.mxu0 %v13720_v38  ;;  %13722 = vst [vmem:[#allocation15_spill] sm:$0xff] %v10614_v1  ;;  %v3536_v12 = vpop.permute.xlu1 %3535  ;;  %v10629_v6 = vsub.f32 %v3852_v22, %v10594_v58  ;;  %4947 = vmatpush1.msra.mxu1 %v13606_v13  ;;  %v13729_v14 = vand.u32 4294901760, %v13728_v21  ;;  %3348 = vst [vmem:[#allocation3 + $0x38] sm:$0xff] %v3336_v20  ;;  %v10634_v7 = vand.u32 4294901760, %v3869_v19  ;;  %v13733_v46 = vld [vmem:[#allocation81_spill] sm:$0xff]  ;;  %v13734_v38 = vld [vmem:[#allocation106_spill] sm:$0xff]  ;;  %v3188_v20 = vpop.permute.xlu0 %3187 }
 0x2de   : > { %13723 = vst [vmem:[#allocation76_spill] sm:$0xff] %v10617_v36  ;;  %4814 = vmatpush1.msra.mxu0 %v13725_v25  ;;  %v3549_v53 = vsel %vm13732_vm8, %v13731_v0, %v3536_v12  ;;  %v3550_v61 = vsel %vm13682_vm4, %v3536_v12, %v10512_v43  ;;  %4949 = vmatprep.subr.mxu1 %v13733_v46  ;;  %v13735_v10 = vand.u32 4294901760, %v13734_v38  ;;  %v13736_v22 = vld [vmem:[#allocation7_spill] sm:$0xff]  ;;  %v13738_v21 = vld [vmem:[#allocation5_spill] sm:$0xff]  ;;  %v12945_v43 = vand.u32 4294901760, %v10614_v1 }
 0x2df   : > { %13727 = vst [vmem:[#allocation79_spill] sm:$0xff] %v10629_v6  ;;  %4818 = vmatprep.subr.mxu0 %v13729_v14  ;;  %13730 = vst [vmem:[#allocation83_spill] sm:$0xff] %v10634_v7  ;;  %v10644_v18 = vand.u32 4294901760, %v13736_v22  ;;  %v3573_v13 = vsel %vm8605_vm5, %v3549_v53, 0.0  ;;  %v3574_v25 = vsel %vm13686_vm14, %v3550_v61, 0.0  ;;  %4951 = vmatpush1.msra.mxu1 %v13738_v21  ;;  %v13739_v14 = vld [vmem:[#allocation108_spill] sm:$0xff]  ;;  %v10658_v23 = vsub.f32 %v10585_v27, %v12943_v17 }
 0x2e0   : > { %4822 = vmatpush1.msra.mxu0 %v13735_v10  ;;  %v13740_v0 = vand.u32 4294901760, %v13739_v14  ;;  %3585 = vst [vmem:[#allocation3 + $0x1b8] sm:$0xff] %v3573_v13  ;;  %3586 = vst [vmem:[#allocation3 + $0x238] sm:$0xff] %v3574_v25  ;;  %v12944_v12 = vand.u32 4294901760, %v10617_v36  ;;  %4953 = vmatprep.subr.mxu1 %v13617_v31  ;;  %v13742_v53 = vld [vmem:[#allocation50_spill] sm:$0xff]  ;;  %v13744_v13 = vand.u32 4294901760, %v9999_v2  ;;  %v10675_v31 = vsub.f32 %v3869_v19, %v10634_v7 }
 0x2e1   : > { %13737 = vst [vmem:[#allocation94_spill] sm:$0xff] %v10644_v18  ;;  %v10664_v61 = vand.u32 4294901760, %v13742_v53  ;;  %v3432_v38 = vpop.permute.xlu1 %3431  ;;  %4955 = vmatpush1.msra.mxu1 %v13619_v41  ;;  %v13745_v25 = vld [vmem:[#allocation55_spill] sm:$0xff]  ;;  %v13747_v14 = vld [vmem:[#allocation37_spill] sm:$0xff]  ;;  %vm13748_vm5 = vmmov %vm13706_vm6  ;;  %v10686_v2 = vsub.f32 %v13736_v22, %v10644_v18  ;;  %v10692_v46 = vpop.permute.xlu0 %3083 }
 0x2e2   : > { %4826 = vmatprep.subr.mxu0 %v13740_v0  ;;  %v10672_v21 = vand.u32 4294901760, %v13745_v25  ;;  %v3445_v0 = vsel %vm13748_vm5, %v13747_v14, %v3432_v38  ;;  %vm13749_vm14 = vmmov %vm13748_vm5  ;;  %v13750_v17 = vld [vmem:[#allocation88_spill] sm:$0xff]  ;;  %v13751_v10 = vld [vmem:[#allocation46_spill] sm:$0xff]  ;;  %v10705_v22 = vsub.f32 %v10617_v36, %v12944_v12  ;;  %vm13824_vm5 = vcmask 908288  }
 0x2e3   : > { %4830 = vmatpush1.msra.mxu0 %v13741_v54  ;;  %13743 = vst [vmem:[#allocation97_spill] sm:$0xff] %v10664_v61  ;;  %v3446_v54 = vsel %vm13749_vm14, %v3432_v38, %v10554_v55  ;;  %4957 = vmatprep.subr.mxu1 %v13750_v17  ;;  %v13752_v41 = vand.u32 4294901760, %v13751_v10  ;;  %v3469_v19 = vsel %vm8556_vm7, %v3445_v0, 0.0  ;;  %v13753_v14 = vld [vmem:[#allocation90_spill] sm:$0xff]  ;;  %v10700_v17 = vsub.f32 %v10614_v1, %v12945_v43  ;;  %v13756_v0 = vld [vmem:[#allocation112_spill] sm:$0xff]  ;;  %vm13789_vm6 = vmmov %vm13721_vm10 }
 0x2e4   : > { %4862 = vmatprep.subr.mxu0 %v13744_v13  ;;  %13746 = vst [vmem:[#allocation100_spill] sm:$0xff] %v10672_v21  ;;  %v3470_v13 = vsel %vm13711_vm9, %v3446_v54, 0.0  ;;  %4959 = vmatpush1.msra.mxu1 %v13753_v14  ;;  %v13754_v55 = vld [vmem:[#allocation110_spill] sm:$0xff]  ;;  %3481 = vst [vmem:[#allocation3 + $0x230] sm:$0xff] %v3469_v19  ;;  %v13757_v54 = vand.u32 4294901760, %v13756_v0  ;;  %v10715_v19 = vand.u32 4294901760, %v3857_v56 }
 0x2e5   : > { %4866 = vmatpush2.msra.mxu0 %v13752_v41  ;;  %v13755_v38 = vand.u32 4294901760, %v13754_v55  ;;  %3482 = vst [vmem:[#allocation3 + $0x2b0] sm:$0xff] %v3470_v13  ;;  %4961 = vmatprep.subr.mxu1 %v13627_v37  ;;  %v10713_v41 = vsub.f32 %v13742_v53, %v10664_v61  ;;  %v13759_v13 = vand.u32 4294901760, %v10624_v50  ;;  %v3186_v55 = vpop.permute.xlu1 %3185  ;;  %v13761_v37 = vld [vmem:[#allocation26_spill] sm:$0xff]  ;;  %v13762_v0 = vld [vmem:[#allocation96_spill] sm:$0xff]  ;;  %v10731_v53 = vsub.f32 %v13745_v25, %v10672_v21  ;;  %v10747_v9 = vpop.permute.xlu0 %2979  ;;  %vm13801_vm10 = vmmov %vm13764_vm1 }
 0x2e6   : > { %13758 = vst [vmem:[#allocation9_spill] sm:$0xff] %v10715_v19  ;;  %4876 = vmatprep.mubr.f32.mxu0 %v13761_v37  ;;  %4963 = vmatpush1.msra.mxu1 %v13762_v0  ;;  %v13763_v43 = vld [vmem:[#allocation58_spill] sm:$0xff]  ;;  %v3208_v10 = vsel %vm13765_vm13, %v3186_v55, %v3188_v20  ;;  %v13770_v20 = vld [vmem:[#allocation99_spill] sm:$0xff]  ;;  %v10773_v40 = vsub.f32 %v3857_v56, %v10715_v19  ;;  %v13787_v36 = vld [vmem:[#allocation64_spill] sm:$0xff] }
 0x2e7   : > { %4870 = vmatprep.subr.mxu0 %v13755_v38  ;;  %v10720_v14 = vsub.f32 %v10624_v50, %v13759_v13  ;;  %v13760_v38 = vand.u32 4294901760, %v10629_v6  ;;  %v3207_v13 = vsel %vm13764_vm1, %v13763_v43, %v3186_v55  ;;  %4965 = vmatprep.subr.mxu1 %v13767_v49  ;;  %v13771_v43 = vld [vmem:[#allocation75_spill] sm:$0xff]  ;;  %v13773_v49 = vld [vmem:[#allocation12_spill] sm:$0xff]  ;;  %v13775_v0 = vld [vmem:[#allocation6_spill] sm:$0xff] }
 0x2e8   : > { %4874 = vmatpush2.msra.mxu0 %v13757_v54  ;;  %v3231_v25 = vsel %vm8755_vm0, %v3207_v13, 0.0  ;;  %v3232_v54 = vsel %vm13711_vm9, %v3208_v10, 0.0  ;;  %4967 = vmatpush1.msra.mxu1 %v13770_v20  ;;  %v10752_v55 = vand.u32 4294901760, %v13771_v43  ;;  %v10755_v45 = vand.u32 4294901760, %v13773_v49  ;;  %13778 = vst [vmem:[#allocation107_spill] sm:$0xff] %v10773_v40  ;;  %v13786_v27 = vld [vmem:[#allocation54_spill] sm:$0xff]  ;;  %vm13838_vm1 = vmmov %vm13824_vm5 }
 0x2e9   : > { %v10725_v12 = vsub.f32 %v10629_v6, %v13760_v38  ;;  %4878 = vmatmul.mubr.f32.vlgmr.msra.gmra.mxu0 %v13766_v34  ;;  %v13768_v38 = vld [vmem:[#allocation57_spill] sm:$0xff]  ;;  %5042 = vmatprep.subr.mxu0 %v10664_v61  ;;  %3243 = vst [vmem:[#allocation3 + $0x2d0] sm:$0xff] %v3231_v25  ;;  %3244 = vst [vmem:[#allocation3 + $0x198] sm:$0xff] %v3232_v54  ;;  %v10763_v20 = vand.u32 4294901760, %v13775_v0  ;;  %v10766_v4 = vpop.permute.xlu1 %3095  ;;  %vm13782_vm0 = vcmask 130048   ;;  %v13783_v25 = vand.u32 4294901760, %v10686_v2 }
 0x2ea   : > { %v10740_v15 = vand.u32 4294901760, %v13768_v38  ;;  %13772 = vst [vmem:[#allocation104_spill] sm:$0xff] %v10752_v55  ;;  %13774 = vst [vmem:[#allocation103_spill] sm:$0xff] %v10755_v45  ;;  %5044 = vmatpush1.msra.mxu0 %v10672_v21  ;;  %4969 = vmatprep.subr.mxu1 %v13640_v35  ;;  %v13777_v54 = vld [vmem:[#allocation49_spill] sm:$0xff]  ;;  %v3109_v26 = vsel %vm13782_vm0, %v13781_v63, %v10766_v4  ;;  %v13784_v13 = vand.u32 4294901760, %v10675_v31  ;;  %v10814_v6 = vld [vmem:[#allocation3 + $0x1d0] sm:$0xff] }
 0x2eb   : > { %13776 = vst [vmem:[#allocation48_spill] sm:$0xff] %v10763_v20  ;;  %5046 = vmatprep.subr.mxu0 %v10644_v18  ;;  %4884 = vmatprep.mubr.f32.mxu0 %v13777_v54  ;;  %v13779_v35 = vld [vmem:[#allocation45_spill] sm:$0xff]  ;;  %v10786_v57 = vsub.f32 %v10686_v2, %v13783_v25  ;;  %v3133_v63 = vsel %vm8730_vm15, %v3109_v26, 0.0  ;;  %v10803_v25 = vsub.f32 %v13771_v43, %v10752_v55  ;;  %vm13797_vm12 = vmmov %vm13782_vm0 }
 0x2ec   : > { %13769 = vst [vmem:[#allocation4_spill] sm:$0xff] %v10740_v15  ;;  %v10776_v10 = vand.u32 4294901760, %v13779_v35  ;;  %4971 = vmatpush1.msra.mxu1 %v13647_v33  ;;  %5048 = vmatpush1.msra.mxu0 %v10592_v29  ;;  %v10790_v56 = vsub.f32 %v13768_v38, %v10740_v15  ;;  %v10795_v39 = vsub.f32 %v10675_v31, %v13784_v13  ;;  %v3306_v33 = vpop.permute.xlu0 %3305  ;;  %v10806_v38 = vand.u32 4294901760, %v13787_v36  ;;  %v10812_v13 = vld [vmem:[#allocation3 + $0x2b8] sm:$0xff]  ;;  %v13791_v29 = vld [vmem:[#allocation41_spill] sm:$0xff]  ;;  %vm13798_vm3 = vmmov %vm13782_vm0 }
 0x2ed   : > { %4886 = vmatmul.mubr.f32.gmra.mxu0 %v13786_v27  ;;  %5001 = vmatprep.subr.mxu1 %v13649_v59  ;;  %v10810_v1 = vsub.f32 %v13773_v49, %v10755_v45  ;;  %3145 = vst [vmem:[#allocation3 + $0x90] sm:$0xff] %v3133_v63  ;;  %v3318_v26 = vsel %vm13789_vm6, %v10541_v52, %v3306_v33  ;;  %v13790_v59 = vand.u32 4294901760, %v10713_v41  ;;  %v10824_v18 = vand.u32 4294901760, %v13791_v29  ;;  %v3082_v21 = vpop.permute.xlu1 %3081  ;;  %v13794_v33 = vld [vmem:[#allocation38_spill] sm:$0xff]  ;;  %vm13843_vm13 = vmmov %vm13838_vm1 }
 0x2ee   : > { %13780 = vst [vmem:[#allocation109_spill] sm:$0xff] %v10776_v10  ;;  %13788 = vst [vmem:[#allocation20_spill] sm:$0xff] %v10806_v38  ;;  %5050 = vmatprep.subr.mxu0 %v10740_v15  ;;  %5003 = vmatpush2.msra.mxu1 %v13652_v30  ;;  %v10828_v49 = vsub.f32 %v13775_v0, %v10763_v20  ;;  %v3342_v63 = vsel %vm8611_vm11, %v3318_v26, 0.0  ;;  %v13793_v30 = vand.u32 4294901760, %v10731_v53  ;;  %v13796_v15 = vld [vmem:[#allocation66_spill] sm:$0xff]  ;;  %v5222_v28 = vand.u32 4294901760, %v10786_v57 }
 0x2ef   : > { %v5209_v43 = vsub.f32 %v10713_v41, %v13790_v59  ;;  %13792 = vst [vmem:[#allocation17_spill] sm:$0xff] %v10824_v18  ;;  %5052 = vmatpush1.msra.mxu0 %v10752_v55  ;;  %5005 = vmatprep.subr.mxu1 %v13654_v47  ;;  %v10838_v59 = vand.u32 4294901760, %v13794_v33  ;;  %3354 = vst [vmem:[#allocation3 + $0x280] sm:$0xff] %v3342_v63  ;;  %v3103_v0 = vsel %vm13797_vm12, %v13796_v15, %v3082_v21  ;;  %v13799_v26 = vld [vmem:[#allocation82_spill] sm:$0xff] }
 0x2f0   : > { %v5215_v52 = vsub.f32 %v10731_v53, %v13793_v30  ;;  %v3104_v61 = vsel %vm13798_vm3, %v3082_v21, %v10692_v46  ;;  %5054 = vmatprep.subr.mxu0 %v10755_v45  ;;  %4892 = vmatprep.mubr.f32.mxu0 %v13799_v26  ;;  %v10848_v55 = vand.u32 4294901760, %v10812_v13  ;;  %v10851_v30 = vand.u32 4294901760, %v10814_v6  ;;  %v3202_v15 = vpop.permute.xlu0 %3201  ;;  %v13802_v21 = vld [vmem:[#allocation92_spill] sm:$0xff] }
 0x2f1   : > { %13795 = vst [vmem:[#allocation18_spill] sm:$0xff] %v10838_v59  ;;  %v3127_v63 = vsel %vm8730_vm15, %v3103_v0, 0.0  ;;  %3140 = vst [vmem:[#allocation3 + $0xd0] sm:$0xff] %v3104_v61  ;;  %5007 = vmatpush2.msra.mxu1 %v13658_v42  ;;  %5009 = vmatprep.mubr.f32.mxu1 %v13761_v37  ;;  %v12978_v46 = vand.u32 4294901760, %v10803_v25  ;;  %v10861_v47 = vsub.f32 %v13787_v36, %v10806_v38  ;;  %v5210_v16 = vand.u32 4294901760, %v5209_v43  ;;  %v2992_v36 = vpop.permute.xlu1 %2991  ;;  %v13803_v43 = vld [vmem:[#allocation65_spill] sm:$0xff] }
 0x2f2   : > { %13800 = vst [vmem:[#allocation39_spill] sm:$0xff] %v10848_v55  ;;  %3139 = vst [vmem:[#allocation3 + $0x338] sm:$0xff] %v3127_v63  ;;  %v3214_v45 = vsel %vm13801_vm10, %v10563_v3, %v3202_v15  ;;  %5056 = vmatpush1.msra.mxu0 %v10634_v7  ;;  %5011 = vmatmul.mubr.f32.vlgmr.msra.gmra.mxu1 %v13766_v34  ;;  %v10869_v42 = vsub.f32 %v13791_v29, %v10824_v18  ;;  %v5216_v3 = vand.u32 4294901760, %v5215_v52  ;;  %vm13804_vm15 = vcmask 138240  }
 0x2f3   : > { %v3238_v0 = vsel %vm13711_vm9, %v3214_v45, 0.0  ;;  %4894 = vmatmul.mubr.f32.gmra.mxu0 %v13802_v21  ;;  %5058 = vmatprep.subr.mxu0 %v10806_v38  ;;  %v3005_v29 = vsel %vm13804_vm15, %v13803_v43, %v2992_v36  ;;  %v13805_v45 = vand.u32 4294901760, %v10790_v56  ;;  %v10887_v52 = vsub.f32 %v13779_v35, %v10776_v10  ;;  %vm13807_vm9 = vmmov %vm13782_vm0 }
 0x2f4   : > { %3250 = vst [vmem:[#allocation3 + $0x2f0] sm:$0xff] %v3238_v0  ;;  %5211 = vmatprep.subr.mxu1 %v5210_v16  ;;  %5060 = vmatpush1.msra.mxu0 %v10824_v18  ;;  %v3029_v15 = vsel %vm8785_vm2, %v3005_v29, 0.0  ;;  %v3098_v0 = vpop.permute.xlu0 %3097  ;;  %v5239_v16 = vsub.f32 %v10803_v25, %v12978_v46  ;;  %v10898_v43 = vsub.f32 %v13794_v33, %v10838_v59  ;;  %v13808_v29 = vld [vmem:[#allocation36_spill] sm:$0xff]  ;;  %v13810_v33 = vand.u32 4294901760, %v10773_v40  ;;  %vm13815_vm8 = vmmov %vm13804_vm15 }
 0x2f5   : > { %v5233_v61 = vsub.f32 %v10790_v56, %v13805_v45  ;;  %5217 = vmatpush1.msra.mxu1 %v5216_v3  ;;  %5062 = vmatprep.subr.mxu0 %v10763_v20  ;;  %3041 = vst [vmem:[#allocation3 + $0x210] sm:$0xff] %v3029_v15  ;;  %v3110_v35 = vsel %vm13807_vm9, %v10766_v4, %v3098_v0  ;;  %v13809_v3 = vand.u32 4294901760, %v10810_v1  ;;  %v2978_v4 = vpop.permute.xlu1 %2977  ;;  %vm13816_vm4 = vmmov %vm13815_vm8  ;;  %v13818_v18 = vld [vmem:[#allocation8_spill] sm:$0xff]  ;;  %v12991_v38 = vand.u32 4294901760, %v10887_v52 }
 0x2f6   : > { %5223 = vmatprep.subr.mxu1 %v5222_v28  ;;  %4900 = vmatprep.mubr.f32.mxu0 %v13808_v29  ;;  %v10909_v46 = vsub.f32 %v10814_v6, %v10851_v30  ;;  %v10914_v15 = vsub.f32 %v10773_v40, %v13810_v33  ;;  %3146 = vst [vmem:[#allocation3 + $0x248] sm:$0xff] %v3110_v35  ;;  %v13811_v28 = vand.u32 4294901760, %v10828_v49  ;;  %v13814_v6 = vld [vmem:[#allocation84_spill] sm:$0xff]  ;;  %v13817_v35 = vand.u32 4294901760, %v10720_v14 }
 0x2f7   : > { %v5245_v45 = vsub.f32 %v10810_v1, %v13809_v3  ;;  %5017 = vmatprep.mubr.f32.mxu1 %v13777_v54  ;;  %5064 = vmatpush1.msra.mxu0 %v10715_v19  ;;  %v13812_v3 = vld [vmem:[#allocation44_spill] sm:$0xff]  ;;  %v2999_v57 = vsel %vm13815_vm8, %v13814_v6, %v2978_v4  ;;  %v3000_v33 = vsel %vm13816_vm4, %v2978_v4, %v10747_v9  ;;  %v5234_v19 = vand.u32 4294901760, %v5233_v61 }
 0x2f8   : > { %v10921_v0 = vsub.f32 %v10828_v49, %v13811_v28  ;;  %v10924_v20 = vand.u32 4294901760, %v13812_v3  ;;  %5229 = vmatpush1.msra.mxu1 %v13817_v35  ;;  %4902 = vmatmul.mubr.f32.gmra.mxu0 %v13818_v18  ;;  %v3023_v28 = vsel %vm8785_vm2, %v2999_v57, 0.0  ;;  %v3024_v7 = vsel %vm8611_vm11, %v3000_v33, 0.0  ;;  %v2994_v40 = vpop.permute.xlu0 %2993  ;;  %vm13820_vm2 = vmmov %vm13816_vm4  ;;  %v13822_v33 = vld [vmem:[#allocation14_spill] sm:$0xff] }
 0x2f9   : > { %5019 = vmatmul.mubr.f32.gmra.mxu1 %v13786_v27  ;;  %5066 = vmatprep.subr.mxu0 %v10594_v58  ;;  %v5240_v9 = vand.u32 4294901760, %v5239_v16  ;;  %v13819_v14 = vand.u32 4294901760, %v10861_v47  ;;  %v10945_v61 = vsub.f32 %v10812_v13, %v10848_v55  ;;  %3035 = vst [vmem:[#allocation3 + $0x2c8] sm:$0xff] %v3023_v28  ;;  %3036 = vst [vmem:[#allocation3 + $0x8] sm:$0xff] %v3024_v7  ;;  %v5246_v57 = vand.u32 4294901760, %v5245_v45  ;;  %v3744_v13 = vpop.permute.xlu1 %3743  ;;  %v13825_v45 = vld [vmem:[#allocation40_spill] sm:$0xff] }
 0x2fa   : > { %13813 = vst [vmem:[#allocation62_spill] sm:$0xff] %v10924_v20  ;;  %v3006_v63 = vsel %vm13820_vm2, %v2992_v36, %v2994_v40  ;;  %5235 = vmatprep.subr.mxu1 %v5234_v19  ;;  %5068 = vmatpush1.msra.mxu0 %v10580_v48  ;;  %v13821_v6 = vand.u32 4294901760, %v10869_v42  ;;  %v10953_v35 = vand.u32 4294901760, %v13822_v33  ;;  %v5276_v7 = vand.u32 4294901760, %v10914_v15  ;;  %v13831_v40 = vld [vmem:[#allocation73_spill] sm:$0xff] }
 0x2fb   : > { %v5257_v4 = vsub.f32 %v10861_v47, %v13819_v14  ;;  %v3030_v14 = vsel %vm8611_vm11, %v3006_v63, 0.0  ;;  %5241 = vmatpush1.msra.mxu1 %v5240_v9  ;;  %5070 = vmatprep.subr.mxu0 %v10582_v60  ;;  %v10961_v19 = vsub.f32 %v13812_v3, %v10924_v20  ;;  %v3757_v36 = vsel %vm13824_vm5, %v10431_v51, %v3744_v13  ;;  %v13827_v9 = vld [vmem:[#allocation42_spill] sm:$0xff]  ;;  %vm13830_vm11 = vmmov %vm13824_vm5 }
 0x2fc   : > { %v5263_v16 = vsub.f32 %v10869_v42, %v13821_v6  ;;  %13823 = vst [vmem:[#allocation22_spill] sm:$0xff] %v10953_v35  ;;  %3042 = vst [vmem:[#allocation3 + $0x2e8] sm:$0xff] %v3030_v14  ;;  %5247 = vmatprep.subr.mxu1 %v5246_v57  ;;  %5025 = vmatprep.mubr.f32.mxu1 %v13799_v26  ;;  %v5270_v44 = vand.u32 4294901760, %v10921_v0  ;;  %v10969_v28 = vand.u32 4294901760, %v13825_v45  ;;  %v10972_v15 = vand.u32 4294901760, %v13827_v9  ;;  %v3746_v63 = vpop.permute.xlu0 %3745 }
 0x2fd   : > { %v3781_v3 = vsel %vm8556_vm7, %v3757_v36, 0.0  ;;  %5072 = vmatpush1.msra.mxu0 %v10558_v5  ;;  %v13829_v6 = vand.u32 4294901760, %v10795_v39  ;;  %v5258_v51 = vand.u32 4294901760, %v5257_v4  ;;  %v10982_v0 = vsub.f32 %v10887_v52, %v12991_v38  ;;  %5027 = vmatmul.mubr.f32.gmra.mxu1 %v13802_v21  ;;  %v13833_v4 = vld [vmem:[#allocation19_spill] sm:$0xff]  ;;  %v3730_v38 = vpop.permute.xlu1 %3729 }
 0x2fe   : > { %13826 = vst [vmem:[#allocation10_spill] sm:$0xff] %v10969_v28  ;;  %13828 = vst [vmem:[#allocation89_spill] sm:$0xff] %v10972_v15  ;;  %v3758_v14 = vsel %vm13830_vm11, %v3744_v13, %v3746_v63  ;;  %5074 = vmatprep.subr.mxu0 %v10776_v10  ;;  %v5264_v36 = vand.u32 4294901760, %v5263_v16  ;;  %v10989_v5 = vand.u32 4294901760, %v13831_v40  ;;  %v10993_v39 = vsub.f32 %v13822_v33, %v10953_v35  ;;  %v13835_v13 = vld [vmem:[#allocation68_spill] sm:$0xff] }
 0x2ff   : > { %5253 = vmatpush1.msra.mxu1 %v13829_v6  ;;  %3793 = vst [vmem:[#allocation3 + $0x270] sm:$0xff] %v3781_v3  ;;  %vm13834_vm14 = vnez %v13833_v4  ;;  %5076 = vmatpush1.msra.mxu0 %v10838_v59  ;;  %v10999_v3 = vand.u32 4294901760, %v13835_v13  ;;  %v13837_v63 = vand.u32 4294901760, %v10898_v43  ;;  %v3751_v33 = vsel %vm13838_vm1, %v10457_v62, %v3730_v38 }
 0x300   : > { %13832 = vst [vmem:[#allocation51_spill] sm:$0xff] %v10989_v5  ;;  %v3782_v6 = vsel %vm13834_vm14, %v3758_v14, 0.0  ;;  %5259 = vmatprep.subr.mxu1 %v5258_v51  ;;  %5078 = vmatprep.subr.mxu0 %v10848_v55  ;;  %v11010_v51 = vsub.f32 %v13827_v9, %v10972_v15  ;;  %v13839_v14 = vld [vmem:[#allocation70_spill] sm:$0xff]  ;;  %v11017_v10 = vsub.f32 %v13825_v45, %v10969_v28  ;;  %v13841_v62 = vand.u32 4294901760, %v10945_v61  ;;  %v13842_v9 = vld [vmem:[#allocation31_spill] sm:$0xff] }
 0x301   : > { %13836 = vst [vmem:[#allocation32_spill] sm:$0xff] %v10999_v3  ;;  %v5311_v16 = vsub.f32 %v10898_v43, %v13837_v63  ;;  %3794 = vst [vmem:[#allocation3 + $0x150] sm:$0xff] %v3782_v6  ;;  %5265 = vmatpush1.msra.mxu1 %v5264_v36  ;;  %v11013_v59 = vand.u32 4294901760, %v13839_v14  ;;  %v3775_v6 = vsel %vm8556_vm7, %v3751_v33, 0.0  ;;  %v3732_v63 = vpop.permute.xlu0 %3731  ;;  %5033 = vmatprep.mubr.f32.mxu1 %v13808_v29  ;;  %v11026_v57 = vand.u32 4294901760, %v13842_v9  ;;  %v13851_v55 = vld [vmem:[#allocation34_spill] sm:$0xff] }
 0x302   : > { %5271 = vmatprep.subr.mxu1 %v5270_v44  ;;  %v5317_v36 = vsub.f32 %v10945_v61, %v13841_v62  ;;  %3787 = vst [vmem:[#allocation3 + $0x350] sm:$0xff] %v3775_v6  ;;  %v3752_v45 = vsel %vm13843_vm13, %v3730_v38, %v3732_v63  ;;  %5080 = vmatpush1.msra.mxu0 %v10851_v30  ;;  %v11032_v33 = vand.u32 4294901760, %v13844_v24  ;;  %v5306_v38 = vand.u32 4294901760, %v10982_v0  ;;  %v13849_v44 = vld [vmem:[#allocation71_spill] sm:$0xff] }
 0x303   : > { %13840 = vst [vmem:[#allocation87_spill] sm:$0xff] %v11013_v59  ;;  %5277 = vmatpush1.msra.mxu1 %v5276_v7  ;;  %v11037_v60 = vsub.f32 %v13831_v40, %v10989_v5  ;;  %v3776_v62 = vsel %vm13834_vm14, %v3752_v45, 0.0  ;;  %5082 = vmatprep.subr.mxu0 %v10953_v35  ;;  %v11046_v7 = vsub.f32 %v13835_v13, %v10999_v3  ;;  %v13848_v6 = vand.u32 4294901760, %v10909_v46 }
 0x304   : > { %13845 = vst [vmem:[#allocation24_spill] sm:$0xff] %v11032_v33  ;;  %5035 = vmatmul.mubr.f32.gmra.mxu1 %v13818_v18  ;;  %v11052_v40 = vand.u32 4294901760, %v13849_v44  ;;  %3788 = vst [vmem:[#allocation3 + $0x1e0] sm:$0xff] %v3776_v62  ;;  %v13850_v4 = vand.u32 4294901760, %v10725_v12  ;;  %5084 = vmatpush1.msra.mxu0 %v10924_v20  ;;  %v5312_v45 = vand.u32 4294901760, %v5311_v16  ;;  %v11058_v0 = vand.u32 4294901760, %v13851_v55 }
 0x305   : > { %13846 = vst [vmem:[#allocation35_spill] sm:$0xff] %v11037_v60  ;;  %13847 = vst [vmem:[#allocation86_spill] sm:$0xff] %v11046_v7  ;;  %v5323_v63 = vsub.f32 %v10909_v46, %v13848_v6  ;;  %v11063_v35 = vsub.f32 %v13839_v14, %v11013_v59  ;;  %v13852_v6 = vand.u32 4294901760, %v10700_v17  ;;  %5086 = vmatprep.subr.mxu0 %v10969_v28  ;;  %v5318_v62 = vand.u32 4294901760, %v5317_v36  ;;  %v13857_v36 = vld [vmem:[#allocation33_spill] sm:$0xff] }
 0x306   : > { %5283 = vmatprep.subr.mxu1 %v13850_v4  ;;  %v11070_v12 = vsub.f32 %v13842_v9, %v11026_v57  ;;  %v13854_v16 = vand.u32 4294901760, %v10961_v19  ;;  %v13855_v20 = vand.u32 4294901760, %v10705_v22  ;;  %5088 = vmatpush1.msra.mxu0 %v10972_v15  ;;  %v13856_v17 = vand.u32 4294901760, %v10993_v39 }
 0x307   : > { %5289 = vmatpush1.msra.mxu1 %v13852_v6  ;;  %v11083_v6 = vand.u32 4294901760, %v13857_v36  ;;  %v11088_v28 = vsub.f32 %v13844_v24, %v11032_v33  ;;  %5090 = vmatprep.subr.mxu0 %v10989_v5  ;;  %v5324_v22 = vand.u32 4294901760, %v5323_v63  ;;  %v13862_v24 = vand.u32 4294901760, %v11017_v10 }
 0x308   : > { %13853 = vst [vmem:[#allocation16_spill] sm:$0xff] %v11070_v12  ;;  %v5335_v4 = vsub.f32 %v10961_v19, %v13854_v16  ;;  %5295 = vmatprep.subr.mxu1 %v13855_v20  ;;  %v5329_v14 = vsub.f32 %v10993_v39, %v13856_v17  ;;  %v13859_v16 = vand.u32 4294901760, %v10658_v23  ;;  %v11095_v20 = vsub.f32 %v13849_v44, %v11052_v40 }
 0x309   : > { %13858 = vst [vmem:[#allocation121_spill] sm:$0xff] %v11088_v28  ;;  %v11098_v17 = vand.u32 4294901760, %v10443_v8  ;;  %5092 = vmatpush1.msra.mxu0 %v10999_v3  ;;  %v5341_v23 = vsub.f32 %v11017_v10, %v13862_v24  ;;  %v11111_v44 = vsub.f32 %v13851_v55, %v11058_v0  ;;  %v11118_v5 = vand.u32 4294901760, %v10468_v32  ;;  %5451 = vmatprep.mubr.f32.mxu1 %v13761_v37  ;;  %v13910_v37 = vld [vmem:[#allocation22_spill] sm:$0xff] }
 0x30a   : > { %5301 = vmatpush1.msra.mxu1 %v13859_v16  ;;  %13860 = vst [vmem:[#allocation95_spill] sm:$0xff] %v11095_v20  ;;  %v13863_v16 = vld [vmem:[#allocation74_spill] sm:$0xff]  ;;  %5094 = vmatprep.subr.mxu0 %v11013_v59  ;;  %v5336_v13 = vand.u32 4294901760, %v5335_v4  ;;  %v5330_v63 = vand.u32 4294901760, %v5329_v14  ;;  %v11124_v55 = vsub.f32 %v13857_v36, %v11083_v6  ;;  %v11135_v24 = vand.u32 4294901760, %v10455_v11 }
 0x30b   : > { %13861 = vst [vmem:[#allocation80_spill] sm:$0xff] %v11098_v17  ;;  %5307 = vmatprep.subr.mxu1 %v5306_v38  ;;  %v11106_v9 = vand.u32 4294901760, %v13863_v16  ;;  %13864 = vst [vmem:[#allocation101_spill] sm:$0xff] %v11111_v44  ;;  %v13865_v38 = vand.u32 4294901760, %v11010_v51  ;;  %5096 = vmatpush1.msra.mxu0 %v11026_v57  ;;  %v11140_v36 = vsub.f32 %v10443_v8, %v11098_v17  ;;  %v13870_v59 = vand.u32 4294901760, %v11063_v35 }
 0x30c   : > { %5313 = vmatpush1.msra.mxu1 %v5312_v45  ;;  %13866 = vst [vmem:[#allocation102_spill] sm:$0xff] %v11118_v5  ;;  %13867 = vst [vmem:[#allocation21_spill] sm:$0xff] %v11124_v55  ;;  %v13868_v45 = vand.u32 4294901760, %v11037_v60  ;;  %5098 = vmatprep.subr.mxu0 %v11032_v33  ;;  %v13871_v8 = vand.u32 4294901760, %v11070_v12 }
 0x30d   : > { %v5347_v3 = vsub.f32 %v11010_v51, %v13865_v38  ;;  %5319 = vmatprep.subr.mxu1 %v5318_v62  ;;  %v13869_v38 = vand.u32 4294901760, %v11046_v7  ;;  %5100 = vmatpush1.msra.mxu0 %v11052_v40 }
 0x30e   : > { %v5353_v4 = vsub.f32 %v11037_v60, %v13868_v45  ;;  %5325 = vmatpush1.msra.mxu1 %v5324_v22  ;;  %v5342_v45 = vand.u32 4294901760, %v5341_v23  ;;  %v11145_v22 = vsub.f32 %v13863_v16, %v11106_v9  ;;  %5102 = vmatprep.subr.mxu0 %v11058_v0  ;;  %v11157_v23 = vsub.f32 %v10468_v32, %v11118_v5 }
 0x30f   : > { %v5359_v62 = vsub.f32 %v11046_v7, %v13869_v38  ;;  %5331 = vmatprep.subr.mxu1 %v5330_v63  ;;  %v5365_v38 = vsub.f32 %v11063_v35, %v13870_v59  ;;  %v5348_v14 = vand.u32 4294901760, %v5347_v3  ;;  %v5371_v63 = vsub.f32 %v11070_v12, %v13871_v8  ;;  %5104 = vmatpush1.msra.mxu0 %v11083_v6 }
 0x310   : > { %5337 = vmatpush1.msra.mxu1 %v5336_v13  ;;  %v5354_v16 = vand.u32 4294901760, %v5353_v4  ;;  %v13872_v59 = vand.u32 4294901760, %v11088_v28  ;;  %5134 = vmatprep.subr.mxu0 %v11098_v17  ;;  %v11167_v8 = vsub.f32 %v10455_v11, %v11135_v24  ;;  %v13874_v32 = vand.u32 4294901760, %v11095_v20  ;;  %v13877_v4 = vld [vmem:[#allocation29_spill] sm:$0xff] }
 0x311   : > { %5343 = vmatprep.subr.mxu1 %v5342_v45  ;;  %v5360_v3 = vand.u32 4294901760, %v5359_v62  ;;  %5136 = vmatpush2.msra.mxu0 %v11106_v9  ;;  %v13875_v13 = vand.u32 4294901760, %v11111_v44  ;;  %v5372_v11 = vand.u32 4294901760, %v5371_v63  ;;  %v13878_v62 = vand.u32 4294901760, %v11140_v36 }
 0x312   : > { %v5377_v33 = vsub.f32 %v11088_v28, %v13872_v59  ;;  %5349 = vmatpush1.msra.mxu1 %v5348_v14  ;;  %13873 = vst [vmem:[#allocation105_spill] sm:$0xff] %v11167_v8  ;;  %v5383_v45 = vsub.f32 %v11095_v20, %v13874_v32  ;;  %v5366_v59 = vand.u32 4294901760, %v5365_v38  ;;  %5138 = vmatprep.subr.mxu0 %v11118_v5  ;;  %v13018_v63 = vand.u32 4294901760, %v11167_v8  ;;  %v13879_v5 = vld [vmem:[#allocation91_spill] sm:$0xff] }
 0x313   : > { %5355 = vmatprep.subr.mxu1 %v5354_v16  ;;  %v5389_v14 = vsub.f32 %v11111_v44, %v13875_v13  ;;  %5140 = vmatpush2.msra.mxu0 %v11135_v24  ;;  %v13876_v16 = vand.u32 4294901760, %v11124_v55 }
 0x314   : > { %5361 = vmatpush1.msra.mxu1 %v5360_v3  ;;  %v5378_v32 = vand.u32 4294901760, %v5377_v33  ;;  %5146 = vmatprep.mubr.f32.mxu0 %v13877_v4  ;;  %v5384_v13 = vand.u32 4294901760, %v5383_v45  ;;  %v5429_v3 = vsub.f32 %v11140_v36, %v13878_v62  ;;  %v13880_v33 = vand.u32 4294901760, %v11145_v22  ;;  %v13902_v4 = vld [vmem:[#allocation17_spill] sm:$0xff] }
 0x315   : > { %5367 = vmatprep.subr.mxu1 %v5366_v59  ;;  %v5395_v38 = vsub.f32 %v11124_v55, %v13876_v16  ;;  %5152 = vmatmul.mubr.f32.vlgmr.msra.gmra.mxu0 %v13879_v5  ;;  %v5390_v59 = vand.u32 4294901760, %v5389_v14  ;;  %v13882_v16 = vld [vmem:[#allocation114_spill] sm:$0xff]  ;;  %v13900_v5 = vld [vmem:[#allocation83_spill] sm:$0xff] }
 0x316   : > { %5373 = vmatpush1.msra.mxu1 %v5372_v11  ;;  %v5435_v17 = vsub.f32 %v11145_v22, %v13880_v33  ;;  %5485 = vmatprep.subr.mxu0 %v10713_v41  ;;  %v13881_v11 = vand.u32 4294901760, %v11157_v23  ;;  %v5430_v14 = vand.u32 4294901760, %v5429_v3  ;;  %v13883_v33 = vld [vmem:[#allocation11_spill] sm:$0xff]  ;;  %v13884_v3 = vld [vmem:[#allocation118_spill] sm:$0xff] }
 0x317   : > { %5379 = vmatprep.subr.mxu1 %v5378_v32  ;;  %5488 = vmatpush1.msra.mxu0 %v10731_v53  ;;  %v5396_v62 = vand.u32 4294901760, %v5395_v38  ;;  %v5447_v32 = vsub.f32 %v11167_v8, %v13018_v63  ;;  %v13894_v63 = vld [vmem:[#allocation4_spill] sm:$0xff] }
 0x318   : > { %5385 = vmatpush1.msra.mxu1 %v5384_v13  ;;  %v5441_v45 = vsub.f32 %v11157_v23, %v13881_v11  ;;  %5491 = vmatprep.subr.mxu0 %v10686_v2  ;;  %v5436_v13 = vand.u32 4294901760, %v5435_v17  ;;  %v13885_v17 = vld [vmem:[#allocation120_spill] sm:$0xff] }
 0x319   : > { %5391 = vmatprep.subr.mxu1 %v5390_v59  ;;  %5162 = vmatprep.mubr.f32.mxu0 %v13882_v16  ;;  %v5448_v38 = vand.u32 4294901760, %v5447_v32  ;;  %v13886_v59 = vld [vmem:[#allocation97_spill] sm:$0xff]  ;;  %v13890_v32 = vld [vmem:[#allocation107_spill] sm:$0xff]  ;;  %v13899_v16 = vld [vmem:[#allocation72_spill] sm:$0xff] }
 0x31a   : > { %5397 = vmatpush1.msra.mxu1 %v5396_v62  ;;  %5494 = vmatpush1.msra.mxu0 %v10624_v50  ;;  %v5442_v11 = vand.u32 4294901760, %v5441_v45  ;;  %v13887_v45 = vld [vmem:[#allocation100_spill] sm:$0xff]  ;;  %v13888_v62 = vld [vmem:[#allocation94_spill] sm:$0xff] }
 0x31b   : > { %5168 = vmatmul.mubr.f32.gmra.mxu0 %v13883_v33  ;;  %5431 = vmatprep.subr.mxu1 %v5430_v14  ;;  %v13889_v14 = vld [vmem:[#allocation69_spill] sm:$0xff]  ;;  %v13897_v33 = vld [vmem:[#allocation76_spill] sm:$0xff] }
 0x31c   : > { %5497 = vmatprep.subr.mxu0 %v10790_v56  ;;  %5437 = vmatpush2.msra.mxu1 %v5436_v13  ;;  %v13891_v13 = vld [vmem:[#allocation77_spill] sm:$0xff] }
 0x31d   : > { %5500 = vmatpush1.msra.mxu0 %v10803_v25  ;;  %5443 = vmatprep.subr.mxu1 %v5442_v11  ;;  %v13892_v11 = vld [vmem:[#allocation59_spill] sm:$0xff] }
 0x31e   : > { %5503 = vmatprep.subr.mxu0 %v10810_v1  ;;  %5178 = vmatprep.mubr.f32.mxu0 %v13884_v3  ;;  %v13896_v3 = vld [vmem:[#allocation104_spill] sm:$0xff] }
 0x31f   : > { %5449 = vmatpush2.msra.mxu1 %v5448_v38  ;;  %5506 = vmatpush1.msra.mxu0 %v10675_v31  ;;  %v13893_v38 = vld [vmem:[#allocation79_spill] sm:$0xff] }
 0x320   : > { %5453 = vmatmul.mubr.f32.vlgmr.msra.gmra.mxu1 %v13766_v34  ;;  %5184 = vmatmul.mubr.f32.gmra.mxu0 %v13885_v17  ;;  %v13895_v17 = vld [vmem:[#allocation15_spill] sm:$0xff] }
 0x321   : > { %5509 = vmatprep.subr.mxu0 %v10861_v47  ;;  %5661 = vmatprep.subr.mxu1 %v13886_v59  ;;  %v13909_v34 = vld [vmem:[#allocation39_spill] sm:$0xff] }
 0x322   : > { %5512 = vmatpush1.msra.mxu0 %v10869_v42  ;;  %5663 = vmatpush1.msra.mxu1 %v13887_v45 }
 0x323   : > { %5515 = vmatprep.subr.mxu0 %v10828_v49  ;;  %5665 = vmatprep.subr.mxu1 %v13888_v62 }
 0x324   : > { %5194 = vmatprep.mubr.f32.mxu0 %v13889_v14  ;;  %5459 = vmatprep.mubr.f32.mxu1 %v13777_v54  ;;  %v13898_v14 = vld [vmem:[#allocation103_spill] sm:$0xff]  ;;  %v13907_v54 = vld [vmem:[#allocation109_spill] sm:$0xff] }
 0x325   : > { %5518 = vmatpush1.msra.mxu0 %v13890_v32  ;;  %5667 = vmatpush1.msra.mxu1 %v13891_v13 }
 0x326   : > { %5200 = vmatmul.mubr.f32.gmra.mxu0 %v13892_v11  ;;  %5461 = vmatmul.mubr.f32.gmra.mxu1 %v13786_v27  ;;  %v13901_v11 = vld [vmem:[#allocation20_spill] sm:$0xff] }
 0x327   : > { %5521 = vmatprep.subr.mxu0 %v13893_v38  ;;  %5669 = vmatprep.subr.mxu1 %v13894_v63  ;;  %v13903_v27 = vld [vmem:[#allocation48_spill] sm:$0xff] }
 0x328   : > { %5524 = vmatpush1.msra.mxu0 %v13895_v17  ;;  %5671 = vmatpush1.msra.mxu1 %v13896_v3 }
 0x329   : > { %5527 = vmatprep.subr.mxu0 %v13897_v33  ;;  %5673 = vmatprep.subr.mxu1 %v13898_v14 }
 0x32a   : > { %5467 = vmatprep.mubr.f32.mxu1 %v13799_v26  ;;  %5530 = vmatpush1.msra.mxu0 %v13899_v16  ;;  %v13904_v26 = vld [vmem:[#allocation9_spill] sm:$0xff] }
 0x32b   : > { %5675 = vmatpush1.msra.mxu1 %v13900_v5  ;;  %5533 = vmatprep.subr.mxu0 %v10887_v52 }
 0x32c   : > { %5469 = vmatmul.mubr.f32.gmra.mxu1 %v13802_v21  ;;  %5677 = vmatprep.subr.mxu1 %v13901_v11  ;;  %v13905_v21 = vld [vmem:[#allocation67_spill] sm:$0xff] }
 0x32d   : > { %5536 = vmatpush1.msra.mxu0 %v10898_v43  ;;  %5679 = vmatpush1.msra.mxu1 %v13902_v4 }
 0x32e   : > { %5539 = vmatprep.subr.mxu0 %v10945_v61  ;;  %5681 = vmatprep.subr.mxu1 %v13903_v27 }
 0x32f   : > { %5475 = vmatprep.mubr.f32.mxu1 %v13808_v29  ;;  %5542 = vmatpush1.msra.mxu0 %v10909_v46  ;;  %v13906_v29 = vld [vmem:[#allocation78_spill] sm:$0xff] }
 0x330   : > { %5683 = vmatpush1.msra.mxu1 %v13904_v26  ;;  %5545 = vmatprep.subr.mxu0 %v10993_v39 }
 0x331   : > { %5477 = vmatmul.mubr.f32.gmra.mxu1 %v13818_v18  ;;  %5685 = vmatprep.subr.mxu1 %v10594_v58  ;;  %v13908_v18 = vld [vmem:[#allocation18_spill] sm:$0xff] }
 0x332   : > { %5548 = vmatpush1.msra.mxu0 %v10961_v19  ;;  %5687 = vmatpush1.msra.mxu1 %v10580_v48 }
 0x333   : > { %5551 = vmatprep.subr.mxu0 %v11017_v10  ;;  %5689 = vmatprep.subr.mxu1 %v13905_v21 }
 0x334   : > { %5554 = vmatpush1.msra.mxu0 %v11010_v51  ;;  %5691 = vmatpush1.msra.mxu1 %v13906_v29 }
 0x335   : > { %5557 = vmatprep.subr.mxu0 %v11037_v60  ;;  %5693 = vmatprep.subr.mxu1 %v13907_v54  ;;  %v13911_v60 = vld [vmem:[#allocation62_spill] sm:$0xff] }
 0x336   : > { %5560 = vmatpush1.msra.mxu0 %v11046_v7  ;;  %5695 = vmatpush1.msra.mxu1 %v13908_v18  ;;  %v13912_v7 = vld [vmem:[#allocation10_spill] sm:$0xff] }
 0x337   : > { %5563 = vmatprep.subr.mxu0 %v11063_v35  ;;  %5697 = vmatprep.subr.mxu1 %v13909_v34 }
 0x338   : > { %5566 = vmatpush1.msra.mxu0 %v11070_v12  ;;  %5699 = vmatpush1.msra.mxu1 %v10851_v30  ;;  %v13913_v12 = vld [vmem:[#allocation51_spill] sm:$0xff] }
 0x339   : > { %5569 = vmatprep.subr.mxu0 %v11088_v28  ;;  %5701 = vmatprep.subr.mxu1 %v13910_v37  ;;  %v13914_v28 = vld [vmem:[#allocation32_spill] sm:$0xff] }
 0x33a   : > { %5572 = vmatpush1.msra.mxu0 %v11095_v20  ;;  %5703 = vmatpush1.msra.mxu1 %v13911_v60  ;;  %v13915_v20 = vld [vmem:[#allocation87_spill] sm:$0xff] }
 0x33b   : > { %5575 = vmatprep.subr.mxu0 %v11111_v44  ;;  %5705 = vmatprep.subr.mxu1 %v13912_v7  ;;  %v13916_v44 = vld [vmem:[#allocation27_spill] sm:$0xff] }
 0x33c   : > { %5578 = vmatpush1.msra.mxu0 %v11124_v55  ;;  %5707 = vmatpush1.msra.mxu1 %v10972_v15  ;;  %v13917_v55 = vld [vmem:[#allocation47_spill] sm:$0xff]  ;;  %v13918_v15 = vld [vmem:[#allocation24_spill] sm:$0xff] }
 0x33d   : > { %5609 = vmatprep.subr.mxu0 %v11140_v36  ;;  %5709 = vmatprep.subr.mxu1 %v13913_v12  ;;  %v13919_v12 = vand.u32 4294901760, %v10713_v41  ;;  %v13925_v41 = vld [vmem:[#allocation80_spill] sm:$0xff] }
 0x33e   : > { %5612 = vmatpush2.msra.mxu0 %v11145_v22  ;;  %5711 = vmatpush1.msra.mxu1 %v13914_v28  ;;  %v13920_v28 = vand.u32 4294901760, %v10731_v53  ;;  %v13927_v53 = vand.u32 4294901760, %v10803_v25  ;;  %v13935_v25 = vand.u32 4294901760, %v10861_v47  ;;  %v13941_v47 = vld [vmem:[#allocation30_spill] sm:$0xff] }
 0x33f   : > { %5615 = vmatprep.subr.mxu0 %v11157_v23  ;;  %5713 = vmatprep.subr.mxu1 %v13915_v20 }
 0x340   : > { %5618 = vmatpush2.msra.mxu0 %v11167_v8  ;;  %5621 = vmatprep.mubr.f32.mxu0 %v13916_v44  ;;  %v13921_v8 = vand.u32 4294901760, %v10686_v2  ;;  %v13922_v44 = vld [vmem:[#allocation56_spill] sm:$0xff]  ;;  %v13928_v2 = vld [vmem:[#allocation102_spill] sm:$0xff] }
 0x341   : > { %5715 = vmatpush1.msra.mxu1 %v11026_v57  ;;  %5624 = vmatmul.mubr.f32.vlgmr.msra.gmra.mxu0 %v13917_v55  ;;  %v13923_v55 = vand.u32 4294901760, %v10624_v50  ;;  %v13931_v50 = vld [vmem:[#allocation28_spill] sm:$0xff] }
 0x342   : > { %5717 = vmatprep.subr.mxu1 %v13918_v15  ;;  %5812 = vmatprep.subr.mxu0 %v13919_v12  ;;  %v13924_v15 = vld [vmem:[#allocation61_spill] sm:$0xff]  ;;  %v13926_v12 = vand.u32 4294901760, %v10790_v56  ;;  %v13933_v56 = vld [vmem:[#allocation52_spill] sm:$0xff] }
 0x343   : > { %5719 = vmatpush1.msra.mxu1 %v11052_v40  ;;  %5816 = vmatpush1.msra.mxu0 %v13920_v28  ;;  %v13929_v28 = vand.u32 4294901760, %v10810_v1  ;;  %v13936_v1 = vand.u32 4294901760, %v10869_v42  ;;  %v13942_v42 = vld [vmem:[#allocation85_spill] sm:$0xff] }
 0x344   : > { %5721 = vmatprep.subr.mxu1 %v11058_v0  ;;  %5820 = vmatprep.subr.mxu0 %v13921_v8  ;;  %v13930_v8 = vld [vmem:[#allocation93_spill] sm:$0xff] }
 0x345   : > { %5631 = vmatprep.mubr.f32.mxu0 %v13922_v44  ;;  %5723 = vmatpush1.msra.mxu1 %v11083_v6 }
 0x346   : > { %5824 = vmatpush1.msra.mxu0 %v13923_v55  ;;  %5753 = vmatprep.subr.mxu1 %v13925_v41  ;;  %v13932_v55 = vand.u32 4294901760, %v10675_v31  ;;  %v13938_v31 = vld [vmem:[#allocation116_spill] sm:$0xff] }
 0x347   : > { %5634 = vmatmul.mubr.f32.gmra.mxu0 %v13924_v15  ;;  %5828 = vmatprep.subr.mxu0 %v13926_v12  ;;  %v13934_v12 = vld [vmem:[#allocation111_spill] sm:$0xff] }
 0x348   : > { %5755 = vmatpush2.msra.mxu1 %v11106_v9  ;;  %5832 = vmatpush1.msra.mxu0 %v13927_v53  ;;  %v13937_v53 = vand.u32 4294901760, %v10828_v49  ;;  %v13944_v49 = vand.u32 4294901760, %v13895_v17  ;;  %v13955_v17 = vand.u32 4294901760, %v10993_v39 }
 0x349   : > { %5757 = vmatprep.subr.mxu1 %v13928_v2  ;;  %5836 = vmatprep.subr.mxu0 %v13929_v28  ;;  %v13939_v28 = vld [vmem:[#allocation63_spill] sm:$0xff] }
 0x34a   : > { %5641 = vmatprep.mubr.f32.mxu0 %v13930_v8  ;;  %5759 = vmatpush2.msra.mxu1 %v11135_v24 }
 0x34b   : > { %5763 = vmatprep.mubr.f32.mxu1 %v13931_v50  ;;  %5840 = vmatpush1.msra.mxu0 %v13932_v55  ;;  %v13940_v55 = vand.u32 4294901760, %v13890_v32  ;;  %v13947_v32 = vand.u32 4294901760, %v13899_v16  ;;  %v13952_v16 = vld [vmem:[#allocation117_spill] sm:$0xff]  ;;  %v14012_v50 = vld [vmem:[#allocation8_spill] sm:$0xff] }
 0x34c   : > { %5767 = vmatmul.mubr.f32.vlgmr.msra.gmra.mxu1 %v13933_v56  ;;  %5644 = vmatmul.mubr.f32.gmra.mxu0 %v13934_v12 }
 0x34d   : > { %5844 = vmatprep.subr.mxu0 %v13935_v25  ;;  %6015 = vmatprep.subr.mxu1 %v13886_v59  ;;  %v13943_v59 = vand.u32 4294901760, %v13893_v38  ;;  %v3853_v25 = vld [vmem:[#allocation3 + $0x340] sm:$0xff] }
 0x34e   : > { %5848 = vmatpush1.msra.mxu0 %v13936_v1  ;;  %6017 = vmatpush1.msra.mxu1 %v13887_v45  ;;  %v13945_v45 = vand.u32 4294901760, %v13897_v33  ;;  %v13951_v33 = vand.u32 4294901760, %v10945_v61  ;;  %v13974_v1 = vld [vmem:[#allocation89_spill] sm:$0xff] }
 0x34f   : > { %5852 = vmatprep.subr.mxu0 %v13937_v53  ;;  %6019 = vmatprep.subr.mxu1 %v13888_v62  ;;  %v13946_v62 = vld [vmem:[#allocation113_spill] sm:$0xff] }
 0x350   : > { %5651 = vmatprep.mubr.f32.mxu0 %v13938_v31  ;;  %5775 = vmatprep.mubr.f32.mxu1 %v13939_v28 }
 0x351   : > { %5856 = vmatpush1.msra.mxu0 %v13940_v55  ;;  %6021 = vmatpush1.msra.mxu1 %v13891_v13  ;;  %v13948_v13 = vld [vmem:[#allocation115_spill] sm:$0xff] }
 0x352   : > { %5654 = vmatmul.mubr.f32.gmra.mxu0 %v13941_v47  ;;  %5779 = vmatmul.mubr.f32.gmra.mxu1 %v13942_v42  ;;  %v13976_v55 = vld [vmem:[#allocation51_spill] sm:$0xff] }
 0x353   : > { %5860 = vmatprep.subr.mxu0 %v13943_v59  ;;  %6023 = vmatprep.subr.mxu1 %v13894_v63  ;;  %v13949_v63 = vand.u32 4294901760, %v10887_v52  ;;  %v13954_v52 = vld [vmem:[#allocation119_spill] sm:$0xff]  ;;  %v13977_v59 = vand.u32 4294901760, %v11145_v22 }
 0x354   : > { %5864 = vmatpush1.msra.mxu0 %v13944_v49  ;;  %6025 = vmatpush1.msra.mxu1 %v13896_v3  ;;  %v13950_v3 = vand.u32 4294901760, %v10898_v43  ;;  %v13956_v43 = vand.u32 4294901760, %v10961_v19  ;;  %v13978_v49 = vld [vmem:[#allocation32_spill] sm:$0xff] }
 0x355   : > { %5868 = vmatprep.subr.mxu0 %v13945_v45  ;;  %6027 = vmatprep.subr.mxu1 %v13898_v14  ;;  %v13979_v45 = vand.u32 4294901760, %v11157_v23 }
 0x356   : > { %5787 = vmatprep.mubr.f32.mxu1 %v13946_v62  ;;  %5872 = vmatpush1.msra.mxu0 %v13947_v32  ;;  %v3878_v32 = vld [vmem:[#allocation3 + $0x238] sm:$0xff] }
 0x357   : > { %6029 = vmatpush1.msra.mxu1 %v13900_v5  ;;  %5876 = vmatprep.subr.mxu0 %v13949_v63  ;;  %v13953_v5 = vand.u32 4294901760, %v10909_v46  ;;  %v13958_v46 = vand.u32 4294901760, %v11010_v51  ;;  %v3890_v51 = vld [vmem:[#allocation3 + $0xc8] sm:$0xff]  ;;  %v11403_v63 = vand.u32 4294901760, %v3853_v25 }
 0x358   : > { %5791 = vmatmul.mubr.f32.gmra.mxu1 %v13948_v13  ;;  %6031 = vmatprep.subr.mxu1 %v13901_v11  ;;  %v13972_v11 = vld [vmem:[#allocation21_spill] sm:$0xff]  ;;  %v11388_v38 = vand.u32 4294901760, %v3890_v51 }
 0x359   : > { %5880 = vmatpush1.msra.mxu0 %v13950_v3  ;;  %6033 = vmatpush1.msra.mxu1 %v13902_v4  ;;  %13980 = vst [vmem:[#allocation53_spill] sm:$0xff] %v11403_v63 }
 0x35a   : > { %5884 = vmatprep.subr.mxu0 %v13951_v33  ;;  %6035 = vmatprep.subr.mxu1 %v13903_v27  ;;  %v13957_v27 = vand.u32 4294901760, %v11017_v10  ;;  %v13964_v10 = vld [vmem:[#allocation16_spill] sm:$0xff]  ;;  %v13982_v33 = vld [vmem:[#allocation105_spill] sm:$0xff] }
 0x35b   : > { %5799 = vmatprep.mubr.f32.mxu1 %v13952_v16  ;;  %5888 = vmatpush1.msra.mxu0 %v13953_v5  ;;  %v13983_v5 = vand.u32 4294901760, %v13982_v33  ;;  %v3829_v16 = vld [vmem:[#allocation3 + $0x70] sm:$0xff] }
 0x35c   : > { %6037 = vmatpush1.msra.mxu1 %v13904_v26  ;;  %5892 = vmatprep.subr.mxu0 %v13955_v17  ;;  %v13959_v26 = vld [vmem:[#allocation35_spill] sm:$0xff] }
 0x35d   : > { %5803 = vmatmul.mubr.f32.gmra.mxu1 %v13954_v52  ;;  %6039 = vmatprep.subr.mxu1 %v10594_v58  ;;  %v13960_v61 = vand.u32 4294901760, %v13959_v26  ;;  %v13961_v58 = vld [vmem:[#allocation86_spill] sm:$0xff]  ;;  %v3877_v17 = vld [vmem:[#allocation3 + $0x1b8] sm:$0xff]  ;;  %v7931_v26 = vld [vmem:[#allocation3 + $0x288] sm:$0xff] }
 0x35e   : > { %5896 = vmatpush1.msra.mxu0 %v13956_v43  ;;  %6041 = vmatpush1.msra.mxu1 %v10580_v48  ;;  %v13962_v19 = vand.u32 4294901760, %v13961_v58  ;;  %v13963_v48 = vand.u32 4294901760, %v11063_v35  ;;  %v13970_v35 = vld [vmem:[#allocation101_spill] sm:$0xff]  ;;  %v11413_v43 = vsub.f32 %v3890_v51, %v11388_v38  ;;  %v13987_v58 = vld [vmem:[#allocation24_spill] sm:$0xff] }
 0x35f   : > { %5900 = vmatprep.subr.mxu0 %v13957_v27  ;;  %6043 = vmatprep.subr.mxu1 %v13905_v21  ;;  %v13965_v21 = vand.u32 4294901760, %v13964_v10  ;;  %v13971_v14 = vand.u32 4294901760, %v13970_v35  ;;  %v13984_v27 = vld [vmem:[#allocation26_spill] sm:$0xff]  ;;  %v13999_v52 = vld [vmem:[#allocation92_spill] sm:$0xff] }
 0x360   : > { %5904 = vmatpush1.msra.mxu0 %v13958_v46  ;;  %6045 = vmatpush1.msra.mxu1 %v13906_v29  ;;  %v13966_v29 = vld [vmem:[#allocation121_spill] sm:$0xff] }
 0x361   : > { %5908 = vmatprep.subr.mxu0 %v13960_v61  ;;  %6047 = vmatprep.subr.mxu1 %v13907_v54  ;;  %v13967_v39 = vand.u32 4294901760, %v13966_v29  ;;  %v13968_v54 = vld [vmem:[#allocation95_spill] sm:$0xff]  ;;  %v3872_v46 = vld [vmem:[#allocation3 + $0xe8] sm:$0xff]  ;;  %v11420_v61 = vand.u32 4294901760, %v7931_v26  ;;  %v11434_v29 = vsub.f32 %v3853_v25, %v11403_v63 }
 0x362   : > { %5912 = vmatpush1.msra.mxu0 %v13962_v19  ;;  %6049 = vmatpush1.msra.mxu1 %v13908_v18  ;;  %v13969_v4 = vand.u32 4294901760, %v13968_v54  ;;  %v3889_v18 = vld [vmem:[#allocation3 + $0xe0] sm:$0xff]  ;;  %v11424_v19 = vand.u32 4294901760, %v3878_v32  ;;  %v11444_v54 = vand.u32 4294901760, %v3872_v46 }
 0x363   : > { %5916 = vmatprep.subr.mxu0 %v13963_v48  ;;  %6051 = vmatprep.subr.mxu1 %v13909_v34  ;;  %v3884_v34 = vld [vmem:[#allocation3 + $0x2d8] sm:$0xff]  ;;  %v11393_v53 = vand.u32 4294901760, %v3889_v18  ;;  %13985 = vst [vmem:[#allocation106_spill] sm:$0xff] %v11420_v61 }
 0x364   : > { %5920 = vmatpush1.msra.mxu0 %v13965_v21  ;;  %6053 = vmatpush1.msra.mxu1 %v10851_v30  ;;  %v13973_v30 = vand.u32 4294901760, %v13972_v11  ;;  %v3871_v48 = vld [vmem:[#allocation3 + $0xd8] sm:$0xff]  ;;  %v3854_v21 = vld [vmem:[#allocation3 + $0x348] sm:$0xff]  ;;  %v11453_v11 = vsub.f32 %v7931_v26, %v11420_v61  ;;  %v13996_v26 = vld [vmem:[#allocation82_spill] sm:$0xff] }
 0x365   : > { %5924 = vmatprep.subr.mxu0 %v13967_v39  ;;  %6055 = vmatprep.subr.mxu1 %v13910_v37  ;;  %v13975_v37 = vand.u32 4294901760, %v11140_v36  ;;  %v7930_v36 = vld [vmem:[#allocation3 + $0x1c0] sm:$0xff]  ;;  %v11418_v23 = vsub.f32 %v3889_v18, %v11393_v53  ;;  %v13988_v18 = vld [vmem:[#allocation49_spill] sm:$0xff]  ;;  %v11449_v35 = vand.u32 4294901760, %v3871_v48  ;;  %v11458_v25 = vand.u32 4294901760, %v3854_v21 }
 0x366   : > { %5928 = vmatpush1.msra.mxu0 %v13969_v4  ;;  %6057 = vmatpush1.msra.mxu1 %v13911_v60  ;;  %v3883_v60 = vld [vmem:[#allocation3 + $0x1b0] sm:$0xff]  ;;  %v11405_v3 = vand.u32 4294901760, %v7930_v36  ;;  %13990 = vst [vmem:[#allocation5_spill] sm:$0xff] %v11453_v11 }
 0x367   : > { %5932 = vmatprep.subr.mxu0 %v13971_v14  ;;  %6059 = vmatprep.subr.mxu1 %v13912_v7  ;;  %v11398_v7 = vand.u32 4294901760, %v3884_v34  ;;  %v11410_v22 = vand.u32 4294901760, %v3883_v60  ;;  %v3866_v4 = vld [vmem:[#allocation3 + $0x2b0] sm:$0xff]  ;;  %13989 = vst [vmem:[#allocation7_spill] sm:$0xff] %v11449_v35  ;;  %13991 = vst [vmem:[#allocation108_spill] sm:$0xff] %v11458_v25  ;;  %v11486_v33 = vsub.f32 %v3871_v48, %v11449_v35  ;;  %v3835_v48 = vld [vmem:[#allocation3 + $0x40] sm:$0xff] }
 0x368   : > { %5936 = vmatpush1.msra.mxu0 %v13973_v30  ;;  %6061 = vmatpush1.msra.mxu1 %v13974_v1  ;;  %13981 = vst [vmem:[#allocation81_spill] sm:$0xff] %v11405_v3  ;;  %v11437_v39 = vsub.f32 %v7930_v36, %v11405_v3  ;;  %v3865_v14 = vld [vmem:[#allocation3 + $0x230] sm:$0xff]  ;;  %v11461_v1 = vsub.f32 %v3878_v32, %v11424_v19 }
 0x369   : > { %5968 = vmatprep.subr.mxu0 %v13975_v37  ;;  %6063 = vmatprep.subr.mxu1 %v13976_v55  ;;  %v11427_v10 = vsub.f32 %v3884_v34, %v11398_v7  ;;  %v11442_v51 = vsub.f32 %v3883_v60, %v11410_v22  ;;  %v13037_v34 = vand.u32 4294901760, %v11418_v23  ;;  %v13992_v37 = vld [vmem:[#allocation54_spill] sm:$0xff]  ;;  %v11468_v55 = vand.u32 4294901760, %v3866_v4 }
 0x36a   : > { %5972 = vmatpush2.msra.mxu0 %v13977_v59  ;;  %6065 = vmatpush1.msra.mxu1 %v13978_v49  ;;  %v13039_v59 = vand.u32 4294901760, %v11434_v29  ;;  %v13040_v49 = vand.u32 4294901760, %v11437_v39  ;;  %v11477_v32 = vand.u32 4294901760, %v3865_v14  ;;  %v11481_v36 = vsub.f32 %v3872_v46, %v11444_v54 }
 0x36b   : > { %5976 = vmatprep.subr.mxu0 %v13979_v45  ;;  %6067 = vmatprep.subr.mxu1 %v13915_v20  ;;  %v13986_v20 = vld [vmem:[#allocation43_spill] sm:$0xff]  ;;  %v13038_v30 = vand.u32 4294901760, %v11427_v10  ;;  %13993 = vst [vmem:[#allocation50_spill] sm:$0xff] %v11468_v55 }
 0x36c   : > { %5980 = vmatpush2.msra.mxu0 %v13983_v5  ;;  %5982 = vmatprep.mubr.f32.mxu0 %v13984_v27  ;;  %13994 = vst [vmem:[#allocation55_spill] sm:$0xff] %v11477_v32  ;;  %v14007_v31 = vand.u32 4294901760, %v11481_v36 }
 0x36d   : > { %6069 = vmatpush1.msra.mxu1 %v11026_v57  ;;  %5984 = vmatmul.mubr.f32.vlgmr.msra.gmra.mxu0 %v13986_v20  ;;  %v11431_v57 = vand.u32 4294901760, %v3877_v17  ;;  %v6327_v46 = vsub.f32 %v11427_v10, %v13038_v30  ;;  %v11514_v30 = vsub.f32 %v11434_v29, %v13039_v59  ;;  %v14001_v59 = vand.u32 4294901760, %v11461_v1 }
 0x36e   : > { %6071 = vmatprep.subr.mxu1 %v13987_v58  ;;  %6148 = vmatprep.subr.mxu0 %v11388_v38  ;;  %v6351_v12 = vsub.f32 %v11481_v36, %v14007_v31 }
 0x36f   : > { %6073 = vmatpush1.msra.mxu1 %v11052_v40  ;;  %6150 = vmatpush1.msra.mxu0 %v11393_v53  ;;  %v13036_v40 = vand.u32 4294901760, %v11413_v43  ;;  %v11466_v60 = vsub.f32 %v3877_v17, %v11431_v57  ;;  %v11509_v17 = vsub.f32 %v3866_v4, %v11468_v55  ;;  %v13998_v4 = vand.u32 4294901760, %v11442_v51 }
 0x370   : > { %6075 = vmatprep.subr.mxu1 %v11058_v0  ;;  %6152 = vmatprep.subr.mxu0 %v11398_v7  ;;  %v3860_v0 = vld [vmem:[#allocation3 + $0x48] sm:$0xff]  ;;  %v6339_v62 = vsub.f32 %v11461_v1, %v14001_v59  ;;  %v14005_v59 = vld [vmem:[#allocation36_spill] sm:$0xff]  ;;  %v6352_v44 = vand.u32 4294901760, %v6351_v12 }
 0x371   : > { %5990 = vmatprep.mubr.f32.mxu0 %v13988_v18  ;;  %6077 = vmatpush1.msra.mxu1 %v11083_v6  ;;  %v3859_v6 = vld [vmem:[#allocation3 + $0xc0] sm:$0xff]  ;;  %v6315_v45 = vsub.f32 %v11413_v43, %v13036_v40  ;;  %v11491_v5 = vand.u32 4294901760, %v3860_v0  ;;  %v11503_v40 = vsub.f32 %v3854_v21, %v11458_v25  ;;  %v11519_v21 = vsub.f32 %v11437_v39, %v13040_v49 }
 0x372   : > { %6154 = vmatpush1.msra.mxu0 %v11410_v22  ;;  %6107 = vmatprep.subr.mxu1 %v13925_v41  ;;  %v3841_v41 = vld [vmem:[#allocation3 + $0x168] sm:$0xff]  ;;  %v6333_v58 = vsub.f32 %v11442_v51, %v13998_v4 }
 0x373   : > { %5992 = vmatmul.mubr.f32.gmra.mxu0 %v13992_v37  ;;  %6156 = vmatprep.subr.mxu0 %v11424_v19  ;;  %13995 = vst [vmem:[#allocation37_spill] sm:$0xff] %v11491_v5  ;;  %v11534_v13 = vsub.f32 %v3860_v0, %v11491_v5  ;;  %v11545_v42 = vand.u32 4294901760, %v3841_v41  ;;  %v14003_v0 = vand.u32 4294901760, %v11466_v60 }
 0x374   : > { %6109 = vmatpush2.msra.mxu1 %v11106_v9  ;;  %6158 = vmatpush1.msra.mxu0 %v11431_v57  ;;  %v6321_v9 = vsub.f32 %v11418_v23, %v13037_v34  ;;  %v11524_v34 = vsub.f32 %v3865_v14, %v11477_v32  ;;  %v6328_v14 = vand.u32 4294901760, %v6327_v46  ;;  %v6334_v28 = vand.u32 4294901760, %v6333_v58 }
 0x375   : > { %6111 = vmatprep.subr.mxu1 %v13928_v2  ;;  %6160 = vmatprep.subr.mxu0 %v11444_v54  ;;  %v11499_v2 = vand.u32 4294901760, %v3859_v6  ;;  %14002 = vst [vmem:[#allocation90_spill] sm:$0xff] %v11545_v42  ;;  %v6340_v46 = vand.u32 4294901760, %v6339_v62  ;;  %v11580_v8 = vsub.f32 %v3841_v41, %v11545_v42  ;;  %v11591_v62 = vand.u32 4294901760, %v3829_v16  ;;  %v3824_v41 = vld [vmem:[#allocation3 + $0x198] sm:$0xff] }
 0x376   : > { %5998 = vmatprep.mubr.f32.mxu0 %v13996_v26  ;;  %6113 = vmatpush2.msra.mxu1 %v11135_v24  ;;  %v6316_v24 = vand.u32 4294901760, %v6315_v45  ;;  %v6322_v49 = vand.u32 4294901760, %v6321_v9  ;;  %v11536_v45 = vand.u32 4294901760, %v3835_v48  ;;  %v3836_v9 = vld [vmem:[#allocation3 + $0x38] sm:$0xff] }
 0x377   : > { %13997 = vst [vmem:[#allocation88_spill] sm:$0xff] %v11499_v2  ;;  %6115 = vmatprep.mubr.f32.mxu1 %v13984_v27  ;;  %6162 = vmatpush1.msra.mxu0 %v11449_v35  ;;  %v11540_v4 = vsub.f32 %v3859_v6, %v11499_v2  ;;  %v14004_v6 = vand.u32 4294901760, %v11453_v11  ;;  %14013 = vst [vmem:[#allocation98_spill] sm:$0xff] %v11580_v8 }
 0x378   : > { %6117 = vmatmul.mubr.f32.vlgmr.msra.gmra.mxu1 %v13986_v20  ;;  %6000 = vmatmul.mubr.f32.gmra.mxu0 %v13999_v52  ;;  %14000 = vst [vmem:[#allocation46_spill] sm:$0xff] %v11536_v45  ;;  %v11576_v31 = vsub.f32 %v3835_v48, %v11536_v45  ;;  %14016 = vst [vmem:[#allocation99_spill] sm:$0xff] %v11591_v62 }
 0x379   : > { %6164 = vmatprep.subr.mxu0 %v11468_v55  ;;  %6317 = vmatprep.subr.mxu1 %v6316_v24  ;;  %v6345_v24 = vsub.f32 %v11466_v60, %v14003_v0  ;;  %v11556_v47 = vsub.f32 %v11453_v11, %v14004_v6  ;;  %v7932_v0 = vld [vmem:[#allocation3 + $0x280] sm:$0xff]  ;;  %v11572_v6 = vand.u32 4294901760, %v3836_v9  ;;  %v3811_v11 = vld [vmem:[#allocation3 + $0x338] sm:$0xff] }
 0x37a   : > { %6166 = vmatpush1.msra.mxu0 %v11477_v32  ;;  %6323 = vmatpush1.msra.mxu1 %v6322_v49  ;;  %v11559_v49 = vpop.f32.mrf.mxu0  ;;  %v11564_v56 = vand.u32 4294901760, %v7932_v0  ;;  %14011 = vst [vmem:[#allocation58_spill] sm:$0xff] %v11576_v31  ;;  %v3823_v32 = vld [vmem:[#allocation3 + $0x2d0] sm:$0xff] }
 0x37b   : > { %6168 = vmatprep.subr.mxu0 %v11491_v5  ;;  %6329 = vmatprep.subr.mxu1 %v6328_v14  ;;  %14006 = vst [vmem:[#allocation110_spill] sm:$0xff] %v11559_v49  ;;  %v14009_v14 = vand.u32 4294901760, %v11486_v33  ;;  %14010 = vst [vmem:[#allocation96_spill] sm:$0xff] %v11572_v6  ;;  %v14014_v49 = vand.u32 4294901760, %v11509_v17  ;;  %v14018_v5 = vand.u32 4294901760, %v11524_v34  ;;  %v11608_v12 = vsub.f32 %v3836_v9, %v11572_v6 }
 0x37c   : > { %6006 = vmatprep.mubr.f32.mxu0 %v14005_v59  ;;  %14008 = vst [vmem:[#allocation112_spill] sm:$0xff] %v11564_v56  ;;  %6123 = vmatprep.mubr.f32.mxu1 %v13988_v18  ;;  %v11594_v15 = vpop.f32.mrf.mxu0 }
 0x37d   : > { %6170 = vmatpush1.msra.mxu0 %v11499_v2  ;;  %v6357_v58 = vsub.f32 %v11486_v33, %v14009_v14  ;;  %6335 = vmatpush1.msra.mxu1 %v6334_v28  ;;  %v6346_v14 = vand.u32 4294901760, %v6345_v24  ;;  %v6363_v48 = vsub.f32 %v11509_v17, %v14014_v49  ;;  %v7933_v28 = vld [vmem:[#allocation3 + $0x2f0] sm:$0xff]  ;;  %14017 = vst [vmem:[#allocation75_spill] sm:$0xff] %v11594_v15 }
 0x37e   : > { %6008 = vmatmul.mubr.f32.gmra.mxu0 %v14012_v50  ;;  %6125 = vmatmul.mubr.f32.gmra.mxu1 %v13992_v37  ;;  %v11589_v2 = vand.u32 4294901760, %v7933_v28  ;;  %v6369_v24 = vsub.f32 %v11524_v34, %v14018_v5  ;;  %v11601_v49 = vsub.f32 %v7932_v0, %v11564_v56  ;;  %v14020_v5 = vand.u32 4294901760, %v11540_v4  ;;  %v3812_v15 = vld [vmem:[#allocation3 + $0xd0] sm:$0xff] }
 0x37f   : > { %6172 = vmatprep.subr.mxu0 %v11458_v25  ;;  %6341 = vmatprep.subr.mxu1 %v6340_v46  ;;  %v6358_v55 = vand.u32 4294901760, %v6357_v58  ;;  %v14019_v46 = vand.u32 4294901760, %v11534_v13  ;;  %v3817_v25 = vld [vmem:[#allocation3 + $0x90] sm:$0xff]  ;;  %v6364_v9 = vand.u32 4294901760, %v6363_v48  ;;  %v7934_v48 = vld [vmem:[#allocation3 + $0x248] sm:$0xff] }
 0x380   : > { %14015 = vst [vmem:[#allocation57_spill] sm:$0xff] %v11589_v2  ;;  %6174 = vmatpush1.msra.mxu0 %v11403_v63  ;;  %6347 = vmatpush1.msra.mxu1 %v6346_v14  ;;  %v6381_v0 = vsub.f32 %v11540_v4, %v14020_v5  ;;  %v11615_v14 = vand.u32 4294901760, %v3824_v41  ;;  %v11626_v35 = vsub.f32 %v7933_v28, %v11589_v2  ;;  %v11628_v5 = vpop.f32.mrf.mxu0  ;;  %v6370_v58 = vand.u32 4294901760, %v6369_v24 }
 0x381   : > { %6176 = vmatprep.subr.mxu0 %v11405_v3  ;;  %v6375_v63 = vsub.f32 %v11534_v13, %v14019_v46  ;;  %6353 = vmatprep.subr.mxu1 %v6352_v44  ;;  %v11621_v46 = vsub.f32 %v3829_v16, %v11591_v62  ;;  %v11623_v44 = vand.u32 4294901760, %v3823_v32  ;;  %14024 = vst [vmem:[#allocation60_spill] sm:$0xff] %v11628_v5  ;;  %v14025_v3 = vand.u32 4294901760, %v11503_v40 }
 0x382   : > { %6131 = vmatprep.mubr.f32.mxu1 %v13996_v26  ;;  %14021 = vst [vmem:[#allocation12_spill] sm:$0xff] %v11615_v14  ;;  %6178 = vmatpush1.msra.mxu0 %v11420_v61  ;;  %14023 = vst [vmem:[#allocation45_spill] sm:$0xff] %v11626_v35  ;;  %v11635_v16 = vand.u32 4294901760, %v7934_v48  ;;  %v11639_v5 = vand.u32 4294901760, %v3817_v25  ;;  %v14028_v24 = vand.u32 4294901760, %v11576_v31  ;;  %v11648_v26 = vpop.f32.mrf.mxu1 }
 0x383   : > { %6359 = vmatpush1.msra.mxu1 %v6358_v55  ;;  %14022 = vst [vmem:[#allocation6_spill] sm:$0xff] %v11623_v44  ;;  %6180 = vmatprep.subr.mxu0 %v11564_v56  ;;  %v6387_v55 = vsub.f32 %v11503_v40, %v14025_v3  ;;  %v6376_v28 = vand.u32 4294901760, %v6375_v63  ;;  %v6382_v3 = vand.u32 4294901760, %v6381_v0  ;;  %14029 = vst [vmem:[#allocation41_spill] sm:$0xff] %v11648_v26  ;;  %v11653_v63 = vand.u32 4294901760, %v3812_v15 }
 0x384   : > { %6133 = vmatmul.mubr.f32.gmra.mxu1 %v13999_v52  ;;  %14026 = vst [vmem:[#allocation23_spill] sm:$0xff] %v11635_v16  ;;  %6365 = vmatprep.subr.mxu1 %v6364_v9  ;;  %14027 = vst [vmem:[#allocation64_spill] sm:$0xff] %v11639_v5  ;;  %v11645_v56 = vsub.f32 %v11576_v31, %v14028_v24  ;;  %v14030_v9 = vand.u32 4294901760, %v11580_v8  ;;  %v11656_v52 = vsub.f32 %v3824_v41, %v11615_v14 }
 0x385   : > { %6182 = vmatpush1.msra.mxu0 %v11545_v42  ;;  %6371 = vmatpush1.msra.mxu1 %v6370_v58  ;;  %14031 = vst [vmem:[#allocation38_spill] sm:$0xff] %v11653_v63  ;;  %v3805_v42 = vld [vmem:[#allocation3 + $0x210] sm:$0xff]  ;;  %v11660_v58 = vsub.f32 %v3823_v32, %v11623_v44  ;;  %v11662_v24 = vand.u32 4294901760, %v3811_v11  ;;  %v6388_v41 = vand.u32 4294901760, %v6387_v55  ;;  %v11680_v26 = vsub.f32 %v3817_v25, %v11639_v5 }
 0x386   : > { %6184 = vmatprep.subr.mxu0 %v11572_v6  ;;  %v6417_v61 = vsub.f32 %v11580_v8, %v14030_v9  ;;  %14032 = vst [vmem:[#allocation66_spill] sm:$0xff] %v11656_v52  ;;  %6377 = vmatprep.subr.mxu1 %v6376_v28  ;;  %v3800_v6 = vld [vmem:[#allocation3 + $0x8] sm:$0xff]  ;;  %v11666_v9 = vpop.f32.mrf.mxu0  ;;  %v14036_v28 = vand.u32 4294901760, %v11601_v49  ;;  %v11675_v8 = vsub.f32 %v7934_v48, %v11635_v16  ;;  %v6430_v0 = vand.u32 4294901760, %v11645_v56  ;;  %v11689_v48 = vpop.f32.mrf.mxu1 }
 0x387   : > { %6139 = vmatprep.mubr.f32.mxu1 %v14005_v59  ;;  %14033 = vst [vmem:[#allocation65_spill] sm:$0xff] %v11660_v58  ;;  %14034 = vst [vmem:[#allocation25_spill] sm:$0xff] %v11662_v24  ;;  %6186 = vmatpush1.msra.mxu0 %v11536_v45  ;;  %v7935_v59 = vld [vmem:[#allocation3 + $0x2e8] sm:$0xff]  ;;  %v11701_v56 = vsub.f32 %v3811_v11, %v11662_v24 }
 0x388   : > { %14035 = vst [vmem:[#allocation44_spill] sm:$0xff] %v11666_v9  ;;  %6383 = vmatpush1.msra.mxu1 %v6382_v3  ;;  %v6411_v31 = vsub.f32 %v11601_v49, %v14036_v28  ;;  %v11672_v32 = vand.u32 4294901760, %v7935_v59  ;;  %14038 = vst [vmem:[#allocation14_spill] sm:$0xff] %v11675_v8  ;;  %6188 = vmatprep.subr.mxu0 %v11589_v2  ;;  %v14040_v3 = vand.u32 4294901760, %v11608_v12  ;;  %v11686_v28 = vand.u32 4294901760, %v3805_v42  ;;  %v3799_v9 = vld [vmem:[#allocation3 + $0x2c8] sm:$0xff] }
 0x389   : > { %6141 = vmatmul.mubr.f32.gmra.mxu1 %v14012_v50  ;;  %14039 = vst [vmem:[#allocation40_spill] sm:$0xff] %v11680_v26  ;;  %6389 = vmatprep.subr.mxu1 %v6388_v41  ;;  %14041 = vst [vmem:[#allocation42_spill] sm:$0xff] %v11689_v48  ;;  %v6418_v45 = vand.u32 4294901760, %v6417_v61  ;;  %v11691_v50 = vand.u32 4294901760, %v3800_v6  ;;  %v11695_v2 = vsub.f32 %v3812_v15, %v11653_v63  ;;  %v14045_v41 = vand.u32 4294901760, %v11626_v35  ;;  %v11710_v15 = vpop.f32.mrf.mxu0 }
 0x38a   : > { %14037 = vst [vmem:[#allocation84_spill] sm:$0xff] %v11672_v32  ;;  %v6423_v55 = vsub.f32 %v11608_v12, %v14040_v3  ;;  %6190 = vmatpush1.msra.mxu0 %v11591_v62  ;;  %v14043_v3 = vand.u32 4294901760, %v11514_v30  ;;  %14044 = vst [vmem:[#allocation19_spill] sm:$0xff] %v11701_v56  ;;  %v14046_v61 = vand.u32 4294901760, %v11621_v46  ;;  %v14048_v30 = vand.u32 4294901760, %v11519_v21  ;;  %v7936_v21 = vld [vmem:[#allocation3 + $0x150] sm:$0xff]  ;;  %6557 = vmatprep.mubr.f32.mxu1 %v13984_v27 }
 0x38b   : > { %14042 = vst [vmem:[#allocation73_spill] sm:$0xff] %v11695_v2  ;;  %6192 = vmatprep.subr.mxu0 %v11615_v14  ;;  %v6435_v48 = vsub.f32 %v11626_v35, %v14045_v41  ;;  %14047 = vst [vmem:[#allocation68_spill] sm:$0xff] %v11710_v15  ;;  %v11715_v11 = vand.u32 4294901760, %v3799_v9  ;;  %v11719_v41 = vsub.f32 %v7935_v59, %v11672_v32  ;;  %v14050_v35 = vand.u32 4294901760, %v11556_v47  ;;  %v11730_v15 = vpop.f32.mrf.mxu1  ;;  %v14101_v27 = vld [vmem:[#allocation55_spill] sm:$0xff] }
 0x38c   : > { %6395 = vmatpush1.msra.mxu1 %v14043_v3  ;;  %v6441_v62 = vsub.f32 %v11621_v46, %v14046_v61  ;;  %6194 = vmatpush1.msra.mxu0 %v11623_v44  ;;  %v6412_v3 = vand.u32 4294901760, %v6411_v31  ;;  %v6424_v61 = vand.u32 4294901760, %v6423_v55  ;;  %v11725_v25 = vsub.f32 %v3805_v42, %v11686_v28  ;;  %14053 = vst [vmem:[#allocation71_spill] sm:$0xff] %v11730_v15  ;;  %v11749_v44 = vpop.f32.mrf.mxu0 }
 0x38d   : > { %6401 = vmatprep.subr.mxu1 %v14048_v30  ;;  %14049 = vst [vmem:[#allocation70_spill] sm:$0xff] %v11719_v41  ;;  %6196 = vmatprep.subr.mxu0 %v11635_v16  ;;  %v11727_v30 = vand.u32 4294901760, %v7936_v21  ;;  %v14054_v59 = vand.u32 4294901760, %v11656_v52  ;;  %v11740_v55 = vsub.f32 %v3800_v6, %v11691_v50  ;;  %v6436_v31 = vand.u32 4294901760, %v6435_v48  ;;  %14058 = vst [vmem:[#allocation74_spill] sm:$0xff] %v11749_v44 }
 0x38e   : > { %6407 = vmatpush1.msra.mxu1 %v14050_v35  ;;  %14051 = vst [vmem:[#allocation31_spill] sm:$0xff] %v11725_v25  ;;  %6198 = vmatpush1.msra.mxu0 %v11639_v5  ;;  %v7937_v35 = vld [vmem:[#allocation3 + $0x270] sm:$0xff]  ;;  %v7938_v5 = vld [vmem:[#allocation3 + $0x1e0] sm:$0xff]  ;;  %v6442_v6 = vand.u32 4294901760, %v6441_v62  ;;  %v14060_v48 = vand.u32 4294901760, %v11675_v8  ;;  %v14067_v62 = vand.u32 4294901760, %v11701_v56 }
 0x38f   : > { %14052 = vst [vmem:[#allocation13_spill] sm:$0xff] %v11727_v30  ;;  %6413 = vmatprep.subr.mxu1 %v6412_v3  ;;  %v6447_v47 = vsub.f32 %v11656_v52, %v14054_v59  ;;  %v11736_v14 = vand.u32 4294901760, %v7937_v35  ;;  %14056 = vst [vmem:[#allocation33_spill] sm:$0xff] %v11740_v55  ;;  %6200 = vmatprep.subr.mxu0 %v11653_v63  ;;  %v14057_v3 = vand.u32 4294901760, %v11660_v58  ;;  %v11746_v16 = vand.u32 4294901760, %v7938_v5 }
 0x390   : > { %6419 = vmatpush1.msra.mxu1 %v6418_v45  ;;  %6202 = vmatpush1.msra.mxu0 %v11662_v24  ;;  %v11753_v45 = vsub.f32 %v3799_v9, %v11715_v11  ;;  %v6459_v42 = vsub.f32 %v11675_v8, %v14060_v48  ;;  %v14061_v59 = vand.u32 4294901760, %v11680_v26  ;;  %v11767_v9 = vsub.f32 %v7936_v21, %v11727_v30  ;;  %v11769_v24 = vpop.f32.mrf.mxu1 }
 0x391   : > { %14055 = vst [vmem:[#allocation34_spill] sm:$0xff] %v11736_v14  ;;  %v6453_v15 = vsub.f32 %v11660_v58, %v14057_v3  ;;  %6425 = vmatprep.subr.mxu1 %v6424_v61  ;;  %6204 = vmatprep.subr.mxu0 %v11672_v32  ;;  %v7939_v61 = vld [vmem:[#allocation3 + $0x350] sm:$0xff]  ;;  %14064 = vst [vmem:[#allocation107_spill] sm:$0xff] %v11769_v24  ;;  %v11773_v48 = vsub.f32 %v7937_v35, %v11736_v14  ;;  %v14066_v3 = vand.u32 4294901760, %v11695_v2 }
 0x392   : > { %14059 = vst [vmem:[#allocation97_spill] sm:$0xff] %v11753_v45  ;;  %6431 = vmatpush1.msra.mxu1 %v6430_v0  ;;  %v6465_v44 = vsub.f32 %v11680_v26, %v14061_v59  ;;  %v11763_v63 = vand.u32 4294901760, %v7939_v61  ;;  %14063 = vst [vmem:[#allocation94_spill] sm:$0xff] %v11767_v9  ;;  %6206 = vmatpush1.msra.mxu0 %v11686_v28  ;;  %v6448_v0 = vand.u32 4294901760, %v6447_v47  ;;  %v11786_v47 = vpop.f32.mrf.mxu0  ;;  %v6460_v35 = vand.u32 4294901760, %v6459_v42  ;;  %v11801_v42 = vpop.f32.mrf.mxu1 }
 0x393   : > { %6437 = vmatprep.subr.mxu1 %v6436_v31  ;;  %14065 = vst [vmem:[#allocation77_spill] sm:$0xff] %v11773_v48  ;;  %v6471_v59 = vsub.f32 %v11695_v2, %v14066_v3  ;;  %6208 = vmatprep.subr.mxu0 %v11691_v50  ;;  %v6454_v21 = vand.u32 4294901760, %v6453_v15  ;;  %v6477_v31 = vsub.f32 %v11701_v56, %v14067_v62  ;;  %14068 = vst [vmem:[#allocation79_spill] sm:$0xff] %v11786_v47 }
 0x394   : > { %14062 = vst [vmem:[#allocation100_spill] sm:$0xff] %v11763_v63  ;;  %6443 = vmatpush1.msra.mxu1 %v6442_v6  ;;  %v11784_v24 = vsub.f32 %v7938_v5, %v11746_v16  ;;  %6210 = vmatpush1.msra.mxu0 %v11715_v11  ;;  %v14069_v3 = vand.u32 4294901760, %v11719_v41  ;;  %v6466_v15 = vand.u32 4294901760, %v6465_v44  ;;  %v11795_v62 = vsub.f32 %v7939_v61, %v11763_v63  ;;  %v11821_v44 = vpop.f32.mrf.mxu1 }
 0x395   : > { %6449 = vmatprep.subr.mxu1 %v6448_v0  ;;  %6240 = vmatprep.subr.mxu0 %v11727_v30  ;;  %v14071_v5 = vand.u32 4294901760, %v11725_v25  ;;  %14072 = vst [vmem:[#allocation15_spill] sm:$0xff] %v11801_v42  ;;  %v6478_v61 = vand.u32 4294901760, %v6477_v31  ;;  %v11810_v30 = vpop.f32.mrf.mxu0  ;;  %v14076_v42 = vld [vmem:[#allocation29_spill] sm:$0xff]  ;;  %14078 = vst [vmem:[#allocation76_spill] sm:$0xff] %v11821_v44 }
 0x396   : > { %v6483_v6 = vsub.f32 %v11719_v41, %v14069_v3  ;;  %6455 = vmatpush1.msra.mxu1 %v6454_v21  ;;  %14070 = vst [vmem:[#allocation4_spill] sm:$0xff] %v11795_v62  ;;  %6242 = vmatpush2.msra.mxu0 %v11736_v14  ;;  %v6472_v3 = vand.u32 4294901760, %v6471_v59  ;;  %v14073_v21 = vand.u32 4294901760, %v11740_v55  ;;  %14074 = vst [vmem:[#allocation104_spill] sm:$0xff] %v11810_v30  ;;  %v14075_v59 = vand.u32 4294901760, %v11753_v45 }
 0x397   : > { %v6489_v0 = vsub.f32 %v11725_v25, %v14071_v5  ;;  %6461 = vmatprep.subr.mxu1 %v6460_v35  ;;  %6244 = vmatprep.subr.mxu0 %v11746_v16  ;;  %v13101_v5 = vand.u32 4294901760, %v11795_v62  ;;  %v14080_v30 = vand.u32 4294901760, %v11773_v48 }
 0x398   : > { %v6495_v32 = vsub.f32 %v11740_v55, %v14073_v21  ;;  %6467 = vmatpush1.msra.mxu1 %v6466_v15  ;;  %6246 = vmatpush2.msra.mxu0 %v11763_v63  ;;  %v6484_v35 = vand.u32 4294901760, %v6483_v6  ;;  %v6501_v47 = vsub.f32 %v11753_v45, %v14075_v59  ;;  %v14077_v15 = vand.u32 4294901760, %v11767_v9  ;;  %v11827_v63 = vpop.f32.mrf.mxu0 }
 0x399   : > { %6473 = vmatprep.subr.mxu1 %v6472_v3  ;;  %6252 = vmatprep.mubr.f32.mxu0 %v14076_v42  ;;  %v6490_v21 = vand.u32 4294901760, %v6489_v0  ;;  %v14079_v3 = vld [vmem:[#allocation91_spill] sm:$0xff]  ;;  %v6541_v59 = vsub.f32 %v11773_v48, %v14080_v30  ;;  %v14081_v0 = vand.u32 4294901760, %v11784_v24  ;;  %v6553_v30 = vsub.f32 %v11795_v62, %v13101_v5  ;;  %v14097_v5 = vld [vmem:[#allocation92_spill] sm:$0xff] }
 0x39a   : > { %6479 = vmatpush1.msra.mxu1 %v6478_v61  ;;  %v6535_v31 = vsub.f32 %v11767_v9, %v14077_v15  ;;  %6258 = vmatmul.mubr.f32.vlgmr.msra.gmra.mxu0 %v14079_v3  ;;  %v6496_v6 = vand.u32 4294901760, %v6495_v32  ;;  %v6502_v61 = vand.u32 4294901760, %v6501_v47  ;;  %v14082_v32 = vld [vmem:[#allocation114_spill] sm:$0xff]  ;;  %v11839_v15 = vpop.f32.mrf.mxu1  ;;  %v11842_v3 = vpop.f32.mrf.mxu0 }
 0x39b   : > { %6485 = vmatprep.subr.mxu1 %v6484_v35  ;;  %6591 = vmatprep.subr.mxu0 %v11413_v43  ;;  %v6547_v42 = vsub.f32 %v11784_v24, %v14081_v0  ;;  %14083 = vst [vmem:[#allocation103_spill] sm:$0xff] %v11839_v15  ;;  %v14084_v0 = vld [vmem:[#allocation11_spill] sm:$0xff]  ;;  %v14104_v15 = vld [vmem:[#allocation36_spill] sm:$0xff] }
 0x39c   : > { %6491 = vmatpush1.msra.mxu1 %v6490_v21  ;;  %6594 = vmatpush1.msra.mxu0 %v11418_v23  ;;  %v6536_v35 = vand.u32 4294901760, %v6535_v31  ;;  %v6542_v21 = vand.u32 4294901760, %v6541_v59  ;;  %v6554_v31 = vand.u32 4294901760, %v6553_v30  ;;  %v11851_v59 = vpop.f32.mrf.mxu0  ;;  %v14089_v30 = vld [vmem:[#allocation69_spill] sm:$0xff] }
 0x39d   : > { %6497 = vmatprep.subr.mxu1 %v6496_v6  ;;  %6597 = vmatprep.subr.mxu0 %v11427_v10  ;;  %v6548_v47 = vand.u32 4294901760, %v6547_v42  ;;  %v11847_v6 = vpop.f32.mrf.mxu1  ;;  %14087 = vst [vmem:[#allocation83_spill] sm:$0xff] %v11851_v59  ;;  %v14110_v59 = vld [vmem:[#allocation108_spill] sm:$0xff] }
 0x39e   : > { %6268 = vmatprep.mubr.f32.mxu0 %v14082_v32  ;;  %6503 = vmatpush1.msra.mxu1 %v6502_v61  ;;  %14085 = vst [vmem:[#allocation72_spill] sm:$0xff] %v11847_v6  ;;  %v14086_v61 = vld [vmem:[#allocation118_spill] sm:$0xff]  ;;  %v14088_v32 = vld [vmem:[#allocation120_spill] sm:$0xff] }
 0x39f   : > { %6600 = vmatpush1.msra.mxu0 %v11442_v51  ;;  %6537 = vmatprep.subr.mxu1 %v6536_v35  ;;  %v11856_v42 = vpop.f32.mrf.mxu1  ;;  %v11862_v35 = vpop.f32.mrf.mxu0  ;;  %v14108_v6 = vld [vmem:[#allocation8_spill] sm:$0xff] }
 0x3a0   : > { %6274 = vmatmul.mubr.f32.gmra.mxu0 %v14084_v0  ;;  %6603 = vmatprep.subr.mxu0 %v11461_v1  ;;  %v14090_v0 = vld [vmem:[#allocation59_spill] sm:$0xff] }
 0x3a1   : > { %6543 = vmatpush2.msra.mxu1 %v6542_v21  ;;  %6606 = vmatpush1.msra.mxu0 %v11466_v60  ;;  %v11868_v21 = vpop.f32.mrf.mxu1 }
 0x3a2   : > { %6549 = vmatprep.subr.mxu1 %v6548_v47  ;;  %6609 = vmatprep.subr.mxu0 %v11481_v36  ;;  %v11874_v47 = vpop.f32.mrf.mxu0 }
 0x3a3   : > { %6284 = vmatprep.mubr.f32.mxu0 %v14086_v61  ;;  %6555 = vmatpush2.msra.mxu1 %v6554_v31  ;;  %14091 = vst [vmem:[#allocation20_spill] sm:$0xff] %v11874_v47  ;;  %v11880_v31 = vpop.f32.mrf.mxu1  ;;  %v14093_v61 = vld [vmem:[#allocation82_spill] sm:$0xff]  ;;  %v14103_v47 = vld [vmem:[#allocation37_spill] sm:$0xff] }
 0x3a4   : > { %6612 = vmatpush1.msra.mxu0 %v11486_v33  ;;  %6559 = vmatmul.mubr.f32.vlgmr.msra.gmra.mxu1 %v13986_v20  ;;  %14092 = vst [vmem:[#allocation17_spill] sm:$0xff] %v11880_v31  ;;  %v14100_v20 = vld [vmem:[#allocation98_spill] sm:$0xff] }
 0x3a5   : > { %6290 = vmatmul.mubr.f32.gmra.mxu0 %v14088_v32  ;;  %6615 = vmatprep.subr.mxu0 %v11509_v17  ;;  %v11886_v32 = vpop.f32.mrf.mxu0  ;;  %v14105_v31 = vld [vmem:[#allocation58_spill] sm:$0xff] }
 0x3a6   : > { %6767 = vmatprep.subr.mxu1 %v11388_v38  ;;  %6618 = vmatpush1.msra.mxu0 %v11524_v34  ;;  %14094 = vst [vmem:[#allocation48_spill] sm:$0xff] %v11886_v32 }
 0x3a7   : > { %6769 = vmatpush1.msra.mxu1 %v11393_v53  ;;  %6621 = vmatprep.subr.mxu0 %v11534_v13 }
 0x3a8   : > { %6771 = vmatprep.subr.mxu1 %v11398_v7  ;;  %6300 = vmatprep.mubr.f32.mxu0 %v14089_v30  ;;  %v14095_v30 = vld [vmem:[#allocation5_spill] sm:$0xff] }
 0x3a9   : > { %6565 = vmatprep.mubr.f32.mxu1 %v13988_v18  ;;  %6624 = vmatpush1.msra.mxu0 %v11540_v4  ;;  %v14099_v18 = vld [vmem:[#allocation50_spill] sm:$0xff] }
 0x3aa   : > { %6773 = vmatpush1.msra.mxu1 %v11410_v22  ;;  %6306 = vmatmul.mubr.f32.gmra.mxu0 %v14090_v0  ;;  %v14096_v0 = vld [vmem:[#allocation7_spill] sm:$0xff] }
 0x3ab   : > { %6567 = vmatmul.mubr.f32.gmra.mxu1 %v13992_v37  ;;  %6627 = vmatprep.subr.mxu0 %v11503_v40  ;;  %v11892_v37 = vpop.f32.mrf.mxu1 }
 0x3ac   : > { %6775 = vmatprep.subr.mxu1 %v11424_v19  ;;  %6630 = vmatpush1.msra.mxu0 %v11434_v29  ;;  %14098 = vst [vmem:[#allocation9_spill] sm:$0xff] %v11892_v37  ;;  %v14109_v37 = vld [vmem:[#allocation45_spill] sm:$0xff] }
 0x3ad   : > { %6777 = vmatpush1.msra.mxu1 %v11431_v57  ;;  %6633 = vmatprep.subr.mxu0 %v11437_v39  ;;  %v11904_v32 = vpop.f32.mrf.mxu1 }
 0x3ae   : > { %6779 = vmatprep.subr.mxu1 %v11444_v54  ;;  %6573 = vmatprep.mubr.f32.mxu1 %v14093_v61  ;;  %v11898_v61 = vpop.f32.mrf.mxu0  ;;  %14107 = vst [vmem:[#allocation78_spill] sm:$0xff] %v11904_v32 }
 0x3af   : > { %6636 = vmatpush1.msra.mxu0 %v14095_v30  ;;  %6781 = vmatpush1.msra.mxu1 %v14096_v0  ;;  %14102 = vst [vmem:[#allocation67_spill] sm:$0xff] %v11898_v61  ;;  %v14112_v61 = vld [vmem:[#allocation53_spill] sm:$0xff] }
 0x3b0   : > { %6575 = vmatmul.mubr.f32.gmra.mxu1 %v14097_v5  ;;  %6639 = vmatprep.subr.mxu0 %v11601_v49  ;;  %v14106_v5 = vld [vmem:[#allocation88_spill] sm:$0xff]  ;;  %v11910_v44 = vpop.f32.mrf.mxu0 }
 0x3b1   : > { %6783 = vmatprep.subr.mxu1 %v14099_v18  ;;  %6642 = vmatpush1.msra.mxu0 %v14100_v20  ;;  %14111 = vst [vmem:[#allocation109_spill] sm:$0xff] %v11910_v44  ;;  %v14117_v44 = vld [vmem:[#allocation90_spill] sm:$0xff] }
 0x3b2   : > { %6785 = vmatpush1.msra.mxu1 %v14101_v27  ;;  %6645 = vmatprep.subr.mxu0 %v11608_v12  ;;  %v11918_v32 = vpop.f32.mrf.mxu0 }
 0x3b3   : > { %6787 = vmatprep.subr.mxu1 %v14103_v47  ;;  %6581 = vmatprep.mubr.f32.mxu1 %v14104_v15  ;;  %v14113_v15 = vld [vmem:[#allocation81_spill] sm:$0xff] }
 0x3b4   : > { %6648 = vmatpush1.msra.mxu0 %v14105_v31  ;;  %6789 = vmatpush1.msra.mxu1 %v14106_v5  ;;  %v11916_v5 = vpop.f32.mrf.mxu1 }
 0x3b5   : > { %6583 = vmatmul.mubr.f32.gmra.mxu1 %v14108_v6  ;;  %6651 = vmatprep.subr.mxu0 %v14109_v37  ;;  %14114 = vst [vmem:[#allocation18_spill] sm:$0xff] %v11916_v5  ;;  %v14115_v6 = vld [vmem:[#allocation106_spill] sm:$0xff] }
 0x3b6   : > { %6791 = vmatprep.subr.mxu1 %v14110_v59  ;;  %6654 = vmatpush1.msra.mxu0 %v11621_v46  ;;  %v14116_v59 = vld [vmem:[#allocation112_spill] sm:$0xff]  ;;  %v14119_v5 = vld [vmem:[#allocation46_spill] sm:$0xff] }
 0x3b7   : > { %6793 = vmatpush1.msra.mxu1 %v14112_v61  ;;  %6657 = vmatprep.subr.mxu0 %v11656_v52  ;;  %v14118_v52 = vld [vmem:[#allocation96_spill] sm:$0xff] }
 0x3b8   : > { %6795 = vmatprep.subr.mxu1 %v14113_v15  ;;  %6660 = vmatpush1.msra.mxu0 %v11660_v58  ;;  %v11928_v58 = vpop.f32.mrf.mxu1  ;;  %v11930_v15 = vpop.f32.mrf.mxu0 }
 0x3b9   : > { %6797 = vmatpush1.msra.mxu1 %v14115_v6  ;;  %6663 = vmatprep.subr.mxu0 %v11675_v8  ;;  %v14120_v8 = vld [vmem:[#allocation57_spill] sm:$0xff] }
 0x3ba   : > { %6799 = vmatprep.subr.mxu1 %v14116_v59  ;;  %6666 = vmatpush1.msra.mxu0 %v11680_v26  ;;  %v14121_v26 = vld [vmem:[#allocation99_spill] sm:$0xff] }
 0x3bb   : > { %6801 = vmatpush1.msra.mxu1 %v14117_v44  ;;  %6669 = vmatprep.subr.mxu0 %v11695_v2  ;;  %v14122_v2 = vld [vmem:[#allocation12_spill] sm:$0xff]  ;;  %v14123_v44 = vld [vmem:[#allocation6_spill] sm:$0xff] }
 0x3bc   : > { %6803 = vmatprep.subr.mxu1 %v14118_v52  ;;  %6672 = vmatpush1.msra.mxu0 %v11701_v56  ;;  %v11940_v56 = vpop.f32.mrf.mxu1  ;;  %v11942_v52 = vpop.f32.mrf.mxu0 }
 0x3bd   : > { %6805 = vmatpush1.msra.mxu1 %v14119_v5  ;;  %6675 = vmatprep.subr.mxu0 %v11719_v41  ;;  %v14124_v41 = vld [vmem:[#allocation23_spill] sm:$0xff] }
 0x3be   : > { %6807 = vmatprep.subr.mxu1 %v14120_v8  ;;  %6678 = vmatpush1.msra.mxu0 %v11725_v25  ;;  %v11948_v25 = vpop.f32.mrf.mxu1 }
 0x3bf   : > { %6809 = vmatpush1.msra.mxu1 %v14121_v26  ;;  %6681 = vmatprep.subr.mxu0 %v11740_v55  ;;  %v14125_v26 = vld [vmem:[#allocation64_spill] sm:$0xff]  ;;  %v14127_v55 = vld [vmem:[#allocation27_spill] sm:$0xff] }
 0x3c0   : > { %6811 = vmatprep.subr.mxu1 %v14122_v2  ;;  %6684 = vmatpush1.msra.mxu0 %v11753_v45  ;;  %v14126_v2 = vld [vmem:[#allocation38_spill] sm:$0xff]  ;;  %v11954_v45 = vpop.f32.mrf.mxu0 }
 0x3c1   : > { %6813 = vmatpush1.msra.mxu1 %v14123_v44  ;;  %6715 = vmatprep.subr.mxu0 %v11767_v9  ;;  %v14128_v44 = vld [vmem:[#allocation25_spill] sm:$0xff]  ;;  %v14129_v9 = vld [vmem:[#allocation47_spill] sm:$0xff] }
 0x3c2   : > { %6815 = vmatprep.subr.mxu1 %v14124_v41  ;;  %6718 = vmatpush2.msra.mxu0 %v11773_v48  ;;  %v14130_v41 = vld [vmem:[#allocation84_spill] sm:$0xff]  ;;  %v11960_v48 = vpop.f32.mrf.mxu1 }
 0x3c3   : > { %6817 = vmatpush1.msra.mxu1 %v14125_v26  ;;  %6721 = vmatprep.subr.mxu0 %v11784_v24  ;;  %v14131_v26 = vand.u32 4294901760, %v11413_v43 }
 0x3c4   : > { %6819 = vmatprep.subr.mxu1 %v14126_v2  ;;  %6724 = vmatpush2.msra.mxu0 %v11795_v62  ;;  %v14132_v2 = vand.u32 4294901760, %v11418_v23  ;;  %v11968_v62 = vpop.f32.mrf.mxu0  ;;  %v11976_v43 = vpop.f32.mrf.mxu1  ;;  %v14137_v23 = vld [vmem:[#allocation13_spill] sm:$0xff] }
 0x3c5   : > { %6727 = vmatprep.mubr.f32.mxu0 %v14127_v55  ;;  %6821 = vmatpush1.msra.mxu1 %v14128_v44  ;;  %v14133_v55 = vand.u32 4294901760, %v11427_v10 }
 0x3c6   : > { %6730 = vmatmul.mubr.f32.vlgmr.msra.gmra.mxu0 %v14129_v9  ;;  %6823 = vmatprep.subr.mxu1 %v14130_v41  ;;  %v14134_v9 = vld [vmem:[#allocation56_spill] sm:$0xff]  ;;  %v14135_v41 = vand.u32 4294901760, %v11442_v51  ;;  %v11983_v10 = vpop.f32.mrf.mxu0  ;;  %v14140_v51 = vand.u32 4294901760, %v11481_v36  ;;  %v14147_v36 = vand.u32 4294901760, %v11509_v17 }
 0x3c7   : > { %6918 = vmatprep.subr.mxu0 %v14131_v26  ;;  %6825 = vmatpush1.msra.mxu1 %v11686_v28  ;;  %v14136_v26 = vld [vmem:[#allocation61_spill] sm:$0xff]  ;;  %v14151_v17 = vld [vmem:[#allocation116_spill] sm:$0xff] }
 0x3c8   : > { %6922 = vmatpush1.msra.mxu0 %v14132_v2  ;;  %6827 = vmatprep.subr.mxu1 %v11691_v50  ;;  %v14138_v2 = vand.u32 4294901760, %v11461_v1  ;;  %v14143_v1 = vld [vmem:[#allocation28_spill] sm:$0xff] }
 0x3c9   : > { %6926 = vmatprep.subr.mxu0 %v14133_v55  ;;  %6737 = vmatprep.mubr.f32.mxu0 %v14134_v9  ;;  %v14139_v55 = vand.u32 4294901760, %v11466_v60  ;;  %v11991_v9 = vpop.f32.mrf.mxu1  ;;  %v11998_v60 = vpop.f32.mrf.mxu0 }
 0x3ca   : > { %6829 = vmatpush1.msra.mxu1 %v11715_v11  ;;  %6930 = vmatpush1.msra.mxu0 %v14135_v41  ;;  %v14141_v41 = vld [vmem:[#allocation93_spill] sm:$0xff] }
 0x3cb   : > { %6740 = vmatmul.mubr.f32.gmra.mxu0 %v14136_v26  ;;  %6859 = vmatprep.subr.mxu1 %v14137_v23  ;;  %v14142_v26 = vld [vmem:[#allocation100_spill] sm:$0xff] }
 0x3cc   : > { %6934 = vmatprep.subr.mxu0 %v14138_v2  ;;  %6861 = vmatpush2.msra.mxu1 %v11736_v14  ;;  %v14144_v2 = vand.u32 4294901760, %v11486_v33  ;;  %v14145_v14 = vld [vmem:[#allocation52_spill] sm:$0xff]  ;;  %v14149_v33 = vand.u32 4294901760, %v11534_v13 }
 0x3cd   : > { %6938 = vmatpush1.msra.mxu0 %v14139_v55  ;;  %6863 = vmatprep.subr.mxu1 %v11746_v16  ;;  %v14146_v55 = vld [vmem:[#allocation111_spill] sm:$0xff] }
 0x3ce   : > { %6942 = vmatprep.subr.mxu0 %v14140_v51  ;;  %6747 = vmatprep.mubr.f32.mxu0 %v14141_v41  ;;  %v14148_v51 = vand.u32 4294901760, %v11524_v34  ;;  %v12006_v41 = vpop.f32.mrf.mxu1  ;;  %v14152_v34 = vld [vmem:[#allocation63_spill] sm:$0xff] }
 0x3cf   : > { %6865 = vmatpush2.msra.mxu1 %v14142_v26  ;;  %6869 = vmatprep.mubr.f32.mxu1 %v14143_v1  ;;  %v12008_v1 = vpop.permute.xlu1 %3905 }
 0x3d0   : > { %6946 = vmatpush1.msra.mxu0 %v14144_v2  ;;  %6873 = vmatmul.mubr.f32.vlgmr.msra.gmra.mxu1 %v14145_v14  ;;  %v14150_v14 = vld [vmem:[#allocation75_spill] sm:$0xff] }
 0x3d1   : > { %6750 = vmatmul.mubr.f32.gmra.mxu0 %v14146_v55  ;;  %6950 = vmatprep.subr.mxu0 %v14147_v36  ;;  %v4050_v2 = vadd.f32 %v14150_v14, %v12008_v1  ;;  %v14153_v55 = vand.u32 4294901760, %v11540_v4  ;;  %v14154_v36 = vld [vmem:[#allocation110_spill] sm:$0xff]  ;;  %v12027_v14 = vpop.f32.mrf.mxu1  ;;  %v12034_v4 = vpop.permute.xlu0 %3910 }
 0x3d2   : > { %7121 = vmatprep.subr.mxu1 %v11388_v38  ;;  %6954 = vmatpush1.msra.mxu0 %v14148_v51  ;;  %v12017_v38 = vpop.f32.mrf.mxu0  ;;  %v14155_v51 = vld [vmem:[#allocation42_spill] sm:$0xff] }
 0x3d3   : > { %7123 = vmatpush1.msra.mxu1 %v11393_v53  ;;  %6958 = vmatprep.subr.mxu0 %v14149_v33  ;;  %v4048_v53 = vadd.f32 %v14154_v36, %v12008_v1  ;;  %v4351_v13 = vadd.f32 %v14155_v51, %v4050_v2  ;;  %v14156_v33 = vld [vmem:[#allocation30_spill] sm:$0xff]  ;;  %v14161_v51 = vand.u32 4294901760, %v11437_v39 }
 0x3d4   : > { %7125 = vmatprep.subr.mxu1 %v11398_v7  ;;  %6757 = vmatprep.mubr.f32.mxu0 %v14151_v17  ;;  %v14157_v17 = vld [vmem:[#allocation85_spill] sm:$0xff] }
 0x3d5   : > { %6881 = vmatprep.mubr.f32.mxu1 %v14152_v34  ;;  %6962 = vmatpush1.msra.mxu0 %v14153_v55  ;;  %v12029_v7 = vpop.f32.mrf.mxu0  ;;  %v14158_v34 = vand.u32 4294901760, %v11503_v40  ;;  %v14159_v55 = vld [vmem:[#allocation41_spill] sm:$0xff]  ;;  %v4522_v36 = vadd.f32 %v11842_v3, %v4351_v13  ;;  %v14162_v40 = vld [vmem:[#allocation44_spill] sm:$0xff] }
 0x3d6   : > { %7127 = vmatpush1.msra.mxu1 %v11410_v22  ;;  %6760 = vmatmul.mubr.f32.gmra.mxu0 %v14156_v33  ;;  %v4349_v26 = vadd.f32 %v14159_v55, %v4048_v53  ;;  %v14160_v22 = vand.u32 4294901760, %v11434_v29  ;;  %v4066_v33 = vadd.f32 %v14162_v40, %v12034_v4  ;;  %v12052_v29 = vpop.f32.mrf.mxu1  ;;  %v14164_v3 = vld [vmem:[#allocation60_spill] sm:$0xff]  ;;  %v14167_v55 = vld [vmem:[#allocation115_spill] sm:$0xff]  ;;  %v14171_v40 = vand.u32 4294901760, %v14100_v20 }
 0x3d7   : > { %6885 = vmatmul.mubr.f32.gmra.mxu1 %v14157_v17  ;;  %6966 = vmatprep.subr.mxu0 %v14158_v34  ;;  %v12041_v2 = vpop.f32.mrf.mxu0  ;;  %v4665_v53 = vadd.f32 %v11868_v21, %v4522_v36  ;;  %v4064_v13 = vadd.f32 %v14164_v3, %v12034_v4  ;;  %v12061_v34 = vpop.permute.xlu1 %3915  ;;  %v14168_v36 = vand.u32 4294901760, %v11601_v49  ;;  %v14172_v49 = vand.u32 4294901760, %v11608_v12  ;;  %v14174_v20 = vld [vmem:[#allocation104_spill] sm:$0xff]  ;;  %v14177_v12 = vld [vmem:[#allocation83_spill] sm:$0xff] }
 0x3d8   : > { %7129 = vmatprep.subr.mxu1 %v11424_v19  ;;  %6970 = vmatpush1.msra.mxu0 %v14160_v22  ;;  %v4520_v17 = vadd.f32 %v11827_v63, %v4349_v26  ;;  %v14163_v19 = vld [vmem:[#allocation113_spill] sm:$0xff]  ;;  %v14166_v63 = vld [vmem:[#allocation107_spill] sm:$0xff] }
 0x3d9   : > { %7131 = vmatpush1.msra.mxu1 %v11431_v57  ;;  %6974 = vmatprep.subr.mxu0 %v14161_v51  ;;  %v14165_v57 = vand.u32 4294901760, %v14095_v30  ;;  %v4359_v21 = vadd.f32 %v14166_v63, %v4066_v33  ;;  %v4882_v26 = vadd.f32 %v11930_v15, %v4665_v53  ;;  %v14169_v30 = vld [vmem:[#allocation74_spill] sm:$0xff]  ;;  %v14170_v51 = vld [vmem:[#allocation71_spill] sm:$0xff]  ;;  %v12075_v33 = vpop.permute.xlu0 %3920  ;;  %v12083_v53 = vpop.f32.mrf.mxu1  ;;  %v14178_v63 = vld [vmem:[#allocation9_spill] sm:$0xff] }
 0x3da   : > { %7133 = vmatprep.subr.mxu1 %v11444_v54  ;;  %6893 = vmatprep.mubr.f32.mxu1 %v14163_v19  ;;  %v4663_v54 = vadd.f32 %v11856_v42, %v4520_v17  ;;  %v4082_v22 = vadd.f32 %v14169_v30, %v12061_v34  ;;  %v4098_v3 = vadd.f32 %v14174_v20, %v12075_v33  ;;  %v14182_v30 = vld [vmem:[#allocation15_spill] sm:$0xff] }
 0x3db   : > { %6978 = vmatpush1.msra.mxu0 %v14165_v57  ;;  %7135 = vmatpush1.msra.mxu1 %v14096_v0  ;;  %v12059_v39 = vpop.f32.mrf.mxu0  ;;  %v4357_v0 = vadd.f32 %v14170_v51, %v4064_v13  ;;  %v4532_v42 = vadd.f32 %v11862_v35, %v4359_v21  ;;  %v5015_v17 = vadd.f32 %v11960_v48, %v4882_v26  ;;  %v14175_v13 = vld [vmem:[#allocation76_spill] sm:$0xff]  ;;  %v14176_v35 = vld [vmem:[#allocation117_spill] sm:$0xff]  ;;  %v14179_v21 = vand.u32 4294901760, %v14105_v31 }
 0x3dc   : > { %6897 = vmatmul.mubr.f32.gmra.mxu1 %v14167_v55  ;;  %6982 = vmatprep.subr.mxu0 %v14168_v36  ;;  %v4880_v15 = vadd.f32 %v11918_v32, %v4663_v54  ;;  %v4367_v57 = vadd.f32 %v14175_v13, %v4082_v22  ;;  %v14180_v54 = vld [vmem:[#allocation88_spill] sm:$0xff]  ;;  %v14181_v36 = vld [vmem:[#allocation79_spill] sm:$0xff]  ;;  %v14189_v13 = vand.u32 4294901760, %v11621_v46 }
 0x3dd   : > { %7137 = vmatprep.subr.mxu1 %v14099_v18  ;;  %6986 = vmatpush1.msra.mxu0 %v14171_v40  ;;  %v14173_v18 = vld [vmem:[#allocation68_spill] sm:$0xff]  ;;  %v4530_v32 = vadd.f32 %v14177_v12, %v4357_v0  ;;  %v4677_v48 = vadd.f32 %v14178_v63, %v4532_v42  ;;  %v14185_v0 = vand.u32 4294901760, %v14109_v37  ;;  %v14193_v37 = vld [vmem:[#allocation66_spill] sm:$0xff] }
 0x3de   : > { %7139 = vmatpush1.msra.mxu1 %v14101_v27  ;;  %6990 = vmatprep.subr.mxu0 %v14172_v49  ;;  %v4080_v19 = vadd.f32 %v14173_v18, %v12061_v34  ;;  %v12092_v27 = vpop.f32.mrf.mxu0  ;;  %v5013_v26 = vadd.f32 %v11948_v25, %v4880_v15  ;;  %v14183_v51 = vld [vmem:[#allocation72_spill] sm:$0xff]  ;;  %v14184_v49 = vld [vmem:[#allocation119_spill] sm:$0xff]  ;;  %v14187_v18 = vld [vmem:[#allocation17_spill] sm:$0xff] }
 0x3df   : > { %7141 = vmatprep.subr.mxu1 %v14103_v47  ;;  %6905 = vmatprep.mubr.f32.mxu1 %v14176_v35  ;;  %v4096_v47 = vadd.f32 %v14181_v36, %v12075_v33  ;;  %v4375_v40 = vadd.f32 %v14183_v51, %v4098_v3  ;;  %v14186_v31 = vld [vmem:[#allocation48_spill] sm:$0xff]  ;;  %v4675_v20 = vadd.f32 %v14187_v18, %v4530_v32  ;;  %v7254_v35 = vmax.f32 %v5015_v17, 0.0  ;;  %v14201_v18 = vld [vmem:[#allocation14_spill] sm:$0xff] }
 0x3e0   : > { %6994 = vmatpush1.msra.mxu0 %v14179_v21  ;;  %7143 = vmatpush1.msra.mxu1 %v14180_v54  ;;  %v12100_v55 = vpop.f32.mrf.mxu1  ;;  %v4365_v22 = vadd.f32 %v14182_v30, %v4080_v19  ;;  %v4542_v42 = vadd.f32 %v14186_v31, %v4367_v57  ;;  %v4890_v25 = vadd.f32 %v11954_v45, %v4677_v48  ;;  %v14188_v15 = vld [vmem:[#allocation108_spill] sm:$0xff]  ;;  %v14190_v19 = vld [vmem:[#allocation103_spill] sm:$0xff]  ;;  %v14192_v21 = vld [vmem:[#allocation109_spill] sm:$0xff]  ;;  %v14194_v57 = vand.u32 4294901760, %v14193_v37  ;;  %v12121_v32 = vpop.f32.mrf.mxu0 }
 0x3e1   : > { %6909 = vmatmul.mubr.f32.gmra.mxu1 %v14184_v49  ;;  %6998 = vmatprep.subr.mxu0 %v14185_v0  ;;  %v4373_v12 = vadd.f32 %v14190_v19, %v4096_v47  ;;  %v14191_v3 = vld [vmem:[#allocation20_spill] sm:$0xff]  ;;  %v4552_v54 = vadd.f32 %v14192_v21, %v4375_v40  ;;  %v14195_v48 = vld [vmem:[#allocation18_spill] sm:$0xff]  ;;  %v4888_v46 = vadd.f32 %v11942_v52, %v4675_v20  ;;  %v7253_v17 = vmax.f32 %v5013_v26, 0.0  ;;  %v14196_v30 = vld [vmem:[#allocation81_spill] sm:$0xff] }
 0x3e2   : > { %7145 = vmatprep.subr.mxu1 %v14188_v15  ;;  %7002 = vmatpush1.msra.mxu0 %v14189_v13  ;;  %v4540_v63 = vadd.f32 %v14191_v3, %v4365_v22  ;;  %v12123_v45 = vpop.f32.mrf.mxu1  ;;  %v4689_v36 = vadd.f32 %v14195_v48, %v4542_v42  ;;  %v14197_v47 = vld [vmem:[#allocation65_spill] sm:$0xff]  ;;  %v5023_v51 = vadd.f32 %v11991_v9, %v4890_v25  ;;  %v14200_v49 = vld [vmem:[#allocation78_spill] sm:$0xff]  ;;  %v14202_v42 = vand.u32 4294901760, %v14201_v18  ;;  %v14203_v15 = vld [vmem:[#allocation40_spill] sm:$0xff] }
 0x3e3   : > { %7147 = vmatpush1.msra.mxu1 %v14112_v61  ;;  %7006 = vmatprep.subr.mxu0 %v14194_v57  ;;  %v14198_v22 = vand.u32 4294901760, %v14197_v47  ;;  %v14199_v61 = vld [vmem:[#allocation67_spill] sm:$0xff]  ;;  %v4701_v31 = vadd.f32 %v11940_v56, %v4552_v54  ;;  %v7309_v26 = vadd.f32 %v7254_v35, %v7253_v17  ;;  %v5021_v20 = vadd.f32 %v11976_v43, %v4888_v46  ;;  %v14205_v13 = vld [vmem:[#allocation90_spill] sm:$0xff]  ;;  %v14206_v56 = vld [vmem:[#allocation73_spill] sm:$0xff] }
 0x3e4   : > { %7149 = vmatprep.subr.mxu1 %v14196_v30  ;;  %v4550_v40 = vadd.f32 %v14199_v61, %v4373_v12  ;;  %v4687_v0 = vadd.f32 %v14200_v49, %v4540_v63  ;;  %v4898_v52 = vadd.f32 %v11983_v10, %v4689_v36  ;;  %v14204_v9 = vand.u32 4294901760, %v14203_v15  ;;  %v14209_v3 = vld [vmem:[#allocation19_spill] sm:$0xff]  ;;  %v14211_v21 = vld [vmem:[#allocation70_spill] sm:$0xff]  ;;  %v14216_v47 = vld [vmem:[#allocation33_spill] sm:$0xff] }
 0x3e5   : > { %7010 = vmatpush1.msra.mxu0 %v14198_v22  ;;  %7151 = vmatpush1.msra.mxu1 %v14115_v6  ;;  %v14207_v19 = vand.u32 4294901760, %v14206_v56  ;;  %v12146_v6 = vpop.f32.mrf.mxu0  ;;  %v4906_v43 = vadd.f32 %v12017_v38, %v4701_v31  ;;  %v7260_v35 = vmax.f32 %v5023_v51, 0.0  ;;  %v14210_v63 = vand.u32 4294901760, %v14209_v3  ;;  %v14213_v36 = vld [vmem:[#allocation31_spill] sm:$0xff]  ;;  %v14222_v49 = vld [vmem:[#allocation94_spill] sm:$0xff] }
 0x3e6   : > { %7014 = vmatprep.subr.mxu0 %v14202_v42  ;;  %7153 = vmatprep.subr.mxu1 %v14116_v59  ;;  %v4699_v25 = vadd.f32 %v11928_v58, %v4550_v40  ;;  %v12148_v12 = vpop.f32.mrf.mxu1  ;;  %v4896_v10 = vadd.f32 %v11968_v62, %v4687_v0  ;;  %v14208_v59 = vld [vmem:[#allocation96_spill] sm:$0xff]  ;;  %v5031_v58 = vadd.f32 %v12027_v14, %v4898_v52  ;;  %v14212_v54 = vand.u32 4294901760, %v14211_v21  ;;  %v14215_v14 = vld [vmem:[#allocation99_spill] sm:$0xff]  ;;  %v14225_v52 = vld [vmem:[#allocation77_spill] sm:$0xff] }
 0x3e7   : > { %7018 = vmatpush1.msra.mxu0 %v14204_v9  ;;  %7155 = vmatpush1.msra.mxu1 %v14205_v13  ;;  %v7259_v62 = vmax.f32 %v5021_v20, 0.0  ;;  %v5039_v48 = vadd.f32 %v12083_v53, %v4906_v43  ;;  %v14214_v46 = vand.u32 4294901760, %v14213_v36  ;;  %v14217_v22 = vand.u32 4294901760, %v14216_v47  ;;  %v14221_v53 = vld [vmem:[#allocation6_spill] sm:$0xff]  ;;  %v14224_v31 = vld [vmem:[#allocation23_spill] sm:$0xff] }
 0x3e8   : > { %7022 = vmatprep.subr.mxu0 %v14207_v19  ;;  %7157 = vmatprep.subr.mxu1 %v14208_v59  ;;  %v12159_v37 = vpop.f32.mrf.mxu1  ;;  %v4904_v57 = vadd.f32 %v11998_v60, %v4699_v25  ;;  %v5029_v38 = vadd.f32 %v12006_v41, %v4896_v10  ;;  %v7266_v30 = vmax.f32 %v5031_v58, 0.0  ;;  %v14218_v60 = vld [vmem:[#allocation12_spill] sm:$0xff]  ;;  %v14223_v0 = vand.u32 4294901760, %v14222_v49  ;;  %v14229_v56 = vld [vmem:[#allocation38_spill] sm:$0xff]  ;;  %v14233_v58 = vld [vmem:[#allocation43_spill] sm:$0xff] }
 0x3e9   : > { %7026 = vmatpush1.msra.mxu0 %v14210_v63  ;;  %7159 = vmatpush1.msra.mxu1 %v14119_v5  ;;  %v5201_v5 = vpop.f32.mrf.mxu0  ;;  %v7312_v17 = vadd.f32 %v7260_v35, %v7259_v62  ;;  %v7272_v18 = vmax.f32 %v5039_v48, 0.0  ;;  %v14228_v25 = vand.u32 4294901760, %v11784_v24  ;;  %v14230_v19 = vld [vmem:[#allocation4_spill] sm:$0xff]  ;;  %v14232_v59 = vld [vmem:[#allocation26_spill] sm:$0xff] }
 0x3ea   : > { %7030 = vmatprep.subr.mxu0 %v14212_v54  ;;  %7161 = vmatprep.subr.mxu1 %v14120_v8  ;;  %v5037_v41 = vadd.f32 %v12052_v29, %v4904_v57  ;;  %v14219_v8 = vld [vmem:[#allocation97_spill] sm:$0xff]  ;;  %v7265_v40 = vmax.f32 %v5029_v38, 0.0  ;;  %v14227_v29 = vld [vmem:[#allocation64_spill] sm:$0xff]  ;;  %v5202_v13 = vadd.f32 %v5201_v5, %v12075_v33  ;;  %v14231_v10 = vand.u32 4294901760, %v14230_v19  ;;  %v14237_v62 = vld [vmem:[#allocation34_spill] sm:$0xff] }
 0x3eb   : > { %7310 = vadd.xlane.f32.xlu1 %v7309_v26  ;;  %7034 = vmatpush1.msra.mxu0 %v14214_v46  ;;  %v14220_v61 = vand.u32 4294901760, %v14219_v8  ;;  %v14226_v26 = vand.u32 4294901760, %v14225_v52  ;;  %v5203_v20 = vpop.f32.mrf.mxu0  ;;  %v14234_v24 = vld [vmem:[#allocation84_spill] sm:$0xff]  ;;  %v14235_v57 = vld [vmem:[#allocation49_spill] sm:$0xff]  ;;  %v14238_v38 = vld [vmem:[#allocation82_spill] sm:$0xff] }
 0x3ec   : > { %7163 = vmatpush1.msra.mxu1 %v14215_v14  ;;  %7038 = vmatprep.subr.mxu0 %v14217_v22  ;;  %v12172_v51 = vpop.f32.mrf.mxu1  ;;  %v7315_v15 = vadd.f32 %v7266_v30, %v7265_v40  ;;  %v7271_v9 = vmax.f32 %v5037_v41, 0.0  ;;  %v5204_v3 = vadd.f32 %v5203_v20, %v12075_v33  ;;  %v14242_v48 = vld [vmem:[#allocation8_spill] sm:$0xff]  ;;  %v5156_v20 = vadd.f32 %v12041_v2, %v12008_v1 }
 0x3ed   : > { %7165 = vmatprep.subr.mxu1 %v14218_v60  ;;  %7042 = vmatpush1.msra.mxu0 %v14220_v61 }
 0x3ee   : > { %7167 = vmatpush1.msra.mxu1 %v14221_v53  ;;  %7074 = vmatprep.subr.mxu0 %v14223_v0  ;;  %v12180_v42 = vpop.f32.mrf.mxu1  ;;  %v7318_v35 = vadd.f32 %v7272_v18, %v7271_v9  ;;  %v5457_v9 = vadd.f32 %v12123_v45, %v5156_v20 }
 0x3ef   : > { %7169 = vmatprep.subr.mxu1 %v14224_v31  ;;  %7078 = vmatpush2.msra.mxu0 %v14226_v26  ;;  %v5154_v26 = vadd.f32 %v12029_v7, %v12008_v1  ;;  %v5172_v7 = vadd.f32 %v12092_v27, %v12034_v4 }
 0x3f0   : > { %7171 = vmatpush1.msra.mxu1 %v14227_v29  ;;  %7313 = vadd.xlane.f32.xlu0 %v7312_v17 }
 0x3f1   : > { %7082 = vmatprep.subr.mxu0 %v14228_v25  ;;  %7173 = vmatprep.subr.mxu1 %v14229_v56  ;;  %v5478_v43 = vpop.f32.mrf.mxu1  ;;  %v5465_v45 = vadd.f32 %v12159_v37, %v5172_v7 }
 0x3f2   : > { %7086 = vmatpush2.msra.mxu0 %v14231_v10  ;;  %7088 = vmatprep.mubr.f32.mxu0 %v14232_v59  ;;  %v5479_v63 = vadd.f32 %v5478_v43, %v5202_v13  ;;  %v5170_v10 = vadd.f32 %v12059_v39, %v12034_v4 }
 0x3f3   : > { %7175 = vmatpush1.msra.mxu1 %v14128_v44  ;;  %7090 = vmatmul.mubr.f32.vlgmr.msra.gmra.mxu0 %v14233_v58  ;;  %v5480_v21 = vpop.f32.mrf.mxu1  ;;  %v14236_v44 = vld [vmem:[#allocation54_spill] sm:$0xff] }
 0x3f4   : > { %7177 = vmatprep.subr.mxu1 %v14234_v24  ;;  %7316 = vadd.xlane.f32.xlu0 %v7315_v15  ;;  %v5481_v54 = vadd.f32 %v5480_v21, %v5204_v3  ;;  %v5455_v15 = vadd.f32 %v12100_v55, %v5154_v26  ;;  %v5463_v3 = vadd.f32 %v12148_v12, %v5170_v10  ;;  %v12243_v10 = vld [vmem:[%s12619_s5] sm:$0xff] }
 0x3f5   : > { %7179 = vmatpush1.msra.mxu1 %v11686_v28  ;;  %7096 = vmatprep.mubr.f32.mxu0 %v14235_v57  ;;  %v14239_v28 = vld [vmem:[#allocation100_spill] sm:$0xff]  ;;  %v5186_v21 = vadd.f32 %v12121_v32, %v12061_v34 }
 0x3f6   : > { %7181 = vmatprep.subr.mxu1 %v11691_v50  ;;  %7319 = vadd.xlane.f32.xlu1 %v7318_v35  ;;  %v14240_v50 = vld [vmem:[#allocation92_spill] sm:$0xff] }
 0x3f7   : > { %7183 = vmatpush1.msra.mxu1 %v11715_v11  ;;  %7098 = vmatmul.mubr.f32.gmra.mxu0 %v14236_v44  ;;  %v14241_v11 = vld [vmem:[#allocation36_spill] sm:$0xff]  ;;  %v5471_v27 = vadd.f32 %v12172_v51, %v5186_v21  ;;  %v7958_v21 = vmov 1966171168  }
 0x3f8   : > { %7213 = vmatprep.subr.mxu1 %v14137_v23  ;;  %7104 = vmatprep.mubr.f32.mxu0 %v14238_v38 }
 0x3f9   : > { %7215 = vmatpush2.msra.mxu1 %v14237_v62  ;;  %7221 = vmatprep.mubr.f32.mxu1 %v14232_v59  ;;  %v5188_v62 = vadd.f32 %v12146_v6, %v12061_v34 }
 0x3fa   : > { %7217 = vmatprep.subr.mxu1 %v11746_v16 }
 0x3fb   : > { %7219 = vmatpush2.msra.mxu1 %v14239_v28  ;;  %7106 = vmatmul.mubr.f32.gmra.mxu0 %v14240_v50  ;;  %v5473_v37 = vadd.f32 %v12180_v42, %v5188_v62  ;;  %v12310_v62 = vld [vmem:[%s12619_s5 + $0x68] sm:$0xff] }
 0x3fc   : > { %7223 = vmatmul.mubr.f32.vlgmr.msra.gmra.mxu1 %v14233_v58  ;;  %7112 = vmatprep.mubr.f32.mxu0 %v14241_v11 }
 0x3fd   : > { %7229 = vmatprep.mubr.f32.mxu1 %v14235_v57 }
 0x3ff   : > { %7114 = vmatmul.mubr.f32.gmra.mxu0 %v14242_v48 }
 0x400   : > { %7231 = vmatmul.mubr.f32.gmra.mxu1 %v14236_v44 }
 0x401   : > { %7237 = vmatprep.mubr.f32.mxu1 %v14238_v38  ;;  %v5625_v23 = vpop.f32.mrf.mxu0 }
 0x402   : > { %v5626_v25 = vadd.f32 %v5625_v23, %v5455_v15 }
 0x403   : > { %v5627_v16 = vpop.f32.mrf.mxu0 }
 0x404   : > { %7239 = vmatmul.mubr.f32.gmra.mxu1 %v14240_v50  ;;  %v5628_v56 = vadd.f32 %v5627_v16, %v5457_v9 }
 0x405   : > { %7245 = vmatprep.mubr.f32.mxu1 %v14241_v11 }
 0x407   : > { %v5635_v36 = vpop.f32.mrf.mxu0 }
 0x408   : > { %7247 = vmatmul.mubr.f32.gmra.mxu1 %v14242_v48  ;;  %v5636_v58 = vadd.f32 %v5635_v36, %v5463_v3 }
 0x409   : > { %v5637_v46 = vpop.f32.mrf.mxu0 }
 0x40a   : > { %v5638_v57 = vadd.f32 %v5637_v46, %v5465_v45  ;;  %v12290_v45 = vld [vmem:[%s12619_s5 + $0x50] sm:$0xff] }
 0x40c   : > { %v5768_v14 = vpop.f32.mrf.mxu1  ;;  %v5645_v5 = vpop.f32.mrf.mxu0 }
 0x40d   : > { %v5769_v19 = vadd.f32 %v5768_v14, %v5626_v25  ;;  %v5646_v11 = vadd.f32 %v5645_v5, %v5471_v27  ;;  %v12315_v27 = vld [vmem:[%s12619_s5 + $0x70] sm:$0xff] }
 0x40e   : > { %v5647_v17 = vpop.f32.mrf.mxu0  ;;  %v5770_v30 = vpop.f32.mrf.mxu1  ;;  %14243 = vst [vmem:[#allocation39_spill] sm:$0xff] %v12315_v27 }
 0x40f   : > { %v5771_v43 = vadd.f32 %v5770_v30, %v5628_v56  ;;  %v5648_v14 = vadd.f32 %v5647_v17, %v5473_v37 }
 0x412   : > { %v5655_v47 = vpop.f32.mrf.mxu0  ;;  %v5780_v60 = vpop.f32.mrf.mxu1 }
 0x413   : > { %v5656_v22 = vadd.f32 %v5655_v47, %v5479_v63  ;;  %v5781_v44 = vadd.f32 %v5780_v60, %v5636_v58  ;;  %v12295_v58 = vld [vmem:[%s12619_s5 + $0x58] sm:$0xff] }
 0x414   : > { %v5657_v41 = vpop.f32.mrf.mxu0  ;;  %v5782_v61 = vpop.f32.mrf.mxu1 }
 0x415   : > { %v5658_v8 = vadd.f32 %v5657_v41, %v5481_v54  ;;  %v5783_v28 = vadd.f32 %v5782_v61, %v5638_v57 }
 0x418   : > { %v5792_v53 = vpop.f32.mrf.mxu1 }
 0x419   : > { %v5793_v46 = vadd.f32 %v5792_v53, %v5646_v11 }
 0x41a   : > { %v5794_v40 = vpop.f32.mrf.mxu1 }
 0x41b   : > { %v5795_v6 = vadd.f32 %v5794_v40, %v5648_v14 }
 0x41d   : > { %v5804_v49 = vpop.f32.mrf.mxu1 }
 0x41e   : > { %v5805_v0 = vadd.f32 %v5804_v49, %v5656_v22 }
 0x41f   : > { %v5806_v31 = vpop.f32.mrf.mxu1 }
 0x420   : > { %v12217_v18 = vadd.f32 %v5806_v31, %v5658_v8 }
 0x42d   : > { %v5985_v52 = vpop.f32.mrf.mxu0 }
 0x42e   : > { %v5986_v35 = vadd.f32 %v5985_v52, %v5769_v19 }
 0x42f   : > { %v5987_v29 = vpop.f32.mrf.mxu0 }
 0x430   : > { %v5988_v63 = vadd.f32 %v5987_v29, %v5771_v43  ;;  %v12258_v43 = vld [vmem:[%s12619_s5 + $0x18] sm:$0xff] }
 0x433   : > { %v5993_v13 = vpop.f32.mrf.mxu0 }
 0x434   : > { %v5994_v50 = vadd.f32 %v5993_v13, %v5781_v44 }
 0x435   : > { %v5995_v59 = vpop.f32.mrf.mxu0 }
 0x436   : > { %v5996_v32 = vadd.f32 %v5995_v59, %v5783_v28  ;;  %v12268_v59 = vld [vmem:[%s12619_s5 + $0x28] sm:$0xff] }
 0x438   : > { %v6118_v2 = vpop.f32.mrf.mxu1  ;;  %v6001_v54 = vpop.f32.mrf.mxu0 }
 0x439   : > { %v6119_v55 = vadd.f32 %v6118_v2, %v5986_v35  ;;  %v6002_v22 = vadd.f32 %v6001_v54, %v5793_v46  ;;  %v12263_v35 = vld [vmem:[%s12619_s5 + $0x20] sm:$0xff]  ;;  %v12275_v2 = vld [vmem:[%s12619_s5 + $0x30] sm:$0xff]  ;;  %v12302_v54 = vunpack.c.l.s4 %v7958_v21  ;;  %v12396_v21 = vld [vmem:[%s12619_s5 + $0xc8] sm:$0xff] }
 0x43a   : > { %v6120_v24 = vpop.f32.mrf.mxu1  ;;  %v6003_v48 = vpop.f32.mrf.mxu0  ;;  %v12340_v46 = vld [vmem:[%s12619_s5 + $0x80] sm:$0xff]  ;;  %14254 = vst [vmem:[#allocation95_spill] sm:$0xff] %v12396_v21 }
 0x43b   : > { %v6121_v39 = vadd.f32 %v6120_v24, %v5988_v63  ;;  %v7255_v12 = vmax.f32 %v6119_v55, 0.0  ;;  %v6004_v61 = vadd.f32 %v6003_v48, %v5795_v6  ;;  %v12280_v63 = vld [vmem:[%s12619_s5 + $0x40] sm:$0xff]  ;;  %v12285_v55 = vld [vmem:[%s12619_s5 + $0x48] sm:$0xff]  ;;  %14245 = vst [vmem:[#allocation62_spill] sm:$0xff] %v12340_v46 }
 0x43c   : > { %v12300_v24 = vld [vmem:[%s12619_s5 + $0x60] sm:$0xff] }
 0x43d   : > { %v7256_v38 = vmax.f32 %v6121_v39, 0.0 }
 0x43e   : > { %v6126_v16 = vpop.f32.mrf.mxu1  ;;  %v6009_v51 = vpop.f32.mrf.mxu0 }
 0x43f   : > { %v7484_v23 = vadd.f32 %v7256_v38, %v7255_v12  ;;  %v6127_v36 = vadd.f32 %v6126_v16, %v5994_v50  ;;  %v6010_v26 = vadd.f32 %v6009_v51, %v5805_v0  ;;  %v12248_v0 = vld [vmem:[%s12619_s5 + $0x8] sm:$0xff]  ;;  %v12320_v12 = vld [vmem:[%s12619_s5 + $0x78] sm:$0xff] }
 0x440   : > { %v6128_v30 = vpop.f32.mrf.mxu1  ;;  %v6011_v31 = vpop.f32.mrf.mxu0  ;;  %14244 = vst [vmem:[#allocation22_spill] sm:$0xff] %v12320_v12  ;;  %v12325_v38 = vld [vmem:[%s12619_s5 + $0x38] sm:$0xff]  ;;  %v12349_v51 = vld [vmem:[%s12619_s5 + $0x88] sm:$0xff] }
 0x441   : > { %7485 = vadd.xlane.f32.xlu0 %v7484_v23  ;;  %v6129_v47 = vadd.f32 %v6128_v30, %v5996_v32  ;;  %v7261_v60 = vmax.f32 %v6127_v36, 0.0  ;;  %v6012_v20 = vadd.f32 %v6011_v31, %v12217_v18  ;;  %v12253_v18 = vld [vmem:[%s12619_s5 + $0x10] sm:$0xff]  ;;  %14246 = vst [vmem:[#allocation10_spill] sm:$0xff] %v12349_v51  ;;  %v12370_v31 = vld [vmem:[%s12619_s5 + $0xa8] sm:$0xff] }
 0x442   : > { %14250 = vst [vmem:[#allocation35_spill] sm:$0xff] %v12370_v31 }
 0x443   : > { %v7262_v41 = vmax.f32 %v6129_v47, 0.0 }
 0x444   : > { %v6134_v8 = vpop.f32.mrf.mxu1 }
 0x445   : > { %v6135_v49 = vadd.f32 %v6134_v8, %v6002_v22  ;;  %v7487_v42 = vadd.f32 %v7262_v41, %v7261_v60  ;;  %v12354_v60 = vld [vmem:[%s12619_s5 + $0x90] sm:$0xff]  ;;  %v12359_v41 = vld [vmem:[%s12619_s5 + $0x98] sm:$0xff] }
 0x446   : > { %v6136_v5 = vpop.f32.mrf.mxu1  ;;  %14247 = vst [vmem:[#allocation87_spill] sm:$0xff] %v12354_v60  ;;  %14248 = vst [vmem:[#allocation80_spill] sm:$0xff] %v12359_v41 }
 0x447   : > { %v6137_v52 = vadd.f32 %v6136_v5, %v6004_v61  ;;  %7488 = vadd.xlane.f32.xlu1 %v7487_v42  ;;  %v7267_v29 = vmax.f32 %v6135_v49, 0.0  ;;  %v12365_v5 = vld [vmem:[%s12619_s5 + $0xa0] sm:$0xff] }
 0x448   : > { %14249 = vst [vmem:[#allocation102_spill] sm:$0xff] %v12365_v5 }
 0x449   : > { %v7268_v17 = vmax.f32 %v6137_v52, 0.0  ;;  %v6142_v53 = vpop.f32.mrf.mxu1  ;;  %v12375_v52 = vld [vmem:[%s12619_s5 + $0xb0] sm:$0xff] }
 0x44a   : > { %v6143_v15 = vadd.f32 %v6142_v53, %v6010_v26  ;;  %14251 = vst [vmem:[#allocation86_spill] sm:$0xff] %v12375_v52 }
 0x44b   : > { %v7490_v40 = vadd.f32 %v7268_v17, %v7267_v29  ;;  %v6144_v9 = vpop.f32.mrf.mxu1 }
 0x44c   : > { %v6145_v25 = vadd.f32 %v6144_v9, %v6012_v20  ;;  %v7273_v13 = vmax.f32 %v6143_v15, 0.0  ;;  %v12380_v20 = vld [vmem:[%s12619_s5 + $0xb8] sm:$0xff] }
 0x44d   : > { %7491 = vadd.xlane.f32.xlu1 %v7490_v40  ;;  %14252 = vst [vmem:[#allocation16_spill] sm:$0xff] %v12380_v20 }
 0x44e   : > { %v7274_v56 = vmax.f32 %v6145_v25, 0.0 }
 0x450   : > { %v12238_v19 = vadd.f32 %v7274_v56, %v7273_v13 }
 0x45a   : > { %v12270_v3 = vpop.f32.mrf.mxu0 }
 0x45c   : > { %v12331_v23 = vpop.f32.mrf.mxu0 }
 0x460   : > { %v12382_v40 = vpop.f32.mrf.mxu0 }
 0x474   : > { %v7311_v7 = vpop.xlane.xlu1 %7310 }
 0x475   : > { %v7321_v39 = vmul.f32 %v7311_v7, %v12243_v10  ;;  %v7322_v57 = vmul.f32 %v7311_v7, %v12248_v0  ;;  %v7323_v44 = vmul.f32 %v7311_v7, %v12253_v18  ;;  %v7324_v28 = vmul.f32 %v7311_v7, %v12258_v43 }
 0x476   : > { %v7325_v50 = vmul.f32 %v7311_v7, %v12263_v35  ;;  %v7326_v37 = vmul.f32 %v7311_v7, %v12268_v59  ;;  %v7327_v11 = vmul.f32 %v7311_v7, %v12275_v2  ;;  %v7328_v8 = vmul.f32 %v7311_v7, %v12325_v38  ;;  %v12391_v7 = vld [vmem:[%s12619_s5 + $0xc0] sm:$0xff] }
 0x477   : > { %14253 = vst [vmem:[#allocation121_spill] sm:$0xff] %v12391_v7 }
 0x479   : > { %v7314_v48 = vpop.xlane.xlu0 %7313 }
 0x47a   : > { %v7329_v16 = vmul.f32 %v7314_v48, %v12280_v63  ;;  %v7330_v32 = vmul.f32 %v7314_v48, %v12285_v55  ;;  %v7331_v36 = vmul.f32 %v7314_v48, %v12290_v45  ;;  %v7332_v14 = vmul.f32 %v7314_v48, %v12295_v58 }
 0x47b   : > { %v7333_v30 = vmul.f32 %v7314_v48, %v12300_v24  ;;  %v7334_v47 = vmul.f32 %v7314_v48, %v12310_v62  ;;  %v7335_v6 = vmul.f32 %v7314_v48, %v12315_v27  ;;  %v7336_v22 = vmul.f32 %v7314_v48, %v12320_v12  ;;  %v12411_v48 = vld [vmem:[%s12619_s5 + $0xd8] sm:$0xff] }
 0x47c   : > { %v7353_v61 = vadd.f32 %v7329_v16, %v7321_v39  ;;  %v7362_v49 = vadd.f32 %v7330_v32, %v7322_v57  ;;  %v7371_v42 = vadd.f32 %v7331_v36, %v7323_v44  ;;  %v7380_v26 = vadd.f32 %v7332_v14, %v7324_v28  ;;  %v12398_v39 = vpop.f32.mrf.mxu1  ;;  %14256 = vst [vmem:[#allocation21_spill] sm:$0xff] %v12411_v48  ;;  %v12416_v16 = vld [vmem:[%s12619_s5 + $0xe0] sm:$0xff] }
 0x47d   : > { %v7389_v29 = vadd.f32 %v7333_v30, %v7325_v50  ;;  %v7398_v17 = vadd.f32 %v7334_v47, %v7326_v37  ;;  %v7407_v53 = vadd.f32 %v7335_v6, %v7327_v11  ;;  %v7317_v15 = vpop.xlane.xlu0 %7316  ;;  %v7416_v57 = vadd.f32 %v7336_v22, %v7328_v8  ;;  %v12406_v11 = vld [vmem:[%s12619_s5 + $0xd0] sm:$0xff]  ;;  %14257 = vst [vmem:[#allocation89_spill] sm:$0xff] %v12416_v16  ;;  %v12422_v47 = vld [vmem:[%s12619_s5 + $0xe8] sm:$0xff]  ;;  %v12432_v22 = vld [vmem:[%s12619_s5 + $0xf8] sm:$0xff] }
 0x47e   : > { %v7337_v9 = vmul.f32 %v7317_v15, %v12340_v46  ;;  %v7338_v25 = vmul.f32 %v7317_v15, %v12349_v51  ;;  %v7339_v13 = vmul.f32 %v7317_v15, %v12354_v60  ;;  %v7340_v56 = vmul.f32 %v7317_v15, %v12359_v41  ;;  %14255 = vst [vmem:[#allocation101_spill] sm:$0xff] %v12406_v11  ;;  %v12427_v6 = vld [vmem:[%s12619_s5 + $0xf0] sm:$0xff] }
 0x47f   : > { %v7341_v44 = vmul.f32 %v7317_v15, %v12365_v5  ;;  %v7342_v28 = vmul.f32 %v7317_v15, %v12370_v31  ;;  %v7343_v50 = vmul.f32 %v7317_v15, %v12375_v52  ;;  %v7320_v37 = vpop.xlane.xlu1 %7319  ;;  %v7344_v32 = vmul.f32 %v7317_v15, %v12380_v20  ;;  %14258 = vst [vmem:[#allocation51_spill] sm:$0xff] %v12422_v47  ;;  %v12438_v20 = vpop.f32.mrf.mxu0 }
 0x480   : > { %v7354_v36 = vadd.f32 %v7353_v61, %v7337_v9  ;;  %v7363_v14 = vadd.f32 %v7362_v49, %v7338_v25  ;;  %v7372_v30 = vadd.f32 %v7371_v42, %v7339_v13  ;;  %14259 = vst [vmem:[#allocation32_spill] sm:$0xff] %v12427_v6  ;;  %14260 = vst [vmem:[#allocation105_spill] sm:$0xff] %v12432_v22  ;;  %v12440_v52 = vpop.f32.mrf.mxu1 }
 0x481   : > { %v7381_v8 = vadd.f32 %v7380_v26, %v7340_v56  ;;  %v7390_v15 = vadd.f32 %v7389_v29, %v7341_v44  ;;  %v7399_v61 = vadd.f32 %v7398_v17, %v7342_v28  ;;  %v7408_v49 = vadd.f32 %v7407_v53, %v7343_v50  ;;  %v12446_v51 = vpop.f32.mrf.mxu0 }
 0x482   : > { %v7345_v42 = vmul.f32 %v7320_v37, %v12391_v7  ;;  %v7346_v9 = vmul.f32 %v7320_v37, %v12396_v21  ;;  %v7347_v25 = vmul.f32 %v7320_v37, %v12406_v11  ;;  %v7348_v13 = vmul.f32 %v7320_v37, %v12411_v48 }
 0x483   : > { %v7349_v31 = vmul.f32 %v7320_v37, %v12416_v16  ;;  %v7350_v5 = vmul.f32 %v7320_v37, %v12422_v47  ;;  %v7351_v26 = vmul.f32 %v7320_v37, %v12427_v6  ;;  %v7352_v29 = vmul.f32 %v7320_v37, %v12432_v22  ;;  %v12448_v16 = vpop.f32.mrf.mxu1 }
 0x484   : > { %v7355_v17 = vadd.f32 %v7354_v36, %v7345_v42  ;;  %v7364_v53 = vadd.f32 %v7363_v14, %v7346_v9  ;;  %v7373_v56 = vadd.f32 %v7372_v30, %v7347_v25  ;;  %v7382_v44 = vadd.f32 %v7381_v8, %v7348_v13  ;;  %v12452_v13 = vpop.f32.mrf.mxu0 }
 0x485   : > { %v7417_v28 = vadd.f32 %v7416_v57, %v7344_v32  ;;  %v7391_v50 = vadd.f32 %v7390_v15, %v7349_v31  ;;  %v7400_v11 = vadd.f32 %v7399_v61, %v7350_v5  ;;  %v7409_v48 = vadd.f32 %v7408_v49, %v7351_v26  ;;  %v12454_v26 = vpop.f32.mrf.mxu1 }
 0x486   : > { %v7356_v21 = vrot.slane %v7355_v17, 4  ;;  %v7365_v7 = vrot.slane %v7364_v53, 4  ;;  %v7374_v41 = vrot.slane %v7373_v56, 4  ;;  %v7383_v60 = vrot.slane %v7382_v44, 4 }
 0x487   : > { %v7392_v47 = vrot.slane %v7391_v50, 4  ;;  %v7401_v6 = vrot.slane %v7400_v11, 4  ;;  %v7410_v46 = vrot.slane %v7409_v48, 4  ;;  %v7418_v37 = vadd.f32 %v7417_v28, %v7352_v29  ;;  %v12456_v28 = vpop.f32.mrf.mxu0 }
 0x488   : > { %v7357_v36 = vadd.f32 %v7356_v21, %v7355_v17  ;;  %v7366_v14 = vadd.f32 %v7365_v7, %v7364_v53  ;;  %v7375_v30 = vadd.f32 %v7374_v41, %v7373_v56  ;;  %v7384_v8 = vadd.f32 %v7383_v60, %v7382_v44 }
 0x489   : > { %v14261_v57 = vlaneseq  ;;  %v7393_v5 = vadd.f32 %v7392_v47, %v7391_v50  ;;  %v7402_v32 = vadd.f32 %v7401_v6, %v7400_v11  ;;  %v7411_v15 = vadd.f32 %v7410_v46, %v7409_v48 }
 0x48a   : > { %v7358_v61 = vrot.slane %v7357_v36, 2  ;;  %v7367_v49 = vrot.slane %v7366_v14, 2  ;;  %v7376_v42 = vrot.slane %v7375_v30, 2  ;;  %v7385_v9 = vrot.slane %v7384_v8, 2 }
 0x48b   : > { %v7441_v31 = vshrl.u32 %v14261_v57, 7  ;;  %v7439_v25 = vunpack.c.0.s8 %v12302_v54  ;;  %v7394_v29 = vrot.slane %v7393_v5, 2  ;;  %v7403_v21 = vrot.slane %v7402_v32, 2  ;;  %v12458_v54 = vpop.f32.mrf.mxu1 }
 0x48c   : > { %v7412_v7 = vrot.slane %v7411_v15, 2  ;;  %v7359_v41 = vadd.f32 %v7358_v61, %v7357_v36  ;;  %v7368_v60 = vadd.f32 %v7367_v49, %v7366_v14  ;;  %v7377_v17 = vadd.f32 %v7376_v42, %v7375_v30  ;;  %v12462_v42 = vpop.f32.mrf.mxu0 }
 0x48d   : > { %v7419_v53 = vrot.slane %v7418_v37, 4  ;;  %v7386_v47 = vadd.f32 %v7385_v9, %v7384_v8  ;;  %v7395_v11 = vadd.f32 %v7394_v29, %v7393_v5  ;;  %v7404_v46 = vadd.f32 %v7403_v21, %v7402_v32  ;;  %v12464_v9 = vpop.f32.mrf.mxu1 }
 0x48e   : > { %v7413_v48 = vadd.f32 %v7412_v7, %v7411_v15  ;;  %v7360_v6 = vrot.slane %v7359_v41, 1  ;;  %v7369_v56 = vrot.slane %v7368_v60, 1  ;;  %v7378_v44 = vrot.slane %v7377_v17, 1  ;;  %v6731_v7 = vpop.f32.mrf.mxu0 }
 0x48f   : > { %v7387_v50 = vrot.slane %v7386_v47, 1  ;;  %v7396_v57 = vrot.slane %v7395_v11, 1  ;;  %v7405_v22 = vrot.slane %v7404_v46, 1  ;;  %v7420_v14 = vadd.f32 %v7419_v53, %v7418_v37 }
 0x490   : > { %v7361_v12 = vadd.f32 %v7360_v6, %v7359_v41  ;;  %v7370_v27 = vadd.f32 %v7369_v56, %v7368_v60  ;;  %v7379_v36 = vadd.f32 %v7378_v44, %v7377_v17  ;;  %v12460_v30 = vsub.s32 %v7439_v25, %v7441_v31  ;;  %v12469_v17 = vpop.f32.mrf.mxu1  ;;  %v6733_v53 = vpop.f32.mrf.mxu0 }
 0x491   : > { %v7388_v8 = vadd.f32 %v7387_v50, %v7386_v47  ;;  %v7414_v5 = vrot.slane %v7413_v48, 1  ;;  %v7397_v32 = vadd.f32 %v7396_v57, %v7395_v11  ;;  %v7406_v15 = vadd.f32 %v7405_v22, %v7404_v46 }
 0x492   : > { %14262 = vst [vmem:[#allocation24_spill] sm:$0xff] %v12460_v30  ;;  %v7421_v61 = vrot.slane %v7420_v14, 2  ;;  %v7433_v49 = vcombine.low %v7361_v12, %v7370_v27  ;;  %v12473_v11 = vpop.f32.mrf.mxu1 }
 0x493   : > { %v7434_v29 = vcombine.low %v7379_v36, %v7388_v8  ;;  %v7415_v41 = vadd.f32 %v7414_v5, %v7413_v48  ;;  %v7435_v37 = vcombine.low %v7397_v32, %v7406_v15  ;;  %v6741_v48 = vpop.f32.mrf.mxu0 }
 0x494   : > { %v7422_v21 = vadd.f32 %v7421_v61, %v7420_v14  ;;  %v7443_v31 = vrot.slane %v7433_v49, %v12460_v30  ;;  %v6874_v6 = vpop.f32.mrf.mxu1 }
 0x495   : > { %v7450_v25 = vrot.slane %v7434_v29, %v12460_v30  ;;  %v7457_v12 = vrot.slane %v7435_v37, %v12460_v30  ;;  %v6743_v57 = vpop.f32.mrf.mxu0  ;;  %v6262_v37 = vadd.f32 %v12331_v23, %v12008_v1 }
 0x496   : > { %v7423_v60 = vrot.slane %v7422_v21, 1  ;;  %v6876_v36 = vpop.f32.mrf.mxu1 }
 0x497   : > { %v7465_v47 = vcombine.low %v7443_v31, %v7450_v25  ;;  %v6751_v8 = vpop.f32.mrf.mxu0 }
 0x498   : > { %v7424_v22 = vadd.f32 %v7423_v60, %v7422_v21  ;;  %v6886_v5 = vpop.f32.mrf.mxu1 }
 0x499   : > { %v7473_v44 = vrot.slane %v7465_v47, %v12460_v30  ;;  %v6753_v32 = vpop.f32.mrf.mxu0 }
 0x49a   : > { %v7436_v27 = vcombine.low %v7415_v41, %v7424_v22  ;;  %v6888_v15 = vpop.f32.mrf.mxu1  ;;  %v6260_v41 = vadd.f32 %v12270_v3, %v12008_v1  ;;  %v6292_v1 = vadd.f32 %v12446_v51, %v12061_v34  ;;  %v6308_v51 = vadd.f32 %v12456_v28, %v12075_v33 }
 0x49b   : > { %v6761_v61 = vpop.f32.mrf.mxu0 }
 0x49c   : > { %v7464_v46 = vrot.slane %v7436_v27, %v12460_v30  ;;  %v6898_v49 = vpop.f32.mrf.mxu1  ;;  %v6561_v31 = vadd.f32 %v12398_v39, %v6260_v41  ;;  %v6276_v27 = vadd.f32 %v12382_v40, %v12034_v4 }
 0x49d   : > { %v6763_v29 = vpop.f32.mrf.mxu0 }
 0x49e   : > { %v7466_v56 = vcombine.low %v7457_v12, %v7464_v46  ;;  %v6900_v21 = vpop.f32.mrf.mxu1  ;;  %v6563_v12 = vadd.f32 %v12440_v52, %v6262_v37  ;;  %v6732_v47 = vadd.f32 %v6731_v7, %v6561_v31  ;;  %v6569_v3 = vadd.f32 %v12448_v16, %v6276_v27 }
 0x49f   : > { %v6294_v52 = vadd.f32 %v12452_v13, %v12061_v34  ;;  %v6577_v7 = vadd.f32 %v12458_v54, %v6292_v1  ;;  %v6310_v34 = vadd.f32 %v12462_v42, %v12075_v33  ;;  %v6585_v13 = vadd.f32 %v12469_v17, %v6308_v51 }
 0x4a0   : > { %v7480_v50 = vrot.slane %v7466_v56, %v12460_v30  ;;  %v6278_v56 = vadd.f32 %v12438_v20, %v12034_v4  ;;  %v6742_v41 = vadd.f32 %v6741_v48, %v6569_v3 }
 0x4a1   : > { %v6910_v25 = vpop.f32.mrf.mxu1  ;;  %v6579_v31 = vadd.f32 %v12464_v9, %v6294_v52  ;;  %v6587_v9 = vadd.f32 %v12473_v11, %v6310_v34 }
 0x4a2   : > { %v7481_v14 = vcombine.low %v7473_v44, %v7480_v50  ;;  %v6734_v44 = vadd.f32 %v6733_v53, %v6563_v12  ;;  %v6875_v50 = vadd.f32 %v6874_v6, %v6732_v47  ;;  %v6887_v53 = vadd.f32 %v6886_v5, %v6742_v41 }
 0x4a3   : > { %v6912_v23 = vpop.f32.mrf.mxu1  ;;  %v6754_v54 = vadd.f32 %v6753_v32, %v6579_v31  ;;  %v6764_v1 = vadd.f32 %v6763_v29, %v6587_v9 }
 0x4a4   : > { %7483 = vst [vmem:[%s12481_s25] ss:$4 sm:$0xff] %v7481_v14  ;;  %v6571_v14 = vadd.f32 %v12454_v26, %v6278_v56  ;;  %v6877_v40 = vadd.f32 %v6876_v36, %v6734_v44  ;;  %v6752_v26 = vadd.f32 %v6751_v8, %v6577_v7  ;;  %v6762_v8 = vadd.f32 %v6761_v61, %v6585_v13 }
 0x4a6   : > { %v6744_v16 = vadd.f32 %v6743_v57, %v6571_v14  ;;  %v6899_v57 = vadd.f32 %v6898_v49, %v6752_v26  ;;  %v6911_v33 = vadd.f32 %v6910_v25, %v6762_v8  ;;  %v14264_v8 = vld [vmem:[#allocation22_spill] sm:$0xff] }
 0x4b3   : > { %v7091_v60 = vpop.f32.mrf.mxu0 }
 0x4b4   : > { %v7092_v30 = vadd.f32 %v7091_v60, %v6875_v50  ;;  %v6889_v60 = vadd.f32 %v6888_v15, %v6744_v16  ;;  %v6901_v15 = vadd.f32 %v6900_v21, %v6754_v54 }
 0x4b5   : > { %v7093_v22 = vpop.f32.mrf.mxu0 }
 0x4b6   : > { %v7094_v6 = vadd.f32 %v7093_v22, %v6877_v40  ;;  %v6913_v40 = vadd.f32 %v6912_v23, %v6764_v1 }
 0x4b7   : > { %v7099_v46 = vpop.f32.mrf.mxu0 }
 0x4b8   : > { %v7100_v27 = vadd.f32 %v7099_v46, %v6887_v53 }
 0x4b9   : > { %v7101_v39 = vpop.f32.mrf.mxu0 }
 0x4bb   : > { %v7107_v4 = vpop.f32.mrf.mxu0 }
 0x4bc   : > { %v7224_v20 = vpop.f32.mrf.mxu1  ;;  %v7108_v46 = vadd.f32 %v7107_v4, %v6899_v57 }
 0x4bd   : > { %v7225_v37 = vadd.f32 %v7224_v20, %v7092_v30  ;;  %v7109_v48 = vpop.f32.mrf.mxu0  ;;  %v7102_v30 = vadd.f32 %v7101_v39, %v6889_v60 }
 0x4be   : > { %v7226_v36 = vpop.f32.mrf.mxu1  ;;  %v7110_v17 = vadd.f32 %v7109_v48, %v6901_v15 }
 0x4bf   : > { %v7227_v12 = vadd.f32 %v7226_v36, %v7094_v6  ;;  %v7257_v22 = vmax.f32 %v7225_v37, 0.0  ;;  %v7115_v56 = vpop.f32.mrf.mxu0 }
 0x4c0   : > { %v7232_v5 = vpop.f32.mrf.mxu1  ;;  %v7116_v52 = vadd.f32 %v7115_v56, %v6911_v33  ;;  %v14268_v33 = vld [vmem:[#allocation80_spill] sm:$0xff] }
 0x4c1   : > { %v7258_v47 = vmax.f32 %v7227_v12, 0.0  ;;  %v7233_v28 = vadd.f32 %v7232_v5, %v7100_v27  ;;  %v7117_v39 = vpop.f32.mrf.mxu0 }
 0x4c2   : > { %v7234_v3 = vpop.f32.mrf.mxu1  ;;  %v7118_v20 = vadd.f32 %v7117_v39, %v6913_v40  ;;  %v14271_v39 = vld [vmem:[#allocation86_spill] sm:$0xff]  ;;  %v14272_v40 = vld [vmem:[#allocation16_spill] sm:$0xff] }
 0x4c3   : > { %v7660_v44 = vadd.f32 %v7258_v47, %v7257_v22  ;;  %v7235_v50 = vadd.f32 %v7234_v3, %v7102_v30  ;;  %v7263_v32 = vmax.f32 %v7233_v28, 0.0  ;;  %v14263_v28 = vld [vmem:[#allocation39_spill] sm:$0xff]  ;;  %v14265_v3 = vld [vmem:[#allocation62_spill] sm:$0xff] }
 0x4c4   : > { %v7240_v42 = vpop.f32.mrf.mxu1 }
 0x4c5   : > { %v7264_v49 = vmax.f32 %v7235_v50, 0.0  ;;  %v7241_v14 = vadd.f32 %v7240_v42, %v7108_v46  ;;  %7661 = vadd.xlane.f32.xlu0 %v7660_v44  ;;  %v14266_v46 = vld [vmem:[#allocation10_spill] sm:$0xff]  ;;  %v14267_v50 = vld [vmem:[#allocation87_spill] sm:$0xff] }
 0x4c6   : > { %v7242_v41 = vpop.f32.mrf.mxu1 }
 0x4c7   : > { %v7663_v11 = vadd.f32 %v7264_v49, %v7263_v32  ;;  %v7243_v61 = vadd.f32 %v7242_v41, %v7110_v17  ;;  %v7269_v21 = vmax.f32 %v7241_v14, 0.0  ;;  %v14269_v17 = vld [vmem:[#allocation102_spill] sm:$0xff]  ;;  %v14270_v49 = vld [vmem:[#allocation35_spill] sm:$0xff] }
 0x4c8   : > { %v7248_v7 = vpop.f32.mrf.mxu1 }
 0x4c9   : > { %v7270_v4 = vmax.f32 %v7243_v61, 0.0  ;;  %v7249_v16 = vadd.f32 %v7248_v7, %v7116_v52  ;;  %7664 = vadd.xlane.f32.xlu1 %v7663_v11 }
 0x4ca   : > { %v7250_v29 = vpop.f32.mrf.mxu1  ;;  %v7486_v31 = vpop.xlane.xlu0 %7485 }
 0x4cb   : > { %v7666_v25 = vadd.f32 %v7270_v4, %v7269_v21  ;;  %v7251_v53 = vadd.f32 %v7250_v29, %v7118_v20  ;;  %v7275_v6 = vmax.f32 %v7249_v16, 0.0  ;;  %v7496_v26 = vmul.f32 %v7486_v31, %v12243_v10 }
 0x4cc   : > { %v7497_v48 = vmul.f32 %v7486_v31, %v12248_v0  ;;  %v7498_v36 = vmul.f32 %v7486_v31, %v12253_v18  ;;  %v7499_v60 = vmul.f32 %v7486_v31, %v12258_v43  ;;  %v7500_v27 = vmul.f32 %v7486_v31, %v12263_v35 }
 0x4cd   : > { %v7276_v37 = vmax.f32 %v7251_v53, 0.0  ;;  %7667 = vadd.xlane.f32.xlu0 %v7666_v25  ;;  %v7501_v12 = vmul.f32 %v7486_v31, %v12268_v59  ;;  %v7502_v34 = vmul.f32 %v7486_v31, %v12275_v2  ;;  %v7503_v13 = vmul.f32 %v7486_v31, %v12325_v38 }
 0x4cf   : > { %v7669_v51 = vadd.f32 %v7276_v37, %v7275_v6 }
 0x4d0   : > { %v7489_v23 = vpop.xlane.xlu1 %7488 }
 0x4d1   : > { %7494 = vadd.xlane.f32.xlu0 %v12238_v19  ;;  %7670 = vadd.xlane.f32.xlu1 %v7669_v51  ;;  %v7504_v54 = vmul.f32 %v7489_v23, %v12280_v63  ;;  %v7505_v57 = vmul.f32 %v7489_v23, %v12285_v55  ;;  %v7506_v5 = vmul.f32 %v7489_v23, %v12290_v45 }
 0x4d2   : > { %v7507_v30 = vmul.f32 %v7489_v23, %v12295_v58  ;;  %v7508_v22 = vmul.f32 %v7489_v23, %v12300_v24  ;;  %v7509_v47 = vmul.f32 %v7489_v23, %v12310_v62  ;;  %v7510_v9 = vmul.f32 %v7489_v23, %v14263_v28 }
 0x4d3   : > { %v7511_v56 = vmul.f32 %v7489_v23, %v14264_v8  ;;  %v7528_v11 = vadd.f32 %v7504_v54, %v7496_v26  ;;  %v7537_v61 = vadd.f32 %v7505_v57, %v7497_v48  ;;  %v7546_v7 = vadd.f32 %v7506_v5, %v7498_v36 }
 0x4d4   : > { %v7555_v20 = vadd.f32 %v7507_v30, %v7499_v60  ;;  %v7564_v4 = vadd.f32 %v7508_v22, %v7500_v27  ;;  %v7573_v16 = vadd.f32 %v7509_v47, %v7501_v12  ;;  %v7582_v29 = vadd.f32 %v7510_v9, %v7502_v34 }
 0x4d5   : > { %v7591_v25 = vadd.f32 %v7511_v56, %v7503_v13 }
 0x4d6   : > { %v7492_v19 = vpop.xlane.xlu1 %7491 }
 0x4d7   : > { %v7512_v15 = vmul.f32 %v7492_v19, %v14265_v3  ;;  %v7513_v44 = vmul.f32 %v7492_v19, %v14266_v46  ;;  %v7514_v1 = vmul.f32 %v7492_v19, %v14267_v50  ;;  %v7515_v42 = vmul.f32 %v7492_v19, %v14268_v33 }
 0x4d8   : > { %v7516_v32 = vmul.f32 %v7492_v19, %v14269_v17  ;;  %v7517_v14 = vmul.f32 %v7492_v19, %v14270_v49  ;;  %v7518_v41 = vmul.f32 %v7492_v19, %v14271_v39  ;;  %v7519_v52 = vmul.f32 %v7492_v19, %v14272_v40 }
 0x4d9   : > { %v12533_v53 = vadd.f32 %v7528_v11, %v7512_v15  ;;  %v12535_v6 = vadd.f32 %v7537_v61, %v7513_v44  ;;  %v12537_v37 = vadd.f32 %v7546_v7, %v7514_v1  ;;  %v12539_v51 = vadd.f32 %v7555_v20, %v7515_v42 }
 0x4da   : > { %v12541_v23 = vadd.f32 %v7564_v4, %v7516_v32  ;;  %v12543_v31 = vadd.f32 %v7573_v16, %v7517_v14  ;;  %v12545_v26 = vadd.f32 %v7582_v29, %v7518_v41  ;;  %v12547_v48 = vadd.f32 %v7591_v25, %v7519_v52  ;;  %v14279_v25 = vld [vmem:[#allocation32_spill] sm:$0xff] }
 0x54e   : > { %v7662_v21 = vpop.xlane.xlu0 %7661 }
 0x54f   : > { %v7672_v36 = vmul.f32 %v7662_v21, %v12243_v10  ;;  %v7673_v60 = vmul.f32 %v7662_v21, %v12248_v0  ;;  %v7674_v27 = vmul.f32 %v7662_v21, %v12253_v18  ;;  %v7675_v12 = vmul.f32 %v7662_v21, %v12258_v43 }
 0x550   : > { %v7676_v34 = vmul.f32 %v7662_v21, %v12263_v35  ;;  %v7677_v13 = vmul.f32 %v7662_v21, %v12268_v59  ;;  %v7678_v19 = vmul.f32 %v7662_v21, %v12275_v2  ;;  %v7679_v54 = vmul.f32 %v7662_v21, %v12325_v38 }
 0x552   : > { %v7665_v57 = vpop.xlane.xlu1 %7664 }
 0x553   : > { %v7680_v5 = vmul.f32 %v7665_v57, %v12280_v63  ;;  %v7681_v30 = vmul.f32 %v7665_v57, %v12285_v55  ;;  %v7682_v10 = vmul.f32 %v7665_v57, %v12290_v45  ;;  %v7683_v0 = vmul.f32 %v7665_v57, %v12295_v58 }
 0x554   : > { %v7684_v18 = vmul.f32 %v7665_v57, %v12300_v24  ;;  %v7685_v43 = vmul.f32 %v7665_v57, %v12310_v62  ;;  %v7686_v35 = vmul.f32 %v7665_v57, %v14263_v28  ;;  %v7687_v59 = vmul.f32 %v7665_v57, %v14264_v8 }
 0x555   : > { %v7704_v2 = vadd.f32 %v7680_v5, %v7672_v36  ;;  %v7713_v22 = vadd.f32 %v7681_v30, %v7673_v60  ;;  %v7722_v38 = vadd.f32 %v7682_v10, %v7674_v27  ;;  %v7731_v47 = vadd.f32 %v7683_v0, %v7675_v12  ;;  %v14280_v60 = vld [vmem:[#allocation105_spill] sm:$0xff] }
 0x556   : > { %v7668_v9 = vpop.xlane.xlu0 %7667  ;;  %v7740_v63 = vadd.f32 %v7684_v18, %v7676_v34  ;;  %v7749_v56 = vadd.f32 %v7685_v43, %v7677_v13  ;;  %v7758_v55 = vadd.f32 %v7686_v35, %v7678_v19  ;;  %v7767_v15 = vadd.f32 %v7687_v59, %v7679_v54 }
 0x557   : > { %v7688_v45 = vmul.f32 %v7668_v9, %v14265_v3  ;;  %v7689_v58 = vmul.f32 %v7668_v9, %v14266_v46  ;;  %v7690_v24 = vmul.f32 %v7668_v9, %v14267_v50  ;;  %v7691_v62 = vmul.f32 %v7668_v9, %v14268_v33  ;;  %v14273_v50 = vld [vmem:[#allocation121_spill] sm:$0xff]  ;;  %v14274_v33 = vld [vmem:[#allocation95_spill] sm:$0xff] }
 0x558   : > { %v7692_v28 = vmul.f32 %v7668_v9, %v14269_v17  ;;  %v7693_v8 = vmul.f32 %v7668_v9, %v14270_v49  ;;  %v7694_v44 = vmul.f32 %v7668_v9, %v14271_v39  ;;  %v7695_v1 = vmul.f32 %v7668_v9, %v14272_v40  ;;  %v14275_v17 = vld [vmem:[#allocation101_spill] sm:$0xff]  ;;  %v14278_v40 = vld [vmem:[#allocation51_spill] sm:$0xff] }
 0x559   : > { %v7705_v42 = vadd.f32 %v7704_v2, %v7688_v45  ;;  %v7714_v32 = vadd.f32 %v7713_v22, %v7689_v58  ;;  %v7723_v14 = vadd.f32 %v7722_v38, %v7690_v24  ;;  %v7732_v41 = vadd.f32 %v7731_v47, %v7691_v62  ;;  %v14276_v49 = vld [vmem:[#allocation21_spill] sm:$0xff] }
 0x55a   : > { %v7671_v52 = vpop.xlane.xlu1 %7670  ;;  %v7741_v3 = vadd.f32 %v7740_v63, %v7692_v28  ;;  %v7750_v11 = vadd.f32 %v7749_v56, %v7693_v8  ;;  %v7759_v46 = vadd.f32 %v7758_v55, %v7694_v44  ;;  %v7768_v61 = vadd.f32 %v7767_v15, %v7695_v1  ;;  %v14277_v39 = vld [vmem:[#allocation89_spill] sm:$0xff] }
 0x55b   : > { %v7696_v7 = vmul.f32 %v7671_v52, %v14273_v50  ;;  %v7697_v20 = vmul.f32 %v7671_v52, %v14274_v33  ;;  %v7698_v21 = vmul.f32 %v7671_v52, %v14275_v17  ;;  %v7699_v4 = vmul.f32 %v7671_v52, %v14276_v49 }
 0x55c   : > { %v7700_v16 = vmul.f32 %v7671_v52, %v14277_v39  ;;  %v7701_v29 = vmul.f32 %v7671_v52, %v14278_v40  ;;  %v7702_v36 = vmul.f32 %v7671_v52, %v14279_v25  ;;  %v7703_v27 = vmul.f32 %v7671_v52, %v14280_v60 }
 0x55d   : > { %v7706_v12 = vadd.f32 %v7705_v42, %v7696_v7  ;;  %v7715_v34 = vadd.f32 %v7714_v32, %v7697_v20  ;;  %v7724_v13 = vadd.f32 %v7723_v14, %v7698_v21  ;;  %v7733_v19 = vadd.f32 %v7732_v41, %v7699_v4 }
 0x55e   : > { %v7742_v54 = vadd.f32 %v7741_v3, %v7700_v16  ;;  %v7751_v57 = vadd.f32 %v7750_v11, %v7701_v29  ;;  %v7760_v5 = vadd.f32 %v7759_v46, %v7702_v36  ;;  %v7769_v30 = vadd.f32 %v7768_v61, %v7703_v27 }
 0x55f   : > { %v7707_v10 = vrot.slane %v7706_v12, 4  ;;  %v7716_v0 = vrot.slane %v7715_v34, 4  ;;  %v7725_v18 = vrot.slane %v7724_v13, 4  ;;  %v7734_v43 = vrot.slane %v7733_v19, 4 }
 0x560   : > { %v7743_v35 = vrot.slane %v7742_v54, 4  ;;  %v7752_v59 = vrot.slane %v7751_v57, 4  ;;  %v7761_v2 = vrot.slane %v7760_v5, 4  ;;  %v7770_v22 = vrot.slane %v7769_v30, 4 }
 0x561   : > { %v7708_v38 = vadd.f32 %v7707_v10, %v7706_v12  ;;  %v7717_v47 = vadd.f32 %v7716_v0, %v7715_v34  ;;  %v7726_v9 = vadd.f32 %v7725_v18, %v7724_v13  ;;  %v7735_v63 = vadd.f32 %v7734_v43, %v7733_v19  ;;  %v7495_v12 = vpop.xlane.xlu0 %7494 }
 0x562   : > { %v7744_v56 = vadd.f32 %v7743_v35, %v7742_v54  ;;  %v7753_v55 = vadd.f32 %v7752_v59, %v7751_v57  ;;  %v7762_v15 = vadd.f32 %v7761_v2, %v7760_v5  ;;  %v7771_v45 = vadd.f32 %v7770_v22, %v7769_v30 }
 0x563   : > { %v7709_v58 = vrot.slane %v7708_v38, 2  ;;  %v7718_v24 = vrot.slane %v7717_v47, 2  ;;  %v7727_v62 = vrot.slane %v7726_v9, 2  ;;  %v7736_v28 = vrot.slane %v7735_v63, 2 }
 0x564   : > { %v7745_v8 = vrot.slane %v7744_v56, 2  ;;  %v7754_v44 = vrot.slane %v7753_v55, 2  ;;  %v7763_v1 = vrot.slane %v7762_v15, 2  ;;  %v7772_v42 = vrot.slane %v7771_v45, 2 }
 0x565   : > { %v7710_v32 = vadd.f32 %v7709_v58, %v7708_v38  ;;  %v7719_v14 = vadd.f32 %v7718_v24, %v7717_v47  ;;  %v7728_v41 = vadd.f32 %v7727_v62, %v7726_v9  ;;  %v7737_v52 = vadd.f32 %v7736_v28, %v7735_v63  ;;  %v14281_v47 = vld [vmem:[#allocation24_spill] sm:$0xff] }
 0x566   : > { %v7746_v3 = vadd.f32 %v7745_v8, %v7744_v56  ;;  %v7755_v11 = vadd.f32 %v7754_v44, %v7753_v55  ;;  %v7764_v46 = vadd.f32 %v7763_v1, %v7762_v15  ;;  %v7773_v61 = vadd.f32 %v7772_v42, %v7771_v45 }
 0x567   : > { %v7711_v7 = vrot.slane %v7710_v32, 1  ;;  %v7720_v20 = vrot.slane %v7719_v14, 1  ;;  %v7729_v21 = vrot.slane %v7728_v41, 1  ;;  %v7738_v4 = vrot.slane %v7737_v52, 1 }
 0x568   : > { %v7747_v16 = vrot.slane %v7746_v3, 1  ;;  %v7756_v29 = vrot.slane %v7755_v11, 1  ;;  %v7765_v36 = vrot.slane %v7764_v46, 1  ;;  %v7774_v27 = vrot.slane %v7773_v61, 1 }
 0x569   : > { %v7712_v34 = vadd.f32 %v7711_v7, %v7710_v32  ;;  %v7721_v13 = vadd.f32 %v7720_v20, %v7719_v14  ;;  %v7730_v19 = vadd.f32 %v7729_v21, %v7728_v41  ;;  %v7739_v54 = vadd.f32 %v7738_v4, %v7737_v52 }
 0x56a   : > { %v7748_v57 = vadd.f32 %v7747_v16, %v7746_v3  ;;  %v7757_v5 = vadd.f32 %v7756_v29, %v7755_v11  ;;  %v7766_v30 = vadd.f32 %v7765_v36, %v7764_v46  ;;  %v7775_v10 = vadd.f32 %v7774_v27, %v7773_v61 }
 0x56b   : > { %v7784_v0 = vcombine.low %v7712_v34, %v7721_v13  ;;  %v7785_v18 = vcombine.low %v7730_v19, %v7739_v54  ;;  %v7520_v43 = vmul.f32 %v7495_v12, %v14273_v50  ;;  %v7521_v35 = vmul.f32 %v7495_v12, %v14274_v33 }
 0x56c   : > { %v7786_v59 = vcombine.low %v7748_v57, %v7757_v5  ;;  %v7787_v2 = vcombine.low %v7766_v30, %v7775_v10  ;;  %v7522_v22 = vmul.f32 %v7495_v12, %v14275_v17  ;;  %v7523_v38 = vmul.f32 %v7495_v12, %v14276_v49 }
 0x56d   : > { %v7794_v9 = vrot.slane %v7784_v0, %v14281_v47  ;;  %v7801_v63 = vrot.slane %v7785_v18, %v14281_v47  ;;  %v7524_v56 = vmul.f32 %v7495_v12, %v14277_v39  ;;  %v7525_v55 = vmul.f32 %v7495_v12, %v14278_v40 }
 0x56e   : > { %v7808_v15 = vrot.slane %v7786_v59, %v14281_v47  ;;  %v7815_v50 = vrot.slane %v7787_v2, %v14281_v47  ;;  %v7526_v33 = vmul.f32 %v7495_v12, %v14279_v25  ;;  %v7527_v45 = vmul.f32 %v7495_v12, %v14280_v60 }
 0x56f   : > { %v7816_v58 = vcombine.low %v7794_v9, %v7801_v63  ;;  %v7530_v17 = vadd.f32 %v12533_v53, %v7520_v43  ;;  %v7539_v49 = vadd.f32 %v12535_v6, %v7521_v35  ;;  %v7548_v24 = vadd.f32 %v12537_v37, %v7522_v22 }
 0x570   : > { %v7817_v62 = vcombine.low %v7808_v15, %v7815_v50  ;;  %v7557_v39 = vadd.f32 %v12539_v51, %v7523_v38  ;;  %v7566_v40 = vadd.f32 %v12541_v23, %v7524_v56  ;;  %v7575_v28 = vadd.f32 %v12543_v31, %v7525_v55 }
 0x571   : > { %v7824_v8 = vrot.slane %v7816_v58, %v14281_v47  ;;  %v7531_v44 = vrot.slane %v7530_v17, 4  ;;  %v7540_v25 = vrot.slane %v7539_v49, 4  ;;  %v7549_v1 = vrot.slane %v7548_v24, 4 }
 0x572   : > { %v7831_v60 = vrot.slane %v7817_v62, %v14281_v47  ;;  %v7558_v53 = vrot.slane %v7557_v39, 4  ;;  %v7567_v42 = vrot.slane %v7566_v40, 4  ;;  %v7576_v6 = vrot.slane %v7575_v28, 4 }
 0x573   : > { %v7532_v32 = vadd.f32 %v7531_v44, %v7530_v17  ;;  %v7541_v37 = vadd.f32 %v7540_v25, %v7539_v49  ;;  %v7550_v14 = vadd.f32 %v7549_v1, %v7548_v24  ;;  %v7584_v51 = vadd.f32 %v12545_v26, %v7526_v33 }
 0x574   : > { %v7832_v41 = vcombine.low %v7824_v8, %v7831_v60  ;;  %v7559_v23 = vadd.f32 %v7558_v53, %v7557_v39  ;;  %v7568_v52 = vadd.f32 %v7567_v42, %v7566_v40  ;;  %v7577_v31 = vadd.f32 %v7576_v6, %v7575_v28 }
 0x575   : > { %v7533_v3 = vrot.slane %v7532_v32, 2  ;;  %v7542_v11 = vrot.slane %v7541_v37, 2  ;;  %v7551_v46 = vrot.slane %v7550_v14, 2  ;;  %v7585_v61 = vrot.slane %v7584_v51, 4 }
 0x576   : > { %7900 = vst [vmem:[%s12481_s25 + $0x2] ss:$4 sm:$0xff] %v7832_v41  ;;  %v7560_v7 = vrot.slane %v7559_v23, 2  ;;  %v7569_v20 = vrot.slane %v7568_v52, 2  ;;  %v7578_v21 = vrot.slane %v7577_v31, 2  ;;  %v7593_v4 = vadd.f32 %v12547_v48, %v7527_v45 }
 0x577   : > { %v7534_v16 = vadd.f32 %v7533_v3, %v7532_v32  ;;  %v7543_v29 = vadd.f32 %v7542_v11, %v7541_v37  ;;  %v7552_v36 = vadd.f32 %v7551_v46, %v7550_v14  ;;  %v7586_v27 = vadd.f32 %v7585_v61, %v7584_v51 }
 0x578   : > { %v7561_v12 = vadd.f32 %v7560_v7, %v7559_v23  ;;  %v7570_v26 = vadd.f32 %v7569_v20, %v7568_v52  ;;  %v7579_v34 = vadd.f32 %v7578_v21, %v7577_v31  ;;  %v7594_v13 = vrot.slane %v7593_v4, 4 }
 0x579   : > { %v7535_v19 = vrot.slane %v7534_v16, 1  ;;  %v7544_v54 = vrot.slane %v7543_v29, 1  ;;  %v7553_v57 = vrot.slane %v7552_v36, 1  ;;  %v7587_v5 = vrot.slane %v7586_v27, 2 }
 0x57a   : > { %v7562_v30 = vrot.slane %v7561_v12, 1  ;;  %v7571_v10 = vrot.slane %v7570_v26, 1  ;;  %v7580_v0 = vrot.slane %v7579_v34, 1  ;;  %v7595_v18 = vadd.f32 %v7594_v13, %v7593_v4 }
 0x57b   : > { %v7536_v43 = vadd.f32 %v7535_v19, %v7534_v16  ;;  %v7545_v35 = vadd.f32 %v7544_v54, %v7543_v29  ;;  %v7554_v59 = vadd.f32 %v7553_v57, %v7552_v36  ;;  %v7588_v48 = vadd.f32 %v7587_v5, %v7586_v27 }
 0x57c   : > { %v7563_v2 = vadd.f32 %v7562_v30, %v7561_v12  ;;  %v7572_v22 = vadd.f32 %v7571_v10, %v7570_v26  ;;  %v7581_v38 = vadd.f32 %v7580_v0, %v7579_v34  ;;  %v7596_v9 = vrot.slane %v7595_v18, 2 }
 0x57d   : > { %v7589_v63 = vrot.slane %v7588_v48, 1  ;;  %v7608_v56 = vcombine.low %v7536_v43, %v7545_v35 }
 0x57e   : > { %v7597_v55 = vadd.f32 %v7596_v9, %v7595_v18  ;;  %v7609_v15 = vcombine.low %v7554_v59, %v7563_v2  ;;  %v7610_v50 = vcombine.low %v7572_v22, %v7581_v38 }
 0x57f   : > { %v7590_v33 = vadd.f32 %v7589_v63, %v7588_v48  ;;  %v7618_v58 = vrot.slane %v7608_v56, %v14281_v47 }
 0x580   : > { %v7598_v45 = vrot.slane %v7597_v55, 1  ;;  %v7625_v17 = vrot.slane %v7609_v15, %v14281_v47  ;;  %v7632_v62 = vrot.slane %v7610_v50, %v14281_v47 }
 0x582   : > { %v7599_v49 = vadd.f32 %v7598_v45, %v7597_v55  ;;  %v7640_v39 = vcombine.low %v7618_v58, %v7625_v17 }
 0x584   : > { %v7611_v24 = vcombine.low %v7590_v33, %v7599_v49  ;;  %v7648_v8 = vrot.slane %v7640_v39, %v14281_v47 }
 0x586   : > { %v7639_v40 = vrot.slane %v7611_v24, %v14281_v47 }
 0x588   : > { %v7641_v28 = vcombine.low %v7632_v62, %v7639_v40 }
 0x58a   : > { %v7655_v44 = vrot.slane %v7641_v28, %v14281_v47 }
 0x58c   : > { %v7656_v25 = vcombine.low %v7648_v8, %v7655_v44 }
 0x58e   : > { %7899 = vst [vmem:[%s12481_s25 + $0x1] ss:$4 sm:$0xff] %v7656_v25 }
 0x58f PF: > { %s16_s21 = sadd.s32 1, %s7946_s21  }
 0x590   : > { %p13_p5 = scmp.ge.s32.totalorder %s16_s21, 4  }
 0x592   :  { %15 = sbr.rel (!%p13_p5) target bundleno = 1 (0x1), region = 76 }

</bundles_post_ra>
